<compile_context>
chip_gen: v7x
topology: tpu7x:2x2x1
jax: 0.10.0
libtpu: 0.0.40
codegen_flags: <defaults>
</compile_context>

<pallas_src>
import functools

import numpy as np

import jax
import jax.numpy as jnp
from jax import lax
from jax.experimental import pallas as pl
from jax.experimental.pallas import tpu as pltpu  # noqa: F401  (TPU backend assumed)

EPS = 1e-5
LEAK = 0.2
HEAD_PAD = 8          # Cout=1 heads padded to 8 channels (one sublane group)


# ---------------------------------------------------------------------------
# Fused decoder kernel
# ---------------------------------------------------------------------------
def _decoder_kernel(xvi_ref, xl_ref, masks_ref,
                    w1_ref, w2_ref, w3_ref, w4_ref,
                    lw1_ref, lw2_ref, lw3_ref, lw4_ref,
                    gb_ref,
                    vi_out_ref, l_out_ref,
                    *, n, h, w):
    m = n * h * w                     # activations are (C, m); m on lanes (N,H,W row-major)

    # Tap t = 3*dh + dw needs input at flattened column r + delta with
    # delta = (dh-1)*w + (dw-1);  out[:, r] = d[:, r + delta] == roll(d, -delta)[:, r].
    # Columns where the wrap crosses a row / image boundary are killed by the masks.
    shifts = [(-((dh - 1) * w + (dw - 1))) % m
              for dh in range(3) for dw in range(3)]

    tapm = masks_ref[...]             # (9, m) f32, 1.0 where the tap is in-bounds
    gb = gb_ref[...]                  # (128, 16): col 2i = gamma_i, col 2i+1 = beta_i

    def conv3x3(x, w_ref, cout):
        """3x3 / stride-1 / pad-1 conv: one tap-stacked bf16 MXU matmul
        (9*cout, cin) @ (cin, m) with f32 accumulation, then 8 output-side
        lane rolls + boundary masks accumulated in f32."""
        big = jnp.dot(w_ref[...], x.astype(jnp.bfloat16),
                      preferred_element_type=jnp.float32)        # (9*cout, m)
        acc = big[4 * cout:5 * cout, :]                          # center tap: no shift/mask
        for t in range(9):
            if t == 4:
                continue
            d = big[t * cout:(t + 1) * cout, :]
            sh = shifts[t]
            if sh != 0:
                d = jnp.roll(d, sh, axis=1)                      # output-side shift
            acc = acc + d * tapm[t:t + 1, :]
        return acc

    def bn(y, li):
        """Training-mode BatchNorm2d (batch statistics, biased variance).
        The conv bias is omitted: the mean subtraction cancels it exactly."""
        cout = y.shape[0]
        gamma = gb[:cout, 2 * li:2 * li + 1]                     # (cout, 1)
        beta = gb[:cout, 2 * li + 1:2 * li + 2]                  # (cout, 1)
        mean = jnp.mean(y, axis=1, keepdims=True)
        cent = y - mean
        var = jnp.mean(cent * cent, axis=1, keepdims=True)
        return cent * (gamma * lax.rsqrt(var + EPS)) + beta

    def lrelu(y):
        return jnp.where(y >= 0.0, y, LEAK * y)

    def sigmoid(y):
        return 1.0 / (1.0 + jnp.exp(-y))

    x_vi = xvi_ref[...]               # (256, m) bf16
    x_l = xl_ref[...]                 # (256, m) bf16

    # ---- vi branch --------------------------------------------------------
    conv1 = lrelu(bn(conv3x3(x_vi, w1_ref, 128), 0))             # (128, m) f32
    conv2 = lrelu(bn(conv3x3(conv1, w2_ref, 64), 1))             # (64, m)
    conv3 = lrelu(bn(conv3x3(conv2, w3_ref, 32), 2))             # (32, m)
    vi_out_ref[...] = sigmoid(bn(conv3x3(conv3, w4_ref, HEAD_PAD), 3))   # (8, m)

    # ---- l branch (torch.cat folded as an in-VMEM sublane concat) ---------
    l1 = lrelu(bn(conv3x3(x_l, lw1_ref, 128), 4))                # (128, m)
    l1c = jnp.concatenate([l1, conv1], axis=0)                   # (256, m)
    l2 = lrelu(bn(conv3x3(l1c, lw2_ref, 64), 5))                 # (64, m)
    l3 = lrelu(bn(conv3x3(l2, lw3_ref, 32), 6))                  # (32, m)
    l3c = jnp.concatenate([l3, conv3], axis=0)                   # (64, m)
    l_out_ref[...] = sigmoid(bn(conv3x3(l3c, lw4_ref, HEAD_PAD), 7))     # (8, m)


# ---------------------------------------------------------------------------
# pallas_call wrapper
# ---------------------------------------------------------------------------
def _tap_masks(n, h, w):
    """(9, N*H*W) f32 validity mask for each 3x3 tap (NHW row-major columns)."""
    r = np.arange(n * h * w)
    wi = r % w
    hi = (r // w) % h
    rows = []
    for dh in range(3):
        for dw in range(3):
            ok = ((hi + dh - 1 >= 0) & (hi + dh - 1 < h)
                  & (wi + dw - 1 >= 0) & (wi + dw - 1 < w))
            rows.append(ok.astype(np.float32))
    return np.stack(rows, axis=0)


def _run_decoder_kernel(x_vi_t, x_l_t, masks, kp, n, h, w):
    m = n * h * w
    kernel = functools.partial(_decoder_kernel, n=n, h=h, w=w)
    # Single invocation (no grid): every operand becomes a fully VMEM-resident
    # ref and nothing is double-buffered.  Total footprint at the test shape is
    # only a few MiB, so the default scoped-VMEM limit is plenty.
    return pl.pallas_call(
        kernel,
        out_shape=(jax.ShapeDtypeStruct((HEAD_PAD, m), jnp.float32),
                   jax.ShapeDtypeStruct((HEAD_PAD, m), jnp.float32)),
    )(x_vi_t, x_l_t, masks,
      kp["w1"], kp["w2"], kp["w3"], kp["w4"],
      kp["lw1"], kp["lw2"], kp["lw3"], kp["lw4"],
      kp["gb"])


@jax.jit
def decoder_vil_forward(feature_vi_e, feature_l, kparams):
    """feature_vi_e / feature_l: (N, 256, H, W) NCHW f32.  Returns two (N, 1, H, W)."""
    n, c, h, w = feature_vi_e.shape
    m = n * h * w
    # TODO(synk): the NCHW -> (C, N*H*W) transposes are an extra HBM pass; feed a
    #             channels-leading layout from the upstream layer to remove them.
    x_vi_t = jnp.transpose(feature_vi_e, (1, 0, 2, 3)).reshape(c, m).astype(jnp.bfloat16)
    x_l_t = jnp.transpose(feature_l, (1, 0, 2, 3)).reshape(c, m).astype(jnp.bfloat16)
    masks = jnp.asarray(_tap_masks(n, h, w))
    vi8, l8 = _run_decoder_kernel(x_vi_t, x_l_t, masks, kparams, n, h, w)
    vi_e_r = vi8[0:1, :].reshape(1, n, h, w).transpose(1, 0, 2, 3)
    l_r = l8[0:1, :].reshape(1, n, h, w).transpose(1, 0, 2, 3)
    return vi_e_r, l_r


# ---------------------------------------------------------------------------
# Parameters (matches the PyTorch module __init__ semantics)
# ---------------------------------------------------------------------------
_LAYER_DEFS = (
    ("conv1", 256, 128), ("conv2", 128, 64), ("conv3", 64, 32), ("conv4", 32, 1),
    ("l_conv1", 256, 128), ("l_conv2", 256, 64), ("l_conv3", 64, 32), ("l_conv4", 64, 1),
)


def init_params(key):
    """conv weight ~ N(0, 0.001), conv bias 0, BN gamma 1, beta 0.  The conv
    bias is kept for fidelity but never fed to the kernel: training-mode BN
    mean subtraction cancels it exactly."""
    params = {}
    keys = jax.random.split(key, len(_LAYER_DEFS))
    for k, (name, cin, cout) in zip(keys, _LAYER_DEFS):
        params[name + "_w"] = 0.001 * jax.random.normal(
            k, (3, 3, cin, cout), dtype=jnp.float32)          # HWIO
        params[name + "_b"] = jnp.zeros((cout,), jnp.float32)
        params[name + "_bn_g"] = jnp.ones((cout,), jnp.float32)
        params[name + "_bn_b"] = jnp.zeros((cout,), jnp.float32)
    return params


def prepare_kernel_params(params):
    """One-time repack into kernel layout: tap-stacked (9*cout, cin) bf16 weights
    (heads zero-padded to 8 output channels) and one packed (128, 16) gamma/beta array."""
    def wt(name, pad_cout=None):
        k = params[name + "_w"]                           # (3,3,cin,cout) HWIO
        cin, cout = k.shape[2], k.shape[3]
        w9 = jnp.swapaxes(k.reshape(9, cin, cout), 1, 2)   # (9, cout, cin)
        if pad_cout is not None and cout < pad_cout:
            w9 = jnp.pad(w9, ((0, 0), (0, pad_cout - cout), (0, 0)))
            cout = pad_cout
        return w9.reshape(9 * cout, cin).astype(jnp.bfloat16)

    cols = []                                              # (128, 16): [g0,b0,g1,b1,...]
    for name, _, cout in _LAYER_DEFS:
        cols.append(jnp.pad(params[name + "_bn_g"], (0, 128 - cout)))
        cols.append(jnp.pad(params[name + "_bn_b"], (0, 128 - cout)))
    gb = jnp.stack(cols, axis=1)

    return {
        "w1": wt("conv1"), "w2": wt("conv2"), "w3": wt("conv3"),
        "w4": wt("conv4", pad_cout=HEAD_PAD),
        "lw1": wt("l_conv1"), "lw2": wt("l_conv2"), "lw3": wt("l_conv3"),
        "lw4": wt("l_conv4", pad_cout=HEAD_PAD),
        "gb": gb,
    }


# ---------------------------------------------------------------------------
# Pure-JAX reference (XLA conv) for the numerical self-check
# ---------------------------------------------------------------------------
def _ref_forward(feature_vi_e, feature_l, params, matmul_dtype=jnp.float32):
    def conv_bn_act(x, name, act):
        y = lax.conv_general_dilated(
            x.astype(matmul_dtype), params[name + "_w"].astype(matmul_dtype),
            window_strides=(1, 1), padding="SAME",
            dimension_numbers=("NHWC", "HWIO", "NHWC"),
            preferred_element_type=jnp.float32,
            precision=lax.Precision.HIGHEST)
        y = y + params[name + "_b"]
        mean = jnp.mean(y, axis=(0, 1, 2), keepdims=True)
        var = jnp.mean((y - mean) ** 2, axis=(0, 1, 2), keepdims=True)
        y = (y - mean) * lax.rsqrt(var + EPS)
        y = y * params[name + "_bn_g"] + params[name + "_bn_b"]
        if act == "lrelu":
            return jnp.where(y >= 0.0, y, LEAK * y)
        return jax.nn.sigmoid(y)

    xv = jnp.transpose(feature_vi_e, (0, 2, 3, 1))
    xl = jnp.transpose(feature_l, (0, 2, 3, 1))
    c1 = conv_bn_act(xv, "conv1", "lrelu")
    c2 = conv_bn_act(c1, "conv2", "lrelu")
    c3 = conv_bn_act(c2, "conv3", "lrelu")
    vi = conv_bn_act(c3, "conv4", "sigmoid")
    l1 = jnp.concatenate([conv_bn_act(xl, "l_conv1", "lrelu"), c1], axis=-1)
    l2 = conv_bn_act(l1, "l_conv2", "lrelu")
    l3 = jnp.concatenate([conv_bn_act(l2, "l_conv3", "lrelu"), c3], axis=-1)
    lr = conv_bn_act(l3, "l_conv4", "sigmoid")
    return jnp.transpose(vi, (0, 3, 1, 2)), jnp.transpose(lr, (0, 3, 1, 2))


if __name__ == "__main__":
    key = jax.random.PRNGKey(0)
    k_params, k_vi, k_l = jax.random.split(key, 3)

    N, C, H, W = 2, 256, 8, 8            # the module requires 256 input channels
    feature_vi_e = jax.random.normal(k_vi, (N, C, H, W), dtype=jnp.float32)
    feature_l = jax.random.normal(k_l, (N, C, H, W), dtype=jnp.float32)

    params = init_params(k_params)
    kparams = prepare_kernel_params(params)

    vi_e_r, l_r = decoder_vil_forward(feature_vi_e, feature_l, kparams)
    jax.block_until_ready((vi_e_r, l_r))
    assert vi_e_r.shape == (N, 1, H, W) and l_r.shape == (N, 1, H, W)

    # Tight check vs. a reference that uses the SAME bf16 matmul operands
    # (verifies the kernel math: shifts, masks, concat folding, BN, activations).
    ref_bf16 = jax.jit(functools.partial(_ref_forward, matmul_dtype=jnp.bfloat16))
    vi_bf, l_bf = ref_bf16(feature_vi_e, feature_l, params)
    jax.block_until_ready((vi_bf, l_bf))
    assert bool(jnp.allclose(vi_e_r, vi_bf, atol=1e-3, rtol=1e-3)), "vi_e_r mismatch (bf16 ref)"
    assert bool(jnp.allclose(l_r, l_bf, atol=1e-3, rtol=1e-3)), "l_r mismatch (bf16 ref)"

    # Looser fidelity check vs. the full-f32 reference (kernel uses bf16 MXU
    # operands per the perf guidance; BN renormalization keeps the drift small).
    vi_f32, l_f32 = jax.jit(_ref_forward)(feature_vi_e, feature_l, params)
    jax.block_until_ready((vi_f32, l_f32))
    assert bool(jnp.allclose(vi_e_r, vi_f32, atol=2e-2, rtol=2e-2)), "vi_e_r mismatch (f32 ref)"
    assert bool(jnp.allclose(l_r, l_f32, atol=2e-2, rtol=2e-2)), "l_r mismatch (f32 ref)"

    print("KERNEL_OK")
</pallas_src>

<mosaic_0001>
module attributes {stable_mosaic.version = 11 : i64} {
  func.func @_decoder_kernel(%arg0: memref<256x128xbf16, #tpu.memory_space<vmem>>, %arg1: memref<256x128xbf16, #tpu.memory_space<vmem>>, %arg2: memref<9x128xf32, #tpu.memory_space<vmem>>, %arg3: memref<1152x256xbf16, #tpu.memory_space<vmem>>, %arg4: memref<576x128xbf16, #tpu.memory_space<vmem>>, %arg5: memref<288x64xbf16, #tpu.memory_space<vmem>>, %arg6: memref<72x32xbf16, #tpu.memory_space<vmem>>, %arg7: memref<1152x256xbf16, #tpu.memory_space<vmem>>, %arg8: memref<576x256xbf16, #tpu.memory_space<vmem>>, %arg9: memref<288x64xbf16, #tpu.memory_space<vmem>>, %arg10: memref<72x64xbf16, #tpu.memory_space<vmem>>, %arg11: memref<128x16xf32, #tpu.memory_space<vmem>>, %arg12: memref<8x128xf32, #tpu.memory_space<vmem>>, %arg13: memref<8x128xf32, #tpu.memory_space<vmem>>) attributes {dimension_semantics = [], scalar_prefetch = 0 : i64, scratch_operands = 0 : i64, tpu.core_type = #tpu.core_type<tc>} {
    %c0 = arith.constant 0 : index
    %c0_0 = arith.constant 0 : index
    %0 = vector.load %arg2[%c0, %c0_0] : memref<9x128xf32, #tpu.memory_space<vmem>>, vector<9x128xf32>
    %c0_1 = arith.constant 0 : index
    %c0_2 = arith.constant 0 : index
    %1 = vector.load %arg11[%c0_1, %c0_2] : memref<128x16xf32, #tpu.memory_space<vmem>>, vector<128x16xf32>
    %c0_3 = arith.constant 0 : index
    %c0_4 = arith.constant 0 : index
    %2 = vector.load %arg0[%c0_3, %c0_4] : memref<256x128xbf16, #tpu.memory_space<vmem>>, vector<256x128xbf16>
    %c0_5 = arith.constant 0 : index
    %c0_6 = arith.constant 0 : index
    %3 = vector.load %arg1[%c0_5, %c0_6] : memref<256x128xbf16, #tpu.memory_space<vmem>>, vector<256x128xbf16>
    %c0_7 = arith.constant 0 : index
    %c0_8 = arith.constant 0 : index
    %4 = vector.load %arg3[%c0_7, %c0_8] : memref<1152x256xbf16, #tpu.memory_space<vmem>>, vector<1152x256xbf16>
    %cst = arith.constant dense<0.000000e+00> : vector<1152x128xf32>
    %5 = tpu.matmul %4, %2, %cst {dimension_numbers = #tpu.dot_dimension_numbers<[1], [0], [0], [1], [0, 0, 1, 1], [], []>} : vector<1152x256xbf16>, vector<256x128xbf16>, vector<1152x128xf32> -> vector<1152x128xf32>
    %6 = vector.extract_strided_slice %5 {offsets = [512, 0], sizes = [128, 128], strides = [1, 1]} : vector<1152x128xf32> to vector<128x128xf32>
    %7 = vector.extract_strided_slice %5 {offsets = [0, 0], sizes = [128, 128], strides = [1, 1]} : vector<1152x128xf32> to vector<128x128xf32>
    %8 = vector.extract_strided_slice %7 {offsets = [0, 119], sizes = [128, 9], strides = [1, 1]} : vector<128x128xf32> to vector<128x9xf32>
    %9 = vector.extract_strided_slice %7 {offsets = [0, 0], sizes = [128, 119], strides = [1, 1]} : vector<128x128xf32> to vector<128x119xf32>
    %10 = tpu.concatenate %8, %9 in 1 : vector<128x9xf32>, vector<128x119xf32> -> vector<128x128xf32>
    %11 = vector.extract_strided_slice %0 {offsets = [0, 0], sizes = [1, 128], strides = [1, 1]} : vector<9x128xf32> to vector<1x128xf32>
    %12 = vector.broadcast %11 : vector<1x128xf32> to vector<128x128xf32>
    %13 = arith.mulf %10, %12 : vector<128x128xf32>
    %14 = arith.addf %6, %13 : vector<128x128xf32>
    %15 = vector.extract_strided_slice %5 {offsets = [128, 0], sizes = [128, 128], strides = [1, 1]} : vector<1152x128xf32> to vector<128x128xf32>
    %16 = vector.extract_strided_slice %15 {offsets = [0, 120], sizes = [128, 8], strides = [1, 1]} : vector<128x128xf32> to vector<128x8xf32>
    %17 = vector.extract_strided_slice %15 {offsets = [0, 0], sizes = [128, 120], strides = [1, 1]} : vector<128x128xf32> to vector<128x120xf32>
    %18 = tpu.concatenate %16, %17 in 1 : vector<128x8xf32>, vector<128x120xf32> -> vector<128x128xf32>
    %19 = vector.extract_strided_slice %0 {offsets = [1, 0], sizes = [1, 128], strides = [1, 1]} : vector<9x128xf32> to vector<1x128xf32>
    %20 = vector.broadcast %19 : vector<1x128xf32> to vector<128x128xf32>
    %21 = arith.mulf %18, %20 : vector<128x128xf32>
    %22 = arith.addf %14, %21 : vector<128x128xf32>
    %23 = vector.extract_strided_slice %5 {offsets = [256, 0], sizes = [128, 128], strides = [1, 1]} : vector<1152x128xf32> to vector<128x128xf32>
    %24 = vector.extract_strided_slice %23 {offsets = [0, 121], sizes = [128, 7], strides = [1, 1]} : vector<128x128xf32> to vector<128x7xf32>
    %25 = vector.extract_strided_slice %23 {offsets = [0, 0], sizes = [128, 121], strides = [1, 1]} : vector<128x128xf32> to vector<128x121xf32>
    %26 = tpu.concatenate %24, %25 in 1 : vector<128x7xf32>, vector<128x121xf32> -> vector<128x128xf32>
    %27 = vector.extract_strided_slice %0 {offsets = [2, 0], sizes = [1, 128], strides = [1, 1]} : vector<9x128xf32> to vector<1x128xf32>
    %28 = vector.broadcast %27 : vector<1x128xf32> to vector<128x128xf32>
    %29 = arith.mulf %26, %28 : vector<128x128xf32>
    %30 = arith.addf %22, %29 : vector<128x128xf32>
    %31 = vector.extract_strided_slice %5 {offsets = [384, 0], sizes = [128, 128], strides = [1, 1]} : vector<1152x128xf32> to vector<128x128xf32>
    %32 = vector.extract_strided_slice %31 {offsets = [0, 127], sizes = [128, 1], strides = [1, 1]} : vector<128x128xf32> to vector<128x1xf32>
    %33 = vector.extract_strided_slice %31 {offsets = [0, 0], sizes = [128, 127], strides = [1, 1]} : vector<128x128xf32> to vector<128x127xf32>
    %34 = tpu.concatenate %32, %33 in 1 : vector<128x1xf32>, vector<128x127xf32> -> vector<128x128xf32>
    %35 = vector.extract_strided_slice %0 {offsets = [3, 0], sizes = [1, 128], strides = [1, 1]} : vector<9x128xf32> to vector<1x128xf32>
    %36 = vector.broadcast %35 : vector<1x128xf32> to vector<128x128xf32>
    %37 = arith.mulf %34, %36 : vector<128x128xf32>
    %38 = arith.addf %30, %37 : vector<128x128xf32>
    %39 = vector.extract_strided_slice %5 {offsets = [640, 0], sizes = [128, 128], strides = [1, 1]} : vector<1152x128xf32> to vector<128x128xf32>
    %40 = vector.extract_strided_slice %39 {offsets = [0, 1], sizes = [128, 127], strides = [1, 1]} : vector<128x128xf32> to vector<128x127xf32>
    %41 = vector.extract_strided_slice %39 {offsets = [0, 0], sizes = [128, 1], strides = [1, 1]} : vector<128x128xf32> to vector<128x1xf32>
    %42 = tpu.concatenate %40, %41 in 1 : vector<128x127xf32>, vector<128x1xf32> -> vector<128x128xf32>
    %43 = vector.extract_strided_slice %0 {offsets = [5, 0], sizes = [1, 128], strides = [1, 1]} : vector<9x128xf32> to vector<1x128xf32>
    %44 = vector.broadcast %43 : vector<1x128xf32> to vector<128x128xf32>
    %45 = arith.mulf %42, %44 : vector<128x128xf32>
    %46 = arith.addf %38, %45 : vector<128x128xf32>
    %47 = vector.extract_strided_slice %5 {offsets = [768, 0], sizes = [128, 128], strides = [1, 1]} : vector<1152x128xf32> to vector<128x128xf32>
    %48 = vector.extract_strided_slice %47 {offsets = [0, 7], sizes = [128, 121], strides = [1, 1]} : vector<128x128xf32> to vector<128x121xf32>
    %49 = vector.extract_strided_slice %47 {offsets = [0, 0], sizes = [128, 7], strides = [1, 1]} : vector<128x128xf32> to vector<128x7xf32>
    %50 = tpu.concatenate %48, %49 in 1 : vector<128x121xf32>, vector<128x7xf32> -> vector<128x128xf32>
    %51 = vector.extract_strided_slice %0 {offsets = [6, 0], sizes = [1, 128], strides = [1, 1]} : vector<9x128xf32> to vector<1x128xf32>
    %52 = vector.broadcast %51 : vector<1x128xf32> to vector<128x128xf32>
    %53 = arith.mulf %50, %52 : vector<128x128xf32>
    %54 = arith.addf %46, %53 : vector<128x128xf32>
    %55 = vector.extract_strided_slice %5 {offsets = [896, 0], sizes = [128, 128], strides = [1, 1]} : vector<1152x128xf32> to vector<128x128xf32>
    %56 = vector.extract_strided_slice %55 {offsets = [0, 8], sizes = [128, 120], strides = [1, 1]} : vector<128x128xf32> to vector<128x120xf32>
    %57 = vector.extract_strided_slice %55 {offsets = [0, 0], sizes = [128, 8], strides = [1, 1]} : vector<128x128xf32> to vector<128x8xf32>
    %58 = tpu.concatenate %56, %57 in 1 : vector<128x120xf32>, vector<128x8xf32> -> vector<128x128xf32>
    %59 = vector.extract_strided_slice %0 {offsets = [7, 0], sizes = [1, 128], strides = [1, 1]} : vector<9x128xf32> to vector<1x128xf32>
    %60 = vector.broadcast %59 : vector<1x128xf32> to vector<128x128xf32>
    %61 = arith.mulf %58, %60 : vector<128x128xf32>
    %62 = arith.addf %54, %61 : vector<128x128xf32>
    %63 = vector.extract_strided_slice %5 {offsets = [1024, 0], sizes = [128, 128], strides = [1, 1]} : vector<1152x128xf32> to vector<128x128xf32>
    %64 = vector.extract_strided_slice %63 {offsets = [0, 9], sizes = [128, 119], strides = [1, 1]} : vector<128x128xf32> to vector<128x119xf32>
    %65 = vector.extract_strided_slice %63 {offsets = [0, 0], sizes = [128, 9], strides = [1, 1]} : vector<128x128xf32> to vector<128x9xf32>
    %66 = tpu.concatenate %64, %65 in 1 : vector<128x119xf32>, vector<128x9xf32> -> vector<128x128xf32>
    %67 = vector.extract_strided_slice %0 {offsets = [8, 0], sizes = [1, 128], strides = [1, 1]} : vector<9x128xf32> to vector<1x128xf32>
    %68 = vector.broadcast %67 : vector<1x128xf32> to vector<128x128xf32>
    %69 = arith.mulf %66, %68 : vector<128x128xf32>
    %70 = arith.addf %62, %69 : vector<128x128xf32>
    %71 = vector.extract_strided_slice %1 {offsets = [0, 0], sizes = [128, 1], strides = [1, 1]} : vector<128x16xf32> to vector<128x1xf32>
    %72 = vector.extract_strided_slice %1 {offsets = [0, 1], sizes = [128, 1], strides = [1, 1]} : vector<128x16xf32> to vector<128x1xf32>
    %cst_9 = arith.constant dense<0.000000e+00> : vector<128xf32>
    %73 = vector.multi_reduction <add>, %70, %cst_9 [1] : vector<128x128xf32> to vector<128xf32>
    %74 = vector.shape_cast %73 : vector<128xf32> to vector<128x1xf32>
    %cst_10 = arith.constant 1.280000e+02 : f32
    %75 = vector.broadcast %cst_10 : f32 to vector<128x1xf32>
    %76 = arith.divf %74, %75 : vector<128x1xf32>
    %77 = vector.broadcast %76 : vector<128x1xf32> to vector<128x128xf32>
    %78 = arith.subf %70, %77 : vector<128x128xf32>
    %79 = arith.mulf %78, %78 : vector<128x128xf32>
    %cst_11 = arith.constant dense<0.000000e+00> : vector<128xf32>
    %80 = vector.multi_reduction <add>, %79, %cst_11 [1] : vector<128x128xf32> to vector<128xf32>
    %81 = vector.shape_cast %80 : vector<128xf32> to vector<128x1xf32>
    %cst_12 = arith.constant 1.280000e+02 : f32
    %82 = vector.broadcast %cst_12 : f32 to vector<128x1xf32>
    %83 = arith.divf %81, %82 : vector<128x1xf32>
    %cst_13 = arith.constant 9.99999974E-6 : f32
    %84 = vector.broadcast %cst_13 : f32 to vector<128x1xf32>
    %85 = arith.addf %83, %84 : vector<128x1xf32>
    %86 = math.rsqrt %85 : vector<128x1xf32>
    %87 = arith.mulf %71, %86 : vector<128x1xf32>
    %88 = vector.broadcast %87 : vector<128x1xf32> to vector<128x128xf32>
    %89 = arith.mulf %78, %88 : vector<128x128xf32>
    %90 = vector.broadcast %72 : vector<128x1xf32> to vector<128x128xf32>
    %91 = arith.addf %89, %90 : vector<128x128xf32>
    %cst_14 = arith.constant 0.000000e+00 : f32
    %92 = vector.broadcast %cst_14 : f32 to vector<128x128xf32>
    %93 = arith.cmpf oge, %91, %92 : vector<128x128xf32>
    %cst_15 = arith.constant 2.000000e-01 : f32
    %94 = vector.broadcast %cst_15 : f32 to vector<128x128xf32>
    %95 = arith.mulf %94, %91 : vector<128x128xf32>
    %96 = arith.select %93, %91, %95 : vector<128x128xi1>, vector<128x128xf32>
    %c0_16 = arith.constant 0 : index
    %c0_17 = arith.constant 0 : index
    %97 = vector.load %arg4[%c0_16, %c0_17] : memref<576x128xbf16, #tpu.memory_space<vmem>>, vector<576x128xbf16>
    %98 = arith.truncf %96 : vector<128x128xf32> to vector<128x128xbf16>
    %cst_18 = arith.constant dense<0.000000e+00> : vector<576x128xf32>
    %99 = tpu.matmul %97, %98, %cst_18 {dimension_numbers = #tpu.dot_dimension_numbers<[1], [0], [0], [1], [0, 0, 1, 1], [], []>} : vector<576x128xbf16>, vector<128x128xbf16>, vector<576x128xf32> -> vector<576x128xf32>
    %100 = vector.extract_strided_slice %99 {offsets = [256, 0], sizes = [64, 128], strides = [1, 1]} : vector<576x128xf32> to vector<64x128xf32>
    %101 = vector.extract_strided_slice %99 {offsets = [0, 0], sizes = [64, 128], strides = [1, 1]} : vector<576x128xf32> to vector<64x128xf32>
    %102 = vector.extract_strided_slice %101 {offsets = [0, 119], sizes = [64, 9], strides = [1, 1]} : vector<64x128xf32> to vector<64x9xf32>
    %103 = vector.extract_strided_slice %101 {offsets = [0, 0], sizes = [64, 119], strides = [1, 1]} : vector<64x128xf32> to vector<64x119xf32>
    %104 = tpu.concatenate %102, %103 in 1 : vector<64x9xf32>, vector<64x119xf32> -> vector<64x128xf32>
    %105 = vector.extract_strided_slice %0 {offsets = [0, 0], sizes = [1, 128], strides = [1, 1]} : vector<9x128xf32> to vector<1x128xf32>
    %106 = vector.broadcast %105 : vector<1x128xf32> to vector<64x128xf32>
    %107 = arith.mulf %104, %106 : vector<64x128xf32>
    %108 = arith.addf %100, %107 : vector<64x128xf32>
    %109 = vector.extract_strided_slice %99 {offsets = [64, 0], sizes = [64, 128], strides = [1, 1]} : vector<576x128xf32> to vector<64x128xf32>
    %110 = vector.extract_strided_slice %109 {offsets = [0, 120], sizes = [64, 8], strides = [1, 1]} : vector<64x128xf32> to vector<64x8xf32>
    %111 = vector.extract_strided_slice %109 {offsets = [0, 0], sizes = [64, 120], strides = [1, 1]} : vector<64x128xf32> to vector<64x120xf32>
    %112 = tpu.concatenate %110, %111 in 1 : vector<64x8xf32>, vector<64x120xf32> -> vector<64x128xf32>
    %113 = vector.extract_strided_slice %0 {offsets = [1, 0], sizes = [1, 128], strides = [1, 1]} : vector<9x128xf32> to vector<1x128xf32>
    %114 = vector.broadcast %113 : vector<1x128xf32> to vector<64x128xf32>
    %115 = arith.mulf %112, %114 : vector<64x128xf32>
    %116 = arith.addf %108, %115 : vector<64x128xf32>
    %117 = vector.extract_strided_slice %99 {offsets = [128, 0], sizes = [64, 128], strides = [1, 1]} : vector<576x128xf32> to vector<64x128xf32>
    %118 = vector.extract_strided_slice %117 {offsets = [0, 121], sizes = [64, 7], strides = [1, 1]} : vector<64x128xf32> to vector<64x7xf32>
    %119 = vector.extract_strided_slice %117 {offsets = [0, 0], sizes = [64, 121], strides = [1, 1]} : vector<64x128xf32> to vector<64x121xf32>
    %120 = tpu.concatenate %118, %119 in 1 : vector<64x7xf32>, vector<64x121xf32> -> vector<64x128xf32>
    %121 = vector.extract_strided_slice %0 {offsets = [2, 0], sizes = [1, 128], strides = [1, 1]} : vector<9x128xf32> to vector<1x128xf32>
    %122 = vector.broadcast %121 : vector<1x128xf32> to vector<64x128xf32>
    %123 = arith.mulf %120, %122 : vector<64x128xf32>
    %124 = arith.addf %116, %123 : vector<64x128xf32>
    %125 = vector.extract_strided_slice %99 {offsets = [192, 0], sizes = [64, 128], strides = [1, 1]} : vector<576x128xf32> to vector<64x128xf32>
    %126 = vector.extract_strided_slice %125 {offsets = [0, 127], sizes = [64, 1], strides = [1, 1]} : vector<64x128xf32> to vector<64x1xf32>
    %127 = vector.extract_strided_slice %125 {offsets = [0, 0], sizes = [64, 127], strides = [1, 1]} : vector<64x128xf32> to vector<64x127xf32>
    %128 = tpu.concatenate %126, %127 in 1 : vector<64x1xf32>, vector<64x127xf32> -> vector<64x128xf32>
    %129 = vector.extract_strided_slice %0 {offsets = [3, 0], sizes = [1, 128], strides = [1, 1]} : vector<9x128xf32> to vector<1x128xf32>
    %130 = vector.broadcast %129 : vector<1x128xf32> to vector<64x128xf32>
    %131 = arith.mulf %128, %130 : vector<64x128xf32>
    %132 = arith.addf %124, %131 : vector<64x128xf32>
    %133 = vector.extract_strided_slice %99 {offsets = [320, 0], sizes = [64, 128], strides = [1, 1]} : vector<576x128xf32> to vector<64x128xf32>
    %134 = vector.extract_strided_slice %133 {offsets = [0, 1], sizes = [64, 127], strides = [1, 1]} : vector<64x128xf32> to vector<64x127xf32>
    %135 = vector.extract_strided_slice %133 {offsets = [0, 0], sizes = [64, 1], strides = [1, 1]} : vector<64x128xf32> to vector<64x1xf32>
    %136 = tpu.concatenate %134, %135 in 1 : vector<64x127xf32>, vector<64x1xf32> -> vector<64x128xf32>
    %137 = vector.extract_strided_slice %0 {offsets = [5, 0], sizes = [1, 128], strides = [1, 1]} : vector<9x128xf32> to vector<1x128xf32>
    %138 = vector.broadcast %137 : vector<1x128xf32> to vector<64x128xf32>
    %139 = arith.mulf %136, %138 : vector<64x128xf32>
    %140 = arith.addf %132, %139 : vector<64x128xf32>
    %141 = vector.extract_strided_slice %99 {offsets = [384, 0], sizes = [64, 128], strides = [1, 1]} : vector<576x128xf32> to vector<64x128xf32>
    %142 = vector.extract_strided_slice %141 {offsets = [0, 7], sizes = [64, 121], strides = [1, 1]} : vector<64x128xf32> to vector<64x121xf32>
    %143 = vector.extract_strided_slice %141 {offsets = [0, 0], sizes = [64, 7], strides = [1, 1]} : vector<64x128xf32> to vector<64x7xf32>
    %144 = tpu.concatenate %142, %143 in 1 : vector<64x121xf32>, vector<64x7xf32> -> vector<64x128xf32>
    %145 = vector.extract_strided_slice %0 {offsets = [6, 0], sizes = [1, 128], strides = [1, 1]} : vector<9x128xf32> to vector<1x128xf32>
    %146 = vector.broadcast %145 : vector<1x128xf32> to vector<64x128xf32>
    %147 = arith.mulf %144, %146 : vector<64x128xf32>
    %148 = arith.addf %140, %147 : vector<64x128xf32>
    %149 = vector.extract_strided_slice %99 {offsets = [448, 0], sizes = [64, 128], strides = [1, 1]} : vector<576x128xf32> to vector<64x128xf32>
    %150 = vector.extract_strided_slice %149 {offsets = [0, 8], sizes = [64, 120], strides = [1, 1]} : vector<64x128xf32> to vector<64x120xf32>
    %151 = vector.extract_strided_slice %149 {offsets = [0, 0], sizes = [64, 8], strides = [1, 1]} : vector<64x128xf32> to vector<64x8xf32>
    %152 = tpu.concatenate %150, %151 in 1 : vector<64x120xf32>, vector<64x8xf32> -> vector<64x128xf32>
    %153 = vector.extract_strided_slice %0 {offsets = [7, 0], sizes = [1, 128], strides = [1, 1]} : vector<9x128xf32> to vector<1x128xf32>
    %154 = vector.broadcast %153 : vector<1x128xf32> to vector<64x128xf32>
    %155 = arith.mulf %152, %154 : vector<64x128xf32>
    %156 = arith.addf %148, %155 : vector<64x128xf32>
    %157 = vector.extract_strided_slice %99 {offsets = [512, 0], sizes = [64, 128], strides = [1, 1]} : vector<576x128xf32> to vector<64x128xf32>
    %158 = vector.extract_strided_slice %157 {offsets = [0, 9], sizes = [64, 119], strides = [1, 1]} : vector<64x128xf32> to vector<64x119xf32>
    %159 = vector.extract_strided_slice %157 {offsets = [0, 0], sizes = [64, 9], strides = [1, 1]} : vector<64x128xf32> to vector<64x9xf32>
    %160 = tpu.concatenate %158, %159 in 1 : vector<64x119xf32>, vector<64x9xf32> -> vector<64x128xf32>
    %161 = vector.extract_strided_slice %0 {offsets = [8, 0], sizes = [1, 128], strides = [1, 1]} : vector<9x128xf32> to vector<1x128xf32>
    %162 = vector.broadcast %161 : vector<1x128xf32> to vector<64x128xf32>
    %163 = arith.mulf %160, %162 : vector<64x128xf32>
    %164 = arith.addf %156, %163 : vector<64x128xf32>
    %165 = vector.extract_strided_slice %1 {offsets = [0, 2], sizes = [64, 1], strides = [1, 1]} : vector<128x16xf32> to vector<64x1xf32>
    %166 = vector.extract_strided_slice %1 {offsets = [0, 3], sizes = [64, 1], strides = [1, 1]} : vector<128x16xf32> to vector<64x1xf32>
    %cst_19 = arith.constant dense<0.000000e+00> : vector<64xf32>
    %167 = vector.multi_reduction <add>, %164, %cst_19 [1] : vector<64x128xf32> to vector<64xf32>
    %168 = vector.shape_cast %167 : vector<64xf32> to vector<64x1xf32>
    %cst_20 = arith.constant 1.280000e+02 : f32
    %169 = vector.broadcast %cst_20 : f32 to vector<64x1xf32>
    %170 = arith.divf %168, %169 : vector<64x1xf32>
    %171 = vector.broadcast %170 : vector<64x1xf32> to vector<64x128xf32>
    %172 = arith.subf %164, %171 : vector<64x128xf32>
    %173 = arith.mulf %172, %172 : vector<64x128xf32>
    %cst_21 = arith.constant dense<0.000000e+00> : vector<64xf32>
    %174 = vector.multi_reduction <add>, %173, %cst_21 [1] : vector<64x128xf32> to vector<64xf32>
    %175 = vector.shape_cast %174 : vector<64xf32> to vector<64x1xf32>
    %cst_22 = arith.constant 1.280000e+02 : f32
    %176 = vector.broadcast %cst_22 : f32 to vector<64x1xf32>
    %177 = arith.divf %175, %176 : vector<64x1xf32>
    %cst_23 = arith.constant 9.99999974E-6 : f32
    %178 = vector.broadcast %cst_23 : f32 to vector<64x1xf32>
    %179 = arith.addf %177, %178 : vector<64x1xf32>
    %180 = math.rsqrt %179 : vector<64x1xf32>
    %181 = arith.mulf %165, %180 : vector<64x1xf32>
    %182 = vector.broadcast %181 : vector<64x1xf32> to vector<64x128xf32>
    %183 = arith.mulf %172, %182 : vector<64x128xf32>
    %184 = vector.broadcast %166 : vector<64x1xf32> to vector<64x128xf32>
    %185 = arith.addf %183, %184 : vector<64x128xf32>
    %cst_24 = arith.constant 0.000000e+00 : f32
    %186 = vector.broadcast %cst_24 : f32 to vector<64x128xf32>
    %187 = arith.cmpf oge, %185, %186 : vector<64x128xf32>
    %cst_25 = arith.constant 2.000000e-01 : f32
    %188 = vector.broadcast %cst_25 : f32 to vector<64x128xf32>
    %189 = arith.mulf %188, %185 : vector<64x128xf32>
    %190 = arith.select %187, %185, %189 : vector<64x128xi1>, vector<64x128xf32>
    %c0_26 = arith.constant 0 : index
    %c0_27 = arith.constant 0 : index
    %191 = vector.load %arg5[%c0_26, %c0_27] : memref<288x64xbf16, #tpu.memory_space<vmem>>, vector<288x64xbf16>
    %192 = arith.truncf %190 : vector<64x128xf32> to vector<64x128xbf16>
    %cst_28 = arith.constant dense<0.000000e+00> : vector<288x128xf32>
    %193 = tpu.matmul %191, %192, %cst_28 {dimension_numbers = #tpu.dot_dimension_numbers<[1], [0], [0], [1], [0, 0, 1, 1], [], []>} : vector<288x64xbf16>, vector<64x128xbf16>, vector<288x128xf32> -> vector<288x128xf32>
    %194 = vector.extract_strided_slice %193 {offsets = [128, 0], sizes = [32, 128], strides = [1, 1]} : vector<288x128xf32> to vector<32x128xf32>
    %195 = vector.extract_strided_slice %193 {offsets = [0, 0], sizes = [32, 128], strides = [1, 1]} : vector<288x128xf32> to vector<32x128xf32>
    %196 = vector.extract_strided_slice %195 {offsets = [0, 119], sizes = [32, 9], strides = [1, 1]} : vector<32x128xf32> to vector<32x9xf32>
    %197 = vector.extract_strided_slice %195 {offsets = [0, 0], sizes = [32, 119], strides = [1, 1]} : vector<32x128xf32> to vector<32x119xf32>
    %198 = tpu.concatenate %196, %197 in 1 : vector<32x9xf32>, vector<32x119xf32> -> vector<32x128xf32>
    %199 = vector.extract_strided_slice %0 {offsets = [0, 0], sizes = [1, 128], strides = [1, 1]} : vector<9x128xf32> to vector<1x128xf32>
    %200 = vector.broadcast %199 : vector<1x128xf32> to vector<32x128xf32>
    %201 = arith.mulf %198, %200 : vector<32x128xf32>
    %202 = arith.addf %194, %201 : vector<32x128xf32>
    %203 = vector.extract_strided_slice %193 {offsets = [32, 0], sizes = [32, 128], strides = [1, 1]} : vector<288x128xf32> to vector<32x128xf32>
    %204 = vector.extract_strided_slice %203 {offsets = [0, 120], sizes = [32, 8], strides = [1, 1]} : vector<32x128xf32> to vector<32x8xf32>
    %205 = vector.extract_strided_slice %203 {offsets = [0, 0], sizes = [32, 120], strides = [1, 1]} : vector<32x128xf32> to vector<32x120xf32>
    %206 = tpu.concatenate %204, %205 in 1 : vector<32x8xf32>, vector<32x120xf32> -> vector<32x128xf32>
    %207 = vector.extract_strided_slice %0 {offsets = [1, 0], sizes = [1, 128], strides = [1, 1]} : vector<9x128xf32> to vector<1x128xf32>
    %208 = vector.broadcast %207 : vector<1x128xf32> to vector<32x128xf32>
    %209 = arith.mulf %206, %208 : vector<32x128xf32>
    %210 = arith.addf %202, %209 : vector<32x128xf32>
    %211 = vector.extract_strided_slice %193 {offsets = [64, 0], sizes = [32, 128], strides = [1, 1]} : vector<288x128xf32> to vector<32x128xf32>
    %212 = vector.extract_strided_slice %211 {offsets = [0, 121], sizes = [32, 7], strides = [1, 1]} : vector<32x128xf32> to vector<32x7xf32>
    %213 = vector.extract_strided_slice %211 {offsets = [0, 0], sizes = [32, 121], strides = [1, 1]} : vector<32x128xf32> to vector<32x121xf32>
    %214 = tpu.concatenate %212, %213 in 1 : vector<32x7xf32>, vector<32x121xf32> -> vector<32x128xf32>
    %215 = vector.extract_strided_slice %0 {offsets = [2, 0], sizes = [1, 128], strides = [1, 1]} : vector<9x128xf32> to vector<1x128xf32>
    %216 = vector.broadcast %215 : vector<1x128xf32> to vector<32x128xf32>
    %217 = arith.mulf %214, %216 : vector<32x128xf32>
    %218 = arith.addf %210, %217 : vector<32x128xf32>
    %219 = vector.extract_strided_slice %193 {offsets = [96, 0], sizes = [32, 128], strides = [1, 1]} : vector<288x128xf32> to vector<32x128xf32>
    %220 = vector.extract_strided_slice %219 {offsets = [0, 127], sizes = [32, 1], strides = [1, 1]} : vector<32x128xf32> to vector<32x1xf32>
    %221 = vector.extract_strided_slice %219 {offsets = [0, 0], sizes = [32, 127], strides = [1, 1]} : vector<32x128xf32> to vector<32x127xf32>
    %222 = tpu.concatenate %220, %221 in 1 : vector<32x1xf32>, vector<32x127xf32> -> vector<32x128xf32>
    %223 = vector.extract_strided_slice %0 {offsets = [3, 0], sizes = [1, 128], strides = [1, 1]} : vector<9x128xf32> to vector<1x128xf32>
    %224 = vector.broadcast %223 : vector<1x128xf32> to vector<32x128xf32>
    %225 = arith.mulf %222, %224 : vector<32x128xf32>
    %226 = arith.addf %218, %225 : vector<32x128xf32>
    %227 = vector.extract_strided_slice %193 {offsets = [160, 0], sizes = [32, 128], strides = [1, 1]} : vector<288x128xf32> to vector<32x128xf32>
    %228 = vector.extract_strided_slice %227 {offsets = [0, 1], sizes = [32, 127], strides = [1, 1]} : vector<32x128xf32> to vector<32x127xf32>
    %229 = vector.extract_strided_slice %227 {offsets = [0, 0], sizes = [32, 1], strides = [1, 1]} : vector<32x128xf32> to vector<32x1xf32>
    %230 = tpu.concatenate %228, %229 in 1 : vector<32x127xf32>, vector<32x1xf32> -> vector<32x128xf32>
    %231 = vector.extract_strided_slice %0 {offsets = [5, 0], sizes = [1, 128], strides = [1, 1]} : vector<9x128xf32> to vector<1x128xf32>
    %232 = vector.broadcast %231 : vector<1x128xf32> to vector<32x128xf32>
    %233 = arith.mulf %230, %232 : vector<32x128xf32>
    %234 = arith.addf %226, %233 : vector<32x128xf32>
    %235 = vector.extract_strided_slice %193 {offsets = [192, 0], sizes = [32, 128], strides = [1, 1]} : vector<288x128xf32> to vector<32x128xf32>
    %236 = vector.extract_strided_slice %235 {offsets = [0, 7], sizes = [32, 121], strides = [1, 1]} : vector<32x128xf32> to vector<32x121xf32>
    %237 = vector.extract_strided_slice %235 {offsets = [0, 0], sizes = [32, 7], strides = [1, 1]} : vector<32x128xf32> to vector<32x7xf32>
    %238 = tpu.concatenate %236, %237 in 1 : vector<32x121xf32>, vector<32x7xf32> -> vector<32x128xf32>
    %239 = vector.extract_strided_slice %0 {offsets = [6, 0], sizes = [1, 128], strides = [1, 1]} : vector<9x128xf32> to vector<1x128xf32>
    %240 = vector.broadcast %239 : vector<1x128xf32> to vector<32x128xf32>
    %241 = arith.mulf %238, %240 : vector<32x128xf32>
    %242 = arith.addf %234, %241 : vector<32x128xf32>
    %243 = vector.extract_strided_slice %193 {offsets = [224, 0], sizes = [32, 128], strides = [1, 1]} : vector<288x128xf32> to vector<32x128xf32>
    %244 = vector.extract_strided_slice %243 {offsets = [0, 8], sizes = [32, 120], strides = [1, 1]} : vector<32x128xf32> to vector<32x120xf32>
    %245 = vector.extract_strided_slice %243 {offsets = [0, 0], sizes = [32, 8], strides = [1, 1]} : vector<32x128xf32> to vector<32x8xf32>
    %246 = tpu.concatenate %244, %245 in 1 : vector<32x120xf32>, vector<32x8xf32> -> vector<32x128xf32>
    %247 = vector.extract_strided_slice %0 {offsets = [7, 0], sizes = [1, 128], strides = [1, 1]} : vector<9x128xf32> to vector<1x128xf32>
    %248 = vector.broadcast %247 : vector<1x128xf32> to vector<32x128xf32>
    %249 = arith.mulf %246, %248 : vector<32x128xf32>
    %250 = arith.addf %242, %249 : vector<32x128xf32>
    %251 = vector.extract_strided_slice %193 {offsets = [256, 0], sizes = [32, 128], strides = [1, 1]} : vector<288x128xf32> to vector<32x128xf32>
    %252 = vector.extract_strided_slice %251 {offsets = [0, 9], sizes = [32, 119], strides = [1, 1]} : vector<32x128xf32> to vector<32x119xf32>
    %253 = vector.extract_strided_slice %251 {offsets = [0, 0], sizes = [32, 9], strides = [1, 1]} : vector<32x128xf32> to vector<32x9xf32>
    %254 = tpu.concatenate %252, %253 in 1 : vector<32x119xf32>, vector<32x9xf32> -> vector<32x128xf32>
    %255 = vector.extract_strided_slice %0 {offsets = [8, 0], sizes = [1, 128], strides = [1, 1]} : vector<9x128xf32> to vector<1x128xf32>
    %256 = vector.broadcast %255 : vector<1x128xf32> to vector<32x128xf32>
    %257 = arith.mulf %254, %256 : vector<32x128xf32>
    %258 = arith.addf %250, %257 : vector<32x128xf32>
    %259 = vector.extract_strided_slice %1 {offsets = [0, 4], sizes = [32, 1], strides = [1, 1]} : vector<128x16xf32> to vector<32x1xf32>
    %260 = vector.extract_strided_slice %1 {offsets = [0, 5], sizes = [32, 1], strides = [1, 1]} : vector<128x16xf32> to vector<32x1xf32>
    %cst_29 = arith.constant dense<0.000000e+00> : vector<32xf32>
    %261 = vector.multi_reduction <add>, %258, %cst_29 [1] : vector<32x128xf32> to vector<32xf32>
    %262 = vector.shape_cast %261 : vector<32xf32> to vector<32x1xf32>
    %cst_30 = arith.constant 1.280000e+02 : f32
    %263 = vector.broadcast %cst_30 : f32 to vector<32x1xf32>
    %264 = arith.divf %262, %263 : vector<32x1xf32>
    %265 = vector.broadcast %264 : vector<32x1xf32> to vector<32x128xf32>
    %266 = arith.subf %258, %265 : vector<32x128xf32>
    %267 = arith.mulf %266, %266 : vector<32x128xf32>
    %cst_31 = arith.constant dense<0.000000e+00> : vector<32xf32>
    %268 = vector.multi_reduction <add>, %267, %cst_31 [1] : vector<32x128xf32> to vector<32xf32>
    %269 = vector.shape_cast %268 : vector<32xf32> to vector<32x1xf32>
    %cst_32 = arith.constant 1.280000e+02 : f32
    %270 = vector.broadcast %cst_32 : f32 to vector<32x1xf32>
    %271 = arith.divf %269, %270 : vector<32x1xf32>
    %cst_33 = arith.constant 9.99999974E-6 : f32
    %272 = vector.broadcast %cst_33 : f32 to vector<32x1xf32>
    %273 = arith.addf %271, %272 : vector<32x1xf32>
    %274 = math.rsqrt %273 : vector<32x1xf32>
    %275 = arith.mulf %259, %274 : vector<32x1xf32>
    %276 = vector.broadcast %275 : vector<32x1xf32> to vector<32x128xf32>
    %277 = arith.mulf %266, %276 : vector<32x128xf32>
    %278 = vector.broadcast %260 : vector<32x1xf32> to vector<32x128xf32>
    %279 = arith.addf %277, %278 : vector<32x128xf32>
    %cst_34 = arith.constant 0.000000e+00 : f32
    %280 = vector.broadcast %cst_34 : f32 to vector<32x128xf32>
    %281 = arith.cmpf oge, %279, %280 : vector<32x128xf32>
    %cst_35 = arith.constant 2.000000e-01 : f32
    %282 = vector.broadcast %cst_35 : f32 to vector<32x128xf32>
    %283 = arith.mulf %282, %279 : vector<32x128xf32>
    %284 = arith.select %281, %279, %283 : vector<32x128xi1>, vector<32x128xf32>
    %c0_36 = arith.constant 0 : index
    %c0_37 = arith.constant 0 : index
    %285 = vector.load %arg6[%c0_36, %c0_37] : memref<72x32xbf16, #tpu.memory_space<vmem>>, vector<72x32xbf16>
    %286 = arith.truncf %284 : vector<32x128xf32> to vector<32x128xbf16>
    %cst_38 = arith.constant dense<0.000000e+00> : vector<72x128xf32>
    %287 = tpu.matmul %285, %286, %cst_38 {dimension_numbers = #tpu.dot_dimension_numbers<[1], [0], [0], [1], [0, 0, 1, 1], [], []>} : vector<72x32xbf16>, vector<32x128xbf16>, vector<72x128xf32> -> vector<72x128xf32>
    %288 = vector.extract_strided_slice %287 {offsets = [32, 0], sizes = [8, 128], strides = [1, 1]} : vector<72x128xf32> to vector<8x128xf32>
    %289 = vector.extract_strided_slice %287 {offsets = [0, 0], sizes = [8, 128], strides = [1, 1]} : vector<72x128xf32> to vector<8x128xf32>
    %290 = vector.extract_strided_slice %289 {offsets = [0, 119], sizes = [8, 9], strides = [1, 1]} : vector<8x128xf32> to vector<8x9xf32>
    %291 = vector.extract_strided_slice %289 {offsets = [0, 0], sizes = [8, 119], strides = [1, 1]} : vector<8x128xf32> to vector<8x119xf32>
    %292 = tpu.concatenate %290, %291 in 1 : vector<8x9xf32>, vector<8x119xf32> -> vector<8x128xf32>
    %293 = vector.extract_strided_slice %0 {offsets = [0, 0], sizes = [1, 128], strides = [1, 1]} : vector<9x128xf32> to vector<1x128xf32>
    %294 = vector.broadcast %293 : vector<1x128xf32> to vector<8x128xf32>
    %295 = arith.mulf %292, %294 : vector<8x128xf32>
    %296 = arith.addf %288, %295 : vector<8x128xf32>
    %297 = vector.extract_strided_slice %287 {offsets = [8, 0], sizes = [8, 128], strides = [1, 1]} : vector<72x128xf32> to vector<8x128xf32>
    %298 = vector.extract_strided_slice %297 {offsets = [0, 120], sizes = [8, 8], strides = [1, 1]} : vector<8x128xf32> to vector<8x8xf32>
    %299 = vector.extract_strided_slice %297 {offsets = [0, 0], sizes = [8, 120], strides = [1, 1]} : vector<8x128xf32> to vector<8x120xf32>
    %300 = tpu.concatenate %298, %299 in 1 : vector<8x8xf32>, vector<8x120xf32> -> vector<8x128xf32>
    %301 = vector.extract_strided_slice %0 {offsets = [1, 0], sizes = [1, 128], strides = [1, 1]} : vector<9x128xf32> to vector<1x128xf32>
    %302 = vector.broadcast %301 : vector<1x128xf32> to vector<8x128xf32>
    %303 = arith.mulf %300, %302 : vector<8x128xf32>
    %304 = arith.addf %296, %303 : vector<8x128xf32>
    %305 = vector.extract_strided_slice %287 {offsets = [16, 0], sizes = [8, 128], strides = [1, 1]} : vector<72x128xf32> to vector<8x128xf32>
    %306 = vector.extract_strided_slice %305 {offsets = [0, 121], sizes = [8, 7], strides = [1, 1]} : vector<8x128xf32> to vector<8x7xf32>
    %307 = vector.extract_strided_slice %305 {offsets = [0, 0], sizes = [8, 121], strides = [1, 1]} : vector<8x128xf32> to vector<8x121xf32>
    %308 = tpu.concatenate %306, %307 in 1 : vector<8x7xf32>, vector<8x121xf32> -> vector<8x128xf32>
    %309 = vector.extract_strided_slice %0 {offsets = [2, 0], sizes = [1, 128], strides = [1, 1]} : vector<9x128xf32> to vector<1x128xf32>
    %310 = vector.broadcast %309 : vector<1x128xf32> to vector<8x128xf32>
    %311 = arith.mulf %308, %310 : vector<8x128xf32>
    %312 = arith.addf %304, %311 : vector<8x128xf32>
    %313 = vector.extract_strided_slice %287 {offsets = [24, 0], sizes = [8, 128], strides = [1, 1]} : vector<72x128xf32> to vector<8x128xf32>
    %314 = vector.extract_strided_slice %313 {offsets = [0, 127], sizes = [8, 1], strides = [1, 1]} : vector<8x128xf32> to vector<8x1xf32>
    %315 = vector.extract_strided_slice %313 {offsets = [0, 0], sizes = [8, 127], strides = [1, 1]} : vector<8x128xf32> to vector<8x127xf32>
    %316 = tpu.concatenate %314, %315 in 1 : vector<8x1xf32>, vector<8x127xf32> -> vector<8x128xf32>
    %317 = vector.extract_strided_slice %0 {offsets = [3, 0], sizes = [1, 128], strides = [1, 1]} : vector<9x128xf32> to vector<1x128xf32>
    %318 = vector.broadcast %317 : vector<1x128xf32> to vector<8x128xf32>
    %319 = arith.mulf %316, %318 : vector<8x128xf32>
    %320 = arith.addf %312, %319 : vector<8x128xf32>
    %321 = vector.extract_strided_slice %287 {offsets = [40, 0], sizes = [8, 128], strides = [1, 1]} : vector<72x128xf32> to vector<8x128xf32>
    %322 = vector.extract_strided_slice %321 {offsets = [0, 1], sizes = [8, 127], strides = [1, 1]} : vector<8x128xf32> to vector<8x127xf32>
    %323 = vector.extract_strided_slice %321 {offsets = [0, 0], sizes = [8, 1], strides = [1, 1]} : vector<8x128xf32> to vector<8x1xf32>
    %324 = tpu.concatenate %322, %323 in 1 : vector<8x127xf32>, vector<8x1xf32> -> vector<8x128xf32>
    %325 = vector.extract_strided_slice %0 {offsets = [5, 0], sizes = [1, 128], strides = [1, 1]} : vector<9x128xf32> to vector<1x128xf32>
    %326 = vector.broadcast %325 : vector<1x128xf32> to vector<8x128xf32>
    %327 = arith.mulf %324, %326 : vector<8x128xf32>
    %328 = arith.addf %320, %327 : vector<8x128xf32>
    %329 = vector.extract_strided_slice %287 {offsets = [48, 0], sizes = [8, 128], strides = [1, 1]} : vector<72x128xf32> to vector<8x128xf32>
    %330 = vector.extract_strided_slice %329 {offsets = [0, 7], sizes = [8, 121], strides = [1, 1]} : vector<8x128xf32> to vector<8x121xf32>
    %331 = vector.extract_strided_slice %329 {offsets = [0, 0], sizes = [8, 7], strides = [1, 1]} : vector<8x128xf32> to vector<8x7xf32>
    %332 = tpu.concatenate %330, %331 in 1 : vector<8x121xf32>, vector<8x7xf32> -> vector<8x128xf32>
    %333 = vector.extract_strided_slice %0 {offsets = [6, 0], sizes = [1, 128], strides = [1, 1]} : vector<9x128xf32> to vector<1x128xf32>
    %334 = vector.broadcast %333 : vector<1x128xf32> to vector<8x128xf32>
    %335 = arith.mulf %332, %334 : vector<8x128xf32>
    %336 = arith.addf %328, %335 : vector<8x128xf32>
    %337 = vector.extract_strided_slice %287 {offsets = [56, 0], sizes = [8, 128], strides = [1, 1]} : vector<72x128xf32> to vector<8x128xf32>
    %338 = vector.extract_strided_slice %337 {offsets = [0, 8], sizes = [8, 120], strides = [1, 1]} : vector<8x128xf32> to vector<8x120xf32>
    %339 = vector.extract_strided_slice %337 {offsets = [0, 0], sizes = [8, 8], strides = [1, 1]} : vector<8x128xf32> to vector<8x8xf32>
    %340 = tpu.concatenate %338, %339 in 1 : vector<8x120xf32>, vector<8x8xf32> -> vector<8x128xf32>
    %341 = vector.extract_strided_slice %0 {offsets = [7, 0], sizes = [1, 128], strides = [1, 1]} : vector<9x128xf32> to vector<1x128xf32>
    %342 = vector.broadcast %341 : vector<1x128xf32> to vector<8x128xf32>
    %343 = arith.mulf %340, %342 : vector<8x128xf32>
    %344 = arith.addf %336, %343 : vector<8x128xf32>
    %345 = vector.extract_strided_slice %287 {offsets = [64, 0], sizes = [8, 128], strides = [1, 1]} : vector<72x128xf32> to vector<8x128xf32>
    %346 = vector.extract_strided_slice %345 {offsets = [0, 9], sizes = [8, 119], strides = [1, 1]} : vector<8x128xf32> to vector<8x119xf32>
    %347 = vector.extract_strided_slice %345 {offsets = [0, 0], sizes = [8, 9], strides = [1, 1]} : vector<8x128xf32> to vector<8x9xf32>
    %348 = tpu.concatenate %346, %347 in 1 : vector<8x119xf32>, vector<8x9xf32> -> vector<8x128xf32>
    %349 = vector.extract_strided_slice %0 {offsets = [8, 0], sizes = [1, 128], strides = [1, 1]} : vector<9x128xf32> to vector<1x128xf32>
    %350 = vector.broadcast %349 : vector<1x128xf32> to vector<8x128xf32>
    %351 = arith.mulf %348, %350 : vector<8x128xf32>
    %352 = arith.addf %344, %351 : vector<8x128xf32>
    %353 = vector.extract_strided_slice %1 {offsets = [0, 6], sizes = [8, 1], strides = [1, 1]} : vector<128x16xf32> to vector<8x1xf32>
    %354 = vector.extract_strided_slice %1 {offsets = [0, 7], sizes = [8, 1], strides = [1, 1]} : vector<128x16xf32> to vector<8x1xf32>
    %cst_39 = arith.constant dense<0.000000e+00> : vector<8xf32>
    %355 = vector.multi_reduction <add>, %352, %cst_39 [1] : vector<8x128xf32> to vector<8xf32>
    %356 = vector.shape_cast %355 : vector<8xf32> to vector<8x1xf32>
    %cst_40 = arith.constant 1.280000e+02 : f32
    %357 = vector.broadcast %cst_40 : f32 to vector<8x1xf32>
    %358 = arith.divf %356, %357 : vector<8x1xf32>
    %359 = vector.broadcast %358 : vector<8x1xf32> to vector<8x128xf32>
    %360 = arith.subf %352, %359 : vector<8x128xf32>
    %361 = arith.mulf %360, %360 : vector<8x128xf32>
    %cst_41 = arith.constant dense<0.000000e+00> : vector<8xf32>
    %362 = vector.multi_reduction <add>, %361, %cst_41 [1] : vector<8x128xf32> to vector<8xf32>
    %363 = vector.shape_cast %362 : vector<8xf32> to vector<8x1xf32>
    %cst_42 = arith.constant 1.280000e+02 : f32
    %364 = vector.broadcast %cst_42 : f32 to vector<8x1xf32>
    %365 = arith.divf %363, %364 : vector<8x1xf32>
    %cst_43 = arith.constant 9.99999974E-6 : f32
    %366 = vector.broadcast %cst_43 : f32 to vector<8x1xf32>
    %367 = arith.addf %365, %366 : vector<8x1xf32>
    %368 = math.rsqrt %367 : vector<8x1xf32>
    %369 = arith.mulf %353, %368 : vector<8x1xf32>
    %370 = vector.broadcast %369 : vector<8x1xf32> to vector<8x128xf32>
    %371 = arith.mulf %360, %370 : vector<8x128xf32>
    %372 = vector.broadcast %354 : vector<8x1xf32> to vector<8x128xf32>
    %373 = arith.addf %371, %372 : vector<8x128xf32>
    %cst_44 = arith.constant 0.000000e+00 : f32
    %374 = vector.broadcast %cst_44 : f32 to vector<8x128xf32>
    %375 = arith.subf %374, %373 : vector<8x128xf32>
    %376 = math.exp %375 : vector<8x128xf32>
    %cst_45 = arith.constant 1.000000e+00 : f32
    %377 = vector.broadcast %cst_45 : f32 to vector<8x128xf32>
    %378 = arith.addf %377, %376 : vector<8x128xf32>
    %cst_46 = arith.constant 1.000000e+00 : f32
    %379 = vector.broadcast %cst_46 : f32 to vector<8x128xf32>
    %380 = arith.divf %379, %378 : vector<8x128xf32>
    %c0_47 = arith.constant 0 : index
    %c0_48 = arith.constant 0 : index
    %381 = vector.load %arg12[%c0_47, %c0_48] : memref<8x128xf32, #tpu.memory_space<vmem>>, vector<8x128xf32>
    tpu.vector_store %arg12[%c0_47, %c0_48], %380 {strides = array<i32>} : memref<8x128xf32, #tpu.memory_space<vmem>>, vector<8x128xf32>,
    %c0_49 = arith.constant 0 : index
    %c0_50 = arith.constant 0 : index
    %382 = vector.load %arg7[%c0_49, %c0_50] : memref<1152x256xbf16, #tpu.memory_space<vmem>>, vector<1152x256xbf16>
    %cst_51 = arith.constant dense<0.000000e+00> : vector<1152x128xf32>
    %383 = tpu.matmul %382, %3, %cst_51 {dimension_numbers = #tpu.dot_dimension_numbers<[1], [0], [0], [1], [0, 0, 1, 1], [], []>} : vector<1152x256xbf16>, vector<256x128xbf16>, vector<1152x128xf32> -> vector<1152x128xf32>
    %384 = vector.extract_strided_slice %383 {offsets = [512, 0], sizes = [128, 128], strides = [1, 1]} : vector<1152x128xf32> to vector<128x128xf32>
    %385 = vector.extract_strided_slice %383 {offsets = [0, 0], sizes = [128, 128], strides = [1, 1]} : vector<1152x128xf32> to vector<128x128xf32>
    %386 = vector.extract_strided_slice %385 {offsets = [0, 119], sizes = [128, 9], strides = [1, 1]} : vector<128x128xf32> to vector<128x9xf32>
    %387 = vector.extract_strided_slice %385 {offsets = [0, 0], sizes = [128, 119], strides = [1, 1]} : vector<128x128xf32> to vector<128x119xf32>
    %388 = tpu.concatenate %386, %387 in 1 : vector<128x9xf32>, vector<128x119xf32> -> vector<128x128xf32>
    %389 = vector.extract_strided_slice %0 {offsets = [0, 0], sizes = [1, 128], strides = [1, 1]} : vector<9x128xf32> to vector<1x128xf32>
    %390 = vector.broadcast %389 : vector<1x128xf32> to vector<128x128xf32>
    %391 = arith.mulf %388, %390 : vector<128x128xf32>
    %392 = arith.addf %384, %391 : vector<128x128xf32>
    %393 = vector.extract_strided_slice %383 {offsets = [128, 0], sizes = [128, 128], strides = [1, 1]} : vector<1152x128xf32> to vector<128x128xf32>
    %394 = vector.extract_strided_slice %393 {offsets = [0, 120], sizes = [128, 8], strides = [1, 1]} : vector<128x128xf32> to vector<128x8xf32>
    %395 = vector.extract_strided_slice %393 {offsets = [0, 0], sizes = [128, 120], strides = [1, 1]} : vector<128x128xf32> to vector<128x120xf32>
    %396 = tpu.concatenate %394, %395 in 1 : vector<128x8xf32>, vector<128x120xf32> -> vector<128x128xf32>
    %397 = vector.extract_strided_slice %0 {offsets = [1, 0], sizes = [1, 128], strides = [1, 1]} : vector<9x128xf32> to vector<1x128xf32>
    %398 = vector.broadcast %397 : vector<1x128xf32> to vector<128x128xf32>
    %399 = arith.mulf %396, %398 : vector<128x128xf32>
    %400 = arith.addf %392, %399 : vector<128x128xf32>
    %401 = vector.extract_strided_slice %383 {offsets = [256, 0], sizes = [128, 128], strides = [1, 1]} : vector<1152x128xf32> to vector<128x128xf32>
    %402 = vector.extract_strided_slice %401 {offsets = [0, 121], sizes = [128, 7], strides = [1, 1]} : vector<128x128xf32> to vector<128x7xf32>
    %403 = vector.extract_strided_slice %401 {offsets = [0, 0], sizes = [128, 121], strides = [1, 1]} : vector<128x128xf32> to vector<128x121xf32>
    %404 = tpu.concatenate %402, %403 in 1 : vector<128x7xf32>, vector<128x121xf32> -> vector<128x128xf32>
    %405 = vector.extract_strided_slice %0 {offsets = [2, 0], sizes = [1, 128], strides = [1, 1]} : vector<9x128xf32> to vector<1x128xf32>
    %406 = vector.broadcast %405 : vector<1x128xf32> to vector<128x128xf32>
    %407 = arith.mulf %404, %406 : vector<128x128xf32>
    %408 = arith.addf %400, %407 : vector<128x128xf32>
    %409 = vector.extract_strided_slice %383 {offsets = [384, 0], sizes = [128, 128], strides = [1, 1]} : vector<1152x128xf32> to vector<128x128xf32>
    %410 = vector.extract_strided_slice %409 {offsets = [0, 127], sizes = [128, 1], strides = [1, 1]} : vector<128x128xf32> to vector<128x1xf32>
    %411 = vector.extract_strided_slice %409 {offsets = [0, 0], sizes = [128, 127], strides = [1, 1]} : vector<128x128xf32> to vector<128x127xf32>
    %412 = tpu.concatenate %410, %411 in 1 : vector<128x1xf32>, vector<128x127xf32> -> vector<128x128xf32>
    %413 = vector.extract_strided_slice %0 {offsets = [3, 0], sizes = [1, 128], strides = [1, 1]} : vector<9x128xf32> to vector<1x128xf32>
    %414 = vector.broadcast %413 : vector<1x128xf32> to vector<128x128xf32>
    %415 = arith.mulf %412, %414 : vector<128x128xf32>
    %416 = arith.addf %408, %415 : vector<128x128xf32>
    %417 = vector.extract_strided_slice %383 {offsets = [640, 0], sizes = [128, 128], strides = [1, 1]} : vector<1152x128xf32> to vector<128x128xf32>
    %418 = vector.extract_strided_slice %417 {offsets = [0, 1], sizes = [128, 127], strides = [1, 1]} : vector<128x128xf32> to vector<128x127xf32>
    %419 = vector.extract_strided_slice %417 {offsets = [0, 0], sizes = [128, 1], strides = [1, 1]} : vector<128x128xf32> to vector<128x1xf32>
    %420 = tpu.concatenate %418, %419 in 1 : vector<128x127xf32>, vector<128x1xf32> -> vector<128x128xf32>
    %421 = vector.extract_strided_slice %0 {offsets = [5, 0], sizes = [1, 128], strides = [1, 1]} : vector<9x128xf32> to vector<1x128xf32>
    %422 = vector.broadcast %421 : vector<1x128xf32> to vector<128x128xf32>
    %423 = arith.mulf %420, %422 : vector<128x128xf32>
    %424 = arith.addf %416, %423 : vector<128x128xf32>
    %425 = vector.extract_strided_slice %383 {offsets = [768, 0], sizes = [128, 128], strides = [1, 1]} : vector<1152x128xf32> to vector<128x128xf32>
    %426 = vector.extract_strided_slice %425 {offsets = [0, 7], sizes = [128, 121], strides = [1, 1]} : vector<128x128xf32> to vector<128x121xf32>
    %427 = vector.extract_strided_slice %425 {offsets = [0, 0], sizes = [128, 7], strides = [1, 1]} : vector<128x128xf32> to vector<128x7xf32>
    %428 = tpu.concatenate %426, %427 in 1 : vector<128x121xf32>, vector<128x7xf32> -> vector<128x128xf32>
    %429 = vector.extract_strided_slice %0 {offsets = [6, 0], sizes = [1, 128], strides = [1, 1]} : vector<9x128xf32> to vector<1x128xf32>
    %430 = vector.broadcast %429 : vector<1x128xf32> to vector<128x128xf32>
    %431 = arith.mulf %428, %430 : vector<128x128xf32>
    %432 = arith.addf %424, %431 : vector<128x128xf32>
    %433 = vector.extract_strided_slice %383 {offsets = [896, 0], sizes = [128, 128], strides = [1, 1]} : vector<1152x128xf32> to vector<128x128xf32>
    %434 = vector.extract_strided_slice %433 {offsets = [0, 8], sizes = [128, 120], strides = [1, 1]} : vector<128x128xf32> to vector<128x120xf32>
    %435 = vector.extract_strided_slice %433 {offsets = [0, 0], sizes = [128, 8], strides = [1, 1]} : vector<128x128xf32> to vector<128x8xf32>
    %436 = tpu.concatenate %434, %435 in 1 : vector<128x120xf32>, vector<128x8xf32> -> vector<128x128xf32>
    %437 = vector.extract_strided_slice %0 {offsets = [7, 0], sizes = [1, 128], strides = [1, 1]} : vector<9x128xf32> to vector<1x128xf32>
    %438 = vector.broadcast %437 : vector<1x128xf32> to vector<128x128xf32>
    %439 = arith.mulf %436, %438 : vector<128x128xf32>
    %440 = arith.addf %432, %439 : vector<128x128xf32>
    %441 = vector.extract_strided_slice %383 {offsets = [1024, 0], sizes = [128, 128], strides = [1, 1]} : vector<1152x128xf32> to vector<128x128xf32>
    %442 = vector.extract_strided_slice %441 {offsets = [0, 9], sizes = [128, 119], strides = [1, 1]} : vector<128x128xf32> to vector<128x119xf32>
    %443 = vector.extract_strided_slice %441 {offsets = [0, 0], sizes = [128, 9], strides = [1, 1]} : vector<128x128xf32> to vector<128x9xf32>
    %444 = tpu.concatenate %442, %443 in 1 : vector<128x119xf32>, vector<128x9xf32> -> vector<128x128xf32>
    %445 = vector.extract_strided_slice %0 {offsets = [8, 0], sizes = [1, 128], strides = [1, 1]} : vector<9x128xf32> to vector<1x128xf32>
    %446 = vector.broadcast %445 : vector<1x128xf32> to vector<128x128xf32>
    %447 = arith.mulf %444, %446 : vector<128x128xf32>
    %448 = arith.addf %440, %447 : vector<128x128xf32>
    %449 = vector.extract_strided_slice %1 {offsets = [0, 8], sizes = [128, 1], strides = [1, 1]} : vector<128x16xf32> to vector<128x1xf32>
    %450 = vector.extract_strided_slice %1 {offsets = [0, 9], sizes = [128, 1], strides = [1, 1]} : vector<128x16xf32> to vector<128x1xf32>
    %cst_52 = arith.constant dense<0.000000e+00> : vector<128xf32>
    %451 = vector.multi_reduction <add>, %448, %cst_52 [1] : vector<128x128xf32> to vector<128xf32>
    %452 = vector.shape_cast %451 : vector<128xf32> to vector<128x1xf32>
    %cst_53 = arith.constant 1.280000e+02 : f32
    %453 = vector.broadcast %cst_53 : f32 to vector<128x1xf32>
    %454 = arith.divf %452, %453 : vector<128x1xf32>
    %455 = vector.broadcast %454 : vector<128x1xf32> to vector<128x128xf32>
    %456 = arith.subf %448, %455 : vector<128x128xf32>
    %457 = arith.mulf %456, %456 : vector<128x128xf32>
    %cst_54 = arith.constant dense<0.000000e+00> : vector<128xf32>
    %458 = vector.multi_reduction <add>, %457, %cst_54 [1] : vector<128x128xf32> to vector<128xf32>
    %459 = vector.shape_cast %458 : vector<128xf32> to vector<128x1xf32>
    %cst_55 = arith.constant 1.280000e+02 : f32
    %460 = vector.broadcast %cst_55 : f32 to vector<128x1xf32>
    %461 = arith.divf %459, %460 : vector<128x1xf32>
    %cst_56 = arith.constant 9.99999974E-6 : f32
    %462 = vector.broadcast %cst_56 : f32 to vector<128x1xf32>
    %463 = arith.addf %461, %462 : vector<128x1xf32>
    %464 = math.rsqrt %463 : vector<128x1xf32>
    %465 = arith.mulf %449, %464 : vector<128x1xf32>
    %466 = vector.broadcast %465 : vector<128x1xf32> to vector<128x128xf32>
    %467 = arith.mulf %456, %466 : vector<128x128xf32>
    %468 = vector.broadcast %450 : vector<128x1xf32> to vector<128x128xf32>
    %469 = arith.addf %467, %468 : vector<128x128xf32>
    %cst_57 = arith.constant 0.000000e+00 : f32
    %470 = vector.broadcast %cst_57 : f32 to vector<128x128xf32>
    %471 = arith.cmpf oge, %469, %470 : vector<128x128xf32>
    %cst_58 = arith.constant 2.000000e-01 : f32
    %472 = vector.broadcast %cst_58 : f32 to vector<128x128xf32>
    %473 = arith.mulf %472, %469 : vector<128x128xf32>
    %474 = arith.select %471, %469, %473 : vector<128x128xi1>, vector<128x128xf32>
    %475 = tpu.concatenate %474, %96 in 0 : vector<128x128xf32>, vector<128x128xf32> -> vector<256x128xf32>
    %c0_59 = arith.constant 0 : index
    %c0_60 = arith.constant 0 : index
    %476 = vector.load %arg8[%c0_59, %c0_60] : memref<576x256xbf16, #tpu.memory_space<vmem>>, vector<576x256xbf16>
    %477 = arith.truncf %475 : vector<256x128xf32> to vector<256x128xbf16>
    %cst_61 = arith.constant dense<0.000000e+00> : vector<576x128xf32>
    %478 = tpu.matmul %476, %477, %cst_61 {dimension_numbers = #tpu.dot_dimension_numbers<[1], [0], [0], [1], [0, 0, 1, 1], [], []>} : vector<576x256xbf16>, vector<256x128xbf16>, vector<576x128xf32> -> vector<576x128xf32>
    %479 = vector.extract_strided_slice %478 {offsets = [256, 0], sizes = [64, 128], strides = [1, 1]} : vector<576x128xf32> to vector<64x128xf32>
    %480 = vector.extract_strided_slice %478 {offsets = [0, 0], sizes = [64, 128], strides = [1, 1]} : vector<576x128xf32> to vector<64x128xf32>
    %481 = vector.extract_strided_slice %480 {offsets = [0, 119], sizes = [64, 9], strides = [1, 1]} : vector<64x128xf32> to vector<64x9xf32>
    %482 = vector.extract_strided_slice %480 {offsets = [0, 0], sizes = [64, 119], strides = [1, 1]} : vector<64x128xf32> to vector<64x119xf32>
    %483 = tpu.concatenate %481, %482 in 1 : vector<64x9xf32>, vector<64x119xf32> -> vector<64x128xf32>
    %484 = vector.extract_strided_slice %0 {offsets = [0, 0], sizes = [1, 128], strides = [1, 1]} : vector<9x128xf32> to vector<1x128xf32>
    %485 = vector.broadcast %484 : vector<1x128xf32> to vector<64x128xf32>
    %486 = arith.mulf %483, %485 : vector<64x128xf32>
    %487 = arith.addf %479, %486 : vector<64x128xf32>
    %488 = vector.extract_strided_slice %478 {offsets = [64, 0], sizes = [64, 128], strides = [1, 1]} : vector<576x128xf32> to vector<64x128xf32>
    %489 = vector.extract_strided_slice %488 {offsets = [0, 120], sizes = [64, 8], strides = [1, 1]} : vector<64x128xf32> to vector<64x8xf32>
    %490 = vector.extract_strided_slice %488 {offsets = [0, 0], sizes = [64, 120], strides = [1, 1]} : vector<64x128xf32> to vector<64x120xf32>
    %491 = tpu.concatenate %489, %490 in 1 : vector<64x8xf32>, vector<64x120xf32> -> vector<64x128xf32>
    %492 = vector.extract_strided_slice %0 {offsets = [1, 0], sizes = [1, 128], strides = [1, 1]} : vector<9x128xf32> to vector<1x128xf32>
    %493 = vector.broadcast %492 : vector<1x128xf32> to vector<64x128xf32>
    %494 = arith.mulf %491, %493 : vector<64x128xf32>
    %495 = arith.addf %487, %494 : vector<64x128xf32>
    %496 = vector.extract_strided_slice %478 {offsets = [128, 0], sizes = [64, 128], strides = [1, 1]} : vector<576x128xf32> to vector<64x128xf32>
    %497 = vector.extract_strided_slice %496 {offsets = [0, 121], sizes = [64, 7], strides = [1, 1]} : vector<64x128xf32> to vector<64x7xf32>
    %498 = vector.extract_strided_slice %496 {offsets = [0, 0], sizes = [64, 121], strides = [1, 1]} : vector<64x128xf32> to vector<64x121xf32>
    %499 = tpu.concatenate %497, %498 in 1 : vector<64x7xf32>, vector<64x121xf32> -> vector<64x128xf32>
    %500 = vector.extract_strided_slice %0 {offsets = [2, 0], sizes = [1, 128], strides = [1, 1]} : vector<9x128xf32> to vector<1x128xf32>
    %501 = vector.broadcast %500 : vector<1x128xf32> to vector<64x128xf32>
    %502 = arith.mulf %499, %501 : vector<64x128xf32>
    %503 = arith.addf %495, %502 : vector<64x128xf32>
    %504 = vector.extract_strided_slice %478 {offsets = [192, 0], sizes = [64, 128], strides = [1, 1]} : vector<576x128xf32> to vector<64x128xf32>
    %505 = vector.extract_strided_slice %504 {offsets = [0, 127], sizes = [64, 1], strides = [1, 1]} : vector<64x128xf32> to vector<64x1xf32>
    %506 = vector.extract_strided_slice %504 {offsets = [0, 0], sizes = [64, 127], strides = [1, 1]} : vector<64x128xf32> to vector<64x127xf32>
    %507 = tpu.concatenate %505, %506 in 1 : vector<64x1xf32>, vector<64x127xf32> -> vector<64x128xf32>
    %508 = vector.extract_strided_slice %0 {offsets = [3, 0], sizes = [1, 128], strides = [1, 1]} : vector<9x128xf32> to vector<1x128xf32>
    %509 = vector.broadcast %508 : vector<1x128xf32> to vector<64x128xf32>
    %510 = arith.mulf %507, %509 : vector<64x128xf32>
    %511 = arith.addf %503, %510 : vector<64x128xf32>
    %512 = vector.extract_strided_slice %478 {offsets = [320, 0], sizes = [64, 128], strides = [1, 1]} : vector<576x128xf32> to vector<64x128xf32>
    %513 = vector.extract_strided_slice %512 {offsets = [0, 1], sizes = [64, 127], strides = [1, 1]} : vector<64x128xf32> to vector<64x127xf32>
    %514 = vector.extract_strided_slice %512 {offsets = [0, 0], sizes = [64, 1], strides = [1, 1]} : vector<64x128xf32> to vector<64x1xf32>
    %515 = tpu.concatenate %513, %514 in 1 : vector<64x127xf32>, vector<64x1xf32> -> vector<64x128xf32>
    %516 = vector.extract_strided_slice %0 {offsets = [5, 0], sizes = [1, 128], strides = [1, 1]} : vector<9x128xf32> to vector<1x128xf32>
    %517 = vector.broadcast %516 : vector<1x128xf32> to vector<64x128xf32>
    %518 = arith.mulf %515, %517 : vector<64x128xf32>
    %519 = arith.addf %511, %518 : vector<64x128xf32>
    %520 = vector.extract_strided_slice %478 {offsets = [384, 0], sizes = [64, 128], strides = [1, 1]} : vector<576x128xf32> to vector<64x128xf32>
    %521 = vector.extract_strided_slice %520 {offsets = [0, 7], sizes = [64, 121], strides = [1, 1]} : vector<64x128xf32> to vector<64x121xf32>
    %522 = vector.extract_strided_slice %520 {offsets = [0, 0], sizes = [64, 7], strides = [1, 1]} : vector<64x128xf32> to vector<64x7xf32>
    %523 = tpu.concatenate %521, %522 in 1 : vector<64x121xf32>, vector<64x7xf32> -> vector<64x128xf32>
    %524 = vector.extract_strided_slice %0 {offsets = [6, 0], sizes = [1, 128], strides = [1, 1]} : vector<9x128xf32> to vector<1x128xf32>
    %525 = vector.broadcast %524 : vector<1x128xf32> to vector<64x128xf32>
    %526 = arith.mulf %523, %525 : vector<64x128xf32>
    %527 = arith.addf %519, %526 : vector<64x128xf32>
    %528 = vector.extract_strided_slice %478 {offsets = [448, 0], sizes = [64, 128], strides = [1, 1]} : vector<576x128xf32> to vector<64x128xf32>
    %529 = vector.extract_strided_slice %528 {offsets = [0, 8], sizes = [64, 120], strides = [1, 1]} : vector<64x128xf32> to vector<64x120xf32>
    %530 = vector.extract_strided_slice %528 {offsets = [0, 0], sizes = [64, 8], strides = [1, 1]} : vector<64x128xf32> to vector<64x8xf32>
    %531 = tpu.concatenate %529, %530 in 1 : vector<64x120xf32>, vector<64x8xf32> -> vector<64x128xf32>
    %532 = vector.extract_strided_slice %0 {offsets = [7, 0], sizes = [1, 128], strides = [1, 1]} : vector<9x128xf32> to vector<1x128xf32>
    %533 = vector.broadcast %532 : vector<1x128xf32> to vector<64x128xf32>
    %534 = arith.mulf %531, %533 : vector<64x128xf32>
    %535 = arith.addf %527, %534 : vector<64x128xf32>
    %536 = vector.extract_strided_slice %478 {offsets = [512, 0], sizes = [64, 128], strides = [1, 1]} : vector<576x128xf32> to vector<64x128xf32>
    %537 = vector.extract_strided_slice %536 {offsets = [0, 9], sizes = [64, 119], strides = [1, 1]} : vector<64x128xf32> to vector<64x119xf32>
    %538 = vector.extract_strided_slice %536 {offsets = [0, 0], sizes = [64, 9], strides = [1, 1]} : vector<64x128xf32> to vector<64x9xf32>
    %539 = tpu.concatenate %537, %538 in 1 : vector<64x119xf32>, vector<64x9xf32> -> vector<64x128xf32>
    %540 = vector.extract_strided_slice %0 {offsets = [8, 0], sizes = [1, 128], strides = [1, 1]} : vector<9x128xf32> to vector<1x128xf32>
    %541 = vector.broadcast %540 : vector<1x128xf32> to vector<64x128xf32>
    %542 = arith.mulf %539, %541 : vector<64x128xf32>
    %543 = arith.addf %535, %542 : vector<64x128xf32>
    %544 = vector.extract_strided_slice %1 {offsets = [0, 10], sizes = [64, 1], strides = [1, 1]} : vector<128x16xf32> to vector<64x1xf32>
    %545 = vector.extract_strided_slice %1 {offsets = [0, 11], sizes = [64, 1], strides = [1, 1]} : vector<128x16xf32> to vector<64x1xf32>
    %cst_62 = arith.constant dense<0.000000e+00> : vector<64xf32>
    %546 = vector.multi_reduction <add>, %543, %cst_62 [1] : vector<64x128xf32> to vector<64xf32>
    %547 = vector.shape_cast %546 : vector<64xf32> to vector<64x1xf32>
    %cst_63 = arith.constant 1.280000e+02 : f32
    %548 = vector.broadcast %cst_63 : f32 to vector<64x1xf32>
    %549 = arith.divf %547, %548 : vector<64x1xf32>
    %550 = vector.broadcast %549 : vector<64x1xf32> to vector<64x128xf32>
    %551 = arith.subf %543, %550 : vector<64x128xf32>
    %552 = arith.mulf %551, %551 : vector<64x128xf32>
    %cst_64 = arith.constant dense<0.000000e+00> : vector<64xf32>
    %553 = vector.multi_reduction <add>, %552, %cst_64 [1] : vector<64x128xf32> to vector<64xf32>
    %554 = vector.shape_cast %553 : vector<64xf32> to vector<64x1xf32>
    %cst_65 = arith.constant 1.280000e+02 : f32
    %555 = vector.broadcast %cst_65 : f32 to vector<64x1xf32>
    %556 = arith.divf %554, %555 : vector<64x1xf32>
    %cst_66 = arith.constant 9.99999974E-6 : f32
    %557 = vector.broadcast %cst_66 : f32 to vector<64x1xf32>
    %558 = arith.addf %556, %557 : vector<64x1xf32>
    %559 = math.rsqrt %558 : vector<64x1xf32>
    %560 = arith.mulf %544, %559 : vector<64x1xf32>
    %561 = vector.broadcast %560 : vector<64x1xf32> to vector<64x128xf32>
    %562 = arith.mulf %551, %561 : vector<64x128xf32>
    %563 = vector.broadcast %545 : vector<64x1xf32> to vector<64x128xf32>
    %564 = arith.addf %562, %563 : vector<64x128xf32>
    %cst_67 = arith.constant 0.000000e+00 : f32
    %565 = vector.broadcast %cst_67 : f32 to vector<64x128xf32>
    %566 = arith.cmpf oge, %564, %565 : vector<64x128xf32>
    %cst_68 = arith.constant 2.000000e-01 : f32
    %567 = vector.broadcast %cst_68 : f32 to vector<64x128xf32>
    %568 = arith.mulf %567, %564 : vector<64x128xf32>
    %569 = arith.select %566, %564, %568 : vector<64x128xi1>, vector<64x128xf32>
    %c0_69 = arith.constant 0 : index
    %c0_70 = arith.constant 0 : index
    %570 = vector.load %arg9[%c0_69, %c0_70] : memref<288x64xbf16, #tpu.memory_space<vmem>>, vector<288x64xbf16>
    %571 = arith.truncf %569 : vector<64x128xf32> to vector<64x128xbf16>
    %cst_71 = arith.constant dense<0.000000e+00> : vector<288x128xf32>
    %572 = tpu.matmul %570, %571, %cst_71 {dimension_numbers = #tpu.dot_dimension_numbers<[1], [0], [0], [1], [0, 0, 1, 1], [], []>} : vector<288x64xbf16>, vector<64x128xbf16>, vector<288x128xf32> -> vector<288x128xf32>
    %573 = vector.extract_strided_slice %572 {offsets = [128, 0], sizes = [32, 128], strides = [1, 1]} : vector<288x128xf32> to vector<32x128xf32>
    %574 = vector.extract_strided_slice %572 {offsets = [0, 0], sizes = [32, 128], strides = [1, 1]} : vector<288x128xf32> to vector<32x128xf32>
    %575 = vector.extract_strided_slice %574 {offsets = [0, 119], sizes = [32, 9], strides = [1, 1]} : vector<32x128xf32> to vector<32x9xf32>
    %576 = vector.extract_strided_slice %574 {offsets = [0, 0], sizes = [32, 119], strides = [1, 1]} : vector<32x128xf32> to vector<32x119xf32>
    %577 = tpu.concatenate %575, %576 in 1 : vector<32x9xf32>, vector<32x119xf32> -> vector<32x128xf32>
    %578 = vector.extract_strided_slice %0 {offsets = [0, 0], sizes = [1, 128], strides = [1, 1]} : vector<9x128xf32> to vector<1x128xf32>
    %579 = vector.broadcast %578 : vector<1x128xf32> to vector<32x128xf32>
    %580 = arith.mulf %577, %579 : vector<32x128xf32>
    %581 = arith.addf %573, %580 : vector<32x128xf32>
    %582 = vector.extract_strided_slice %572 {offsets = [32, 0], sizes = [32, 128], strides = [1, 1]} : vector<288x128xf32> to vector<32x128xf32>
    %583 = vector.extract_strided_slice %582 {offsets = [0, 120], sizes = [32, 8], strides = [1, 1]} : vector<32x128xf32> to vector<32x8xf32>
    %584 = vector.extract_strided_slice %582 {offsets = [0, 0], sizes = [32, 120], strides = [1, 1]} : vector<32x128xf32> to vector<32x120xf32>
    %585 = tpu.concatenate %583, %584 in 1 : vector<32x8xf32>, vector<32x120xf32> -> vector<32x128xf32>
    %586 = vector.extract_strided_slice %0 {offsets = [1, 0], sizes = [1, 128], strides = [1, 1]} : vector<9x128xf32> to vector<1x128xf32>
    %587 = vector.broadcast %586 : vector<1x128xf32> to vector<32x128xf32>
    %588 = arith.mulf %585, %587 : vector<32x128xf32>
    %589 = arith.addf %581, %588 : vector<32x128xf32>
    %590 = vector.extract_strided_slice %572 {offsets = [64, 0], sizes = [32, 128], strides = [1, 1]} : vector<288x128xf32> to vector<32x128xf32>
    %591 = vector.extract_strided_slice %590 {offsets = [0, 121], sizes = [32, 7], strides = [1, 1]} : vector<32x128xf32> to vector<32x7xf32>
    %592 = vector.extract_strided_slice %590 {offsets = [0, 0], sizes = [32, 121], strides = [1, 1]} : vector<32x128xf32> to vector<32x121xf32>
    %593 = tpu.concatenate %591, %592 in 1 : vector<32x7xf32>, vector<32x121xf32> -> vector<32x128xf32>
    %594 = vector.extract_strided_slice %0 {offsets = [2, 0], sizes = [1, 128], strides = [1, 1]} : vector<9x128xf32> to vector<1x128xf32>
    %595 = vector.broadcast %594 : vector<1x128xf32> to vector<32x128xf32>
    %596 = arith.mulf %593, %595 : vector<32x128xf32>
    %597 = arith.addf %589, %596 : vector<32x128xf32>
    %598 = vector.extract_strided_slice %572 {offsets = [96, 0], sizes = [32, 128], strides = [1, 1]} : vector<288x128xf32> to vector<32x128xf32>
    %599 = vector.extract_strided_slice %598 {offsets = [0, 127], sizes = [32, 1], strides = [1, 1]} : vector<32x128xf32> to vector<32x1xf32>
    %600 = vector.extract_strided_slice %598 {offsets = [0, 0], sizes = [32, 127], strides = [1, 1]} : vector<32x128xf32> to vector<32x127xf32>
    %601 = tpu.concatenate %599, %600 in 1 : vector<32x1xf32>, vector<32x127xf32> -> vector<32x128xf32>
    %602 = vector.extract_strided_slice %0 {offsets = [3, 0], sizes = [1, 128], strides = [1, 1]} : vector<9x128xf32> to vector<1x128xf32>
    %603 = vector.broadcast %602 : vector<1x128xf32> to vector<32x128xf32>
    %604 = arith.mulf %601, %603 : vector<32x128xf32>
    %605 = arith.addf %597, %604 : vector<32x128xf32>
    %606 = vector.extract_strided_slice %572 {offsets = [160, 0], sizes = [32, 128], strides = [1, 1]} : vector<288x128xf32> to vector<32x128xf32>
    %607 = vector.extract_strided_slice %606 {offsets = [0, 1], sizes = [32, 127], strides = [1, 1]} : vector<32x128xf32> to vector<32x127xf32>
    %608 = vector.extract_strided_slice %606 {offsets = [0, 0], sizes = [32, 1], strides = [1, 1]} : vector<32x128xf32> to vector<32x1xf32>
    %609 = tpu.concatenate %607, %608 in 1 : vector<32x127xf32>, vector<32x1xf32> -> vector<32x128xf32>
    %610 = vector.extract_strided_slice %0 {offsets = [5, 0], sizes = [1, 128], strides = [1, 1]} : vector<9x128xf32> to vector<1x128xf32>
    %611 = vector.broadcast %610 : vector<1x128xf32> to vector<32x128xf32>
    %612 = arith.mulf %609, %611 : vector<32x128xf32>
    %613 = arith.addf %605, %612 : vector<32x128xf32>
    %614 = vector.extract_strided_slice %572 {offsets = [192, 0], sizes = [32, 128], strides = [1, 1]} : vector<288x128xf32> to vector<32x128xf32>
    %615 = vector.extract_strided_slice %614 {offsets = [0, 7], sizes = [32, 121], strides = [1, 1]} : vector<32x128xf32> to vector<32x121xf32>
    %616 = vector.extract_strided_slice %614 {offsets = [0, 0], sizes = [32, 7], strides = [1, 1]} : vector<32x128xf32> to vector<32x7xf32>
    %617 = tpu.concatenate %615, %616 in 1 : vector<32x121xf32>, vector<32x7xf32> -> vector<32x128xf32>
    %618 = vector.extract_strided_slice %0 {offsets = [6, 0], sizes = [1, 128], strides = [1, 1]} : vector<9x128xf32> to vector<1x128xf32>
    %619 = vector.broadcast %618 : vector<1x128xf32> to vector<32x128xf32>
    %620 = arith.mulf %617, %619 : vector<32x128xf32>
    %621 = arith.addf %613, %620 : vector<32x128xf32>
    %622 = vector.extract_strided_slice %572 {offsets = [224, 0], sizes = [32, 128], strides = [1, 1]} : vector<288x128xf32> to vector<32x128xf32>
    %623 = vector.extract_strided_slice %622 {offsets = [0, 8], sizes = [32, 120], strides = [1, 1]} : vector<32x128xf32> to vector<32x120xf32>
    %624 = vector.extract_strided_slice %622 {offsets = [0, 0], sizes = [32, 8], strides = [1, 1]} : vector<32x128xf32> to vector<32x8xf32>
    %625 = tpu.concatenate %623, %624 in 1 : vector<32x120xf32>, vector<32x8xf32> -> vector<32x128xf32>
    %626 = vector.extract_strided_slice %0 {offsets = [7, 0], sizes = [1, 128], strides = [1, 1]} : vector<9x128xf32> to vector<1x128xf32>
    %627 = vector.broadcast %626 : vector<1x128xf32> to vector<32x128xf32>
    %628 = arith.mulf %625, %627 : vector<32x128xf32>
    %629 = arith.addf %621, %628 : vector<32x128xf32>
    %630 = vector.extract_strided_slice %572 {offsets = [256, 0], sizes = [32, 128], strides = [1, 1]} : vector<288x128xf32> to vector<32x128xf32>
    %631 = vector.extract_strided_slice %630 {offsets = [0, 9], sizes = [32, 119], strides = [1, 1]} : vector<32x128xf32> to vector<32x119xf32>
    %632 = vector.extract_strided_slice %630 {offsets = [0, 0], sizes = [32, 9], strides = [1, 1]} : vector<32x128xf32> to vector<32x9xf32>
    %633 = tpu.concatenate %631, %632 in 1 : vector<32x119xf32>, vector<32x9xf32> -> vector<32x128xf32>
    %634 = vector.extract_strided_slice %0 {offsets = [8, 0], sizes = [1, 128], strides = [1, 1]} : vector<9x128xf32> to vector<1x128xf32>
    %635 = vector.broadcast %634 : vector<1x128xf32> to vector<32x128xf32>
    %636 = arith.mulf %633, %635 : vector<32x128xf32>
    %637 = arith.addf %629, %636 : vector<32x128xf32>
    %638 = vector.extract_strided_slice %1 {offsets = [0, 12], sizes = [32, 1], strides = [1, 1]} : vector<128x16xf32> to vector<32x1xf32>
    %639 = vector.extract_strided_slice %1 {offsets = [0, 13], sizes = [32, 1], strides = [1, 1]} : vector<128x16xf32> to vector<32x1xf32>
    %cst_72 = arith.constant dense<0.000000e+00> : vector<32xf32>
    %640 = vector.multi_reduction <add>, %637, %cst_72 [1] : vector<32x128xf32> to vector<32xf32>
    %641 = vector.shape_cast %640 : vector<32xf32> to vector<32x1xf32>
    %cst_73 = arith.constant 1.280000e+02 : f32
    %642 = vector.broadcast %cst_73 : f32 to vector<32x1xf32>
    %643 = arith.divf %641, %642 : vector<32x1xf32>
    %644 = vector.broadcast %643 : vector<32x1xf32> to vector<32x128xf32>
    %645 = arith.subf %637, %644 : vector<32x128xf32>
    %646 = arith.mulf %645, %645 : vector<32x128xf32>
    %cst_74 = arith.constant dense<0.000000e+00> : vector<32xf32>
    %647 = vector.multi_reduction <add>, %646, %cst_74 [1] : vector<32x128xf32> to vector<32xf32>
    %648 = vector.shape_cast %647 : vector<32xf32> to vector<32x1xf32>
    %cst_75 = arith.constant 1.280000e+02 : f32
    %649 = vector.broadcast %cst_75 : f32 to vector<32x1xf32>
    %650 = arith.divf %648, %649 : vector<32x1xf32>
    %cst_76 = arith.constant 9.99999974E-6 : f32
    %651 = vector.broadcast %cst_76 : f32 to vector<32x1xf32>
    %652 = arith.addf %650, %651 : vector<32x1xf32>
    %653 = math.rsqrt %652 : vector<32x1xf32>
    %654 = arith.mulf %638, %653 : vector<32x1xf32>
    %655 = vector.broadcast %654 : vector<32x1xf32> to vector<32x128xf32>
    %656 = arith.mulf %645, %655 : vector<32x128xf32>
    %657 = vector.broadcast %639 : vector<32x1xf32> to vector<32x128xf32>
    %658 = arith.addf %656, %657 : vector<32x128xf32>
    %cst_77 = arith.constant 0.000000e+00 : f32
    %659 = vector.broadcast %cst_77 : f32 to vector<32x128xf32>
    %660 = arith.cmpf oge, %658, %659 : vector<32x128xf32>
    %cst_78 = arith.constant 2.000000e-01 : f32
    %661 = vector.broadcast %cst_78 : f32 to vector<32x128xf32>
    %662 = arith.mulf %661, %658 : vector<32x128xf32>
    %663 = arith.select %660, %658, %662 : vector<32x128xi1>, vector<32x128xf32>
    %664 = tpu.concatenate %663, %284 in 0 : vector<32x128xf32>, vector<32x128xf32> -> vector<64x128xf32>
    %c0_79 = arith.constant 0 : index
    %c0_80 = arith.constant 0 : index
    %665 = vector.load %arg10[%c0_79, %c0_80] : memref<72x64xbf16, #tpu.memory_space<vmem>>, vector<72x64xbf16>
    %666 = arith.truncf %664 : vector<64x128xf32> to vector<64x128xbf16>
    %cst_81 = arith.constant dense<0.000000e+00> : vector<72x128xf32>
    %667 = tpu.matmul %665, %666, %cst_81 {dimension_numbers = #tpu.dot_dimension_numbers<[1], [0], [0], [1], [0, 0, 1, 1], [], []>} : vector<72x64xbf16>, vector<64x128xbf16>, vector<72x128xf32> -> vector<72x128xf32>
    %668 = vector.extract_strided_slice %667 {offsets = [32, 0], sizes = [8, 128], strides = [1, 1]} : vector<72x128xf32> to vector<8x128xf32>
    %669 = vector.extract_strided_slice %667 {offsets = [0, 0], sizes = [8, 128], strides = [1, 1]} : vector<72x128xf32> to vector<8x128xf32>
    %670 = vector.extract_strided_slice %669 {offsets = [0, 119], sizes = [8, 9], strides = [1, 1]} : vector<8x128xf32> to vector<8x9xf32>
    %671 = vector.extract_strided_slice %669 {offsets = [0, 0], sizes = [8, 119], strides = [1, 1]} : vector<8x128xf32> to vector<8x119xf32>
    %672 = tpu.concatenate %670, %671 in 1 : vector<8x9xf32>, vector<8x119xf32> -> vector<8x128xf32>
    %673 = vector.extract_strided_slice %0 {offsets = [0, 0], sizes = [1, 128], strides = [1, 1]} : vector<9x128xf32> to vector<1x128xf32>
    %674 = vector.broadcast %673 : vector<1x128xf32> to vector<8x128xf32>
    %675 = arith.mulf %672, %674 : vector<8x128xf32>
    %676 = arith.addf %668, %675 : vector<8x128xf32>
    %677 = vector.extract_strided_slice %667 {offsets = [8, 0], sizes = [8, 128], strides = [1, 1]} : vector<72x128xf32> to vector<8x128xf32>
    %678 = vector.extract_strided_slice %677 {offsets = [0, 120], sizes = [8, 8], strides = [1, 1]} : vector<8x128xf32> to vector<8x8xf32>
    %679 = vector.extract_strided_slice %677 {offsets = [0, 0], sizes = [8, 120], strides = [1, 1]} : vector<8x128xf32> to vector<8x120xf32>
    %680 = tpu.concatenate %678, %679 in 1 : vector<8x8xf32>, vector<8x120xf32> -> vector<8x128xf32>
    %681 = vector.extract_strided_slice %0 {offsets = [1, 0], sizes = [1, 128], strides = [1, 1]} : vector<9x128xf32> to vector<1x128xf32>
    %682 = vector.broadcast %681 : vector<1x128xf32> to vector<8x128xf32>
    %683 = arith.mulf %680, %682 : vector<8x128xf32>
    %684 = arith.addf %676, %683 : vector<8x128xf32>
    %685 = vector.extract_strided_slice %667 {offsets = [16, 0], sizes = [8, 128], strides = [1, 1]} : vector<72x128xf32> to vector<8x128xf32>
    %686 = vector.extract_strided_slice %685 {offsets = [0, 121], sizes = [8, 7], strides = [1, 1]} : vector<8x128xf32> to vector<8x7xf32>
    %687 = vector.extract_strided_slice %685 {offsets = [0, 0], sizes = [8, 121], strides = [1, 1]} : vector<8x128xf32> to vector<8x121xf32>
    %688 = tpu.concatenate %686, %687 in 1 : vector<8x7xf32>, vector<8x121xf32> -> vector<8x128xf32>
    %689 = vector.extract_strided_slice %0 {offsets = [2, 0], sizes = [1, 128], strides = [1, 1]} : vector<9x128xf32> to vector<1x128xf32>
    %690 = vector.broadcast %689 : vector<1x128xf32> to vector<8x128xf32>
    %691 = arith.mulf %688, %690 : vector<8x128xf32>
    %692 = arith.addf %684, %691 : vector<8x128xf32>
    %693 = vector.extract_strided_slice %667 {offsets = [24, 0], sizes = [8, 128], strides = [1, 1]} : vector<72x128xf32> to vector<8x128xf32>
    %694 = vector.extract_strided_slice %693 {offsets = [0, 127], sizes = [8, 1], strides = [1, 1]} : vector<8x128xf32> to vector<8x1xf32>
    %695 = vector.extract_strided_slice %693 {offsets = [0, 0], sizes = [8, 127], strides = [1, 1]} : vector<8x128xf32> to vector<8x127xf32>
    %696 = tpu.concatenate %694, %695 in 1 : vector<8x1xf32>, vector<8x127xf32> -> vector<8x128xf32>
    %697 = vector.extract_strided_slice %0 {offsets = [3, 0], sizes = [1, 128], strides = [1, 1]} : vector<9x128xf32> to vector<1x128xf32>
    %698 = vector.broadcast %697 : vector<1x128xf32> to vector<8x128xf32>
    %699 = arith.mulf %696, %698 : vector<8x128xf32>
    %700 = arith.addf %692, %699 : vector<8x128xf32>
    %701 = vector.extract_strided_slice %667 {offsets = [40, 0], sizes = [8, 128], strides = [1, 1]} : vector<72x128xf32> to vector<8x128xf32>
    %702 = vector.extract_strided_slice %701 {offsets = [0, 1], sizes = [8, 127], strides = [1, 1]} : vector<8x128xf32> to vector<8x127xf32>
    %703 = vector.extract_strided_slice %701 {offsets = [0, 0], sizes = [8, 1], strides = [1, 1]} : vector<8x128xf32> to vector<8x1xf32>
    %704 = tpu.concatenate %702, %703 in 1 : vector<8x127xf32>, vector<8x1xf32> -> vector<8x128xf32>
    %705 = vector.extract_strided_slice %0 {offsets = [5, 0], sizes = [1, 128], strides = [1, 1]} : vector<9x128xf32> to vector<1x128xf32>
    %706 = vector.broadcast %705 : vector<1x128xf32> to vector<8x128xf32>
    %707 = arith.mulf %704, %706 : vector<8x128xf32>
    %708 = arith.addf %700, %707 : vector<8x128xf32>
    %709 = vector.extract_strided_slice %667 {offsets = [48, 0], sizes = [8, 128], strides = [1, 1]} : vector<72x128xf32> to vector<8x128xf32>
    %710 = vector.extract_strided_slice %709 {offsets = [0, 7], sizes = [8, 121], strides = [1, 1]} : vector<8x128xf32> to vector<8x121xf32>
    %711 = vector.extract_strided_slice %709 {offsets = [0, 0], sizes = [8, 7], strides = [1, 1]} : vector<8x128xf32> to vector<8x7xf32>
    %712 = tpu.concatenate %710, %711 in 1 : vector<8x121xf32>, vector<8x7xf32> -> vector<8x128xf32>
    %713 = vector.extract_strided_slice %0 {offsets = [6, 0], sizes = [1, 128], strides = [1, 1]} : vector<9x128xf32> to vector<1x128xf32>
    %714 = vector.broadcast %713 : vector<1x128xf32> to vector<8x128xf32>
    %715 = arith.mulf %712, %714 : vector<8x128xf32>
    %716 = arith.addf %708, %715 : vector<8x128xf32>
    %717 = vector.extract_strided_slice %667 {offsets = [56, 0], sizes = [8, 128], strides = [1, 1]} : vector<72x128xf32> to vector<8x128xf32>
    %718 = vector.extract_strided_slice %717 {offsets = [0, 8], sizes = [8, 120], strides = [1, 1]} : vector<8x128xf32> to vector<8x120xf32>
    %719 = vector.extract_strided_slice %717 {offsets = [0, 0], sizes = [8, 8], strides = [1, 1]} : vector<8x128xf32> to vector<8x8xf32>
    %720 = tpu.concatenate %718, %719 in 1 : vector<8x120xf32>, vector<8x8xf32> -> vector<8x128xf32>
    %721 = vector.extract_strided_slice %0 {offsets = [7, 0], sizes = [1, 128], strides = [1, 1]} : vector<9x128xf32> to vector<1x128xf32>
    %722 = vector.broadcast %721 : vector<1x128xf32> to vector<8x128xf32>
    %723 = arith.mulf %720, %722 : vector<8x128xf32>
    %724 = arith.addf %716, %723 : vector<8x128xf32>
    %725 = vector.extract_strided_slice %667 {offsets = [64, 0], sizes = [8, 128], strides = [1, 1]} : vector<72x128xf32> to vector<8x128xf32>
    %726 = vector.extract_strided_slice %725 {offsets = [0, 9], sizes = [8, 119], strides = [1, 1]} : vector<8x128xf32> to vector<8x119xf32>
    %727 = vector.extract_strided_slice %725 {offsets = [0, 0], sizes = [8, 9], strides = [1, 1]} : vector<8x128xf32> to vector<8x9xf32>
    %728 = tpu.concatenate %726, %727 in 1 : vector<8x119xf32>, vector<8x9xf32> -> vector<8x128xf32>
    %729 = vector.extract_strided_slice %0 {offsets = [8, 0], sizes = [1, 128], strides = [1, 1]} : vector<9x128xf32> to vector<1x128xf32>
    %730 = vector.broadcast %729 : vector<1x128xf32> to vector<8x128xf32>
    %731 = arith.mulf %728, %730 : vector<8x128xf32>
    %732 = arith.addf %724, %731 : vector<8x128xf32>
    %733 = vector.extract_strided_slice %1 {offsets = [0, 14], sizes = [8, 1], strides = [1, 1]} : vector<128x16xf32> to vector<8x1xf32>
    %734 = vector.extract_strided_slice %1 {offsets = [0, 15], sizes = [8, 1], strides = [1, 1]} : vector<128x16xf32> to vector<8x1xf32>
    %cst_82 = arith.constant dense<0.000000e+00> : vector<8xf32>
    %735 = vector.multi_reduction <add>, %732, %cst_82 [1] : vector<8x128xf32> to vector<8xf32>
    %736 = vector.shape_cast %735 : vector<8xf32> to vector<8x1xf32>
    %cst_83 = arith.constant 1.280000e+02 : f32
    %737 = vector.broadcast %cst_83 : f32 to vector<8x1xf32>
    %738 = arith.divf %736, %737 : vector<8x1xf32>
    %739 = vector.broadcast %738 : vector<8x1xf32> to vector<8x128xf32>
    %740 = arith.subf %732, %739 : vector<8x128xf32>
    %741 = arith.mulf %740, %740 : vector<8x128xf32>
    %cst_84 = arith.constant dense<0.000000e+00> : vector<8xf32>
    %742 = vector.multi_reduction <add>, %741, %cst_84 [1] : vector<8x128xf32> to vector<8xf32>
    %743 = vector.shape_cast %742 : vector<8xf32> to vector<8x1xf32>
    %cst_85 = arith.constant 1.280000e+02 : f32
    %744 = vector.broadcast %cst_85 : f32 to vector<8x1xf32>
    %745 = arith.divf %743, %744 : vector<8x1xf32>
    %cst_86 = arith.constant 9.99999974E-6 : f32
    %746 = vector.broadcast %cst_86 : f32 to vector<8x1xf32>
    %747 = arith.addf %745, %746 : vector<8x1xf32>
    %748 = math.rsqrt %747 : vector<8x1xf32>
    %749 = arith.mulf %733, %748 : vector<8x1xf32>
    %750 = vector.broadcast %749 : vector<8x1xf32> to vector<8x128xf32>
    %751 = arith.mulf %740, %750 : vector<8x128xf32>
    %752 = vector.broadcast %734 : vector<8x1xf32> to vector<8x128xf32>
    %753 = arith.addf %751, %752 : vector<8x128xf32>
    %cst_87 = arith.constant 0.000000e+00 : f32
    %754 = vector.broadcast %cst_87 : f32 to vector<8x128xf32>
    %755 = arith.subf %754, %753 : vector<8x128xf32>
    %756 = math.exp %755 : vector<8x128xf32>
    %cst_88 = arith.constant 1.000000e+00 : f32
    %757 = vector.broadcast %cst_88 : f32 to vector<8x128xf32>
    %758 = arith.addf %757, %756 : vector<8x128xf32>
    %cst_89 = arith.constant 1.000000e+00 : f32
    %759 = vector.broadcast %cst_89 : f32 to vector<8x128xf32>
    %760 = arith.divf %759, %758 : vector<8x128xf32>
    %c0_90 = arith.constant 0 : index
    %c0_91 = arith.constant 0 : index
    %761 = vector.load %arg13[%c0_90, %c0_91] : memref<8x128xf32, #tpu.memory_space<vmem>>, vector<8x128xf32>
    tpu.vector_store %arg13[%c0_90, %c0_91], %760 {strides = array<i32>} : memref<8x128xf32, #tpu.memory_space<vmem>>, vector<8x128xf32>,
    return
  }
}

</mosaic_0001>

<bundles_post_ra>
// kernel: decoder_vil_forward.1
= control target key start
LH: loop header
LB: loop body
LE: loop exit
PB: predicated region body
PF: predicated region fallthrough
CT: control target
= control target key end

     0   :  { %19 = vsyncpa [#allocation3], 0  ;;  %s11689_s25 = smov [#allocation2]   ;;  %s15781_s0 = inlined_call_operand.vmem [shape: bf16[256,128], index: 0, kind: input, shape index: {}]   ;;  %s15782_s1 = inlined_call_operand.vmem [shape: bf16[256,128], index: 1, kind: input, shape index: {}]   ;;  %s15783_s2 = inlined_call_operand.vmem [shape: f32[9,128], index: 2, kind: input, shape index: {}]   ;;  %s15784_s3 = inlined_call_operand.vmem [shape: bf16[1152,256], index: 3, kind: input, shape index: {}]   ;;  %s15785_s4 = inlined_call_operand.vmem [shape: bf16[576,128], index: 4, kind: input, shape index: {}]   ;;  %s15786_s5 = inlined_call_operand.vmem [shape: bf16[288,64], index: 5, kind: input, shape index: {}]   ;;  %s15787_s6 = inlined_call_operand.vmem [shape: bf16[72,32], index: 6, kind: input, shape index: {}]   ;;  %s15788_s7 = inlined_call_operand.hbm [shape: bf16[1152,256], index: 7, kind: input, shape index: {}]   ;;  %s15789_s8 = inlined_call_operand.vmem [shape: bf16[576,256], index: 8, kind: input, shape index: {}]   ;;  %s15790_s9 = inlined_call_operand.vmem [shape: bf16[288,64], index: 9, kind: input, shape index: {}]   ;;  %s15791_s10 = inlined_call_operand.vmem [shape: bf16[72,64], index: 10, kind: input, shape index: {}]   ;;  %s15792_s11 = inlined_call_operand.vmem [shape: f32[128,16], index: 11, kind: input, shape index: {}]   ;;  %s15793_s12 = inlined_call_operand.vmem [shape: f32[8,128], index: 12, kind: output, shape index: {0}]   ;;  %s15794_s13 = inlined_call_operand.vmem [shape: f32[8,128], index: 13, kind: output, shape index: {1}]  }
   0x1   :  { %s39_s26 = sshll.u32 %s11689_s25, 4  ;;  %s11665_s29 = scalar_lea.hbm %s15788_s7, 18432  ;;  %s40_s26 = int_to_ptr.vmem [resolvable:$true] %s39_s26 }
   0x2   :  { %p11666_p0 = scmp.ne.s32.totalorder %s15788_s7, %s11665_s29  ;;  %p11669_p1 = scmp.lt.u32.totalorder %s11665_s29, %s15788_s7 }
   0x4   :  { %p11671_p2 = pnand %p11669_p1, %p11666_p0 }
   0x6   :  { %11674 = shalt.err (!%p11671_p2)
}
   0x7   :  { %s11675_s17 = scalar_lea.vmem %s40_s26, 18432  ;;  %p11680_p4 = scmp.lt.s32.totalorder %s40_s26, %s40_s26 }
   0x8   :  { %p11676_p3 = scmp.ne.s32.totalorder %s40_s26, %s11675_s17  ;;  %p11681_p5 = scmp.lt.s32.totalorder %s11675_s17, %s11675_s17 }
   0xa   :  { %p11682_p6 = por %p11681_p5, %p11680_p4 }
   0xc   :  { %p11683_p7 = pnand %p11682_p6, %p11676_p3 }
   0xe   :  { %11686 = shalt.err (!%p11683_p7)
}
   0xf   :  { %s11690_s18 = smov 128   ;;  %s11691_s19 = smov 8  }
  0x10   :  { %45 = dma.hbm_to_vmem [thread:$0]  %s15788_s7, 18432, %s40_s26, [#allocation3], %s11690_s18, %s11690_s18, %s11691_s19  }
  0x11   :  { %11687 = dma.done.wait [#allocation3], 18432  }
  0x12   :  { %11688 = vsyncadd [#allocation3], 4294948864  ;;  %v15795_v0 = vmov 0   ;;  %v10850_v1 = vld [vmem:[%s15781_s0] sm:$0xff]   ;;  %v10851_v2 = vld [vmem:[%s15781_s0 + $0x8] sm:$0xff]   ;;  %s11693_s22 = smov 9  }
  0x13   :  { %1100 = vmatprep.subr.bf16.mxu0 %v15795_v0  ;;  %v10852_v3 = vld [vmem:[%s15781_s0 + $0x10] sm:$0xff]   ;;  %v10853_v4 = vld [vmem:[%s15781_s0 + $0x18] sm:$0xff]   ;;  %v10854_v5 = vld [vmem:[%s15781_s0 + $0x20] sm:$0xff]   ;;  %s11694_s17 = smov 7   ;;  %s11695_s18 = smov 1  }
  0x14   :  { %1101 = vmatpush1.bf16.msra.mxu0 %v10850_v1  ;;  %v10868_v6 = vld [vmem:[%s15784_s3 + $0x4] ss:$8 sps:$4 sm:$0xff]   ;;  %v10856_v8 = vld [vmem:[%s15781_s0 + $0x30] sm:$0xff]   ;;  %v10857_v9 = vld [vmem:[%s15781_s0 + $0x38] sm:$0xff]   ;;  %s11696_s25 = smov 127   ;;  %s11698_s26 = smov 120  }
  0x15   :  { %1102 = vmatprep.subr.bf16.mxu0 %v15795_v0  ;;  %v10855_v7 = vld [vmem:[%s15781_s0 + $0x28] sm:$0xff]   ;;  %1132 = vmatprep.mubr.bf16.mxu0 %v10868_v6  ;;  %v10858_v10 = vld [vmem:[%s15781_s0 + $0x40] sm:$0xff]   ;;  %v10860_v12 = vld [vmem:[%s15781_s0 + $0x50] sm:$0xff]   ;;  %s11699_s29 = smov 119  }
  0x16   :  { %v10859_v11 = vld [vmem:[%s15781_s0 + $0x48] sm:$0xff]   ;;  %v10861_v13 = vld [vmem:[%s15781_s0 + $0x58] sm:$0xff]   ;;  %v10862_v14 = vld [vmem:[%s15781_s0 + $0x60] sm:$0xff]  }
  0x17   :  { %v10863_v15 = vld [vmem:[%s15781_s0 + $0x68] sm:$0xff]   ;;  %v10864_v16 = vld [vmem:[%s15781_s0 + $0x70] sm:$0xff]   ;;  %v10865_v17 = vld [vmem:[%s15781_s0 + $0x78] sm:$0xff]  }
  0x18   :  { %1103 = vmatpush1.bf16.msra.mxu0 %v10851_v2  ;;  %v10866_v18 = vld [vmem:[%s15784_s3] ss:$8 sps:$4 sm:$0xff]   ;;  %v10869_v19 = vld [vmem:[%s15784_s3 + $0x14] ss:$8 sps:$4 sm:$0xff]   ;;  %v10871_v20 = vld [vmem:[%s15784_s3 + $0x10] ss:$8 sps:$4 sm:$0xff]  }
  0x19   :  { %1104 = vmatprep.subr.bf16.mxu0 %v15795_v0  ;;  %v10872_v21 = vld [vmem:[%s15784_s3 + $0x24] ss:$8 sps:$4 sm:$0xff]   ;;  %v10874_v22 = vld [vmem:[%s15784_s3 + $0x20] ss:$8 sps:$4 sm:$0xff]   ;;  %v10875_v23 = vld [vmem:[%s15784_s3 + $0x34] ss:$8 sps:$4 sm:$0xff]  }
  0x1a   :  { %v10877_v24 = vld [vmem:[%s15784_s3 + $0x30] ss:$8 sps:$4 sm:$0xff]   ;;  %v10878_v25 = vld [vmem:[%s15784_s3 + $0x44] ss:$8 sps:$4 sm:$0xff]   ;;  %v10880_v26 = vld [vmem:[%s15784_s3 + $0x40] ss:$8 sps:$4 sm:$0xff]  }
  0x1b   :  { %v10881_v27 = vld [vmem:[%s15784_s3 + $0x54] ss:$8 sps:$4 sm:$0xff]   ;;  %v10883_v28 = vld [vmem:[%s15784_s3 + $0x50] ss:$8 sps:$4 sm:$0xff]   ;;  %v10884_v29 = vld [vmem:[%s15784_s3 + $0x64] ss:$8 sps:$4 sm:$0xff]  }
  0x1c   :  { %1105 = vmatpush1.bf16.msra.mxu0 %v10852_v3  ;;  %v10886_v30 = vld [vmem:[%s15784_s3 + $0x60] ss:$8 sps:$4 sm:$0xff]   ;;  %v10887_v31 = vld [vmem:[%s15784_s3 + $0x74] ss:$8 sps:$4 sm:$0xff]   ;;  %v10889_v32 = vld [vmem:[%s15784_s3 + $0x70] ss:$8 sps:$4 sm:$0xff]  }
  0x1d   :  { %1106 = vmatprep.subr.bf16.mxu0 %v15795_v0  ;;  %v10890_v33 = vld [vmem:[%s15784_s3 + $0x84] ss:$8 sps:$4 sm:$0xff]   ;;  %v10892_v34 = vld [vmem:[%s15784_s3 + $0x80] ss:$8 sps:$4 sm:$0xff]   ;;  %v10893_v35 = vld [vmem:[%s15784_s3 + $0x94] ss:$8 sps:$4 sm:$0xff]  }
  0x1e   :  { %v10895_v36 = vld [vmem:[%s15784_s3 + $0x90] ss:$8 sps:$4 sm:$0xff]   ;;  %v10896_v37 = vld [vmem:[%s15784_s3 + $0xa4] ss:$8 sps:$4 sm:$0xff]   ;;  %v10898_v38 = vld [vmem:[%s15784_s3 + $0xa0] ss:$8 sps:$4 sm:$0xff]  }
  0x1f   :  { %v10899_v39 = vld [vmem:[%s15784_s3 + $0xb4] ss:$8 sps:$4 sm:$0xff]   ;;  %v10901_v40 = vld [vmem:[%s15784_s3 + $0xb0] ss:$8 sps:$4 sm:$0xff]   ;;  %v10902_v41 = vld [vmem:[%s15784_s3 + $0xc4] ss:$8 sps:$4 sm:$0xff]  }
  0x20   :  { %1107 = vmatpush1.bf16.msra.mxu0 %v10853_v4  ;;  %v10904_v42 = vld [vmem:[%s15784_s3 + $0xc0] ss:$8 sps:$4 sm:$0xff]   ;;  %v10905_v43 = vld [vmem:[%s15784_s3 + $0xd4] ss:$8 sps:$4 sm:$0xff]   ;;  %v10907_v44 = vld [vmem:[%s15784_s3 + $0xd0] ss:$8 sps:$4 sm:$0xff]  }
  0x21   :  { %1108 = vmatprep.subr.bf16.mxu0 %v15795_v0  ;;  %v10908_v45 = vld [vmem:[%s15784_s3 + $0xe4] ss:$8 sps:$4 sm:$0xff]   ;;  %v10910_v46 = vld [vmem:[%s15784_s3 + $0xe0] ss:$8 sps:$4 sm:$0xff]   ;;  %v10911_v47 = vld [vmem:[%s15784_s3 + $0xf4] ss:$8 sps:$4 sm:$0xff]  }
  0x22   :  { %v10913_v48 = vld [vmem:[%s15784_s3 + $0xf0] ss:$8 sps:$4 sm:$0xff]   ;;  %v10914_v49 = vld [vmem:[%s15784_s3 + $0x104] ss:$8 sps:$4 sm:$0xff]   ;;  %v10916_v50 = vld [vmem:[%s15784_s3 + $0x100] ss:$8 sps:$4 sm:$0xff]  }
  0x23   :  { %v10917_v51 = vld [vmem:[%s15784_s3 + $0x114] ss:$8 sps:$4 sm:$0xff]   ;;  %v10919_v52 = vld [vmem:[%s15784_s3 + $0x110] ss:$8 sps:$4 sm:$0xff]   ;;  %v10920_v53 = vld [vmem:[%s15784_s3 + $0x124] ss:$8 sps:$4 sm:$0xff]  }
  0x24   :  { %1109 = vmatpush1.bf16.msra.mxu0 %v10854_v5  ;;  %v10922_v54 = vld [vmem:[%s15784_s3 + $0x120] ss:$8 sps:$4 sm:$0xff]   ;;  %v10923_v55 = vld [vmem:[%s15784_s3 + $0x134] ss:$8 sps:$4 sm:$0xff]   ;;  %v10925_v56 = vld [vmem:[%s15784_s3 + $0x130] ss:$8 sps:$4 sm:$0xff]  }
  0x25   :  { %1110 = vmatprep.subr.bf16.mxu0 %v15795_v0  ;;  %v10926_v57 = vld [vmem:[%s15784_s3 + $0x144] ss:$8 sps:$4 sm:$0xff]   ;;  %v10928_v58 = vld [vmem:[%s15784_s3 + $0x140] ss:$8 sps:$4 sm:$0xff]   ;;  %v10929_v59 = vld [vmem:[%s15784_s3 + $0x154] ss:$8 sps:$4 sm:$0xff]  }
  0x26   :  { %v10931_v60 = vld [vmem:[%s15784_s3 + $0x150] ss:$8 sps:$4 sm:$0xff]   ;;  %v10932_v61 = vld [vmem:[%s15784_s3 + $0x164] ss:$8 sps:$4 sm:$0xff]   ;;  %v10934_v62 = vld [vmem:[%s15784_s3 + $0x160] ss:$8 sps:$4 sm:$0xff]  }
  0x27   :  { %v10935_v63 = vld [vmem:[%s15784_s3 + $0x174] ss:$8 sps:$4 sm:$0xff]   ;;  %v10937_v1 = vld [vmem:[%s15784_s3 + $0x170] ss:$8 sps:$4 sm:$0xff]   ;;  %v10938_v2 = vld [vmem:[%s15784_s3 + $0x184] ss:$8 sps:$4 sm:$0xff]  }
  0x28   :  { %1111 = vmatpush1.bf16.msra.mxu0 %v10855_v7  ;;  %v10940_v3 = vld [vmem:[%s15784_s3 + $0x180] ss:$8 sps:$4 sm:$0xff]   ;;  %v10941_v4 = vld [vmem:[%s15784_s3 + $0x194] ss:$8 sps:$4 sm:$0xff]   ;;  %v10943_v5 = vld [vmem:[%s15784_s3 + $0x190] ss:$8 sps:$4 sm:$0xff]  }
  0x29   :  { %1112 = vmatprep.subr.bf16.mxu0 %v15795_v0  ;;  %v10944_v6 = vld [vmem:[%s15784_s3 + $0x1a4] ss:$8 sps:$4 sm:$0xff]   ;;  %v10946_v7 = vld [vmem:[%s15784_s3 + $0x1a0] ss:$8 sps:$4 sm:$0xff]  }
  0x2c   :  { %1113 = vmatpush1.bf16.msra.mxu0 %v10856_v8  ;;  %v10947_v8 = vld [vmem:[%s15784_s3 + $0x1b4] ss:$8 sps:$4 sm:$0xff]  }
  0x2d   :  { %1114 = vmatprep.subr.bf16.mxu0 %v15795_v0 }
  0x30   :  { %1115 = vmatpush1.bf16.msra.mxu0 %v10857_v9 }
  0x31   :  { %1116 = vmatprep.subr.bf16.mxu0 %v15795_v0 }
  0x34   :  { %1117 = vmatpush1.bf16.msra.mxu0 %v10858_v10 }
  0x35   :  { %1118 = vmatprep.subr.bf16.mxu0 %v15795_v0 }
  0x38   :  { %1119 = vmatpush1.bf16.msra.mxu0 %v10859_v11  ;;  %v10949_v11 = vld [vmem:[%s15784_s3 + $0x1b0] ss:$8 sps:$4 sm:$0xff]  }
  0x39   :  { %1120 = vmatprep.subr.bf16.mxu0 %v15795_v0 }
  0x3c   :  { %1121 = vmatpush1.bf16.msra.mxu0 %v10860_v12 }
  0x3d   :  { %1122 = vmatprep.subr.bf16.mxu0 %v15795_v0 }
  0x40   :  { %1123 = vmatpush1.bf16.msra.mxu0 %v10861_v13  ;;  %v10950_v13 = vld [vmem:[%s15784_s3 + $0x1c4] ss:$8 sps:$4 sm:$0xff]  }
  0x41   :  { %1124 = vmatprep.subr.bf16.mxu0 %v15795_v0 }
  0x44   :  { %1125 = vmatpush1.bf16.msra.mxu0 %v10862_v14 }
  0x45   :  { %1126 = vmatprep.subr.bf16.mxu0 %v15795_v0 }
  0x48   :  { %1127 = vmatpush1.bf16.msra.mxu0 %v10863_v15 }
  0x49   :  { %1128 = vmatprep.subr.bf16.mxu0 %v15795_v0 }
  0x4c   :  { %1129 = vmatpush1.bf16.msra.mxu0 %v10864_v16 }
  0x4d   :  { %1130 = vmatprep.subr.bf16.mxu0 %v15795_v0 }
  0x50   :  { %1131 = vmatpush1.bf16.msra.mxu0 %v10865_v17  ;;  %v10952_v17 = vld [vmem:[%s15784_s3 + $0x1c0] ss:$8 sps:$4 sm:$0xff]  }
  0x51   :  { %8157 = vmatprep.subr.bf16.mxu0 %v15795_v0 }
  0x53   :  { %1133 = vmatmul.mubr.bf16.vlgmr.msra.gmra.mrb[0].mxu0 %v10866_v18 }
  0x54   :  { %1140 = vmatprep.mubr.bf16.mxu0 %v10869_v19  ;;  %v10953_v19 = vld [vmem:[%s15784_s3 + $0x1d4] ss:$8 sps:$4 sm:$0xff]  }
  0x5b   :  { %1141 = vmatmul.mubr.bf16.gmra.mrb[4].mxu0 %v10871_v20 }
  0x5c   :  { %1148 = vmatprep.mubr.bf16.mxu0 %v10872_v21 }
  0x63   :  { %1149 = vmatmul.mubr.bf16.gmra.mrb[8].mxu0 %v10874_v22 }
  0x64   :  { %1156 = vmatprep.mubr.bf16.mxu0 %v10875_v23  ;;  %v10955_v23 = vld [vmem:[%s15784_s3 + $0x1d0] ss:$8 sps:$4 sm:$0xff]  }
  0x6b   :  { %1157 = vmatmul.mubr.bf16.gmra.mrb[12].mxu0 %v10877_v24 }
  0x6c   :  { %1164 = vmatprep.mubr.bf16.mxu0 %v10878_v25  ;;  %v10956_v25 = vld [vmem:[%s15784_s3 + $0x1e4] ss:$8 sps:$4 sm:$0xff]  }
  0x73   :  { %1165 = vmatmul.mubr.bf16.gmra.mrb[16].mxu0 %v10880_v26 }
  0x74   :  { %1172 = vmatprep.mubr.bf16.mxu0 %v10881_v27 }
  0x7b   :  { %1173 = vmatmul.mubr.bf16.gmra.mrb[20].mxu0 %v10883_v28 }
  0x7c   :  { %1180 = vmatprep.mubr.bf16.mxu0 %v10884_v29  ;;  %v10958_v29 = vld [vmem:[%s15784_s3 + $0x1e0] ss:$8 sps:$4 sm:$0xff]  }
  0x83   :  { %1181 = vmatmul.mubr.bf16.gmra.mrb[24].mxu0 %v10886_v30 }
  0x84   :  { %1188 = vmatprep.mubr.bf16.mxu0 %v10887_v31  ;;  %v10959_v31 = vld [vmem:[%s15784_s3 + $0x1f4] ss:$8 sps:$4 sm:$0xff]  }
  0x8b   :  { %1189 = vmatmul.mubr.bf16.gmra.mrb[28].mxu0 %v10889_v32 }
  0x8c   :  { %1196 = vmatprep.mubr.bf16.mxu0 %v10890_v33 }
  0x93   :  { %1197 = vmatmul.mubr.bf16.gmra.mrb[32].mxu0 %v10892_v34 }
  0x94   :  { %1204 = vmatprep.mubr.bf16.mxu0 %v10893_v35  ;;  %v10961_v35 = vld [vmem:[%s15784_s3 + $0x1f0] ss:$8 sps:$4 sm:$0xff]  }
  0x9b   :  { %1205 = vmatmul.mubr.bf16.gmra.mrb[36].mxu0 %v10895_v36 }
  0x9c   :  { %1212 = vmatprep.mubr.bf16.mxu0 %v10896_v37  ;;  %v10962_v37 = vld [vmem:[%s15784_s3 + $0x204] ss:$8 sps:$4 sm:$0xff]  }
  0xa3   :  { %1213 = vmatmul.mubr.bf16.gmra.mrb[40].mxu0 %v10898_v38 }
  0xa4   :  { %1220 = vmatprep.mubr.bf16.mxu0 %v10899_v39 }
  0xab   :  { %1221 = vmatmul.mubr.bf16.gmra.mrb[44].mxu0 %v10901_v40 }
  0xac   :  { %1228 = vmatprep.mubr.bf16.mxu0 %v10902_v41  ;;  %v10964_v41 = vld [vmem:[%s15784_s3 + $0x200] ss:$8 sps:$4 sm:$0xff]  }
  0xb3   :  { %1229 = vmatmul.mubr.bf16.gmra.mrb[48].mxu0 %v10904_v42 }
  0xb4   :  { %1236 = vmatprep.mubr.bf16.mxu0 %v10905_v43  ;;  %v10965_v43 = vld [vmem:[%s15784_s3 + $0x214] ss:$8 sps:$4 sm:$0xff]  }
  0xbb   :  { %1237 = vmatmul.mubr.bf16.gmra.mrb[52].mxu0 %v10907_v44 }
  0xbc   :  { %1244 = vmatprep.mubr.bf16.mxu0 %v10908_v45 }
  0xc3   :  { %1245 = vmatmul.mubr.bf16.gmra.mrb[56].mxu0 %v10910_v46 }
  0xc4   :  { %1252 = vmatprep.mubr.bf16.mxu0 %v10911_v47  ;;  %v10967_v47 = vld [vmem:[%s15784_s3 + $0x210] ss:$8 sps:$4 sm:$0xff]  }
  0xcb   :  { %1253 = vmatmul.mubr.bf16.gmra.mrb[60].mxu0 %v10913_v48 }
  0xcc   :  { %1260 = vmatprep.mubr.bf16.mxu0 %v10914_v49  ;;  %v10968_v49 = vld [vmem:[%s15784_s3 + $0x224] ss:$8 sps:$4 sm:$0xff]  }
  0xd3   :  { %1261 = vmatmul.mubr.bf16.gmra.mrb[64].mxu0 %v10916_v50 }
  0xd4   :  { %1268 = vmatprep.mubr.bf16.mxu0 %v10917_v51 }
  0xdb   :  { %1269 = vmatmul.mubr.bf16.gmra.mrb[68].mxu0 %v10919_v52 }
  0xdc   :  { %1276 = vmatprep.mubr.bf16.mxu0 %v10920_v53  ;;  %v10970_v53 = vld [vmem:[%s15784_s3 + $0x220] ss:$8 sps:$4 sm:$0xff]  }
  0xe3   :  { %1277 = vmatmul.mubr.bf16.gmra.mrb[72].mxu0 %v10922_v54 }
  0xe4   :  { %1284 = vmatprep.mubr.bf16.mxu0 %v10923_v55  ;;  %v10971_v55 = vld [vmem:[%s15784_s3 + $0x234] ss:$8 sps:$4 sm:$0xff]  }
  0xeb   :  { %1285 = vmatmul.mubr.bf16.gmra.mrb[76].mxu0 %v10925_v56 }
  0xec   :  { %1292 = vmatprep.mubr.bf16.mxu0 %v10926_v57 }
  0xf3   :  { %1293 = vmatmul.mubr.bf16.gmra.mrb[80].mxu0 %v10928_v58 }
  0xf4   :  { %1300 = vmatprep.mubr.bf16.mxu0 %v10929_v59  ;;  %v10973_v59 = vld [vmem:[%s15784_s3 + $0x230] ss:$8 sps:$4 sm:$0xff]  }
  0xfb   :  { %1301 = vmatmul.mubr.bf16.gmra.mrb[84].mxu0 %v10931_v60 }
  0xfc   :  { %1308 = vmatprep.mubr.bf16.mxu0 %v10932_v61  ;;  %v10974_v61 = vld [vmem:[%s15784_s3 + $0x244] ss:$8 sps:$4 sm:$0xff]  }
 0x103   :  { %1309 = vmatmul.mubr.bf16.gmra.mrb[88].mxu0 %v10934_v62 }
 0x104   :  { %1316 = vmatprep.mubr.bf16.mxu0 %v10935_v63 }
 0x10b   :  { %1317 = vmatmul.mubr.bf16.gmra.mrb[92].mxu0 %v10937_v1 }
 0x10c   :  { %1324 = vmatprep.mubr.bf16.mxu0 %v10938_v2  ;;  %v10976_v2 = vld [vmem:[%s15784_s3 + $0x240] ss:$8 sps:$4 sm:$0xff]  }
 0x113   :  { %1325 = vmatmul.mubr.bf16.gmra.mrb[96].mxu0 %v10940_v3 }
 0x114   :  { %1332 = vmatprep.mubr.bf16.mxu0 %v10941_v4  ;;  %v10977_v4 = vld [vmem:[%s15784_s3 + $0x254] ss:$8 sps:$4 sm:$0xff]  }
 0x11b   :  { %1333 = vmatmul.mubr.bf16.gmra.mrb[100].mxu0 %v10943_v5 }
 0x11c   :  { %1340 = vmatprep.mubr.bf16.mxu0 %v10944_v6 }
 0x123   :  { %1341 = vmatmul.mubr.bf16.gmra.mrb[104].mxu0 %v10946_v7 }
 0x124   :  { %1348 = vmatprep.mubr.bf16.mxu0 %v10947_v8  ;;  %v10979_v8 = vld [vmem:[%s15784_s3 + $0x250] ss:$8 sps:$4 sm:$0xff]  }
 0x126   :  { %v1134_v9 = vpop.f32.mrb[0].mxu0 }
 0x127   :  { %1725 = vrot.lane.b32.xlu0 %v1134_v9, %s11693_s22  ;;  %v1136_v10 = vpop.f32.mrb[1].mxu0 }
 0x128   :  { %v1137_v12 = vpop.f32.mrb[2].mxu0  ;;  %v10980_v10 = vld [vmem:[%s15784_s3 + $0x264] ss:$8 sps:$4 sm:$0xff]  }
 0x129   :  { %v1139_v14 = vpop.f32.mrb[3].mxu0 }
 0x12a   :  { %v10982_v14 = vld [vmem:[%s15784_s3 + $0x260] ss:$8 sps:$4 sm:$0xff]  }
 0x12b   :  { %1349 = vmatmul.mubr.bf16.gmra.mrb[108].mxu0 %v10949_v11  ;;  %1727 = vrot.lane.b32.xlu0 %v1137_v12, %s11693_s22 }
 0x12c   :  { %1356 = vmatprep.mubr.bf16.mxu0 %v10950_v13 }
 0x12e   :  { %v1142_v15 = vpop.f32.mrb[4].mxu0 }
 0x12f   :  { %1729 = vrot.lane.b32.xlu0 %v1142_v15, %s11693_s22  ;;  %v1144_v16 = vpop.f32.mrb[5].mxu0 }
 0x130   :  { %v1145_v18 = vpop.f32.mrb[6].mxu0  ;;  %v10983_v16 = vld [vmem:[%s15784_s3 + $0x274] ss:$8 sps:$4 sm:$0xff]  }
 0x131   :  { %1731 = vrot.lane.b32.xlu1 %v1145_v18, %s11693_s22  ;;  %v1147_v20 = vpop.f32.mrb[7].mxu0 }
 0x132   :  { %v10985_v20 = vld [vmem:[%s15784_s3 + $0x270] ss:$8 sps:$4 sm:$0xff]  }
 0x133   :  { %1357 = vmatmul.mubr.bf16.gmra.mrb[112].mxu0 %v10952_v17 }
 0x134   :  { %1364 = vmatprep.mubr.bf16.mxu0 %v10953_v19 }
 0x136   :  { %v1150_v21 = vpop.f32.mrb[8].mxu0 }
 0x137   :  { %1733 = vrot.lane.b32.xlu0 %v1150_v21, %s11693_s22  ;;  %v1152_v22 = vpop.f32.mrb[9].mxu0 }
 0x138   :  { %v1153_v24 = vpop.f32.mrb[10].mxu0  ;;  %v10986_v22 = vld [vmem:[%s15784_s3 + $0x284] ss:$8 sps:$4 sm:$0xff]  }
 0x139   :  { %1735 = vrot.lane.b32.xlu1 %v1153_v24, %s11693_s22  ;;  %v1155_v26 = vpop.f32.mrb[11].mxu0 }
 0x13a   :  { %v10988_v26 = vld [vmem:[%s15784_s3 + $0x280] ss:$8 sps:$4 sm:$0xff]  }
 0x13b   :  { %1365 = vmatmul.mubr.bf16.gmra.mrb[116].mxu0 %v10955_v23 }
 0x13c   :  { %1372 = vmatprep.mubr.bf16.mxu0 %v10956_v25 }
 0x13e   :  { %v1158_v27 = vpop.f32.mrb[12].mxu0 }
 0x13f   :  { %1737 = vrot.lane.b32.xlu0 %v1158_v27, %s11693_s22  ;;  %v1160_v28 = vpop.f32.mrb[13].mxu0 }
 0x140   :  { %v1161_v30 = vpop.f32.mrb[14].mxu0  ;;  %v10989_v28 = vld [vmem:[%s15784_s3 + $0x294] ss:$8 sps:$4 sm:$0xff]  }
 0x141   :  { %1739 = vrot.lane.b32.xlu1 %v1161_v30, %s11693_s22  ;;  %v1163_v32 = vpop.f32.mrb[15].mxu0 }
 0x142   :  { %v10991_v32 = vld [vmem:[%s15784_s3 + $0x290] ss:$8 sps:$4 sm:$0xff]  }
 0x143   :  { %1373 = vmatmul.mubr.bf16.gmra.mrb[120].mxu0 %v10958_v29 }
 0x144   :  { %1380 = vmatprep.mubr.bf16.mxu0 %v10959_v31 }
 0x146   :  { %v1166_v33 = vpop.f32.mrb[16].mxu0 }
 0x147   :  { %1741 = vrot.lane.b32.xlu0 %v1166_v33, %s11693_s22  ;;  %v1168_v34 = vpop.f32.mrb[17].mxu0 }
 0x148   :  { %v1169_v36 = vpop.f32.mrb[18].mxu0  ;;  %v10992_v34 = vld [vmem:[%s15784_s3 + $0x2a4] ss:$8 sps:$4 sm:$0xff]  }
 0x149   :  { %1743 = vrot.lane.b32.xlu1 %v1169_v36, %s11693_s22  ;;  %v1171_v38 = vpop.f32.mrb[19].mxu0 }
 0x14a   :  { %v10994_v38 = vld [vmem:[%s15784_s3 + $0x2a0] ss:$8 sps:$4 sm:$0xff]  }
 0x14b   :  { %1381 = vmatmul.mubr.bf16.gmra.mrb[124].mxu0 %v10961_v35 }
 0x14c   :  { %1388 = vmatprep.mubr.bf16.mxu0 %v10962_v37 }
 0x14e   :  { %v1174_v39 = vpop.f32.mrb[20].mxu0 }
 0x14f   :  { %1745 = vrot.lane.b32.xlu0 %v1174_v39, %s11693_s22  ;;  %v1176_v40 = vpop.f32.mrb[21].mxu0 }
 0x150   :  { %v1177_v42 = vpop.f32.mrb[22].mxu0  ;;  %v10995_v40 = vld [vmem:[%s15784_s3 + $0x2b4] ss:$8 sps:$4 sm:$0xff]  }
 0x151   :  { %1747 = vrot.lane.b32.xlu1 %v1177_v42, %s11693_s22  ;;  %v1179_v44 = vpop.f32.mrb[23].mxu0 }
 0x152   :  { %v10997_v44 = vld [vmem:[%s15784_s3 + $0x2b0] ss:$8 sps:$4 sm:$0xff]  }
 0x153   :  { %1389 = vmatmul.mubr.bf16.gmra.mrb[128].mxu0 %v10964_v41 }
 0x154   :  { %1396 = vmatprep.mubr.bf16.mxu0 %v10965_v43 }
 0x156   :  { %v1182_v45 = vpop.f32.mrb[24].mxu0 }
 0x157   :  { %1749 = vrot.lane.b32.xlu0 %v1182_v45, %s11693_s22  ;;  %v1184_v46 = vpop.f32.mrb[25].mxu0 }
 0x158   :  { %v1185_v48 = vpop.f32.mrb[26].mxu0  ;;  %v10998_v46 = vld [vmem:[%s15784_s3 + $0x2c4] ss:$8 sps:$4 sm:$0xff]  }
 0x159   :  { %1751 = vrot.lane.b32.xlu1 %v1185_v48, %s11693_s22  ;;  %v1187_v50 = vpop.f32.mrb[27].mxu0 }
 0x15a   :  { %v11000_v50 = vld [vmem:[%s15784_s3 + $0x2c0] ss:$8 sps:$4 sm:$0xff]  }
 0x15b   :  { %1397 = vmatmul.mubr.bf16.gmra.mrb[132].mxu0 %v10967_v47 }
 0x15c   :  { %1404 = vmatprep.mubr.bf16.mxu0 %v10968_v49 }
 0x15e   :  { %v1190_v51 = vpop.f32.mrb[28].mxu0 }
 0x15f   :  { %1753 = vrot.lane.b32.xlu0 %v1190_v51, %s11693_s22  ;;  %v1192_v52 = vpop.f32.mrb[29].mxu0 }
 0x160   :  { %v1193_v54 = vpop.f32.mrb[30].mxu0  ;;  %v11001_v52 = vld [vmem:[%s15784_s3 + $0x2d4] ss:$8 sps:$4 sm:$0xff]  }
 0x161   :  { %1755 = vrot.lane.b32.xlu1 %v1193_v54, %s11693_s22  ;;  %v1195_v56 = vpop.f32.mrb[31].mxu0 }
 0x162   :  { %v11003_v56 = vld [vmem:[%s15784_s3 + $0x2d0] ss:$8 sps:$4 sm:$0xff]  }
 0x163   :  { %1405 = vmatmul.mubr.bf16.gmra.mrb[136].mxu0 %v10970_v53 }
 0x164   :  { %1412 = vmatprep.mubr.bf16.mxu0 %v10971_v55 }
 0x166   :  { %v1198_v57 = vpop.f32.mrb[32].mxu0 }
 0x167   :  { %1825 = vrot.lane.b32.xlu1 %v1198_v57, %s11691_s19  ;;  %v1200_v58 = vpop.f32.mrb[33].mxu0 }
 0x168   :  { %v1201_v60 = vpop.f32.mrb[34].mxu0  ;;  %v11004_v58 = vld [vmem:[%s15784_s3 + $0x2e4] ss:$8 sps:$4 sm:$0xff]  }
 0x169   :  { %v1203_v62 = vpop.f32.mrb[35].mxu0 }
 0x16a   :  { %v11006_v62 = vld [vmem:[%s15784_s3 + $0x2e0] ss:$8 sps:$4 sm:$0xff]  }
 0x16b   :  { %1413 = vmatmul.mubr.bf16.gmra.mrb[140].mxu0 %v10973_v59  ;;  %1827 = vrot.lane.b32.xlu1 %v1201_v60, %s11691_s19 }
 0x16c   :  { %1420 = vmatprep.mubr.bf16.mxu0 %v10974_v61 }
 0x16e   :  { %v1206_v63 = vpop.f32.mrb[36].mxu0 }
 0x16f   :  { %1829 = vrot.lane.b32.xlu0 %v1206_v63, %s11691_s19  ;;  %v1208_v1 = vpop.f32.mrb[37].mxu0 }
 0x170   :  { %v1209_v3 = vpop.f32.mrb[38].mxu0  ;;  %v11007_v1 = vld [vmem:[%s15784_s3 + $0x2f4] ss:$8 sps:$4 sm:$0xff]  }
 0x171   :  { %1831 = vrot.lane.b32.xlu1 %v1209_v3, %s11691_s19  ;;  %v1211_v5 = vpop.f32.mrb[39].mxu0 }
 0x172   :  { %v11009_v5 = vld [vmem:[%s15784_s3 + $0x2f0] ss:$8 sps:$4 sm:$0xff]  }
 0x173   :  { %1421 = vmatmul.mubr.bf16.gmra.mrb[144].mxu0 %v10976_v2 }
 0x174   :  { %1428 = vmatprep.mubr.bf16.mxu0 %v10977_v4 }
 0x176   :  { %v1214_v6 = vpop.f32.mrb[40].mxu0 }
 0x177   :  { %1833 = vrot.lane.b32.xlu0 %v1214_v6, %s11691_s19  ;;  %v1216_v7 = vpop.f32.mrb[41].mxu0 }
 0x178   :  { %v1217_v9 = vpop.f32.mrb[42].mxu0  ;;  %v11010_v7 = vld [vmem:[%s15784_s3 + $0x304] ss:$8 sps:$4 sm:$0xff]  }
 0x179   :  { %1835 = vrot.lane.b32.xlu1 %v1217_v9, %s11691_s19  ;;  %v1219_v11 = vpop.f32.mrb[43].mxu0 }
 0x17a   :  { %v11012_v11 = vld [vmem:[%s15784_s3 + $0x300] ss:$8 sps:$4 sm:$0xff]  }
 0x17b   :  { %1429 = vmatmul.mubr.bf16.gmra.mrb[148].mxu0 %v10979_v8 }
 0x17c   :  { %1436 = vmatprep.mubr.bf16.mxu0 %v10980_v10 }
 0x17e   :  { %v1222_v12 = vpop.f32.mrb[44].mxu0 }
 0x17f   :  { %1837 = vrot.lane.b32.xlu0 %v1222_v12, %s11691_s19  ;;  %v1224_v13 = vpop.f32.mrb[45].mxu0 }
 0x180   :  { %v1225_v15 = vpop.f32.mrb[46].mxu0  ;;  %v11013_v13 = vld [vmem:[%s15784_s3 + $0x314] ss:$8 sps:$4 sm:$0xff]  }
 0x181   :  { %1839 = vrot.lane.b32.xlu1 %v1225_v15, %s11691_s19  ;;  %v1227_v17 = vpop.f32.mrb[47].mxu0 }
 0x182   :  { %v11015_v17 = vld [vmem:[%s15784_s3 + $0x310] ss:$8 sps:$4 sm:$0xff]  }
 0x183   :  { %1437 = vmatmul.mubr.bf16.gmra.mrb[152].mxu0 %v10982_v14 }
 0x184   :  { %1444 = vmatprep.mubr.bf16.mxu0 %v10983_v16 }
 0x186   :  { %v1230_v18 = vpop.f32.mrb[48].mxu0 }
 0x187   :  { %1841 = vrot.lane.b32.xlu0 %v1230_v18, %s11691_s19  ;;  %v1232_v19 = vpop.f32.mrb[49].mxu0 }
 0x188   :  { %v1233_v21 = vpop.f32.mrb[50].mxu0  ;;  %v11016_v19 = vld [vmem:[%s15784_s3 + $0x324] ss:$8 sps:$4 sm:$0xff]  }
 0x189   :  { %1843 = vrot.lane.b32.xlu1 %v1233_v21, %s11691_s19  ;;  %v1235_v23 = vpop.f32.mrb[51].mxu0 }
 0x18a   :  { %v11018_v23 = vld [vmem:[%s15784_s3 + $0x320] ss:$8 sps:$4 sm:$0xff]  }
 0x18b   :  { %1445 = vmatmul.mubr.bf16.gmra.mrb[156].mxu0 %v10985_v20 }
 0x18c   :  { %1452 = vmatprep.mubr.bf16.mxu0 %v10986_v22 }
 0x18e   :  { %v1238_v24 = vpop.f32.mrb[52].mxu0 }
 0x18f   :  { %1845 = vrot.lane.b32.xlu0 %v1238_v24, %s11691_s19  ;;  %v1240_v25 = vpop.f32.mrb[53].mxu0 }
 0x190   :  { %v1241_v27 = vpop.f32.mrb[54].mxu0  ;;  %v11019_v25 = vld [vmem:[%s15784_s3 + $0x334] ss:$8 sps:$4 sm:$0xff]  }
 0x191   :  { %1847 = vrot.lane.b32.xlu1 %v1241_v27, %s11691_s19  ;;  %v1243_v29 = vpop.f32.mrb[55].mxu0 }
 0x192   :  { %v11021_v29 = vld [vmem:[%s15784_s3 + $0x330] ss:$8 sps:$4 sm:$0xff]  }
 0x193   :  { %1453 = vmatmul.mubr.bf16.gmra.mrb[160].mxu0 %v10988_v26 }
 0x194   :  { %1460 = vmatprep.mubr.bf16.mxu0 %v10989_v28 }
 0x196   :  { %v1246_v30 = vpop.f32.mrb[56].mxu0 }
 0x197   :  { %1849 = vrot.lane.b32.xlu0 %v1246_v30, %s11691_s19  ;;  %v1248_v31 = vpop.f32.mrb[57].mxu0 }
 0x198   :  { %v1249_v33 = vpop.f32.mrb[58].mxu0  ;;  %v11022_v31 = vld [vmem:[%s15784_s3 + $0x344] ss:$8 sps:$4 sm:$0xff]  }
 0x199   :  { %1851 = vrot.lane.b32.xlu1 %v1249_v33, %s11691_s19  ;;  %v1251_v35 = vpop.f32.mrb[59].mxu0 }
 0x19a   :  { %v11024_v35 = vld [vmem:[%s15784_s3 + $0x340] ss:$8 sps:$4 sm:$0xff]  }
 0x19b   :  { %1461 = vmatmul.mubr.bf16.gmra.mrb[164].mxu0 %v10991_v32 }
 0x19c   :  { %1468 = vmatprep.mubr.bf16.mxu0 %v10992_v34 }
 0x19e   :  { %v1254_v36 = vpop.f32.mrb[60].mxu0 }
 0x19f   :  { %1853 = vrot.lane.b32.xlu0 %v1254_v36, %s11691_s19  ;;  %v1256_v37 = vpop.f32.mrb[61].mxu0 }
 0x1a0   :  { %v1257_v39 = vpop.f32.mrb[62].mxu0  ;;  %v11025_v37 = vld [vmem:[%s15784_s3 + $0x354] ss:$8 sps:$4 sm:$0xff]  }
 0x1a1   :  { %1855 = vrot.lane.b32.xlu1 %v1257_v39, %s11691_s19  ;;  %v1259_v41 = vpop.f32.mrb[63].mxu0 }
 0x1a2   :  { %v11027_v41 = vld [vmem:[%s15784_s3 + $0x350] ss:$8 sps:$4 sm:$0xff]  }
 0x1a3   :  { %1469 = vmatmul.mubr.bf16.gmra.mrb[168].mxu0 %v10994_v38 }
 0x1a4   :  { %1476 = vmatprep.mubr.bf16.mxu0 %v10995_v40 }
 0x1a6   :  { %v1262_v42 = vpop.f32.mrb[64].mxu0 }
 0x1a7   :  { %1925 = vrot.lane.b32.xlu0 %v1262_v42, %s11694_s17  ;;  %v1264_v43 = vpop.f32.mrb[65].mxu0 }
 0x1a8   :  { %v1265_v45 = vpop.f32.mrb[66].mxu0  ;;  %v11028_v43 = vld [vmem:[%s15784_s3 + $0x364] ss:$8 sps:$4 sm:$0xff]  }
 0x1a9   :  { %1927 = vrot.lane.b32.xlu1 %v1265_v45, %s11694_s17  ;;  %v1267_v47 = vpop.f32.mrb[67].mxu0 }
 0x1aa   :  { %v11030_v47 = vld [vmem:[%s15784_s3 + $0x360] ss:$8 sps:$4 sm:$0xff]  }
 0x1ab   :  { %1477 = vmatmul.mubr.bf16.gmra.mrb[172].mxu0 %v10997_v44 }
 0x1ac   :  { %1484 = vmatprep.mubr.bf16.mxu0 %v10998_v46 }
 0x1ae   :  { %v1270_v48 = vpop.f32.mrb[68].mxu0 }
 0x1af   :  { %1929 = vrot.lane.b32.xlu0 %v1270_v48, %s11694_s17  ;;  %v1272_v49 = vpop.f32.mrb[69].mxu0 }
 0x1b0   :  { %v1273_v51 = vpop.f32.mrb[70].mxu0  ;;  %v11031_v49 = vld [vmem:[%s15784_s3 + $0x374] ss:$8 sps:$4 sm:$0xff]  }
 0x1b1   :  { %1931 = vrot.lane.b32.xlu1 %v1273_v51, %s11694_s17  ;;  %v1275_v53 = vpop.f32.mrb[71].mxu0 }
 0x1b2   :  { %v11033_v53 = vld [vmem:[%s15784_s3 + $0x370] ss:$8 sps:$4 sm:$0xff]  }
 0x1b3   :  { %1485 = vmatmul.mubr.bf16.gmra.mrb[176].mxu0 %v11000_v50 }
 0x1b4   :  { %1492 = vmatprep.mubr.bf16.mxu0 %v11001_v52 }
 0x1b6   :  { %v1278_v54 = vpop.f32.mrb[72].mxu0 }
 0x1b7   :  { %1933 = vrot.lane.b32.xlu0 %v1278_v54, %s11694_s17  ;;  %v1280_v55 = vpop.f32.mrb[73].mxu0 }
 0x1b8   :  { %v1281_v57 = vpop.f32.mrb[74].mxu0  ;;  %v11034_v55 = vld [vmem:[%s15784_s3 + $0x384] ss:$8 sps:$4 sm:$0xff]  }
 0x1b9   :  { %1935 = vrot.lane.b32.xlu1 %v1281_v57, %s11694_s17  ;;  %v1283_v59 = vpop.f32.mrb[75].mxu0 }
 0x1ba   :  { %v11036_v59 = vld [vmem:[%s15784_s3 + $0x380] ss:$8 sps:$4 sm:$0xff]  }
 0x1bb   :  { %1493 = vmatmul.mubr.bf16.gmra.mrb[180].mxu0 %v11003_v56 }
 0x1bc   :  { %1500 = vmatprep.mubr.bf16.mxu0 %v11004_v58 }
 0x1be   :  { %v1286_v60 = vpop.f32.mrb[76].mxu0 }
 0x1bf   :  { %1937 = vrot.lane.b32.xlu0 %v1286_v60, %s11694_s17  ;;  %v1288_v61 = vpop.f32.mrb[77].mxu0 }
 0x1c0   :  { %v1289_v63 = vpop.f32.mrb[78].mxu0  ;;  %v11037_v61 = vld [vmem:[%s15784_s3 + $0x394] ss:$8 sps:$4 sm:$0xff]  }
 0x1c1   :  { %1939 = vrot.lane.b32.xlu1 %v1289_v63, %s11694_s17  ;;  %v1291_v2 = vpop.f32.mrb[79].mxu0 }
 0x1c2   :  { %v11039_v2 = vld [vmem:[%s15784_s3 + $0x390] ss:$8 sps:$4 sm:$0xff]  }
 0x1c3   :  { %1501 = vmatmul.mubr.bf16.gmra.mrb[184].mxu0 %v11006_v62 }
 0x1c4   :  { %1508 = vmatprep.mubr.bf16.mxu0 %v11007_v1 }
 0x1c6   :  { %v1294_v3 = vpop.f32.mrb[80].mxu0 }
 0x1c7   :  { %1941 = vrot.lane.b32.xlu0 %v1294_v3, %s11694_s17  ;;  %v1296_v4 = vpop.f32.mrb[81].mxu0 }
 0x1c8   :  { %v1297_v6 = vpop.f32.mrb[82].mxu0  ;;  %v11040_v4 = vld [vmem:[%s15784_s3 + $0x3a4] ss:$8 sps:$4 sm:$0xff]  }
 0x1c9   :  { %1943 = vrot.lane.b32.xlu1 %v1297_v6, %s11694_s17  ;;  %v1299_v8 = vpop.f32.mrb[83].mxu0 }
 0x1ca   :  { %v11042_v8 = vld [vmem:[%s15784_s3 + $0x3a0] ss:$8 sps:$4 sm:$0xff]  }
 0x1cb   :  { %1509 = vmatmul.mubr.bf16.gmra.mrb[188].mxu0 %v11009_v5 }
 0x1cc   :  { %1516 = vmatprep.mubr.bf16.mxu0 %v11010_v7 }
 0x1ce   :  { %v1302_v9 = vpop.f32.mrb[84].mxu0 }
 0x1cf   :  { %1945 = vrot.lane.b32.xlu0 %v1302_v9, %s11694_s17  ;;  %v1304_v10 = vpop.f32.mrb[85].mxu0 }
 0x1d0   :  { %v1305_v12 = vpop.f32.mrb[86].mxu0  ;;  %v11043_v10 = vld [vmem:[%s15784_s3 + $0x3b4] ss:$8 sps:$4 sm:$0xff]  }
 0x1d1   :  { %1947 = vrot.lane.b32.xlu1 %v1305_v12, %s11694_s17  ;;  %v1307_v14 = vpop.f32.mrb[87].mxu0 }
 0x1d2   :  { %v11045_v14 = vld [vmem:[%s15784_s3 + $0x3b0] ss:$8 sps:$4 sm:$0xff]  }
 0x1d3   :  { %1517 = vmatmul.mubr.bf16.gmra.mrb[192].mxu0 %v11012_v11 }
 0x1d4   :  { %1524 = vmatprep.mubr.bf16.mxu0 %v11013_v13 }
 0x1d6   :  { %v1310_v15 = vpop.f32.mrb[88].mxu0 }
 0x1d7   :  { %1949 = vrot.lane.b32.xlu0 %v1310_v15, %s11694_s17  ;;  %v1312_v16 = vpop.f32.mrb[89].mxu0 }
 0x1d8   :  { %v1313_v18 = vpop.f32.mrb[90].mxu0  ;;  %v11046_v16 = vld [vmem:[%s15784_s3 + $0x3c4] ss:$8 sps:$4 sm:$0xff]  }
 0x1d9   :  { %1951 = vrot.lane.b32.xlu1 %v1313_v18, %s11694_s17  ;;  %v1315_v20 = vpop.f32.mrb[91].mxu0 }
 0x1da   :  { %v11048_v20 = vld [vmem:[%s15784_s3 + $0x3c0] ss:$8 sps:$4 sm:$0xff]  }
 0x1db   :  { %1525 = vmatmul.mubr.bf16.gmra.mrb[196].mxu0 %v11015_v17 }
 0x1dc   :  { %1532 = vmatprep.mubr.bf16.mxu0 %v11016_v19 }
 0x1de   :  { %v1318_v21 = vpop.f32.mrb[92].mxu0 }
 0x1df   :  { %1953 = vrot.lane.b32.xlu0 %v1318_v21, %s11694_s17  ;;  %v1320_v22 = vpop.f32.mrb[93].mxu0 }
 0x1e0   :  { %v1321_v24 = vpop.f32.mrb[94].mxu0  ;;  %v11049_v22 = vld [vmem:[%s15784_s3 + $0x3d4] ss:$8 sps:$4 sm:$0xff]  }
 0x1e1   :  { %1955 = vrot.lane.b32.xlu1 %v1321_v24, %s11694_s17  ;;  %v1323_v26 = vpop.f32.mrb[95].mxu0 }
 0x1e2   :  { %v11051_v26 = vld [vmem:[%s15784_s3 + $0x3d0] ss:$8 sps:$4 sm:$0xff]  }
 0x1e3   :  { %1533 = vmatmul.mubr.bf16.gmra.mrb[200].mxu0 %v11018_v23 }
 0x1e4   :  { %1540 = vmatprep.mubr.bf16.mxu0 %v11019_v25 }
 0x1e6   :  { %v1326_v27 = vpop.f32.mrb[96].mxu0 }
 0x1e7   :  { %2025 = vrot.lane.b32.xlu0 %v1326_v27, %s11695_s18  ;;  %v1328_v28 = vpop.f32.mrb[97].mxu0 }
 0x1e8   :  { %v1329_v30 = vpop.f32.mrb[98].mxu0  ;;  %v11052_v28 = vld [vmem:[%s15784_s3 + $0x3e4] ss:$8 sps:$4 sm:$0xff]  }
 0x1e9   :  { %2027 = vrot.lane.b32.xlu1 %v1329_v30, %s11695_s18  ;;  %v1331_v32 = vpop.f32.mrb[99].mxu0 }
 0x1ea   :  { %v11054_v32 = vld [vmem:[%s15784_s3 + $0x3e0] ss:$8 sps:$4 sm:$0xff]  }
 0x1eb   :  { %1541 = vmatmul.mubr.bf16.gmra.mrb[204].mxu0 %v11021_v29 }
 0x1ec   :  { %1548 = vmatprep.mubr.bf16.mxu0 %v11022_v31 }
 0x1ee   :  { %v1334_v33 = vpop.f32.mrb[100].mxu0 }
 0x1ef   :  { %2029 = vrot.lane.b32.xlu0 %v1334_v33, %s11695_s18  ;;  %v1336_v34 = vpop.f32.mrb[101].mxu0 }
 0x1f0   :  { %v1337_v36 = vpop.f32.mrb[102].mxu0  ;;  %v11055_v34 = vld [vmem:[%s15784_s3 + $0x3f4] ss:$8 sps:$4 sm:$0xff]  }
 0x1f1   :  { %2031 = vrot.lane.b32.xlu1 %v1337_v36, %s11695_s18  ;;  %v1339_v38 = vpop.f32.mrb[103].mxu0 }
 0x1f2   :  { %v11057_v38 = vld [vmem:[%s15784_s3 + $0x3f0] ss:$8 sps:$4 sm:$0xff]  }
 0x1f3   :  { %1549 = vmatmul.mubr.bf16.gmra.mrb[208].mxu0 %v11024_v35 }
 0x1f4   :  { %1556 = vmatprep.mubr.bf16.mxu0 %v11025_v37 }
 0x1f6   :  { %v1342_v39 = vpop.f32.mrb[104].mxu0 }
 0x1f7   :  { %2033 = vrot.lane.b32.xlu0 %v1342_v39, %s11695_s18  ;;  %v1344_v40 = vpop.f32.mrb[105].mxu0 }
 0x1f8   :  { %v1345_v42 = vpop.f32.mrb[106].mxu0  ;;  %v11060_v40 = vld [vmem:[%s15784_s3 + $0x404] ss:$8 sps:$4 sm:$0xff]  }
 0x1f9   :  { %2035 = vrot.lane.b32.xlu1 %v1345_v42, %s11695_s18  ;;  %v1347_v44 = vpop.f32.mrb[107].mxu0 }
 0x1fa   :  { %v11058_v44 = vld [vmem:[%s15784_s3 + $0x400] ss:$8 sps:$4 sm:$0xff]  }
 0x1fb   :  { %1557 = vmatmul.mubr.bf16.gmra.mrb[212].mxu0 %v11027_v41 }
 0x1fc   :  { %1564 = vmatprep.mubr.bf16.mxu0 %v11028_v43 }
 0x1fe   :  { %v1350_v45 = vpop.f32.mrb[108].mxu0 }
 0x1ff   :  { %2037 = vrot.lane.b32.xlu0 %v1350_v45, %s11695_s18  ;;  %v1352_v46 = vpop.f32.mrb[109].mxu0 }
 0x200   :  { %v1353_v48 = vpop.f32.mrb[110].mxu0  ;;  %v11063_v46 = vld [vmem:[%s15784_s3 + $0x414] ss:$8 sps:$4 sm:$0xff]  }
 0x201   :  { %2039 = vrot.lane.b32.xlu1 %v1353_v48, %s11695_s18  ;;  %v1355_v50 = vpop.f32.mrb[111].mxu0 }
 0x202   :  { %v11061_v50 = vld [vmem:[%s15784_s3 + $0x410] ss:$8 sps:$4 sm:$0xff]  }
 0x203   :  { %1565 = vmatmul.mubr.bf16.gmra.mrb[216].mxu0 %v11030_v47 }
 0x204   :  { %1572 = vmatprep.mubr.bf16.mxu0 %v11031_v49 }
 0x206   :  { %v1358_v51 = vpop.f32.mrb[112].mxu0 }
 0x207   :  { %2041 = vrot.lane.b32.xlu0 %v1358_v51, %s11695_s18  ;;  %v1360_v52 = vpop.f32.mrb[113].mxu0 }
 0x208   :  { %v1361_v54 = vpop.f32.mrb[114].mxu0  ;;  %v11066_v52 = vld [vmem:[%s15784_s3 + $0x424] ss:$8 sps:$4 sm:$0xff]  }
 0x209   :  { %2043 = vrot.lane.b32.xlu1 %v1361_v54, %s11695_s18  ;;  %v1363_v56 = vpop.f32.mrb[115].mxu0 }
 0x20a   :  { %v11064_v56 = vld [vmem:[%s15784_s3 + $0x420] ss:$8 sps:$4 sm:$0xff]  }
 0x20b   :  { %1573 = vmatmul.mubr.bf16.gmra.mrb[220].mxu0 %v11033_v53 }
 0x20c   :  { %1580 = vmatprep.mubr.bf16.mxu0 %v11034_v55 }
 0x20e   :  { %v1366_v57 = vpop.f32.mrb[116].mxu0 }
 0x20f   :  { %2045 = vrot.lane.b32.xlu0 %v1366_v57, %s11695_s18  ;;  %v1368_v58 = vpop.f32.mrb[117].mxu0 }
 0x210   :  { %v1369_v60 = vpop.f32.mrb[118].mxu0  ;;  %v11069_v58 = vld [vmem:[%s15784_s3 + $0x434] ss:$8 sps:$4 sm:$0xff]  }
 0x211   :  { %2047 = vrot.lane.b32.xlu1 %v1369_v60, %s11695_s18  ;;  %v1371_v62 = vpop.f32.mrb[119].mxu0 }
 0x212   :  { %v11067_v62 = vld [vmem:[%s15784_s3 + $0x430] ss:$8 sps:$4 sm:$0xff]  }
 0x213   :  { %1581 = vmatmul.mubr.bf16.gmra.mrb[224].mxu0 %v11036_v59 }
 0x214   :  { %1588 = vmatprep.mubr.bf16.mxu0 %v11037_v61 }
 0x216   :  { %v1374_v63 = vpop.f32.mrb[120].mxu0 }
 0x217   :  { %2049 = vrot.lane.b32.xlu0 %v1374_v63, %s11695_s18  ;;  %v1376_v1 = vpop.f32.mrb[121].mxu0 }
 0x218   :  { %v1377_v3 = vpop.f32.mrb[122].mxu0  ;;  %v11072_v1 = vld [vmem:[%s15784_s3 + $0x444] ss:$8 sps:$4 sm:$0xff]  }
 0x219   :  { %2051 = vrot.lane.b32.xlu1 %v1377_v3, %s11695_s18  ;;  %v1379_v5 = vpop.f32.mrb[123].mxu0 }
 0x21a   :  { %v11070_v5 = vld [vmem:[%s15784_s3 + $0x440] ss:$8 sps:$4 sm:$0xff]  }
 0x21b   :  { %1589 = vmatmul.mubr.bf16.gmra.mrb[228].mxu0 %v11039_v2 }
 0x21c   :  { %1596 = vmatprep.mubr.bf16.mxu0 %v11040_v4 }
 0x21e   :  { %v1382_v6 = vpop.f32.mrb[124].mxu0 }
 0x21f   :  { %2053 = vrot.lane.b32.xlu0 %v1382_v6, %s11695_s18  ;;  %v1384_v7 = vpop.f32.mrb[125].mxu0 }
 0x220   :  { %v1385_v9 = vpop.f32.mrb[126].mxu0  ;;  %v11075_v7 = vld [vmem:[%s15784_s3 + $0x454] ss:$8 sps:$4 sm:$0xff]  }
 0x221   :  { %2055 = vrot.lane.b32.xlu1 %v1385_v9, %s11695_s18  ;;  %v1387_v11 = vpop.f32.mrb[127].mxu0 }
 0x222   :  { %v11073_v11 = vld [vmem:[%s15784_s3 + $0x450] ss:$8 sps:$4 sm:$0xff]  }
 0x223   :  { %1597 = vmatmul.mubr.bf16.gmra.mrb[232].mxu0 %v11042_v8 }
 0x224   :  { %1604 = vmatprep.mubr.bf16.mxu0 %v11043_v10 }
 0x226   :  { %v12286_v12 = vpop.f32.mrb[128].mxu0 }
 0x227   :  { %v1392_v13 = vpop.f32.mrb[129].mxu0 }
 0x228   :  { %v12291_v15 = vpop.f32.mrb[130].mxu0 }
 0x229   :  { %v1395_v17 = vpop.f32.mrb[131].mxu0 }
 0x22b   :  { %1605 = vmatmul.mubr.bf16.gmra.mrb[236].mxu0 %v11045_v14  ;;  %v11078_v14 = vld [vmem:[%s15784_s3 + $0x464] ss:$8 sps:$4 sm:$0xff]  }
 0x22c   :  { %1612 = vmatprep.mubr.bf16.mxu0 %v11046_v16 }
 0x22e   :  { %v12296_v18 = vpop.f32.mrb[132].mxu0 }
 0x22f   :  { %v1400_v19 = vpop.f32.mrb[133].mxu0 }
 0x230   :  { %v12301_v21 = vpop.f32.mrb[134].mxu0 }
 0x231   :  { %v1403_v23 = vpop.f32.mrb[135].mxu0 }
 0x232   :  { %v11081_v23 = vld [vmem:[%s15784_s3 + $0x474] ss:$8 sps:$4 sm:$0xff]  }
 0x233   :  { %1613 = vmatmul.mubr.bf16.gmra.mrb[240].mxu0 %v11048_v20  ;;  %v11076_v20 = vld [vmem:[%s15784_s3 + $0x460] ss:$8 sps:$4 sm:$0xff]  }
 0x234   :  { %1620 = vmatprep.mubr.bf16.mxu0 %v11049_v22 }
 0x236   :  { %v12306_v24 = vpop.f32.mrb[136].mxu0 }
 0x237   :  { %v1408_v25 = vpop.f32.mrb[137].mxu0 }
 0x238   :  { %v12311_v27 = vpop.f32.mrb[138].mxu0 }
 0x239   :  { %v1411_v29 = vpop.f32.mrb[139].mxu0 }
 0x23a   :  { %v11079_v29 = vld [vmem:[%s15784_s3 + $0x470] ss:$8 sps:$4 sm:$0xff]   ;;  %s11697_s3 = smov 121  }
 0x23b   :  { %1621 = vmatmul.mubr.bf16.gmra.mrb[244].mxu0 %v11051_v26 }
 0x23c   :  { %1628 = vmatprep.mubr.bf16.mxu0 %v11052_v28 }
 0x23e   :  { %v12316_v30 = vpop.f32.mrb[140].mxu0 }
 0x23f   :  { %v1416_v31 = vpop.f32.mrb[141].mxu0 }
 0x240   :  { %v12321_v33 = vpop.f32.mrb[142].mxu0 }
 0x241   :  { %15812 = vst [vmem:[#allocation5_spill] sm:$0xff] %v12321_v33  ;;  %v1419_v35 = vpop.f32.mrb[143].mxu0 }
 0x243   :  { %1629 = vmatmul.mubr.bf16.gmra.mrb[248].mxu0 %v11054_v32 }
 0x244   :  { %1636 = vmatprep.mubr.bf16.mxu0 %v11055_v34 }
 0x246   :  { %v12326_v36 = vpop.f32.mrb[144].mxu0 }
 0x247   :  { %15813 = vst [vmem:[#allocation6_spill] sm:$0xff] %v12326_v36  ;;  %v1424_v37 = vpop.f32.mrb[145].mxu0 }
 0x248   :  { %v12331_v39 = vpop.f32.mrb[146].mxu0 }
 0x249   :  { %15814 = vst [vmem:[#allocation7_spill] sm:$0xff] %v12331_v39  ;;  %v1427_v41 = vpop.f32.mrb[147].mxu0 }
 0x24b   :  { %1637 = vmatmul.mubr.bf16.gmra.mrb[252].mxu0 %v11057_v38 }
 0x24c   :  { %1644 = vmatprep.mubr.bf16.mxu0 %v11060_v40 }
 0x24e   :  { %v12336_v42 = vpop.f32.mrb[148].mxu0 }
 0x24f   :  { %15815 = vst [vmem:[#allocation8_spill] sm:$0xff] %v12336_v42  ;;  %v1432_v43 = vpop.f32.mrb[149].mxu0 }
 0x250   :  { %v12341_v45 = vpop.f32.mrb[150].mxu0 }
 0x251   :  { %15816 = vst [vmem:[#allocation9_spill] sm:$0xff] %v12341_v45  ;;  %v1435_v47 = vpop.f32.mrb[151].mxu0 }
 0x253   :  { %1645 = vmatmul.mubr.bf16.gmra.mrb[0].mxu0 %v11058_v44 }
 0x254   :  { %1652 = vmatprep.mubr.bf16.mxu0 %v11063_v46 }
 0x256   :  { %v12346_v48 = vpop.f32.mrb[152].mxu0 }
 0x257   :  { %15817 = vst [vmem:[#allocation10_spill] sm:$0xff] %v12346_v48  ;;  %v1440_v49 = vpop.f32.mrb[153].mxu0 }
 0x258   :  { %v12351_v51 = vpop.f32.mrb[154].mxu0 }
 0x259   :  { %15818 = vst [vmem:[#allocation11_spill] sm:$0xff] %v12351_v51  ;;  %v1443_v53 = vpop.f32.mrb[155].mxu0 }
 0x25b   :  { %1653 = vmatmul.mubr.bf16.gmra.mrb[4].mxu0 %v11061_v50 }
 0x25c   :  { %1660 = vmatprep.mubr.bf16.mxu0 %v11066_v52 }
 0x25e   :  { %v12356_v54 = vpop.f32.mrb[156].mxu0 }
 0x25f   :  { %15819 = vst [vmem:[#allocation12_spill] sm:$0xff] %v12356_v54  ;;  %v1448_v55 = vpop.f32.mrb[157].mxu0 }
 0x260   :  { %v12361_v57 = vpop.f32.mrb[158].mxu0 }
 0x261   :  { %15820 = vst [vmem:[#allocation13_spill] sm:$0xff] %v12361_v57  ;;  %v1451_v59 = vpop.f32.mrb[159].mxu0 }
 0x263   :  { %1661 = vmatmul.mubr.bf16.gmra.mrb[8].mxu0 %v11064_v56 }
 0x264   :  { %1668 = vmatprep.mubr.bf16.mxu0 %v11069_v58 }
 0x266   :  { %v1454_v60 = vpop.f32.mrb[160].mxu0 }
 0x267   :  { %2125 = vrot.lane.b32.xlu0 %v1454_v60, %s11696_s25  ;;  %v1456_v61 = vpop.f32.mrb[161].mxu0 }
 0x268   :  { %v1457_v63 = vpop.f32.mrb[162].mxu0 }
 0x269   :  { %2127 = vrot.lane.b32.xlu1 %v1457_v63, %s11696_s25  ;;  %v1459_v2 = vpop.f32.mrb[163].mxu0 }
 0x26b   :  { %1669 = vmatmul.mubr.bf16.gmra.mrb[12].mxu0 %v11067_v62  ;;  %v12413_v62 = vpop.permute.xlu0 %1725 }
 0x26c   :  { %1676 = vmatprep.mubr.bf16.mxu0 %v11072_v1 }
 0x26e   :  { %v1462_v3 = vpop.f32.mrb[164].mxu0 }
 0x26f   :  { %2129 = vrot.lane.b32.xlu0 %v1462_v3, %s11696_s25  ;;  %v1464_v4 = vpop.f32.mrb[165].mxu0  ;;  %v12416_v3 = vpop.permute.xlu1 %1731 }
 0x270   :  { %v1465_v6 = vpop.f32.mrb[166].mxu0 }
 0x271   :  { %2131 = vrot.lane.b32.xlu1 %v1465_v6, %s11696_s25  ;;  %v1467_v8 = vpop.f32.mrb[167].mxu0 }
 0x273   :  { %1677 = vmatmul.mubr.bf16.gmra.mrb[16].mxu0 %v11070_v5  ;;  %v12419_v5 = vpop.permute.xlu0 %1727  ;;  %v12421_v6 = vpop.permute.xlu1 %1735 }
 0x274   :  { %1684 = vmatprep.mubr.bf16.mxu0 %v11075_v7 }
 0x276   :  { %v1470_v9 = vpop.f32.mrb[168].mxu0 }
 0x277   :  { %2133 = vrot.lane.b32.xlu0 %v1470_v9, %s11696_s25  ;;  %v1472_v10 = vpop.f32.mrb[169].mxu0  ;;  %v12424_v9 = vpop.permute.xlu0 %1729 }
 0x278   :  { %v1473_v13 = vpop.f32.mrb[170].mxu0 }
 0x279   :  { %2135 = vrot.lane.b32.xlu1 %v1473_v13, %s11696_s25  ;;  %v1475_v16 = vpop.f32.mrb[171].mxu0 }
 0x27b   :  { %1685 = vmatmul.mubr.bf16.gmra.mrb[20].mxu0 %v11073_v11  ;;  %v12426_v11 = vpop.permute.xlu1 %1739 }
 0x27c   :  { %1692 = vmatprep.mubr.bf16.mxu0 %v11078_v14  ;;  %v12429_v14 = vpop.permute.xlu0 %1733 }
 0x27e   :  { %v1478_v17 = vpop.f32.mrb[172].mxu0 }
 0x27f   :  { %2137 = vrot.lane.b32.xlu0 %v1478_v17, %s11696_s25  ;;  %v1480_v19 = vpop.f32.mrb[173].mxu0  ;;  %v12431_v16 = vpop.permute.xlu1 %1743 }
 0x280   :  { %v1481_v22 = vpop.f32.mrb[174].mxu0  ;;  %15821 = vst [vmem:[#allocation14_spill] sm:$0xff] %v12431_v16 }
 0x281   :  { %2139 = vrot.lane.b32.xlu1 %v1481_v22, %s11696_s25  ;;  %v1483_v25 = vpop.f32.mrb[175].mxu0 }
 0x283   :  { %1693 = vmatmul.mubr.bf16.gmra.mrb[24].mxu0 %v11076_v20  ;;  %v12434_v20 = vpop.permute.xlu0 %1737 }
 0x284   :  { %1700 = vmatprep.mubr.bf16.mxu0 %v11081_v23  ;;  %v12436_v23 = vpop.permute.xlu1 %1747 }
 0x285   :  { %15822 = vst [vmem:[#allocation15_spill] sm:$0xff] %v12436_v23 }
 0x286   :  { %v1486_v26 = vpop.f32.mrb[176].mxu0 }
 0x287   :  { %2141 = vrot.lane.b32.xlu0 %v1486_v26, %s11696_s25  ;;  %v1488_v28 = vpop.f32.mrb[177].mxu0  ;;  %v12439_v26 = vpop.permute.xlu0 %1741 }
 0x288   :  { %v1489_v31 = vpop.f32.mrb[178].mxu0  ;;  %v12441_v28 = vpop.permute.xlu1 %1751 }
 0x289   :  { %2143 = vrot.lane.b32.xlu1 %v1489_v31, %s11696_s25  ;;  %v1491_v32 = vpop.f32.mrb[179].mxu0  ;;  %15823 = vst [vmem:[#allocation16_spill] sm:$0xff] %v12441_v28 }
 0x28b   :  { %1701 = vmatmul.mubr.bf16.gmra.mrb[28].mxu0 %v11079_v29  ;;  %v12444_v32 = vpop.permute.xlu0 %1745 }
 0x28c   :  { %15824 = vst [vmem:[#allocation17_spill] sm:$0xff] %v12444_v32 }
 0x28e   :  { %v1494_v34 = vpop.f32.mrb[180].mxu0 }
 0x28f   :  { %2145 = vrot.lane.b32.xlu0 %v1494_v34, %s11696_s25  ;;  %v1496_v35 = vpop.f32.mrb[181].mxu0 }
 0x290   :  { %v1497_v37 = vpop.f32.mrb[182].mxu0  ;;  %v12446_v35 = vpop.permute.xlu1 %1755 }
 0x291   :  { %2147 = vrot.lane.b32.xlu1 %v1497_v37, %s11696_s25  ;;  %v1499_v38 = vpop.f32.mrb[183].mxu0  ;;  %15825 = vst [vmem:[#allocation18_spill] sm:$0xff] %v12446_v35 }
 0x292   :  { %v12449_v38 = vpop.permute.xlu0 %1749 }
 0x293   :  { %15826 = vst [vmem:[#allocation19_spill] sm:$0xff] %v12449_v38 }
 0x296   :  { %v1502_v40 = vpop.f32.mrb[184].mxu0 }
 0x297   :  { %2149 = vrot.lane.b32.xlu0 %v1502_v40, %s11696_s25  ;;  %v1504_v41 = vpop.f32.mrb[185].mxu0  ;;  %v12451_v40 = vpop.permute.xlu1 %1825 }
 0x298   :  { %v1505_v43 = vpop.f32.mrb[186].mxu0 }
 0x299   :  { %2151 = vrot.lane.b32.xlu1 %v1505_v43, %s11696_s25  ;;  %v1507_v44 = vpop.f32.mrb[187].mxu0 }
 0x29e   :  { %v1510_v46 = vpop.f32.mrb[188].mxu0 }
 0x29f   :  { %2153 = vrot.lane.b32.xlu0 %v1510_v46, %s11696_s25  ;;  %v1512_v47 = vpop.f32.mrb[189].mxu0  ;;  %v12454_v46 = vpop.permute.xlu0 %1753 }
 0x2a0   :  { %v1513_v49 = vpop.f32.mrb[190].mxu0  ;;  %15827 = vst [vmem:[#allocation20_spill] sm:$0xff] %v12454_v46 }
 0x2a1   :  { %2155 = vrot.lane.b32.xlu1 %v1513_v49, %s11696_s25  ;;  %v1515_v50 = vpop.f32.mrb[191].mxu0  ;;  %v12457_v49 = vpop.permute.xlu1 %1827 }
 0x2a3   :  { %v12459_v50 = vpop.permute.xlu0 %1829 }
 0x2a6   :  { %v1518_v52 = vpop.f32.mrb[192].mxu0 }
 0x2a7   :  { %2225 = vrot.lane.b32.xlu0 %v1518_v52, %s11697_s3  ;;  %v1520_v53 = vpop.f32.mrb[193].mxu0 }
 0x2a8   :  { %v1521_v55 = vpop.f32.mrb[194].mxu0  ;;  %v12461_v53 = vpop.permute.xlu1 %1831 }
 0x2a9   :  { %2227 = vrot.lane.b32.xlu1 %v1521_v55, %s11697_s3  ;;  %v1523_v56 = vpop.f32.mrb[195].mxu0 }
 0x2ae   :  { %v1526_v58 = vpop.f32.mrb[196].mxu0 }
 0x2af   :  { %2229 = vrot.lane.b32.xlu0 %v1526_v58, %s11697_s3  ;;  %v1528_v59 = vpop.f32.mrb[197].mxu0  ;;  %v12464_v58 = vpop.permute.xlu0 %1833 }
 0x2b0   :  { %v1529_v60 = vpop.f32.mrb[198].mxu0 }
 0x2b1   :  { %2231 = vrot.lane.b32.xlu1 %v1529_v60, %s11697_s3  ;;  %v1531_v61 = vpop.f32.mrb[199].mxu0  ;;  %v12467_v60 = vpop.permute.xlu1 %1835 }
 0x2b3   :  { %v12469_v61 = vpop.permute.xlu0 %1837 }
 0x2b6   :  { %v1534_v63 = vpop.f32.mrb[200].mxu0 }
 0x2b7   :  { %2233 = vrot.lane.b32.xlu0 %v1534_v63, %s11697_s3  ;;  %v1536_v1 = vpop.f32.mrb[201].mxu0 }
 0x2b8   :  { %v1537_v2 = vpop.f32.mrb[202].mxu0  ;;  %v12471_v1 = vpop.permute.xlu1 %1839 }
 0x2b9   :  { %2235 = vrot.lane.b32.xlu1 %v1537_v2, %s11697_s3  ;;  %v1539_v4 = vpop.f32.mrb[203].mxu0  ;;  %15828 = vst [vmem:[#allocation21_spill] sm:$0xff] %v12471_v1 }
 0x2be   :  { %v1542_v7 = vpop.f32.mrb[204].mxu0 }
 0x2bf   :  { %2237 = vrot.lane.b32.xlu0 %v1542_v7, %s11697_s3  ;;  %v1544_v8 = vpop.f32.mrb[205].mxu0  ;;  %v12474_v7 = vpop.permute.xlu0 %1841 }
 0x2c0   :  { %v1545_v10 = vpop.f32.mrb[206].mxu0  ;;  %15829 = vst [vmem:[#allocation22_spill] sm:$0xff] %v12474_v7 }
 0x2c1   :  { %2239 = vrot.lane.b32.xlu1 %v1545_v10, %s11697_s3  ;;  %v1547_v13 = vpop.f32.mrb[207].mxu0  ;;  %v12477_v10 = vpop.permute.xlu1 %1843 }
 0x2c2   :  { %15830 = vst [vmem:[#allocation23_spill] sm:$0xff] %v12477_v10 }
 0x2c3   :  { %v12479_v13 = vpop.permute.xlu0 %1845 }
 0x2c4   :  { %15831 = vst [vmem:[#allocation24_spill] sm:$0xff] %v12479_v13 }
 0x2c6   :  { %v1550_v17 = vpop.f32.mrb[208].mxu0 }
 0x2c7   :  { %2241 = vrot.lane.b32.xlu0 %v1550_v17, %s11697_s3  ;;  %v1552_v19 = vpop.f32.mrb[209].mxu0 }
 0x2c8   :  { %v1553_v22 = vpop.f32.mrb[210].mxu0  ;;  %v12481_v19 = vpop.permute.xlu1 %1847 }
 0x2c9   :  { %2243 = vrot.lane.b32.xlu1 %v1553_v22, %s11697_s3  ;;  %v1555_v25 = vpop.f32.mrb[211].mxu0  ;;  %15832 = vst [vmem:[#allocation25_spill] sm:$0xff] %v12481_v19 }
 0x2ce   :  { %v1558_v29 = vpop.f32.mrb[212].mxu0 }
 0x2cf   :  { %2245 = vrot.lane.b32.xlu0 %v1558_v29, %s11697_s3  ;;  %v1560_v31 = vpop.f32.mrb[213].mxu0  ;;  %v12484_v29 = vpop.permute.xlu0 %1849 }
 0x2d0   :  { %v1561_v34 = vpop.f32.mrb[214].mxu0  ;;  %15833 = vst [vmem:[#allocation26_spill] sm:$0xff] %v12484_v29 }
 0x2d1   :  { %2247 = vrot.lane.b32.xlu1 %v1561_v34, %s11697_s3  ;;  %v1563_v37 = vpop.f32.mrb[215].mxu0  ;;  %v12487_v34 = vpop.permute.xlu1 %1851 }
 0x2d2   :  { %15834 = vst [vmem:[#allocation27_spill] sm:$0xff] %v12487_v34 }
 0x2d3   :  { %v12489_v37 = vpop.permute.xlu0 %1853 }
 0x2d4   :  { %15835 = vst [vmem:[#allocation28_spill] sm:$0xff] %v12489_v37 }
 0x2d6   :  { %v1566_v41 = vpop.f32.mrb[216].mxu0 }
 0x2d7   :  { %2249 = vrot.lane.b32.xlu0 %v1566_v41, %s11697_s3  ;;  %v1568_v43 = vpop.f32.mrb[217].mxu0 }
 0x2d8   :  { %v1569_v44 = vpop.f32.mrb[218].mxu0  ;;  %v12491_v43 = vpop.permute.xlu1 %1855 }
 0x2d9   :  { %2251 = vrot.lane.b32.xlu1 %v1569_v44, %s11697_s3  ;;  %v1571_v47 = vpop.f32.mrb[219].mxu0  ;;  %15836 = vst [vmem:[#allocation29_spill] sm:$0xff] %v12491_v43 }
 0x2de   :  { %v1574_v52 = vpop.f32.mrb[220].mxu0 }
 0x2df   :  { %2253 = vrot.lane.b32.xlu0 %v1574_v52, %s11697_s3  ;;  %v1576_v55 = vpop.f32.mrb[221].mxu0  ;;  %v12494_v52 = vpop.permute.xlu0 %1925 }
 0x2e0   :  { %v1577_v56 = vpop.f32.mrb[222].mxu0 }
 0x2e1   :  { %2255 = vrot.lane.b32.xlu1 %v1577_v56, %s11697_s3  ;;  %v1579_v59 = vpop.f32.mrb[223].mxu0  ;;  %v12497_v56 = vpop.permute.xlu1 %1927 }
 0x2e3   :  { %v12499_v59 = vpop.permute.xlu0 %1929 }
 0x2e6   :  { %v1582_v63 = vpop.f32.mrb[224].mxu0 }
 0x2e7   :  { %2325 = vrot.lane.b32.xlu0 %v1582_v63, %s11698_s26  ;;  %v1584_v2 = vpop.f32.mrb[225].mxu0 }
 0x2e8   :  { %v1585_v4 = vpop.f32.mrb[226].mxu0  ;;  %v12501_v2 = vpop.permute.xlu1 %1931 }
 0x2e9   :  { %2327 = vrot.lane.b32.xlu1 %v1585_v4, %s11698_s26  ;;  %v1587_v8 = vpop.f32.mrb[227].mxu0 }
 0x2ee   :  { %v1590_v17 = vpop.f32.mrb[228].mxu0 }
 0x2ef   :  { %2329 = vrot.lane.b32.xlu0 %v1590_v17, %s11698_s26  ;;  %v1592_v22 = vpop.f32.mrb[229].mxu0  ;;  %v12504_v17 = vpop.permute.xlu0 %1933 }
 0x2f0   :  { %v1593_v25 = vpop.f32.mrb[230].mxu0 }
 0x2f1   :  { %2331 = vrot.lane.b32.xlu1 %v1593_v25, %s11698_s26  ;;  %v1595_v31 = vpop.f32.mrb[231].mxu0  ;;  %v12507_v25 = vpop.permute.xlu1 %1935 }
 0x2f3   :  { %v12509_v31 = vpop.permute.xlu0 %1937 }
 0x2f4   :  { %15837 = vst [vmem:[#allocation30_spill] sm:$0xff] %v12509_v31 }
 0x2f6   :  { %v1598_v41 = vpop.f32.mrb[232].mxu0 }
 0x2f7   :  { %2333 = vrot.lane.b32.xlu0 %v1598_v41, %s11698_s26  ;;  %v1600_v44 = vpop.f32.mrb[233].mxu0  ;;  %v12514_v0 = vpop.permute.xlu0 %1941 }
 0x2f8   :  { %v1601_v47 = vpop.f32.mrb[234].mxu0  ;;  %v12511_v44 = vpop.permute.xlu1 %1939  ;;  %15839 = vst [vmem:[#allocation32_spill] sm:$0xff] %v12514_v0 }
 0x2f9   :  { %2335 = vrot.lane.b32.xlu1 %v1601_v47, %s11698_s26  ;;  %v1603_v55 = vpop.f32.mrb[235].mxu0  ;;  %15838 = vst [vmem:[#allocation31_spill] sm:$0xff] %v12511_v44  ;;  %v1773_v44 = vlaneseq }
 0x2fe   :  { %v1606_v63 = vpop.f32.mrb[236].mxu0 }
 0x2ff   :  { %2337 = vrot.lane.b32.xlu0 %v1606_v63, %s11698_s26  ;;  %v1608_v4 = vpop.f32.mrb[237].mxu0 }
 0x300   :  { %v1609_v8 = vpop.f32.mrb[238].mxu0  ;;  %v12517_v4 = vpop.permute.xlu1 %1943 }
 0x301   :  { %2339 = vrot.lane.b32.xlu1 %v1609_v8, %s11698_s26  ;;  %v1611_v22 = vpop.f32.mrb[239].mxu0  ;;  %15840 = vst [vmem:[#allocation33_spill] sm:$0xff] %v12517_v4  ;;  %v12519_v8 = vpop.permute.xlu0 %1945 }
 0x302   :  { %15841 = vst [vmem:[#allocation34_spill] sm:$0xff] %v12519_v8 }
 0x304   :  { %v12521_v43 = vpop.permute.xlu1 %1947 }
 0x305   :  { %15842 = vst [vmem:[#allocation35_spill] sm:$0xff] %v12521_v43  ;;  %v12524_v37 = vpop.permute.xlu0 %1949 }
 0x306   :  { %v1614_v41 = vpop.f32.mrb[240].mxu0  ;;  %15843 = vst [vmem:[#allocation36_spill] sm:$0xff] %v12524_v37 }
 0x307   :  { %2341 = vrot.lane.b32.xlu0 %v1614_v41, %s11698_s26  ;;  %v1616_v47 = vpop.f32.mrb[241].mxu0 }
 0x308   :  { %v1617_v55 = vpop.f32.mrb[242].mxu0  ;;  %v12527_v47 = vpop.permute.xlu1 %1951 }
 0x309   :  { %2343 = vrot.lane.b32.xlu1 %v1617_v55, %s11698_s26  ;;  %v1619_v63 = vpop.f32.mrb[243].mxu0  ;;  %15844 = vst [vmem:[#allocation37_spill] sm:$0xff] %v12527_v47  ;;  %v12529_v55 = vpop.permute.xlu0 %1953 }
 0x30a   :  { %15845 = vst [vmem:[#allocation38_spill] sm:$0xff] %v12529_v55 }
 0x30c   :  { %v12531_v35 = vpop.permute.xlu1 %1955 }
 0x30d   :  { %15846 = vst [vmem:[#allocation39_spill] sm:$0xff] %v12531_v35  ;;  %v12534_v51 = vpop.permute.xlu0 %2025 }
 0x30e   :  { %v1622_v22 = vpop.f32.mrb[244].mxu0 }
 0x30f   :  { %2345 = vrot.lane.b32.xlu0 %v1622_v22, %s11698_s26  ;;  %v1624_v57 = vpop.f32.mrb[245].mxu0 }
 0x310   :  { %v1625_v54 = vpop.f32.mrb[246].mxu0  ;;  %v12537_v22 = vpop.permute.xlu1 %2027 }
 0x311   :  { %2347 = vrot.lane.b32.xlu1 %v1625_v54, %s11698_s26  ;;  %v1627_v41 = vpop.f32.mrb[247].mxu0  ;;  %v12539_v54 = vpop.permute.xlu0 %2029 }
 0x314   :  { %v12541_v47 = vpop.permute.xlu1 %2031 }
 0x315   :  { %v12544_v37 = vpop.permute.xlu0 %2033 }
 0x316   :  { %v1630_v63 = vpop.f32.mrb[248].mxu0 }
 0x317   :  { %2349 = vrot.lane.b32.xlu0 %v1630_v63, %s11698_s26  ;;  %v1632_v34 = vpop.f32.mrb[249].mxu0 }
 0x318   :  { %v1633_v46 = vpop.f32.mrb[250].mxu0  ;;  %v12547_v63 = vpop.permute.xlu1 %2035 }
 0x319   :  { %2351 = vrot.lane.b32.xlu1 %v1633_v46, %s11698_s26  ;;  %v1635_v57 = vpop.f32.mrb[251].mxu0  ;;  %v12549_v46 = vpop.permute.xlu0 %2037 }
 0x31a   :  { %15847 = vst [vmem:[#allocation40_spill] sm:$0xff] %v12549_v46 }
 0x31c   :  { %v12551_v48 = vpop.permute.xlu1 %2039 }
 0x31d   :  { %15848 = vst [vmem:[#allocation41_spill] sm:$0xff] %v12551_v48 }
 0x31e   :  { %v1638_v41 = vpop.f32.mrb[252].mxu0 }
 0x31f   :  { %2353 = vrot.lane.b32.xlu0 %v1638_v41, %s11698_s26  ;;  %v1640_v55 = vpop.f32.mrb[253].mxu0  ;;  %v12554_v41 = vpop.permute.xlu0 %2041 }
 0x320   :  { %v1641_v35 = vpop.f32.mrb[254].mxu0  ;;  %15849 = vst [vmem:[#allocation42_spill] sm:$0xff] %v12554_v41  ;;  %v12557_v8 = vpop.permute.xlu1 %2043 }
 0x321   :  { %2355 = vrot.lane.b32.xlu1 %v1641_v35, %s11698_s26  ;;  %v1643_v34 = vpop.f32.mrb[255].mxu0  ;;  %15850 = vst [vmem:[#allocation43_spill] sm:$0xff] %v12557_v8 }
 0x323   :  { %v12559_v35 = vpop.permute.xlu0 %2045 }
 0x324   :  { %15851 = vst [vmem:[#allocation44_spill] sm:$0xff] %v12559_v35  ;;  %v12561_v28 = vpop.permute.xlu1 %2047 }
 0x325   :  { %15852 = vst [vmem:[#allocation45_spill] sm:$0xff] %v12561_v28 }
 0x326   :  { %v1646_v57 = vpop.f32.mrb[0].mxu0 }
 0x327   :  { %2425 = vrot.lane.b32.xlu0 %v1646_v57, %s11699_s29  ;;  %v1648_v43 = vpop.f32.mrb[1].mxu0  ;;  %v12564_v45 = vpop.permute.xlu0 %2049 }
 0x328   :  { %v1649_v29 = vpop.f32.mrb[2].mxu0  ;;  %15853 = vst [vmem:[#allocation46_spill] sm:$0xff] %v12564_v45  ;;  %v12567_v57 = vpop.permute.xlu1 %2051 }
 0x329   :  { %2427 = vrot.lane.b32.xlu1 %v1649_v29, %s11699_s29  ;;  %v1651_v55 = vpop.f32.mrb[3].mxu0  ;;  %15854 = vst [vmem:[#allocation47_spill] sm:$0xff] %v12567_v57 }
 0x32b   :  { %v12569_v29 = vpop.permute.xlu0 %2053 }
 0x32c   :  { %15855 = vst [vmem:[#allocation48_spill] sm:$0xff] %v12569_v29  ;;  %v12571_v8 = vpop.permute.xlu1 %2055 }
 0x32d   :  { %15856 = vst [vmem:[#allocation49_spill] sm:$0xff] %v12571_v8 }
 0x32e   :  { %v1654_v34 = vpop.f32.mrb[4].mxu0 }
 0x32f   :  { %2429 = vrot.lane.b32.xlu0 %v1654_v34, %s11699_s29  ;;  %v1656_v19 = vpop.f32.mrb[5].mxu0  ;;  %v12574_v42 = vpop.permute.xlu0 %2125 }
 0x330   :  { %v1657_v38 = vpop.f32.mrb[6].mxu0  ;;  %v12577_v34 = vpop.permute.xlu1 %2127 }
 0x331   :  { %2431 = vrot.lane.b32.xlu1 %v1657_v38, %s11699_s29  ;;  %v1659_v43 = vpop.f32.mrb[7].mxu0 }
 0x333   :  { %v12579_v38 = vpop.permute.xlu0 %2129 }
 0x334   :  { %v12581_v57 = vpop.permute.xlu1 %2131 }
 0x336   :  { %v1662_v55 = vpop.f32.mrb[8].mxu0 }
 0x337   :  { %2433 = vrot.lane.b32.xlu0 %v1662_v55, %s11699_s29  ;;  %v1664_v35 = vpop.f32.mrb[9].mxu0  ;;  %v12584_v45 = vpop.permute.xlu0 %2133 }
 0x338   :  { %v1665_v28 = vpop.f32.mrb[10].mxu0  ;;  %v12587_v55 = vpop.permute.xlu1 %2135 }
 0x339   :  { %2435 = vrot.lane.b32.xlu1 %v1665_v28, %s11699_s29  ;;  %v1667_v19 = vpop.f32.mrb[11].mxu0  ;;  %15857 = vst [vmem:[#allocation50_spill] sm:$0xff] %v12587_v55 }
 0x33b   :  { %v12589_v28 = vpop.permute.xlu0 %2137 }
 0x33c   :  { %15858 = vst [vmem:[#allocation51_spill] sm:$0xff] %v12589_v28  ;;  %v12591_v4 = vpop.permute.xlu1 %2139 }
 0x33d   :  { %15859 = vst [vmem:[#allocation52_spill] sm:$0xff] %v12591_v4 }
 0x33e   :  { %v1670_v43 = vpop.f32.mrb[12].mxu0 }
 0x33f   :  { %2437 = vrot.lane.b32.xlu0 %v1670_v43, %s11699_s29  ;;  %v1672_v29 = vpop.f32.mrb[13].mxu0  ;;  %v12594_v0 = vpop.permute.xlu0 %2141 }
 0x340   :  { %v1673_v8 = vpop.f32.mrb[14].mxu0  ;;  %15860 = vst [vmem:[#allocation53_spill] sm:$0xff] %v12594_v0  ;;  %v12597_v43 = vpop.permute.xlu1 %2143 }
 0x341   :  { %2439 = vrot.lane.b32.xlu1 %v1673_v8, %s11699_s29  ;;  %v1675_v35 = vpop.f32.mrb[15].mxu0  ;;  %15861 = vst [vmem:[#allocation54_spill] sm:$0xff] %v12597_v43 }
 0x343   :  { %v12599_v8 = vpop.permute.xlu0 %2145 }
 0x344   :  { %15862 = vst [vmem:[#allocation55_spill] sm:$0xff] %v12599_v8  ;;  %v12601_v23 = vpop.permute.xlu1 %2147 }
 0x345   :  { %15863 = vst [vmem:[#allocation56_spill] sm:$0xff] %v12601_v23 }
 0x346   :  { %v1678_v19 = vpop.f32.mrb[16].mxu0 }
 0x347   :  { %2441 = vrot.lane.b32.xlu0 %v1678_v19, %s11699_s29  ;;  %v1680_v13 = vpop.f32.mrb[17].mxu0  ;;  %v12604_v4 = vpop.permute.xlu0 %2149 }
 0x348   :  { %v1681_v41 = vpop.f32.mrb[18].mxu0  ;;  %15864 = vst [vmem:[#allocation57_spill] sm:$0xff] %v12604_v4  ;;  %v12607_v19 = vpop.permute.xlu1 %2151 }
 0x349   :  { %2443 = vrot.lane.b32.xlu1 %v1681_v41, %s11699_s29  ;;  %v1683_v29 = vpop.f32.mrb[19].mxu0  ;;  %15865 = vst [vmem:[#allocation58_spill] sm:$0xff] %v12607_v19 }
 0x34b   :  { %v12609_v41 = vpop.permute.xlu0 %2153 }
 0x34c   :  { %15866 = vst [vmem:[#allocation59_spill] sm:$0xff] %v12609_v41  ;;  %v12611_v43 = vpop.permute.xlu1 %2155 }
 0x34d   :  { %15867 = vst [vmem:[#allocation60_spill] sm:$0xff] %v12611_v43 }
 0x34e   :  { %v1686_v35 = vpop.f32.mrb[20].mxu0 }
 0x34f   :  { %2445 = vrot.lane.b32.xlu0 %v1686_v35, %s11699_s29  ;;  %v1688_v10 = vpop.f32.mrb[21].mxu0  ;;  %v12614_v0 = vpop.permute.xlu0 %2225 }
 0x350   :  { %v1689_v32 = vpop.f32.mrb[22].mxu0  ;;  %v12617_v35 = vpop.permute.xlu1 %2227 }
 0x351   :  { %2447 = vrot.lane.b32.xlu1 %v1689_v32, %s11699_s29  ;;  %v1691_v13 = vpop.f32.mrb[23].mxu0 }
 0x353   :  { %v12619_v32 = vpop.permute.xlu0 %2229 }
 0x354   :  { %v12621_v19 = vpop.permute.xlu1 %2231 }
 0x356   :  { %v1694_v29 = vpop.f32.mrb[24].mxu0 }
 0x357   :  { %2449 = vrot.lane.b32.xlu0 %v1694_v29, %s11699_s29  ;;  %v1696_v8 = vpop.f32.mrb[25].mxu0  ;;  %v12624_v4 = vpop.permute.xlu0 %2233 }
 0x358   :  { %v1697_v23 = vpop.f32.mrb[26].mxu0  ;;  %15868 = vst [vmem:[#allocation61_spill] sm:$0xff] %v12624_v4  ;;  %v12627_v29 = vpop.permute.xlu1 %2235 }
 0x359   :  { %2451 = vrot.lane.b32.xlu1 %v1697_v23, %s11699_s29  ;;  %v1699_v10 = vpop.f32.mrb[27].mxu0  ;;  %15869 = vst [vmem:[#allocation62_spill] sm:$0xff] %v12627_v29 }
 0x35b   :  { %v12629_v23 = vpop.permute.xlu0 %2237 }
 0x35c   :  { %15870 = vst [vmem:[#allocation63_spill] sm:$0xff] %v12629_v23  ;;  %v12631_v10 = vpop.permute.xlu1 %2239 }
 0x35d   :  { %15871 = vst [vmem:[#allocation64_spill] sm:$0xff] %v12631_v10  ;;  %v1774_v10 = vshrl.u32 %v1773_v44, 7 }
 0x35e   :  { %v1702_v13 = vpop.f32.mrb[28].mxu0 }
 0x35f   :  { %2453 = vrot.lane.b32.xlu0 %v1702_v13, %s11699_s29  ;;  %v1704_v41 = vpop.f32.mrb[29].mxu0  ;;  %v12633_v39 = vpop.permute.xlu0 %2241  ;;  %v1975_v7 = vsub.s32 2, %v1774_v10  ;;  %v2075_v16 = vsub.s32 3, %v1774_v10  ;;  %v2275_v33 = vsub.s32 6, %v1774_v10 }
 0x360   :  { %v1705_v43 = vpop.f32.mrb[30].mxu0  ;;  %15872 = vst [vmem:[#allocation65_spill] sm:$0xff] %v12633_v39  ;;  %v12635_v28 = vpop.permute.xlu1 %2243 }
 0x361   :  { %2455 = vrot.lane.b32.xlu1 %v1705_v43, %s11699_s29  ;;  %v1707_v8 = vpop.f32.mrb[31].mxu0  ;;  %15873 = vst [vmem:[#allocation66_spill] sm:$0xff] %v12635_v28 }
 0x363   :  { %v12637_v48 = vpop.permute.xlu0 %2245 }
 0x364   :  { %15874 = vst [vmem:[#allocation67_spill] sm:$0xff] %v12637_v48  ;;  %v12639_v13 = vpop.permute.xlu1 %2247  ;;  %v1775_v48 = vsub.s32 0, %v1774_v10 }
 0x365   :  { %15875 = vst [vmem:[#allocation68_spill] sm:$0xff] %v12639_v13 }
 0x367   :  { %v12641_v41 = vpop.permute.xlu0 %2249 }
 0x368   :  { %15876 = vst [vmem:[#allocation69_spill] sm:$0xff] %v12641_v41  ;;  %v12643_v36 = vpop.permute.xlu1 %2251  ;;  %v58_v41 = vld [vmem:[%s15783_s2] sm:$0xff] }
 0x369   :  { %15877 = vst [vmem:[#allocation70_spill] sm:$0xff] %v12643_v36  ;;  %v12677_v55 = vrot.slane %v58_v41, %v1975_v7  ;;  %v2375_v7 = vsub.s32 7, %v1774_v10 }
 0x36b   :  { %v12645_v43 = vpop.permute.xlu0 %2253 }
 0x36c   :  { %15878 = vst [vmem:[#allocation71_spill] sm:$0xff] %v12645_v43  ;;  %v12647_v8 = vpop.permute.xlu1 %2255  ;;  %v12662_v43 = vrot.slane %v58_v41, %v1775_v48 }
 0x36d   :  { %15879 = vst [vmem:[#allocation72_spill] sm:$0xff] %v12647_v8  ;;  %v1875_v8 = vsub.s32 1, %v1774_v10 }
 0x36e   :  { %v1777_v29 = vmul.f32 %v12662_v43, %v12413_v62 }
 0x36f   :  { %v2326_v23 = vpop.permute.xlu0 %2325  ;;  %v12670_v1 = vrot.slane %v58_v41, %v1875_v8  ;;  %v12684_v8 = vrot.slane %v58_v41, %v2075_v16 }
 0x370   :  { %v12649_v46 = vpop.permute.xlu1 %2327  ;;  %v1793_v48 = vadd.f32 %v1777_v29, %v12286_v12  ;;  %v1779_v29 = vmul.f32 %v12662_v43, %v12424_v9 }
 0x371   :  { %v2078_v9 = vmul.f32 %v12684_v8, %v12537_v22 }
 0x373   :  { %v12651_v39 = vpop.permute.xlu0 %2329 }
 0x374   :  { %v12653_v28 = vpop.permute.xlu1 %2331 }
 0x375   :  { %15880 = vst [vmem:[#allocation73_spill] sm:$0xff] %v12653_v28 }
 0x377   :  { %v12658_v13 = vpop.permute.xlu0 %2333 }
 0x378   :  { %15881 = vst [vmem:[#allocation74_spill] sm:$0xff] %v12658_v13  ;;  %v12660_v36 = vpop.permute.xlu1 %2335  ;;  %v1778_v13 = vmul.f32 %v12662_v43, %v12419_v5  ;;  %v1878_v5 = vmul.f32 %v12670_v1, %v12457_v49  ;;  %v1978_v49 = vmul.f32 %v12677_v55, %v12497_v56 }
 0x379   :  { %15882 = vst [vmem:[#allocation75_spill] sm:$0xff] %v12660_v36  ;;  %v2175_v36 = vsub.s32 5, %v1774_v10 }
 0x37a   :  { %v1794_v62 = vadd.f32 %v1778_v13, %v12291_v15  ;;  %v1977_v15 = vmul.f32 %v12677_v55, %v12494_v52  ;;  %v12700_v13 = vrot.slane %v58_v41, %v2275_v33  ;;  %v1780_v33 = vmul.f32 %v12662_v43, %v12416_v3 }
 0x37b   :  { %v12664_v31 = vpop.permute.xlu0 %2337  ;;  %v12690_v12 = vrot.slane %v58_v41, %v2175_v36  ;;  %v1795_v36 = vadd.f32 %v1779_v29, %v12296_v18 }
 0x37c   :  { %15883 = vst [vmem:[#allocation76_spill] sm:$0xff] %v12664_v31  ;;  %v12666_v44 = vpop.permute.xlu1 %2339  ;;  %v1894_v16 = vadd.f32 %v1878_v5, %v1794_v62  ;;  %v2277_v22 = vmul.f32 %v12700_v13, %v12614_v0  ;;  %v1796_v5 = vadd.f32 %v1780_v33, %v12301_v21  ;;  %v1783_v0 = vmul.f32 %v12662_v43, %v12434_v20 }
 0x37d   :  { %15884 = vst [vmem:[#allocation77_spill] sm:$0xff] %v12666_v44  ;;  %v1877_v44 = vmul.f32 %v12670_v1, %v12451_v40  ;;  %v2077_v40 = vmul.f32 %v12684_v8, %v12534_v51  ;;  %v2177_v52 = vmul.f32 %v12690_v12, %v12574_v42  ;;  %v1879_v51 = vmul.f32 %v12670_v1, %v12459_v50 }
 0x37e   :  { %v1994_v62 = vadd.f32 %v1978_v49, %v1894_v16  ;;  %v1781_v42 = vmul.f32 %v12662_v43, %v12429_v14  ;;  %v1880_v14 = vmul.f32 %v12670_v1, %v12461_v53  ;;  %v2079_v21 = vmul.f32 %v12684_v8, %v12539_v54 }
 0x37f   :  { %v12672_v4 = vpop.permute.xlu0 %2341  ;;  %v1895_v3 = vadd.f32 %v1879_v51, %v1795_v36  ;;  %v1980_v51 = vmul.f32 %v12677_v55, %v12501_v2 }
 0x380   :  { %15885 = vst [vmem:[#allocation78_spill] sm:$0xff] %v12672_v4  ;;  %v12679_v31 = vpop.permute.xlu1 %2343  ;;  %v1893_v4 = vadd.f32 %v1877_v44, %v1793_v48  ;;  %v12711_v48 = vrot.slane %v58_v41, %v2375_v7  ;;  %v1782_v41 = vmul.f32 %v12662_v43, %v12421_v6  ;;  %v2094_v7 = vadd.f32 %v2078_v9, %v1994_v62 }
 0x381   :  { %15886 = vst [vmem:[#allocation79_spill] sm:$0xff] %v12679_v31  ;;  %v1979_v6 = vmul.f32 %v12677_v55, %v12499_v59  ;;  %v1881_v59 = vmul.f32 %v12670_v1, %v12464_v58  ;;  %v1896_v49 = vadd.f32 %v1880_v14, %v1796_v5  ;;  %v1797_v54 = vadd.f32 %v1781_v42, %v12306_v24 }
 0x382   :  { %v1993_v44 = vadd.f32 %v1977_v15, %v1893_v4  ;;  %v2178_v4 = vmul.f32 %v12690_v12, %v12577_v34  ;;  %v2278_v15 = vmul.f32 %v12700_v13, %v12617_v35  ;;  %v2377_v34 = vmul.f32 %v12711_v48, %v2326_v23  ;;  %v12746_v35 = vld [vmem:[%s15783_s2 + $0x8] ss:$0 sm:$0xff] }
 0x383   :  { %v12686_v28 = vpop.permute.xlu0 %2345  ;;  %v1784_v23 = vmul.f32 %v12662_v43, %v12426_v11  ;;  %v2378_v53 = vmul.f32 %v12711_v48, %v12649_v46  ;;  %v1995_v36 = vadd.f32 %v1979_v6, %v1895_v3  ;;  %v2179_v9 = vmul.f32 %v12690_v12, %v12579_v38 }
 0x384   :  { %v12694_v31 = vpop.permute.xlu1 %2347  ;;  %v2093_v18 = vadd.f32 %v2077_v40, %v1993_v44  ;;  %v2194_v20 = vadd.f32 %v2178_v4, %v2094_v7  ;;  %v1798_v46 = vadd.f32 %v1782_v41, %v12311_v27  ;;  %v2080_v58 = vmul.f32 %v12684_v8, %v12541_v47 }
 0x385   :  { %v2279_v24 = vmul.f32 %v12700_v13, %v12619_v32  ;;  %v1882_v42 = vmul.f32 %v12670_v1, %v12467_v60  ;;  %v1897_v3 = vadd.f32 %v1881_v59, %v1797_v54  ;;  %v1996_v2 = vadd.f32 %v1980_v51, %v1896_v49  ;;  %v15892_v51 = vld [vmem:[#allocation21_spill] sm:$0xff] }
 0x386   :  { %v2193_v29 = vadd.f32 %v2177_v52, %v2093_v18  ;;  %v2294_v52 = vadd.f32 %v2278_v15, %v2194_v20  ;;  %v2095_v18 = vadd.f32 %v2079_v21, %v1995_v36  ;;  %v2180_v27 = vmul.f32 %v12690_v12, %v12581_v57 }
 0x387   :  { %v1785_v47 = vmul.f32 %v12662_v43, %v12439_v26  ;;  %v2379_v32 = vmul.f32 %v12711_v48, %v12651_v39  ;;  %v1981_v7 = vmul.f32 %v12677_v55, %v12504_v17  ;;  %v1898_v60 = vadd.f32 %v1882_v42, %v1798_v46 }
 0x388   :  { %v2293_v40 = vadd.f32 %v2277_v22, %v2193_v29  ;;  %v2394_v4 = vadd.f32 %v2378_v53, %v2294_v52  ;;  %v2195_v41 = vadd.f32 %v2179_v9, %v2095_v18  ;;  %v2096_v29 = vadd.f32 %v2080_v58, %v1996_v2 }
 0x389   :  { %v12705_v10 = vpop.permute.xlu0 %2349  ;;  %v2081_v15 = vmul.f32 %v12684_v8, %v12544_v37  ;;  %v1883_v57 = vmul.f32 %v12670_v1, %v12469_v61  ;;  %v1982_v26 = vmul.f32 %v12677_v55, %v12507_v25  ;;  %v2280_v39 = vmul.f32 %v12700_v13, %v12621_v19  ;;  %v15888_v19 = vld [vmem:[#allocation5_spill] sm:$0xff] }
 0x38a   :  { %v2393_v33 = vadd.f32 %v2377_v34, %v2293_v40  ;;  %v2295_v34 = vadd.f32 %v2279_v24, %v2195_v41  ;;  %v1799_v14 = vadd.f32 %v1783_v0, %v12316_v30  ;;  %v1997_v17 = vadd.f32 %v1981_v7, %v1897_v3  ;;  %v15887_v40 = vld [vmem:[#allocation73_spill] sm:$0xff]  ;;  %v15889_v30 = vld [vmem:[#allocation50_spill] sm:$0xff]  ;;  %v15897_v7 = vld [vmem:[#allocation40_spill] sm:$0xff] }
 0x38b   :  { %v12717_v56 = vpop.permute.xlu1 %2351  ;;  %v2082_v6 = vmul.f32 %v12684_v8, %v12547_v63  ;;  %v2196_v21 = vadd.f32 %v2180_v27, %v2096_v29  ;;  %v2181_v61 = vmul.f32 %v12690_v12, %v12584_v45  ;;  %v2380_v25 = vmul.f32 %v12711_v48, %v15887_v40  ;;  %v15895_v3 = vld [vmem:[#allocation22_spill] sm:$0xff]  ;;  %v15902_v40 = vld [vmem:[#allocation51_spill] sm:$0xff] }
 0x38c   :  { %v2395_v20 = vadd.f32 %v2379_v32, %v2295_v34  ;;  %v1800_v59 = vadd.f32 %v1784_v23, %v15888_v19  ;;  %v2097_v49 = vadd.f32 %v2081_v15, %v1997_v17  ;;  %v1998_v54 = vadd.f32 %v1982_v26, %v1898_v60  ;;  %v15896_v27 = vld [vmem:[#allocation30_spill] sm:$0xff] }
 0x38d   :  { %v2182_v0 = vmul.f32 %v12690_v12, %v15889_v30  ;;  %v2296_v63 = vadd.f32 %v2280_v39, %v2196_v21  ;;  %v1884_v23 = vmul.f32 %v12670_v1, %v15892_v51  ;;  %v1899_v46 = vadd.f32 %v1883_v57, %v1799_v14  ;;  %v15898_v57 = vld [vmem:[#allocation75_spill] sm:$0xff]  ;;  %v15900_v17 = vld [vmem:[#allocation6_spill] sm:$0xff] }
 0x38e   :  { %v2098_v18 = vadd.f32 %v2082_v6, %v1998_v54  ;;  %v2197_v58 = vadd.f32 %v2181_v61, %v2097_v49  ;;  %v1885_v2 = vmul.f32 %v12670_v1, %v15895_v3  ;;  %v1983_v41 = vmul.f32 %v12677_v55, %v15896_v27  ;;  %v15899_v39 = vld [vmem:[#allocation31_spill] sm:$0xff] }
 0x38f   :  { %v1900_v32 = vadd.f32 %v1884_v23, %v1800_v59  ;;  %v2083_v60 = vmul.f32 %v12684_v8, %v15897_v7  ;;  %v2382_v26 = vmul.f32 %v12711_v48, %v15898_v57  ;;  %v1984_v14 = vmul.f32 %v12677_v55, %v15899_v39  ;;  %v15903_v49 = vld [vmem:[#allocation7_spill] sm:$0xff]  ;;  %v15906_v23 = vld [vmem:[#allocation17_spill] sm:$0xff]  ;;  %v15911_v7 = vld [vmem:[#allocation32_spill] sm:$0xff] }
 0x390   :  { %v2198_v29 = vadd.f32 %v2182_v0, %v2098_v18  ;;  %v1801_v6 = vadd.f32 %v1785_v47, %v15900_v17  ;;  %v1999_v21 = vadd.f32 %v1983_v41, %v1899_v46  ;;  %v1787_v46 = vmul.f32 %v12662_v43, %v15906_v23  ;;  %v15907_v18 = vld [vmem:[#allocation23_spill] sm:$0xff]  ;;  %v15913_v57 = vld [vmem:[#allocation24_spill] sm:$0xff]  ;;  %v15914_v17 = vld [vmem:[#allocation77_spill] sm:$0xff] }
 0x391   :  { %v12728_v50 = vpop.permute.xlu0 %2353  ;;  %v2000_v0 = vadd.f32 %v1984_v14, %v1900_v32  ;;  %v15910_v41 = vld [vmem:[#allocation15_spill] sm:$0xff]  ;;  %v15921_v23 = vld [vmem:[#allocation65_spill] sm:$0xff] }
 0x392   :  { %v2099_v30 = vadd.f32 %v2083_v60, %v1999_v21  ;;  %v1788_v32 = vmul.f32 %v12662_v43, %v15910_v41  ;;  %v1985_v60 = vmul.f32 %v12677_v55, %v15911_v7  ;;  %v15915_v21 = vld [vmem:[#allocation33_spill] sm:$0xff] }
 0x393   :  { %v12741_v16 = vpop.permute.xlu1 %2355 }
 0x399   :  { %v2426_v44 = vpop.permute.xlu0 %2425 }
 0x39a   :  { %v2477_v11 = vmul.f32 %v12746_v35, %v2426_v44  ;;  %v15890_v44 = vld [vmem:[#allocation61_spill] sm:$0xff] }
 0x39b   :  { %v2428_v62 = vpop.permute.xlu1 %2427  ;;  %v2281_v9 = vmul.f32 %v12700_v13, %v15890_v44  ;;  %v15905_v44 = vld [vmem:[#allocation63_spill] sm:$0xff] }
 0x39c   :  { %v12765_v22 = vadd.f32 %v2477_v11, %v2393_v33  ;;  %v2478_v38 = vmul.f32 %v12746_v35, %v2428_v62  ;;  %v15891_v33 = vld [vmem:[#allocation14_spill] sm:$0xff] }
 0x39d   :  { %v1786_v11 = vmul.f32 %v12662_v43, %v15891_v33  ;;  %v15893_v62 = vld [vmem:[#allocation62_spill] sm:$0xff]  ;;  %v2297_v15 = vadd.f32 %v2281_v9, %v2197_v58  ;;  %v2283_v9 = vmul.f32 %v12700_v13, %v15905_v44  ;;  %v1901_v58 = vadd.f32 %v1885_v2, %v1801_v6 }
 0x39e   :  { %v12776_v5 = vadd.f32 %v2478_v38, %v2394_v4  ;;  %2509 = vadd.xlane.f32.xlu0 %v12765_v22  ;;  %v2282_v24 = vmul.f32 %v12700_v13, %v15893_v62  ;;  %v2396_v4 = vadd.f32 %v2380_v25, %v2296_v63  ;;  %v15894_v38 = vld [vmem:[#allocation74_spill] sm:$0xff]  ;;  %v2183_v25 = vmul.f32 %v12690_v12, %v15902_v40 }
 0x39f   :  { %v2381_v42 = vmul.f32 %v12711_v48, %v15894_v38  ;;  %v1802_v54 = vadd.f32 %v1786_v11, %v15903_v49  ;;  %v1886_v11 = vmul.f32 %v12670_v1, %v15907_v18  ;;  %v15912_v2 = vld [vmem:[#allocation42_spill] sm:$0xff]  ;;  %v2384_v6 = vmul.f32 %v12711_v48, %v15914_v17 }
 0x3a0   :  { %2511 = vadd.xlane.f32.xlu1 %v12776_v5  ;;  %v2001_v40 = vadd.f32 %v1985_v60, %v1901_v58  ;;  %v15925_v60 = vld [vmem:[#allocation78_spill] sm:$0xff] }
 0x3a1   :  { %v2430_v37 = vpop.permute.xlu0 %2429  ;;  %v2397_v19 = vadd.f32 %v2381_v42, %v2297_v15  ;;  %v15909_v42 = vld [vmem:[#allocation76_spill] sm:$0xff]  ;;  %v2085_v15 = vmul.f32 %v12684_v8, %v15912_v2 }
 0x3a2   :  { %v2479_v53 = vmul.f32 %v12746_v35, %v2430_v37  ;;  %v15901_v37 = vld [vmem:[#allocation41_spill] sm:$0xff]  ;;  %v2383_v3 = vmul.f32 %v12711_v48, %v15909_v42 }
 0x3a3   :  { %v2432_v36 = vpop.permute.xlu1 %2431  ;;  %v2084_v61 = vmul.f32 %v12684_v8, %v15901_v37  ;;  %v1986_v37 = vmul.f32 %v12677_v55, %v15915_v21  ;;  %v15929_v21 = vld [vmem:[#allocation26_spill] sm:$0xff] }
 0x3a4   :  { %v12803_v52 = vadd.f32 %v2479_v53, %v2395_v20  ;;  %v2480_v45 = vmul.f32 %v12746_v35, %v2432_v36  ;;  %v2298_v53 = vadd.f32 %v2282_v24, %v2198_v29  ;;  %v15904_v36 = vld [vmem:[#allocation52_spill] sm:$0xff]  ;;  %v2199_v24 = vadd.f32 %v2183_v25, %v2099_v30  ;;  %v15917_v25 = vld [vmem:[#allocation43_spill] sm:$0xff] }
 0x3a5   :  { %v2184_v47 = vmul.f32 %v12690_v12, %v15904_v36  ;;  %v2100_v62 = vadd.f32 %v2084_v61, %v2000_v0  ;;  %v1902_v29 = vadd.f32 %v1886_v11, %v1802_v54  ;;  %v15916_v61 = vld [vmem:[#allocation8_spill] sm:$0xff]  ;;  %v15919_v36 = vld [vmem:[#allocation9_spill] sm:$0xff] }
 0x3a6   :  { %2513 = vadd.xlane.f32.xlu0 %v12803_v52  ;;  %v12823_v34 = vadd.f32 %v2480_v45, %v2396_v4  ;;  %v2398_v45 = vadd.f32 %v2382_v26, %v2298_v53  ;;  %v15908_v4 = vld [vmem:[#allocation64_spill] sm:$0xff]  ;;  %v1887_v26 = vmul.f32 %v12670_v1, %v15913_v57  ;;  %v2299_v14 = vadd.f32 %v2283_v9, %v2199_v24  ;;  %v15920_v9 = vld [vmem:[#allocation54_spill] sm:$0xff] }
 0x3a7   :  { %v2284_v38 = vmul.f32 %v12700_v13, %v15908_v4  ;;  %v2200_v39 = vadd.f32 %v2184_v47, %v2100_v62  ;;  %v2086_v53 = vmul.f32 %v12684_v8, %v15917_v25  ;;  %v1804_v47 = vadd.f32 %v1788_v32, %v15919_v36  ;;  %v15922_v62 = vld [vmem:[#allocation19_spill] sm:$0xff]  ;;  %v15923_v4 = vld [vmem:[#allocation25_spill] sm:$0xff]  ;;  %v15924_v32 = vld [vmem:[#allocation66_spill] sm:$0xff] }
 0x3a8   :  { %v2399_v30 = vadd.f32 %v2383_v3, %v2299_v14  ;;  %v2002_v44 = vadd.f32 %v1986_v37, %v1902_v29  ;;  %v1789_v24 = vmul.f32 %v12662_v43, %v15922_v62  ;;  %v2286_v7 = vmul.f32 %v12700_v13, %v15924_v32  ;;  %v15938_v32 = vld [vmem:[#allocation20_spill] sm:$0xff] }
 0x3a9   :  { %v2434_v20 = vpop.permute.xlu0 %2433  ;;  %v2300_v54 = vadd.f32 %v2284_v38, %v2200_v39  ;;  %v1888_v38 = vmul.f32 %v12670_v1, %v15923_v4  ;;  %v2385_v29 = vmul.f32 %v12711_v48, %v15925_v60  ;;  %v15927_v39 = vld [vmem:[#allocation34_spill] sm:$0xff]  ;;  %v1889_v37 = vmul.f32 %v12670_v1, %v15929_v21  ;;  %v15937_v4 = vld [vmem:[#allocation67_spill] sm:$0xff] }
 0x3aa   :  { %v2481_v59 = vmul.f32 %v12746_v35, %v2434_v20  ;;  %2515 = vadd.xlane.f32.xlu0 %v12823_v34  ;;  %v1803_v20 = vadd.f32 %v1787_v46, %v15916_v61  ;;  %v2285_v46 = vmul.f32 %v12700_v13, %v15921_v23  ;;  %v2102_v3 = vadd.f32 %v2086_v53, %v2002_v44  ;;  %v15931_v53 = vld [vmem:[#allocation35_spill] sm:$0xff]  ;;  %v15941_v21 = vld [vmem:[#allocation18_spill] sm:$0xff] }
 0x3ab   :  { %v2436_v63 = vpop.permute.xlu1 %2435  ;;  %v2400_v18 = vadd.f32 %v2384_v6, %v2300_v54  ;;  %v1987_v14 = vmul.f32 %v12677_v55, %v15927_v39  ;;  %v1904_v17 = vadd.f32 %v1888_v38, %v1804_v47  ;;  %v15934_v47 = vld [vmem:[#allocation55_spill] sm:$0xff]  ;;  %v2287_v38 = vmul.f32 %v12700_v13, %v15937_v4 }
 0x3ac   :  { %v12839_v33 = vadd.f32 %v2481_v59, %v2397_v19  ;;  %v2482_v51 = vmul.f32 %v12746_v35, %v2436_v63  ;;  %v15918_v59 = vld [vmem:[#allocation53_spill] sm:$0xff]  ;;  %v2101_v63 = vadd.f32 %v2085_v15, %v2001_v40  ;;  %v1903_v42 = vadd.f32 %v1887_v26, %v1803_v20  ;;  %v15926_v15 = vld [vmem:[#allocation16_spill] sm:$0xff]  ;;  %v15930_v40 = vld [vmem:[#allocation79_spill] sm:$0xff] }
 0x3ad   :  { %v2185_v49 = vmul.f32 %v12690_v12, %v15918_v59  ;;  %v1790_v57 = vmul.f32 %v12662_v43, %v15926_v15  ;;  %v15928_v26 = vld [vmem:[#allocation44_spill] sm:$0xff]  ;;  %v2386_v25 = vmul.f32 %v12711_v48, %v15930_v40  ;;  %v15932_v59 = vld [vmem:[#allocation10_spill] sm:$0xff]  ;;  %v15939_v60 = vld [vmem:[#allocation27_spill] sm:$0xff] }
 0x3ae   :  { %v12850_v27 = vadd.f32 %v2482_v51, %v2398_v45  ;;  %2517 = vadd.xlane.f32.xlu1 %v12839_v33  ;;  %v2186_v45 = vmul.f32 %v12690_v12, %v15920_v9  ;;  %v2087_v6 = vmul.f32 %v12684_v8, %v15928_v26  ;;  %v2003_v54 = vadd.f32 %v1987_v14, %v1903_v42  ;;  %v15940_v14 = vld [vmem:[#allocation68_spill] sm:$0xff] }
 0x3af   :  { %v2201_v41 = vadd.f32 %v2185_v49, %v2101_v63  ;;  %v1805_v49 = vadd.f32 %v1789_v24, %v15932_v59  ;;  %v2187_v63 = vmul.f32 %v12690_v12, %v15934_v47  ;;  %v2387_v26 = vmul.f32 %v12711_v48, %v12686_v28 }
 0x3b0   :  { %2519 = vadd.xlane.f32.xlu0 %v12850_v27  ;;  %v2202_v61 = vadd.f32 %v2186_v45, %v2102_v3  ;;  %v2388_v28 = vmul.f32 %v12711_v48, %v12694_v31  ;;  %v15949_v31 = vld [vmem:[#allocation13_spill] sm:$0xff] }
 0x3b1   :  { %v2438_v19 = vpop.permute.xlu0 %2437  ;;  %v2301_v20 = vadd.f32 %v2285_v46, %v2201_v41  ;;  %v2103_v46 = vadd.f32 %v2087_v6, %v2003_v54  ;;  %v1905_v15 = vadd.f32 %v1889_v37, %v1805_v49  ;;  %v15943_v37 = vld [vmem:[#allocation46_spill] sm:$0xff] }
 0x3b2   :  { %v2483_v0 = vmul.f32 %v12746_v35, %v2438_v19  ;;  %v1988_v19 = vmul.f32 %v12677_v55, %v15931_v53  ;;  %v2302_v44 = vadd.f32 %v2286_v7, %v2202_v61  ;;  %v1791_v7 = vmul.f32 %v12662_v43, %v15938_v32  ;;  %v15951_v32 = vld [vmem:[#allocation69_spill] sm:$0xff] }
 0x3b3   :  { %v2440_v51 = vpop.permute.xlu1 %2439  ;;  %v2401_v9 = vadd.f32 %v2385_v29, %v2301_v20  ;;  %v1890_v29 = vmul.f32 %v12670_v1, %v15939_v60  ;;  %v2203_v39 = vadd.f32 %v2187_v63, %v2103_v46  ;;  %v1792_v61 = vmul.f32 %v12662_v43, %v15941_v21  ;;  %v15942_v20 = vld [vmem:[#allocation36_spill] sm:$0xff]  ;;  %v15953_v21 = vld [vmem:[#allocation70_spill] sm:$0xff] }
 0x3b4   :  { %v12877_v11 = vadd.f32 %v2483_v0, %v2399_v30  ;;  %v2484_v58 = vmul.f32 %v12746_v35, %v2440_v51  ;;  %v15933_v30 = vld [vmem:[#allocation45_spill] sm:$0xff]  ;;  %v15935_v51 = vld [vmem:[#allocation11_spill] sm:$0xff]  ;;  %v2402_v42 = vadd.f32 %v2386_v25, %v2302_v44  ;;  %v1989_v40 = vmul.f32 %v12677_v55, %v15942_v20 }
 0x3b5   :  { %v2088_v0 = vmul.f32 %v12684_v8, %v15933_v30  ;;  %v1806_v23 = vadd.f32 %v1790_v57, %v15935_v51  ;;  %v2089_v53 = vmul.f32 %v12684_v8, %v15943_v37  ;;  %v2303_v54 = vadd.f32 %v2287_v38, %v2203_v39  ;;  %v15945_v30 = vld [vmem:[#allocation37_spill] sm:$0xff]  ;;  %v15947_v44 = vld [vmem:[#allocation47_spill] sm:$0xff]  ;;  %v15950_v38 = vld [vmem:[#allocation58_spill] sm:$0xff] }
 0x3b6   :  { %v12888_v2 = vadd.f32 %v2484_v58, %v2400_v18  ;;  %2521 = vadd.xlane.f32.xlu1 %v12877_v11  ;;  %v2004_v18 = vadd.f32 %v1988_v19, %v1904_v17  ;;  %v15936_v58 = vld [vmem:[#allocation56_spill] sm:$0xff]  ;;  %v2288_v17 = vmul.f32 %v12700_v13, %v15940_v14  ;;  %v2005_v63 = vadd.f32 %v1989_v40, %v1905_v15  ;;  %v15948_v51 = vld [vmem:[#allocation57_spill] sm:$0xff] }
 0x3b7   :  { %v2188_v62 = vmul.f32 %v12690_v12, %v15936_v58  ;;  %v1906_v25 = vadd.f32 %v1890_v29, %v1806_v23  ;;  %v15944_v19 = vld [vmem:[#allocation28_spill] sm:$0xff]  ;;  %v2189_v23 = vmul.f32 %v12690_v12, %v15948_v51  ;;  %v2389_v20 = vmul.f32 %v12711_v48, %v12705_v10 }
 0x3b8   :  { %2523 = vadd.xlane.f32.xlu0 %v12888_v2  ;;  %v2104_v57 = vadd.f32 %v2088_v0, %v2004_v18  ;;  %v1891_v59 = vmul.f32 %v12670_v1, %v15944_v19  ;;  %v1990_v0 = vmul.f32 %v12677_v55, %v15945_v30  ;;  %v2403_v18 = vadd.f32 %v2387_v26, %v2303_v54  ;;  %v15955_v19 = vld [vmem:[#allocation48_spill] sm:$0xff]  ;;  %v15956_v30 = vld [vmem:[#allocation39_spill] sm:$0xff] }
 0x3b9   :  { %v2442_v36 = vpop.permute.xlu0 %2441  ;;  %v1992_v10 = vmul.f32 %v12677_v55, %v15956_v30 }
 0x3ba   :  { %v2485_v45 = vmul.f32 %v12746_v35, %v2442_v36  ;;  %v2204_v49 = vadd.f32 %v2188_v62, %v2104_v57  ;;  %v15946_v36 = vld [vmem:[#allocation12_spill] sm:$0xff]  ;;  %v1808_v62 = vadd.f32 %v1792_v61, %v15949_v31  ;;  %v2006_v4 = vadd.f32 %v1990_v0, %v1906_v25  ;;  %v15952_v57 = vld [vmem:[#allocation29_spill] sm:$0xff]  ;;  %v15954_v25 = vld [vmem:[#allocation38_spill] sm:$0xff] }
 0x3bb   :  { %v2444_v24 = vpop.permute.xlu1 %2443  ;;  %v1807_v47 = vadd.f32 %v1791_v7, %v15946_v36  ;;  %v2289_v7 = vmul.f32 %v12700_v13, %v15951_v32  ;;  %v1892_v39 = vmul.f32 %v12670_v1, %v15952_v57  ;;  %v2290_v61 = vmul.f32 %v12700_v13, %v15953_v21  ;;  %v15957_v36 = vld [vmem:[#allocation49_spill] sm:$0xff] }
 0x3bc   :  { %v12915_v3 = vadd.f32 %v2485_v45, %v2401_v9  ;;  %v2486_v41 = vmul.f32 %v12746_v35, %v2444_v24  ;;  %v2090_v9 = vmul.f32 %v12684_v8, %v15947_v44  ;;  %v2304_v46 = vadd.f32 %v2288_v17, %v2204_v49  ;;  %v15958_v44 = vld [vmem:[#allocation59_spill] sm:$0xff] }
 0x3bd   :  { %v2105_v24 = vadd.f32 %v2089_v53, %v2005_v63  ;;  %v1907_v14 = vadd.f32 %v1891_v59, %v1807_v47  ;;  %v1991_v37 = vmul.f32 %v12677_v55, %v15954_v25  ;;  %v1908_v53 = vadd.f32 %v1892_v39, %v1808_v62  ;;  %v15960_v62 = vld [vmem:[#allocation71_spill] sm:$0xff] }
 0x3be   :  { %v12926_v6 = vadd.f32 %v2486_v41, %v2402_v42  ;;  %2525 = vadd.xlane.f32.xlu1 %v12915_v3  ;;  %v2190_v42 = vmul.f32 %v12690_v12, %v15950_v38  ;;  %v2404_v60 = vadd.f32 %v2388_v28, %v2304_v46  ;;  %v2106_v17 = vadd.f32 %v2090_v9, %v2006_v4 }
 0x3bf   :  { %v2205_v26 = vadd.f32 %v2189_v23, %v2105_v24  ;;  %v2091_v49 = vmul.f32 %v12684_v8, %v15955_v19  ;;  %v2390_v28 = vmul.f32 %v12711_v48, %v12717_v56  ;;  %v2007_v0 = vadd.f32 %v1991_v37, %v1907_v14  ;;  %v15959_v56 = vld [vmem:[#allocation60_spill] sm:$0xff] }
 0x3c0   :  { %2527 = vadd.xlane.f32.xlu0 %v12926_v6  ;;  %v2206_v59 = vadd.f32 %v2190_v42, %v2106_v17  ;;  %v2092_v47 = vmul.f32 %v12684_v8, %v15957_v36  ;;  %v2191_v9 = vmul.f32 %v12690_v12, %v15958_v44  ;;  %v2291_v24 = vmul.f32 %v12700_v13, %v15960_v62 }
 0x3c1   :  { %v2446_v45 = vpop.permute.xlu0 %2445  ;;  %v2305_v54 = vadd.f32 %v2289_v7, %v2205_v26  ;;  %v2107_v46 = vadd.f32 %v2091_v49, %v2007_v0  ;;  %v15961_v7 = vld [vmem:[#allocation72_spill] sm:$0xff]  ;;  %v2392_v17 = vmul.f32 %v12711_v48, %v12741_v16  ;;  %v11700_v16 = vmov 1  }
 0x3c2   :  { %v2487_v58 = vmul.f32 %v12746_v35, %v2446_v45  ;;  %v2306_v45 = vadd.f32 %v2290_v61, %v2206_v59  ;;  %10803 = vset.pattern.permute.xlu1 %v11700_v16  ;;  %10804 = vset.pattern.permute.xlu0 %v11700_v16 }
 0x3c3   :  { %v2448_v41 = vpop.permute.xlu1 %2447  ;;  %v2405_v51 = vadd.f32 %v2389_v20, %v2305_v54  ;;  %v2207_v32 = vadd.f32 %v2191_v9, %v2107_v46 }
 0x3c4   :  { %v12953_v29 = vadd.f32 %v2487_v58, %v2403_v18  ;;  %v2488_v15 = vmul.f32 %v12746_v35, %v2448_v41  ;;  %v2008_v18 = vadd.f32 %v1992_v10, %v1908_v53  ;;  %v2192_v58 = vmul.f32 %v12690_v12, %v15959_v56 }
 0x3c5   :  { %v2406_v4 = vadd.f32 %v2390_v28, %v2306_v45  ;;  %v2307_v14 = vadd.f32 %v2291_v24, %v2207_v32 }
 0x3c6   :  { %v12962_v40 = vadd.f32 %v2488_v15, %v2404_v60  ;;  %2529 = vadd.xlane.f32.xlu1 %v12953_v29  ;;  %v2108_v41 = vadd.f32 %v2092_v47, %v2008_v18  ;;  %v2292_v60 = vmul.f32 %v12700_v13, %v15961_v7  ;;  %v2391_v15 = vmul.f32 %v12711_v48, %v12728_v50 }
 0x3c8   :  { %2531 = vadd.xlane.f32.xlu0 %v12962_v40  ;;  %v2208_v39 = vadd.f32 %v2192_v58, %v2108_v41  ;;  %v2407_v61 = vadd.f32 %v2391_v15, %v2307_v14 }
 0x3c9   :  { %v2450_v63 = vpop.permute.xlu0 %2449 }
 0x3ca   :  { %v2489_v23 = vmul.f32 %v12746_v35, %v2450_v63  ;;  %v2308_v21 = vadd.f32 %v2292_v60, %v2208_v39 }
 0x3cb   :  { %v2452_v31 = vpop.permute.xlu1 %2451 }
 0x3cc   :  { %v12983_v38 = vadd.f32 %v2489_v23, %v2405_v51  ;;  %v2490_v42 = vmul.f32 %v12746_v35, %v2452_v31  ;;  %v2408_v37 = vadd.f32 %v2392_v17, %v2308_v21 }
 0x3ce   :  { %v12990_v57 = vadd.f32 %v2490_v42, %v2406_v4  ;;  %2533 = vadd.xlane.f32.xlu1 %v12983_v38 }
 0x3d0   :  { %2535 = vadd.xlane.f32.xlu0 %v12990_v57 }
 0x3d1   :  { %v2454_v26 = vpop.permute.xlu0 %2453 }
 0x3d2   :  { %v2491_v20 = vmul.f32 %v12746_v35, %v2454_v26 }
 0x3d3   :  { %v2456_v25 = vpop.permute.xlu1 %2455 }
 0x3d4   :  { %v12997_v53 = vadd.f32 %v2491_v20, %v2407_v61  ;;  %v2492_v50 = vmul.f32 %v12746_v35, %v2456_v25 }
 0x3d6   :  { %v13000_v19 = vadd.f32 %v2492_v50, %v2408_v37  ;;  %2537 = vadd.xlane.f32.xlu1 %v12997_v53 }
 0x3d8   :  { %2539 = vadd.xlane.f32.xlu0 %v13000_v19 }
 0x42b   :  { %v2510_v49 = vpop.xlane.xlu0 %2509 }
 0x42c   :  { %v2542_v59 = vmul.f32 0.0078125, %v2510_v49 }
 0x42d   :  { %v2512_v54 = vpop.xlane.xlu1 %2511 }
 0x42e   :  { %v13007_v28 = vsub.f32 %v12765_v22, %v2542_v59  ;;  %v2543_v30 = vmul.f32 0.0078125, %v2512_v54 }
 0x430   :  { %v13010_v35 = vsub.f32 %v12776_v5, %v2543_v30  ;;  %v2574_v10 = vmul.f32 %v13007_v28, %v13007_v28 }
 0x432   :  { %2590 = vadd.xlane.f32.xlu1 %v2574_v10  ;;  %v2575_v0 = vmul.f32 %v13010_v35, %v13010_v35 }
 0x433   :  { %v2514_v36 = vpop.xlane.xlu0 %2513 }
 0x434   :  { %v2544_v47 = vmul.f32 0.0078125, %v2514_v36  ;;  %2592 = vadd.xlane.f32.xlu0 %v2575_v0 }
 0x436   :  { %v13017_v63 = vsub.f32 %v12803_v52, %v2544_v47 }
 0x437   :  { %v2516_v44 = vpop.xlane.xlu0 %2515 }
 0x438   :  { %v2545_v22 = vmul.f32 0.0078125, %v2516_v44  ;;  %v2576_v9 = vmul.f32 %v13017_v63, %v13017_v63 }
 0x43a   :  { %v13022_v5 = vsub.f32 %v12823_v34, %v2545_v22  ;;  %2594 = vadd.xlane.f32.xlu1 %v2576_v9  ;;  %v60_v9 = vld [vmem:[%s15792_s11] sm:$0xff] }
 0x43b   :  { %v2518_v45 = vpop.xlane.xlu1 %2517 }
 0x43c   :  { %v2546_v51 = vmul.f32 0.0078125, %v2518_v45  ;;  %v2577_v23 = vmul.f32 %v13022_v5, %v13022_v5  ;;  %v62_v45 = vld [vmem:[%s15792_s11 + $0x10] sm:$0xff] }
 0x43d   :  { %v2520_v46 = vpop.xlane.xlu0 %2519 }
 0x43e   :  { %v13027_v18 = vsub.f32 %v12839_v33, %v2546_v51  ;;  %v2547_v52 = vmul.f32 0.0078125, %v2520_v46  ;;  %2596 = vadd.xlane.f32.xlu0 %v2577_v23  ;;  %v13104_v51 = vld [vmem:[%s15792_s11 + $0x40] sm:$0xff]  ;;  %v13109_v23 = vld [vmem:[%s15792_s11 + $0x18] sm:$0xff]  ;;  %v13116_v46 = vld [vmem:[%s15792_s11 + $0x28] sm:$0xff] }
 0x440   :  { %v13030_v56 = vsub.f32 %v12850_v27, %v2547_v52  ;;  %v2578_v58 = vmul.f32 %v13027_v18, %v13027_v18  ;;  %v15962_v52 = vmov 0  }
 0x442   :  { %2598 = vadd.xlane.f32.xlu1 %v2578_v58  ;;  %v2579_v34 = vmul.f32 %v13030_v56, %v13030_v56  ;;  %v13123_v58 = vld [vmem:[%s15792_s11 + $0x30] sm:$0xff] }
 0x443   :  { %v2522_v31 = vpop.xlane.xlu1 %2521 }
 0x444   :  { %v2548_v62 = vmul.f32 0.0078125, %v2522_v31  ;;  %2600 = vadd.xlane.f32.xlu0 %v2579_v34  ;;  %v13129_v34 = vld [vmem:[%s15792_s11 + $0x38] sm:$0xff]  ;;  %v13135_v31 = vld [vmem:[%s15792_s11 + $0x48] sm:$0xff] }
 0x445   :  { %v2524_v24 = vpop.xlane.xlu0 %2523 }
 0x446   :  { %v13037_v4 = vsub.f32 %v12877_v11, %v2548_v62  ;;  %v2549_v33 = vmul.f32 0.0078125, %v2524_v24  ;;  %v13141_v62 = vld [vmem:[%s15792_s11 + $0x50] sm:$0xff]  ;;  %v13147_v24 = vld [vmem:[%s15792_s11 + $0x58] sm:$0xff] }
 0x448   :  { %v13040_v42 = vsub.f32 %v12888_v2, %v2549_v33  ;;  %v2580_v27 = vmul.f32 %v13037_v4, %v13037_v4 }
 0x44a   :  { %2602 = vadd.xlane.f32.xlu1 %v2580_v27  ;;  %v2581_v41 = vmul.f32 %v13040_v42, %v13040_v42 }
 0x44b   :  { %v2526_v32 = vpop.xlane.xlu1 %2525 }
 0x44c   :  { %v2550_v7 = vmul.f32 0.0078125, %v2526_v32  ;;  %2604 = vadd.xlane.f32.xlu0 %v2581_v41 }
 0x44d   :  { %v2528_v60 = vpop.xlane.xlu0 %2527 }
 0x44e   :  { %v13047_v15 = vsub.f32 %v12915_v3, %v2550_v7  ;;  %v2551_v11 = vmul.f32 0.0078125, %v2528_v60 }
 0x450   :  { %v13050_v39 = vsub.f32 %v12926_v6, %v2551_v11  ;;  %v2582_v2 = vmul.f32 %v13047_v15, %v13047_v15 }
 0x452   :  { %2606 = vadd.xlane.f32.xlu1 %v2582_v2  ;;  %v2583_v14 = vmul.f32 %v13050_v39, %v13050_v39 }
 0x453   :  { %v2530_v17 = vpop.xlane.xlu1 %2529 }
 0x454   :  { %v2552_v26 = vmul.f32 0.0078125, %v2530_v17  ;;  %2608 = vadd.xlane.f32.xlu0 %v2583_v14 }
 0x455   :  { %v2532_v21 = vpop.xlane.xlu0 %2531 }
 0x456   :  { %v13057_v61 = vsub.f32 %v12953_v29, %v2552_v26  ;;  %v2553_v3 = vmul.f32 0.0078125, %v2532_v21 }
 0x458   :  { %v13060_v20 = vsub.f32 %v12962_v40, %v2553_v3  ;;  %v2584_v6 = vmul.f32 %v13057_v61, %v13057_v61 }
 0x45a   :  { %2610 = vadd.xlane.f32.xlu1 %v2584_v6  ;;  %v2585_v25 = vmul.f32 %v13060_v20, %v13060_v20 }
 0x45b   :  { %v2534_v37 = vpop.xlane.xlu1 %2533 }
 0x45c   :  { %v2554_v50 = vmul.f32 0.0078125, %v2534_v37  ;;  %2612 = vadd.xlane.f32.xlu0 %v2585_v25 }
 0x45d   :  { %v2536_v49 = vpop.xlane.xlu0 %2535 }
 0x45e   :  { %v13067_v59 = vsub.f32 %v12983_v38, %v2554_v50  ;;  %v2555_v29 = vmul.f32 0.0078125, %v2536_v49 }
 0x460   :  { %v13070_v54 = vsub.f32 %v12990_v57, %v2555_v29  ;;  %v2586_v40 = vmul.f32 %v13067_v59, %v13067_v59 }
 0x462   :  { %2614 = vadd.xlane.f32.xlu1 %v2586_v40  ;;  %v2587_v30 = vmul.f32 %v13070_v54, %v13070_v54 }
 0x463   :  { %v2538_v10 = vpop.xlane.xlu1 %2537 }
 0x464   :  { %v2556_v0 = vmul.f32 0.0078125, %v2538_v10  ;;  %2616 = vadd.xlane.f32.xlu0 %v2587_v30  ;;  %v13154_v10 = vld [vmem:[%s15792_s11 + $0x68] sm:$0xff] }
 0x465   :  { %v2540_v36 = vpop.xlane.xlu0 %2539 }
 0x466   :  { %v13077_v47 = vsub.f32 %v12997_v53, %v2556_v0  ;;  %v2557_v38 = vmul.f32 0.0078125, %v2540_v36  ;;  %v61_v53 = vld [vmem:[%s15792_s11 + $0x8] sm:$0xff]  ;;  %v13160_v36 = vld [vmem:[%s15792_s11 + $0x60] sm:$0xff] }
 0x468   :  { %v13080_v44 = vsub.f32 %v13000_v19, %v2557_v38  ;;  %v2588_v57 = vmul.f32 %v13077_v47, %v13077_v47  ;;  %v13095_v19 = vld [vmem:[%s15792_s11 + $0x20] sm:$0xff] }
 0x46a   :  { %2618 = vadd.xlane.f32.xlu1 %v2588_v57  ;;  %v2589_v22 = vmul.f32 %v13080_v44, %v13080_v44 }
 0x46c   :  { %2620 = vadd.xlane.f32.xlu0 %v2589_v22 }
 0x47b   :  { %2784 = vperm.xlu1 %10803, %v60_v9  }
 0x47f   :  { %2789 = vperm.xlu1 %10803, %v61_v53  }
 0x482   :  { %2804 = vperm.xlu0 %10804, %v13095_v19  }
 0x483   :  { %2794 = vperm.xlu1 %10803, %v62_v45  }
 0x486   :  { %2824 = vperm.xlu0 %10804, %v13104_v51  }
 0x487   :  { %2799 = vperm.xlu1 %10803, %v13109_v23  }
 0x48a   :  { %10806 = vset.pattern.permute.xlu0 %v15962_v52 }
 0x48b   :  { %2809 = vperm.xlu1 %10803, %v13116_v46  }
 0x48f   :  { %2814 = vperm.xlu1 %10803, %v13123_v58  }
 0x493   :  { %2819 = vperm.xlu1 %10803, %v13129_v34  }
 0x497   :  { %2829 = vperm.xlu1 %10803, %v13135_v31  }
 0x49b   :  { %2834 = vperm.xlu1 %10803, %v13141_v62  }
 0x49f   :  { %2839 = vperm.xlu1 %10803, %v13147_v24  }
 0x4a3   :  { %10805 = vset.pattern.permute.xlu1 %v15962_v52 }
 0x4bf   :  { %v2591_v33 = vpop.xlane.xlu1 %2590 }
 0x4c0   :  { %v2622_v27 = vmul.f32 0.0078125, %v2591_v33 }
 0x4c1   :  { %v2593_v41 = vpop.xlane.xlu0 %2592 }
 0x4c2   :  { %v2638_v32 = vadd.f32 1e-05, %v2622_v27  ;;  %v2623_v7 = vmul.f32 0.0078125, %v2593_v41 }
 0x4c4   :  { %11504 = vrsqrt.f32 %v2638_v32  ;;  %v2639_v60 = vadd.f32 1e-05, %v2623_v7 }
 0x4c6   :  { %11506 = vrsqrt.f32 %v2639_v60 }
 0x4c7   :  { %v2595_v11 = vpop.xlane.xlu1 %2594 }
 0x4c8   :  { %v2624_v2 = vmul.f32 0.0078125, %v2595_v11 }
 0x4ca   :  { %v2640_v14 = vadd.f32 1e-05, %v2624_v2 }
 0x4cb   :  { %v2597_v17 = vpop.xlane.xlu0 %2596 }
 0x4cc   :  { %11508 = vrsqrt.f32 %v2640_v14  ;;  %v2625_v26 = vmul.f32 0.0078125, %v2597_v17 }
 0x4ce   :  { %v11505_v21 = vpop.eup %11504  ;;  %v2641_v3 = vadd.f32 1e-05, %v2625_v26 }
 0x4cf   :  { %v2599_v6 = vpop.xlane.xlu1 %2598  ;;  %v2670_v25 = vmul.f32 %v11505_v21, %v60_v9 }
 0x4d0   :  { %v11507_v37 = vpop.eup %11506  ;;  %11510 = vrsqrt.f32 %v2641_v3  ;;  %v2626_v50 = vmul.f32 0.0078125, %v2599_v6 }
 0x4d1   :  { %2688 = vperm.xlu1 %10805, %v2670_v25   ;;  %v2601_v49 = vpop.xlane.xlu0 %2600  ;;  %v2671_v29 = vmul.f32 %v11507_v37, %v61_v53 }
 0x4d2   :  { %v2642_v40 = vadd.f32 1e-05, %v2626_v50  ;;  %v2627_v30 = vmul.f32 0.0078125, %v2601_v49 }
 0x4d3   :  { %2693 = vperm.xlu0 %10806, %v2671_v29  }
 0x4d4   :  { %11512 = vrsqrt.f32 %v2642_v40  ;;  %v2643_v0 = vadd.f32 1e-05, %v2627_v30 }
 0x4d5   :  { %10808 = vset.pattern.permute.xlu1 %v11700_v16 }
 0x4d6   :  { %v11509_v38 = vpop.eup %11508  ;;  %2849 = vperm.xlu1 %10808, %v13154_v10   ;;  %11514 = vrsqrt.f32 %v2643_v0 }
 0x4d7   :  { %v2603_v57 = vpop.xlane.xlu1 %2602  ;;  %10807 = vset.pattern.permute.xlu0 %v11700_v16  ;;  %v2672_v53 = vmul.f32 %v11509_v38, %v62_v45 }
 0x4d8   :  { %v2628_v22 = vmul.f32 0.0078125, %v2603_v57  ;;  %2844 = vperm.xlu0 %10807, %v13160_v36  }
 0x4d9   :  { %v2605_v9 = vpop.xlane.xlu0 %2604 }
 0x4da   :  { %v11511_v33 = vpop.eup %11510  ;;  %v2644_v27 = vadd.f32 1e-05, %v2628_v22  ;;  %v2629_v41 = vmul.f32 0.0078125, %v2605_v9  ;;  %10809 = vset.pattern.permute.xlu1 %v15962_v52 }
 0x4db   :  { %2698 = vperm.xlu1 %10809, %v2672_v53   ;;  %v2673_v7 = vmul.f32 %v11511_v33, %v13109_v23 }
 0x4dc   :  { %11516 = vrsqrt.f32 %v2644_v27  ;;  %v2645_v32 = vadd.f32 1e-05, %v2629_v41  ;;  %10810 = vset.pattern.permute.xlu0 %v15962_v52 }
 0x4de   :  { %v11513_v60 = vpop.eup %11512  ;;  %11518 = vrsqrt.f32 %v2645_v32 }
 0x4df   :  { %v2607_v11 = vpop.xlane.xlu1 %2606  ;;  %2703 = vperm.xlu1 %10809, %v2673_v7   ;;  %v2674_v45 = vmul.f32 %v11513_v60, %v13095_v19 }
 0x4e0   :  { %v2630_v2 = vmul.f32 0.0078125, %v2607_v11  ;;  %v11515_v17 = vpop.eup %11514 }
 0x4e1   :  { %v2609_v14 = vpop.xlane.xlu0 %2608  ;;  %v2675_v6 = vmul.f32 %v11515_v17, %v13116_v46 }
 0x4e2   :  { %v2646_v26 = vadd.f32 1e-05, %v2630_v2  ;;  %v2631_v21 = vmul.f32 0.0078125, %v2609_v14 }
 0x4e3   :  { %2708 = vperm.xlu1 %10809, %v2674_v45  }
 0x4e4   :  { %11520 = vrsqrt.f32 %v2646_v26  ;;  %v2647_v3 = vadd.f32 1e-05, %v2631_v21 }
 0x4e6   :  { %v11517_v25 = vpop.eup %11516  ;;  %11522 = vrsqrt.f32 %v2647_v3 }
 0x4e7   :  { %v2611_v37 = vpop.xlane.xlu1 %2610  ;;  %2713 = vperm.xlu1 %10809, %v2675_v6   ;;  %v2676_v29 = vmul.f32 %v11517_v25, %v13123_v58 }
 0x4e8   :  { %v11519_v23 = vpop.eup %11518  ;;  %v2632_v50 = vmul.f32 0.0078125, %v2611_v37 }
 0x4e9   :  { %v2613_v49 = vpop.xlane.xlu0 %2612  ;;  %v2677_v40 = vmul.f32 %v11519_v23, %v13129_v34 }
 0x4ea   :  { %v2648_v19 = vadd.f32 1e-05, %v2632_v50  ;;  %v2633_v30 = vmul.f32 0.0078125, %v2613_v49 }
 0x4eb   :  { %2718 = vperm.xlu1 %10809, %v2676_v29   ;;  %2723 = vperm.xlu0 %10810, %v2677_v40  }
 0x4ec   :  { %11524 = vrsqrt.f32 %v2648_v19  ;;  %v2649_v0 = vadd.f32 1e-05, %v2633_v30 }
 0x4ee   :  { %v11521_v38 = vpop.eup %11520  ;;  %11526 = vrsqrt.f32 %v2649_v0 }
 0x4ef   :  { %v2615_v46 = vpop.xlane.xlu1 %2614  ;;  %v2678_v57 = vmul.f32 %v11521_v38, %v13104_v51 }
 0x4f0   :  { %v11523_v22 = vpop.eup %11522  ;;  %v2634_v9 = vmul.f32 0.0078125, %v2615_v46 }
 0x4f1   :  { %2728 = vperm.xlu0 %10810, %v2678_v57   ;;  %v2617_v53 = vpop.xlane.xlu0 %2616  ;;  %v2679_v33 = vmul.f32 %v11523_v22, %v13135_v31 }
 0x4f2   :  { %v2650_v58 = vadd.f32 1e-05, %v2634_v9  ;;  %v2635_v27 = vmul.f32 0.0078125, %v2617_v53 }
 0x4f3   :  { %2733 = vperm.xlu1 %10809, %v2679_v33  }
 0x4f4   :  { %11528 = vrsqrt.f32 %v2650_v58  ;;  %v2651_v34 = vadd.f32 1e-05, %v2635_v27 }
 0x4f6   :  { %v11525_v41 = vpop.eup %11524  ;;  %11530 = vrsqrt.f32 %v2651_v34 }
 0x4f7   :  { %v2619_v32 = vpop.xlane.xlu1 %2618  ;;  %v2680_v7 = vmul.f32 %v11525_v41, %v13141_v62  ;;  %v74_v62 = vld [vmem:[%s15792_s11 + $0x70] sm:$0xff] }
 0x4f8   :  { %v11527_v60 = vpop.eup %11526  ;;  %v2636_v11 = vmul.f32 0.0078125, %v2619_v32 }
 0x4f9   :  { %2738 = vperm.xlu1 %10809, %v2680_v7   ;;  %v2621_v51 = vpop.xlane.xlu0 %2620  ;;  %v2681_v2 = vmul.f32 %v11527_v60, %v13147_v24  ;;  %v75_v24 = vld [vmem:[%s15792_s11 + $0x78] sm:$0xff] }
 0x4fa   :  { %v2652_v14 = vadd.f32 1e-05, %v2636_v11  ;;  %v2637_v45 = vmul.f32 0.0078125, %v2621_v51 }
 0x4fb   :  { %2743 = vperm.xlu0 %10810, %v2681_v2  }
 0x4fc   :  { %11532 = vrsqrt.f32 %v2652_v14  ;;  %v2653_v31 = vadd.f32 1e-05, %v2637_v45 }
 0x4fe   :  { %v11529_v17 = vpop.eup %11528  ;;  %11534 = vrsqrt.f32 %v2653_v31 }
 0x4ff   :  { %v2682_v26 = vmul.f32 %v11529_v17, %v13160_v36  ;;  %v11082_v36 = vld [vmem:[%s15785_s4] sm:$0xff]  }
 0x500   :  { %v11531_v21 = vpop.eup %11530  ;;  %10563 = vmatprep.mubr.bf16.mxu1 %v11082_v36 }
 0x501   :  { %2748 = vperm.xlu0 %10810, %v2682_v26   ;;  %v2683_v3 = vmul.f32 %v11531_v21, %v13154_v10  ;;  %v2785_v10 = vpop.permute.xlu1 %2784  ;;  %v2805_v46 = vpop.permute.xlu0 %2804 }
 0x503   :  { %2753 = vperm.xlu1 %10809, %v2683_v3  }
 0x505   :  { %v2790_v50 = vpop.permute.xlu1 %2789  ;;  %v13194_v57 = vpop.permute.xlu0 %2824 }
 0x506   :  { %v11533_v6 = vpop.eup %11532 }
 0x507   :  { %v2684_v25 = vmul.f32 %v11533_v6, %v74_v62 }
 0x508   :  { %v11535_v37 = vpop.eup %11534 }
 0x509   :  { %2758 = vperm.xlu1 %10809, %v2684_v25   ;;  %v2685_v23 = vmul.f32 %v11535_v37, %v75_v24  ;;  %v2795_v49 = vpop.permute.xlu1 %2794 }
 0x50b   :  { %2763 = vperm.xlu0 %10810, %v2685_v23  }
 0x50d   :  { %10811 = vset.pattern.permute.xlu1 %v11700_v16  ;;  %v2800_v29 = vpop.permute.xlu1 %2799 }
 0x50e   :  { %2854 = vperm.xlu1 %10811, %v74_v62  }
 0x511   :  { %v2810_v40 = vpop.permute.xlu1 %2809 }
 0x512   :  { %2859 = vperm.xlu1 %10811, %v75_v24  }
 0x515   :  { %v2815_v19 = vpop.permute.xlu1 %2814 }
 0x519   :  { %v2820_v30 = vpop.permute.xlu1 %2819 }
 0x51d   :  { %v13188_v0 = vpop.permute.xlu1 %2829 }
 0x521   :  { %v13190_v38 = vpop.permute.xlu1 %2834 }
 0x525   :  { %v13192_v16 = vpop.permute.xlu1 %2839 }
 0x550   :  { %v2689_v22 = vpop.permute.xlu1 %2688 }
 0x551   :  { %v2766_v9 = vmul.f32 %v2689_v22, %v13007_v28 }
 0x552   :  { %v2694_v53 = vpop.permute.xlu0 %2693 }
 0x553   :  { %v2862_v33 = vadd.f32 %v2785_v10, %v2766_v9  ;;  %v2767_v58 = vmul.f32 %v2694_v53, %v13010_v35 }
 0x555   :  { %v2894_v27 = vmul.f32 0.2, %v2862_v33  ;;  %v2863_v34 = vadd.f32 %v2790_v50, %v2767_v58  ;;  %v13198_v41 = vpop.permute.xlu1 %2849  ;;  %vm2878_vm0 = vcmp.ge.f32.partialorder %v2862_v33, 0.0 }
 0x557   :  { %v2895_v32 = vmul.f32 0.2, %v2863_v34  ;;  %vm2879_vm1 = vcmp.ge.f32.partialorder %v2863_v34, 0.0  ;;  %v2910_v7 = vsel %vm2878_vm0, %v2862_v33, %v2894_v27  ;;  %v13207_v3 = vpop.permute.xlu0 %2844  ;;  %vm4257_vm0 = vcmask 523264  }
 0x559   :  { %v2911_v60 = vsel %vm2879_vm1, %v2863_v34, %v2895_v32 }
 0x55a   :  { %v2699_v11 = vpop.permute.xlu1 %2698  ;;  %v13200_v51 = vpack.c.bf16 %v2911_v60, %v2910_v7 }
 0x55b   :  { %v2768_v2 = vmul.f32 %v2699_v11, %v13017_v63 }
 0x55c   :  { %15963 = vst [vmem:[#allocation73_spill] sm:$0xff] %v13200_v51  ;;  %10547 = vmatprep.subr.bf16.mxu1 %v13200_v51 }
 0x55d   :  { %v2864_v28 = vadd.f32 %v2795_v49, %v2768_v2  ;;  %10548 = vmatpush3.bf16.msra.mxu1 %v13200_v51 }
 0x55e   :  { %v2704_v35 = vpop.permute.xlu1 %2703 }
 0x55f   :  { %v2769_v14 = vmul.f32 %v2704_v35, %v13022_v5  ;;  %v2896_v45 = vmul.f32 0.2, %v2864_v28  ;;  %vm2880_vm2 = vcmp.ge.f32.partialorder %v2864_v28, 0.0 }
 0x561   :  { %v2865_v31 = vadd.f32 %v2800_v29, %v2769_v14  ;;  %v2912_v63 = vsel %vm2880_vm2, %v2864_v28, %v2896_v45 }
 0x562   :  { %v2709_v17 = vpop.permute.xlu1 %2708 }
 0x563   :  { %v2897_v26 = vmul.f32 0.2, %v2865_v31  ;;  %v2770_v21 = vmul.f32 %v2709_v17, %v13027_v18  ;;  %vm2881_vm3 = vcmp.ge.f32.partialorder %v2865_v31, 0.0 }
 0x565   :  { %v2866_v62 = vadd.f32 %v2805_v46, %v2770_v21  ;;  %v2913_v6 = vsel %vm2881_vm3, %v2865_v31, %v2897_v26 }
 0x566   :  { %v2714_v24 = vpop.permute.xlu1 %2713  ;;  %v13209_v25 = vpack.c.bf16 %v2913_v6, %v2912_v63 }
 0x567   :  { %v2771_v37 = vmul.f32 %v2714_v24, %v13030_v56  ;;  %v2898_v5 = vmul.f32 0.2, %v2866_v62  ;;  %vm2882_vm4 = vcmp.ge.f32.partialorder %v2866_v62, 0.0 }
 0x568   :  { %15964 = vst [vmem:[#allocation5_spill] sm:$0xff] %v13209_v25  ;;  %10549 = vmatprep.subr.bf16.mxu1 %v13209_v25 }
 0x569   :  { %v2867_v23 = vadd.f32 %v2810_v40, %v2771_v37  ;;  %10550 = vmatpush3.bf16.msra.mxu1 %v13209_v25  ;;  %v2914_v22 = vsel %vm2882_vm4, %v2866_v62, %v2898_v5 }
 0x56a   :  { %v2719_v10 = vpop.permute.xlu1 %2718  ;;  %v2724_v36 = vpop.permute.xlu0 %2723 }
 0x56b   :  { %v2899_v18 = vmul.f32 0.2, %v2867_v23  ;;  %v2772_v50 = vmul.f32 %v2719_v10, %v13037_v4  ;;  %v2773_v49 = vmul.f32 %v2724_v36, %v13040_v42  ;;  %vm2883_vm5 = vcmp.ge.f32.partialorder %v2867_v23, 0.0 }
 0x56d   :  { %v2868_v29 = vadd.f32 %v2815_v19, %v2772_v50  ;;  %v2869_v46 = vadd.f32 %v2820_v30, %v2773_v49  ;;  %v2915_v9 = vsel %vm2883_vm5, %v2867_v23, %v2899_v18 }
 0x56e   :  { %v13216_v56 = vpack.c.bf16 %v2915_v9, %v2914_v22 }
 0x56f   :  { %v2900_v53 = vmul.f32 0.2, %v2868_v29  ;;  %v2901_v33 = vmul.f32 0.2, %v2869_v46  ;;  %vm2884_vm6 = vcmp.ge.f32.partialorder %v2868_v29, 0.0  ;;  %vm2885_vm7 = vcmp.ge.f32.partialorder %v2869_v46, 0.0 }
 0x570   :  { %15965 = vst [vmem:[#allocation50_spill] sm:$0xff] %v13216_v56  ;;  %10551 = vmatprep.subr.bf16.mxu1 %v13216_v56  ;;  %v2729_v40 = vpop.permute.xlu0 %2728 }
 0x571   :  { %v2774_v58 = vmul.f32 %v2729_v40, %v13047_v15  ;;  %10552 = vmatpush3.bf16.msra.mxu1 %v13216_v56  ;;  %v2916_v4 = vsel %vm2884_vm6, %v2868_v29, %v2900_v53  ;;  %v2917_v42 = vsel %vm2885_vm7, %v2869_v46, %v2901_v33  ;;  %v11085_v53 = vld [vmem:[%s15785_s4 + $0x18] sm:$0xff]   ;;  %v11086_v33 = vld [vmem:[%s15785_s4 + $0x20] sm:$0xff]   ;;  %v11087_v40 = vld [vmem:[%s15785_s4 + $0x28] sm:$0xff]  }
 0x572   :  { %v2734_v27 = vpop.permute.xlu1 %2733  ;;  %v13221_v19 = vpack.c.bf16 %v2917_v42, %v2916_v4  ;;  %v11089_v4 = vld [vmem:[%s15785_s4 + $0x38] sm:$0xff]   ;;  %v11090_v42 = vld [vmem:[%s15785_s4 + $0x40] sm:$0xff]  }
 0x573   :  { %v2870_v30 = vadd.f32 %v13194_v57, %v2774_v58  ;;  %v2775_v34 = vmul.f32 %v2734_v27, %v13050_v39  ;;  %v11088_v58 = vld [vmem:[%s15785_s4 + $0x30] sm:$0xff]   ;;  %v11091_v27 = vld [vmem:[%s15785_s4 + $0x48] sm:$0xff]  }
 0x574   :  { %15966 = vst [vmem:[#allocation61_spill] sm:$0xff] %v13221_v19  ;;  %10553 = vmatprep.subr.bf16.mxu1 %v13221_v19 }
 0x575   :  { %v2902_v32 = vmul.f32 0.2, %v2870_v30  ;;  %v2871_v7 = vadd.f32 %v13188_v0, %v2775_v34  ;;  %10554 = vmatpush3.bf16.msra.mxu1 %v13221_v19  ;;  %vm2886_vm8 = vcmp.ge.f32.partialorder %v2870_v30, 0.0  ;;  %v11093_v34 = vld [vmem:[%s15785_s4 + $0x58] sm:$0xff]  }
 0x577   :  { %v2903_v15 = vmul.f32 0.2, %v2871_v7  ;;  %vm2887_vm9 = vcmp.ge.f32.partialorder %v2871_v7, 0.0  ;;  %v2918_v2 = vsel %vm2886_vm8, %v2870_v30, %v2902_v32  ;;  %v11092_v30 = vld [vmem:[%s15785_s4 + $0x50] sm:$0xff]   ;;  %v11094_v32 = vld [vmem:[%s15785_s4 + $0x60] sm:$0xff]  }
 0x578   :  { %v2739_v60 = vpop.permute.xlu1 %2738 }
 0x579   :  { %v2776_v11 = vmul.f32 %v2739_v60, %v13057_v61  ;;  %v2919_v28 = vsel %vm2887_vm9, %v2871_v7, %v2903_v15  ;;  %v11095_v7 = vld [vmem:[%s15785_s4 + $0x68] sm:$0xff]   ;;  %v11096_v15 = vld [vmem:[%s15785_s4 + $0x70] sm:$0xff]   ;;  %v11097_v60 = vld [vmem:[%s15785_s4 + $0x78] sm:$0xff]   ;;  %vm11706_vm9 = vmmov 0  }
 0x57a   :  { %v2744_v35 = vpop.permute.xlu0 %2743  ;;  %v13229_v14 = vpack.c.bf16 %v2919_v28, %v2918_v2  ;;  %v11099_v2 = vld [vmem:[%s15785_s4 + $0x88] sm:$0xff]   ;;  %v11100_v28 = vld [vmem:[%s15785_s4 + $0x90] sm:$0xff]  }
 0x57b   :  { %v2872_v39 = vadd.f32 %v13190_v38, %v2776_v11  ;;  %v2777_v57 = vmul.f32 %v2744_v35, %v13060_v20  ;;  %v11098_v11 = vld [vmem:[%s15785_s4 + $0x80] sm:$0xff]   ;;  %v11101_v35 = vld [vmem:[%s15785_s4 + $0x98] sm:$0xff]  }
 0x57c   :  { %15967 = vst [vmem:[#allocation14_spill] sm:$0xff] %v13229_v14  ;;  %10555 = vmatprep.subr.bf16.mxu1 %v13229_v14 }
 0x57d   :  { %v2904_v0 = vmul.f32 0.2, %v2872_v39  ;;  %v2873_v45 = vadd.f32 %v13192_v16, %v2777_v57  ;;  %10556 = vmatpush3.bf16.msra.mxu1 %v13229_v14  ;;  %vm2888_vm10 = vcmp.ge.f32.partialorder %v2872_v39, 0.0  ;;  %v11103_v57 = vld [vmem:[%s15785_s4 + $0xa8] sm:$0xff]  }
 0x57f   :  { %v2905_v31 = vmul.f32 0.2, %v2873_v45  ;;  %vm2889_vm11 = vcmp.ge.f32.partialorder %v2873_v45, 0.0  ;;  %v2920_v26 = vsel %vm2888_vm10, %v2872_v39, %v2904_v0  ;;  %v11102_v39 = vld [vmem:[%s15785_s4 + $0xa0] sm:$0xff]   ;;  %v11104_v0 = vld [vmem:[%s15785_s4 + $0xb0] sm:$0xff]  }
 0x580   :  { %v2749_v61 = vpop.permute.xlu0 %2748 }
 0x581   :  { %v2778_v17 = vmul.f32 %v2749_v61, %v13067_v59  ;;  %v2921_v21 = vsel %vm2889_vm11, %v2873_v45, %v2905_v31  ;;  %v11105_v45 = vld [vmem:[%s15785_s4 + $0xb8] sm:$0xff]   ;;  %v11106_v31 = vld [vmem:[%s15785_s4 + $0xc0] sm:$0xff]   ;;  %v11107_v61 = vld [vmem:[%s15785_s4 + $0xc8] sm:$0xff]  }
 0x582   :  { %v2754_v62 = vpop.permute.xlu1 %2753  ;;  %v13237_v63 = vpack.c.bf16 %v2921_v21, %v2920_v26  ;;  %v11109_v26 = vld [vmem:[%s15785_s4 + $0xd8] sm:$0xff]   ;;  %v11110_v21 = vld [vmem:[%s15785_s4 + $0xe0] sm:$0xff]  }
 0x583   :  { %v2874_v20 = vadd.f32 %v13207_v3, %v2778_v17  ;;  %v2779_v38 = vmul.f32 %v2754_v62, %v13070_v54  ;;  %v11108_v17 = vld [vmem:[%s15785_s4 + $0xd0] sm:$0xff]   ;;  %v11111_v62 = vld [vmem:[%s15785_s4 + $0xe8] sm:$0xff]  }
 0x584   :  { %15968 = vst [vmem:[#allocation21_spill] sm:$0xff] %v13237_v63  ;;  %10557 = vmatprep.subr.bf16.mxu1 %v13237_v63 }
 0x585   :  { %v2906_v16 = vmul.f32 0.2, %v2874_v20  ;;  %v2875_v6 = vadd.f32 %v13198_v41, %v2779_v38  ;;  %10558 = vmatpush3.bf16.msra.mxu1 %v13237_v63  ;;  %vm2890_vm12 = vcmp.ge.f32.partialorder %v2874_v20, 0.0  ;;  %v11113_v38 = vld [vmem:[%s15785_s4 + $0xf8] sm:$0xff]  }
 0x587   :  { %v2907_v24 = vmul.f32 0.2, %v2875_v6  ;;  %vm2891_vm13 = vcmp.ge.f32.partialorder %v2875_v6, 0.0  ;;  %v2922_v37 = vsel %vm2890_vm12, %v2874_v20, %v2906_v16  ;;  %v11112_v20 = vld [vmem:[%s15785_s4 + $0xf0] sm:$0xff]   ;;  %v11114_v16 = vld [vmem:[%s15785_s4 + $0x100] sm:$0xff]  }
 0x588   :  { %v2759_v59 = vpop.permute.xlu1 %2758 }
 0x589   :  { %v2923_v5 = vsel %vm2891_vm13, %v2875_v6, %v2907_v24  ;;  %v2780_v10 = vmul.f32 %v2759_v59, %v13077_v47  ;;  %v11083_v47 = vld [vmem:[%s15785_s4 + $0x8] sm:$0xff]   ;;  %v11116_v24 = vld [vmem:[%s15785_s4 + $0x110] sm:$0xff]   ;;  %v11117_v59 = vld [vmem:[%s15785_s4 + $0x118] sm:$0xff]  }
 0x58a   :  { %v13244_v23 = vpack.c.bf16 %v2923_v5, %v2922_v37  ;;  %v2764_v54 = vpop.permute.xlu0 %2763  ;;  %v11115_v6 = vld [vmem:[%s15785_s4 + $0x108] sm:$0xff]  }
 0x58b   :  { %v2781_v41 = vmul.f32 %v2764_v54, %v13080_v44  ;;  %v11084_v44 = vld [vmem:[%s15785_s4 + $0x10] sm:$0xff]  }
 0x58c   :  { %15969 = vst [vmem:[#allocation62_spill] sm:$0xff] %v13244_v23  ;;  %10559 = vmatprep.subr.bf16.mxu1 %v13244_v23 }
 0x58d   :  { %v2855_v3 = vpop.permute.xlu1 %2854  ;;  %10560 = vmatpush3.bf16.msra.mxu1 %v13244_v23 }
 0x58e   :  { %v2876_v36 = vadd.f32 %v2855_v3, %v2780_v10 }
 0x590   :  { %v2908_v50 = vmul.f32 0.2, %v2876_v36  ;;  %vm2892_vm14 = vcmp.ge.f32.partialorder %v2876_v36, 0.0 }
 0x591   :  { %v2860_v18 = vpop.permute.xlu1 %2859 }
 0x592   :  { %v2877_v49 = vadd.f32 %v2860_v18, %v2781_v41  ;;  %v2924_v46 = vsel %vm2892_vm14, %v2876_v36, %v2908_v50  ;;  %vm4815_vm14 = vcmask 261120  }
 0x594   :  { %vm2893_vm15 = vcmp.ge.f32.partialorder %v2877_v49, 0.0  ;;  %v2909_v29 = vmul.f32 0.2, %v2877_v49 }
 0x596   :  { %v2925_v22 = vsel %vm2893_vm15, %v2877_v49, %v2909_v29 }
 0x597   :  { %v13250_v9 = vpack.c.bf16 %v2925_v22, %v2924_v46 }
 0x599   :  { %15970 = vst [vmem:[#allocation74_spill] sm:$0xff] %v13250_v9  ;;  %10561 = vmatprep.subr.bf16.mxu1 %v13250_v9 }
 0x59a   :  { %10562 = vmatpush3.bf16.msra.mxu1 %v13250_v9 }
 0x59d   :  { %10564 = vmatmul.mubr.bf16.vlgmr.msra.gmra.mrb[0].mxu1 %v11083_v47 }
 0x59e   :  { %10567 = vmatprep.mubr.bf16.mxu1 %v11084_v44 }
 0x5a5   :  { %10568 = vmatmul.mubr.bf16.gmra.mrb[4].mxu1 %v11085_v53 }
 0x5a6   :  { %10571 = vmatprep.mubr.bf16.mxu1 %v11086_v33 }
 0x5ad   :  { %10572 = vmatmul.mubr.bf16.gmra.mrb[8].mxu1 %v11087_v40 }
 0x5ae   :  { %10575 = vmatprep.mubr.bf16.mxu1 %v11088_v58 }
 0x5b5   :  { %10576 = vmatmul.mubr.bf16.gmra.mrb[12].mxu1 %v11089_v4 }
 0x5b6   :  { %10579 = vmatprep.mubr.bf16.mxu1 %v11090_v42 }
 0x5bd   :  { %10580 = vmatmul.mubr.bf16.gmra.mrb[16].mxu1 %v11091_v27 }
 0x5be   :  { %10583 = vmatprep.mubr.bf16.mxu1 %v11092_v30 }
 0x5c5   :  { %10584 = vmatmul.mubr.bf16.gmra.mrb[20].mxu1 %v11093_v34 }
 0x5c6   :  { %10587 = vmatprep.mubr.bf16.mxu1 %v11094_v32 }
 0x5cd   :  { %10588 = vmatmul.mubr.bf16.gmra.mrb[24].mxu1 %v11095_v7 }
 0x5ce   :  { %10591 = vmatprep.mubr.bf16.mxu1 %v11096_v15 }
 0x5d5   :  { %10592 = vmatmul.mubr.bf16.gmra.mrb[28].mxu1 %v11097_v60 }
 0x5d6   :  { %10595 = vmatprep.mubr.bf16.mxu1 %v11098_v11 }
 0x5dd   :  { %10596 = vmatmul.mubr.bf16.gmra.mrb[32].mxu1 %v11099_v2 }
 0x5de   :  { %10599 = vmatprep.mubr.bf16.mxu1 %v11100_v28 }
 0x5e5   :  { %10600 = vmatmul.mubr.bf16.gmra.mrb[36].mxu1 %v11101_v35 }
 0x5e6   :  { %10603 = vmatprep.mubr.bf16.mxu1 %v11102_v39 }
 0x5ed   :  { %10604 = vmatmul.mubr.bf16.gmra.mrb[40].mxu1 %v11103_v57 }
 0x5ee   :  { %10607 = vmatprep.mubr.bf16.mxu1 %v11104_v0 }
 0x5f5   :  { %10608 = vmatmul.mubr.bf16.gmra.mrb[44].mxu1 %v11105_v45 }
 0x5f6   :  { %10611 = vmatprep.mubr.bf16.mxu1 %v11106_v31 }
 0x5fd   :  { %10612 = vmatmul.mubr.bf16.gmra.mrb[48].mxu1 %v11107_v61 }
 0x5fe   :  { %10615 = vmatprep.mubr.bf16.mxu1 %v11108_v17 }
 0x605   :  { %10616 = vmatmul.mubr.bf16.gmra.mrb[52].mxu1 %v11109_v26 }
 0x606   :  { %10619 = vmatprep.mubr.bf16.mxu1 %v11110_v21 }
 0x60d   :  { %10620 = vmatmul.mubr.bf16.gmra.mrb[56].mxu1 %v11111_v62 }
 0x60e   :  { %10623 = vmatprep.mubr.bf16.mxu1 %v11112_v20 }
 0x615   :  { %10624 = vmatmul.mubr.bf16.gmra.mrb[60].mxu1 %v11113_v38 }
 0x616   :  { %10627 = vmatprep.mubr.bf16.mxu1 %v11114_v16 }
 0x61d   :  { %10628 = vmatmul.mubr.bf16.gmra.mrb[64].mxu1 %v11115_v6 }
 0x61e   :  { %10631 = vmatprep.mubr.bf16.mxu1 %v11116_v24 }
 0x625   :  { %10632 = vmatmul.mubr.bf16.gmra.mrb[68].mxu1 %v11117_v59 }
 0x670   :  { %v10565_v37 = vpop.f32.mrb[0].mxu1 }
 0x671   :  { %3555 = vrot.lane.b32.xlu0 %v10565_v37, %s11693_s22  ;;  %v3256_v5 = vpop.f32.mrb[1].mxu1 }
 0x672   :  { %v10566_v10 = vpop.f32.mrb[2].mxu1 }
 0x673   :  { %3557 = vrot.lane.b32.xlu1 %v10566_v10, %s11693_s22  ;;  %v3259_v54 = vpop.f32.mrb[3].mxu1 }
 0x675   :  { %3551 = vrot.lane.b32.xlu0 %v3256_v5, %s11693_s22 }
 0x677   :  { %3553 = vrot.lane.b32.xlu1 %v3259_v54, %s11693_s22 }
 0x678   :  { %v10569_v3 = vpop.f32.mrb[4].mxu1 }
 0x679   :  { %3563 = vrot.lane.b32.xlu0 %v10569_v3, %s11693_s22  ;;  %v3272_v36 = vpop.f32.mrb[5].mxu1 }
 0x67a   :  { %v10570_v41 = vpop.f32.mrb[6].mxu1 }
 0x67b   :  { %3565 = vrot.lane.b32.xlu1 %v10570_v41, %s11693_s22  ;;  %v3275_v18 = vpop.f32.mrb[7].mxu1 }
 0x67d   :  { %3559 = vrot.lane.b32.xlu0 %v3272_v36, %s11693_s22 }
 0x67f   :  { %3561 = vrot.lane.b32.xlu1 %v3275_v18, %s11693_s22 }
 0x680   :  { %v10573_v50 = vpop.f32.mrb[8].mxu1 }
 0x681   :  { %3603 = vrot.lane.b32.xlu0 %v10573_v50, %s11691_s19  ;;  %v3288_v49 = vpop.f32.mrb[9].mxu1 }
 0x682   :  { %v10574_v29 = vpop.f32.mrb[10].mxu1 }
 0x683   :  { %3605 = vrot.lane.b32.xlu1 %v10574_v29, %s11691_s19  ;;  %v3291_v46 = vpop.f32.mrb[11].mxu1 }
 0x685   :  { %3599 = vrot.lane.b32.xlu0 %v3288_v49, %s11691_s19 }
 0x687   :  { %3601 = vrot.lane.b32.xlu1 %v3291_v46, %s11691_s19 }
 0x688   :  { %v10577_v22 = vpop.f32.mrb[12].mxu1 }
 0x689   :  { %3611 = vrot.lane.b32.xlu0 %v10577_v22, %s11691_s19  ;;  %v3304_v47 = vpop.f32.mrb[13].mxu1 }
 0x68a   :  { %v10578_v44 = vpop.f32.mrb[14].mxu1 }
 0x68b   :  { %3613 = vrot.lane.b32.xlu1 %v10578_v44, %s11691_s19  ;;  %v3307_v53 = vpop.f32.mrb[15].mxu1 }
 0x68d   :  { %3607 = vrot.lane.b32.xlu0 %v3304_v47, %s11691_s19 }
 0x68f   :  { %3609 = vrot.lane.b32.xlu1 %v3307_v53, %s11691_s19 }
 0x690   :  { %v10581_v33 = vpop.f32.mrb[16].mxu1 }
 0x691   :  { %3651 = vrot.lane.b32.xlu0 %v10581_v33, %s11694_s17  ;;  %v3320_v40 = vpop.f32.mrb[17].mxu1 }
 0x692   :  { %v10582_v58 = vpop.f32.mrb[18].mxu1 }
 0x693   :  { %3653 = vrot.lane.b32.xlu1 %v10582_v58, %s11694_s17  ;;  %v3323_v4 = vpop.f32.mrb[19].mxu1 }
 0x695   :  { %3647 = vrot.lane.b32.xlu0 %v3320_v40, %s11694_s17 }
 0x697   :  { %3649 = vrot.lane.b32.xlu1 %v3323_v4, %s11694_s17 }
 0x698   :  { %v10585_v42 = vpop.f32.mrb[20].mxu1 }
 0x699   :  { %3659 = vrot.lane.b32.xlu0 %v10585_v42, %s11694_s17  ;;  %v3336_v27 = vpop.f32.mrb[21].mxu1 }
 0x69a   :  { %v10586_v30 = vpop.f32.mrb[22].mxu1 }
 0x69b   :  { %3661 = vrot.lane.b32.xlu1 %v10586_v30, %s11694_s17  ;;  %v3339_v34 = vpop.f32.mrb[23].mxu1 }
 0x69d   :  { %3655 = vrot.lane.b32.xlu0 %v3336_v27, %s11694_s17 }
 0x69f   :  { %3657 = vrot.lane.b32.xlu1 %v3339_v34, %s11694_s17 }
 0x6a0   :  { %v10589_v32 = vpop.f32.mrb[24].mxu1 }
 0x6a1   :  { %3699 = vrot.lane.b32.xlu0 %v10589_v32, %s11695_s18  ;;  %v3352_v7 = vpop.f32.mrb[25].mxu1 }
 0x6a2   :  { %v10590_v15 = vpop.f32.mrb[26].mxu1 }
 0x6a3   :  { %3701 = vrot.lane.b32.xlu1 %v10590_v15, %s11695_s18  ;;  %v3355_v60 = vpop.f32.mrb[27].mxu1 }
 0x6a5   :  { %3695 = vrot.lane.b32.xlu0 %v3352_v7, %s11695_s18 }
 0x6a7   :  { %3697 = vrot.lane.b32.xlu1 %v3355_v60, %s11695_s18 }
 0x6a8   :  { %v10593_v11 = vpop.f32.mrb[28].mxu1 }
 0x6a9   :  { %3707 = vrot.lane.b32.xlu0 %v10593_v11, %s11695_s18  ;;  %v3368_v2 = vpop.f32.mrb[29].mxu1 }
 0x6aa   :  { %v10594_v28 = vpop.f32.mrb[30].mxu1 }
 0x6ab   :  { %3709 = vrot.lane.b32.xlu1 %v10594_v28, %s11695_s18  ;;  %v3371_v35 = vpop.f32.mrb[31].mxu1 }
 0x6ad   :  { %3703 = vrot.lane.b32.xlu0 %v3368_v2, %s11695_s18 }
 0x6af   :  { %3705 = vrot.lane.b32.xlu1 %v3371_v35, %s11695_s18 }
 0x6b0   :  { %v13391_v39 = vpop.f32.mrb[32].mxu1 }
 0x6b1   :  { %v13393_v57 = vpop.f32.mrb[33].mxu1 }
 0x6b2   :  { %v13395_v0 = vpop.f32.mrb[34].mxu1 }
 0x6b3   :  { %v13397_v45 = vpop.f32.mrb[35].mxu1 }
 0x6b8   :  { %v13399_v31 = vpop.f32.mrb[36].mxu1 }
 0x6b9   :  { %v13401_v61 = vpop.f32.mrb[37].mxu1 }
 0x6ba   :  { %v13403_v17 = vpop.f32.mrb[38].mxu1 }
 0x6bb   :  { %v13405_v26 = vpop.f32.mrb[39].mxu1 }
 0x6c0   :  { %v10605_v21 = vpop.f32.mrb[40].mxu1 }
 0x6c1   :  { %3747 = vrot.lane.b32.xlu0 %v10605_v21, %s11696_s25  ;;  %v3416_v62 = vpop.f32.mrb[41].mxu1 }
 0x6c2   :  { %v10606_v20 = vpop.f32.mrb[42].mxu1 }
 0x6c3   :  { %3749 = vrot.lane.b32.xlu1 %v10606_v20, %s11696_s25  ;;  %v3419_v38 = vpop.f32.mrb[43].mxu1 }
 0x6c5   :  { %3743 = vrot.lane.b32.xlu0 %v3416_v62, %s11696_s25 }
 0x6c7   :  { %3745 = vrot.lane.b32.xlu1 %v3419_v38, %s11696_s25 }
 0x6c8   :  { %v10609_v16 = vpop.f32.mrb[44].mxu1 }
 0x6c9   :  { %3755 = vrot.lane.b32.xlu0 %v10609_v16, %s11696_s25  ;;  %v3432_v6 = vpop.f32.mrb[45].mxu1 }
 0x6ca   :  { %v10610_v24 = vpop.f32.mrb[46].mxu1 }
 0x6cb   :  { %3757 = vrot.lane.b32.xlu1 %v10610_v24, %s11696_s25  ;;  %v3435_v59 = vpop.f32.mrb[47].mxu1 }
 0x6cd   :  { %3751 = vrot.lane.b32.xlu0 %v3432_v6, %s11696_s25 }
 0x6cf   :  { %3753 = vrot.lane.b32.xlu1 %v3435_v59, %s11696_s25 }
 0x6d0   :  { %v10613_v37 = vpop.f32.mrb[48].mxu1 }
 0x6d1   :  { %3795 = vrot.lane.b32.xlu0 %v10613_v37, %s11697_s3  ;;  %v3448_v5 = vpop.f32.mrb[49].mxu1 }
 0x6d2   :  { %v10614_v10 = vpop.f32.mrb[50].mxu1 }
 0x6d3   :  { %3797 = vrot.lane.b32.xlu1 %v10614_v10, %s11697_s3  ;;  %v3451_v54 = vpop.f32.mrb[51].mxu1 }
 0x6d5   :  { %3791 = vrot.lane.b32.xlu0 %v3448_v5, %s11697_s3 }
 0x6d7   :  { %3793 = vrot.lane.b32.xlu1 %v3451_v54, %s11697_s3 }
 0x6d8   :  { %v10617_v3 = vpop.f32.mrb[52].mxu1 }
 0x6d9   :  { %3803 = vrot.lane.b32.xlu0 %v10617_v3, %s11697_s3  ;;  %v3464_v36 = vpop.f32.mrb[53].mxu1 }
 0x6da   :  { %v10618_v41 = vpop.f32.mrb[54].mxu1 }
 0x6db   :  { %3805 = vrot.lane.b32.xlu1 %v10618_v41, %s11697_s3  ;;  %v3467_v18 = vpop.f32.mrb[55].mxu1 }
 0x6dd   :  { %3799 = vrot.lane.b32.xlu0 %v3464_v36, %s11697_s3 }
 0x6df   :  { %3801 = vrot.lane.b32.xlu1 %v3467_v18, %s11697_s3 }
 0x6e0   :  { %v10621_v50 = vpop.f32.mrb[56].mxu1 }
 0x6e1   :  { %3843 = vrot.lane.b32.xlu0 %v10621_v50, %s11698_s26  ;;  %v3480_v49 = vpop.f32.mrb[57].mxu1 }
 0x6e2   :  { %v10622_v29 = vpop.f32.mrb[58].mxu1 }
 0x6e3   :  { %v13424_v46 = vpop.permute.xlu0 %3555  ;;  %3845 = vrot.lane.b32.xlu1 %v10622_v29, %s11698_s26  ;;  %v3483_v22 = vpop.f32.mrb[59].mxu1 }
 0x6e4   :  { %v3577_v52 = vmul.f32 %v13424_v46, %v12662_v43 }
 0x6e5   :  { %v13427_v47 = vpop.permute.xlu1 %3557  ;;  %3839 = vrot.lane.b32.xlu0 %v3480_v49, %s11698_s26 }
 0x6e6   :  { %v3585_v46 = vadd.f32 %v13391_v39, %v3577_v52 }
 0x6e7   :  { %v13430_v44 = vpop.permute.xlu0 %3551  ;;  %3841 = vrot.lane.b32.xlu1 %v3483_v22, %s11698_s26 }
 0x6e8   :  { %v10625_v53 = vpop.f32.mrb[60].mxu1 }
 0x6e9   :  { %v13433_v33 = vpop.permute.xlu1 %3553  ;;  %v3496_v40 = vpop.f32.mrb[61].mxu1 }
 0x6ea   :  { %3847 = vrot.lane.b32.xlu0 %v3496_v40, %s11698_s26  ;;  %v10626_v58 = vpop.f32.mrb[62].mxu1 }
 0x6eb   :  { %v13436_v4 = vpop.permute.xlu0 %3563  ;;  %v3499_v42 = vpop.f32.mrb[63].mxu1 }
 0x6ec   :  { %3849 = vrot.lane.b32.xlu1 %v3499_v42, %s11698_s26 }
 0x6ed   :  { %v13439_v27 = vpop.permute.xlu1 %3565 }
 0x6ef   :  { %v13441_v30 = vpop.permute.xlu0 %3559 }
 0x6f0   :  { %v10629_v34 = vpop.f32.mrb[64].mxu1 }
 0x6f1   :  { %v13443_v32 = vpop.permute.xlu1 %3561  ;;  %3891 = vrot.lane.b32.xlu0 %v10629_v34, %s11699_s29  ;;  %v3512_v7 = vpop.f32.mrb[65].mxu1 }
 0x6f2   :  { %v10630_v15 = vpop.f32.mrb[66].mxu1 }
 0x6f3   :  { %v13446_v60 = vpop.permute.xlu0 %3603  ;;  %3893 = vrot.lane.b32.xlu1 %v10630_v15, %s11699_s29  ;;  %v3515_v11 = vpop.f32.mrb[67].mxu1 }
 0x6f5   :  { %v13449_v2 = vpop.permute.xlu1 %3605  ;;  %3887 = vrot.lane.b32.xlu0 %v3512_v7, %s11699_s29 }
 0x6f7   :  { %v13452_v28 = vpop.permute.xlu0 %3599  ;;  %3889 = vrot.lane.b32.xlu1 %v3515_v11, %s11699_s29 }
 0x6f8   :  { %v10633_v35 = vpop.f32.mrb[68].mxu1  ;;  %v3623_v39 = vmul.f32 %v13452_v28, %v12670_v1 }
 0x6f9   :  { %v13455_v21 = vpop.permute.xlu1 %3601  ;;  %3851 = vrot.lane.b32.xlu0 %v10625_v53, %s11698_s26  ;;  %v3528_v62 = vpop.f32.mrb[69].mxu1 }
 0x6fa   :  { %v10634_v20 = vpop.f32.mrb[70].mxu1 }
 0x6fb   :  { %v3612_v38 = vpop.permute.xlu0 %3611  ;;  %3853 = vrot.lane.b32.xlu1 %v10626_v58, %s11698_s26  ;;  %v3531_v16 = vpop.f32.mrb[71].mxu1 }
 0x6fd   :  { %v3614_v6 = vpop.permute.xlu1 %3613  ;;  %3895 = vrot.lane.b32.xlu0 %v3528_v62, %s11699_s29 }
 0x6ff   :  { %v3608_v24 = vpop.permute.xlu0 %3607  ;;  %3897 = vrot.lane.b32.xlu1 %v3531_v16, %s11699_s29 }
 0x701   :  { %v3610_v59 = vpop.permute.xlu1 %3609  ;;  %3899 = vrot.lane.b32.xlu0 %v10633_v35, %s11699_s29 }
 0x703   :  { %3901 = vrot.lane.b32.xlu1 %v10634_v20, %s11699_s29  ;;  %v3652_v37 = vpop.permute.xlu0 %3651 }
 0x705   :  { %v3654_v5 = vpop.permute.xlu1 %3653 }
 0x706   :  { %v3674_v28 = vmul.f32 %v3654_v5, %v12677_v55 }
 0x707   :  { %v3648_v10 = vpop.permute.xlu0 %3647 }
 0x709   :  { %v3650_v54 = vpop.permute.xlu1 %3649 }
 0x70b   :  { %v13463_v3 = vpop.permute.xlu0 %3659 }
 0x70d   :  { %v13465_v36 = vpop.permute.xlu1 %3661 }
 0x70f   :  { %v13467_v41 = vpop.permute.xlu0 %3655 }
 0x711   :  { %v13469_v18 = vpop.permute.xlu1 %3657 }
 0x713   :  { %v13471_v50 = vpop.permute.xlu0 %3699 }
 0x715   :  { %v13473_v49 = vpop.permute.xlu1 %3701 }
 0x717   :  { %v13475_v29 = vpop.permute.xlu0 %3695 }
 0x719   :  { %v13477_v22 = vpop.permute.xlu1 %3697 }
 0x71b   :  { %v13479_v53 = vpop.permute.xlu0 %3707 }
 0x71d   :  { %v13481_v40 = vpop.permute.xlu1 %3709 }
 0x71e   :  { %15971 = vst [vmem:[#allocation22_spill] sm:$0xff] %v13481_v40 }
 0x71f   :  { %v13483_v58 = vpop.permute.xlu0 %3703 }
 0x721   :  { %v13485_v42 = vpop.permute.xlu1 %3705 }
 0x733   :  { %v13487_v34 = vpop.permute.xlu0 %3747 }
 0x735   :  { %v13489_v7 = vpop.permute.xlu1 %3749 }
 0x737   :  { %v13491_v15 = vpop.permute.xlu0 %3743 }
 0x739   :  { %v13493_v11 = vpop.permute.xlu1 %3745 }
 0x73b   :  { %v13495_v35 = vpop.permute.xlu0 %3755 }
 0x73c   :  { %15972 = vst [vmem:[#allocation30_spill] sm:$0xff] %v13495_v35 }
 0x73d   :  { %v13497_v62 = vpop.permute.xlu1 %3757 }
 0x73e   :  { %15973 = vst [vmem:[#allocation40_spill] sm:$0xff] %v13497_v62  ;;  %v3578_v62 = vmul.f32 %v13427_v47, %v12662_v43 }
 0x73f   :  { %v13499_v20 = vpop.permute.xlu0 %3751 }
 0x740   :  { %v3586_v47 = vadd.f32 %v13395_v0, %v3578_v62  ;;  %v3624_v0 = vmul.f32 %v13455_v21, %v12670_v1 }
 0x741   :  { %v13501_v16 = vpop.permute.xlu1 %3753 }
 0x742   :  { %15974 = vst [vmem:[#allocation75_spill] sm:$0xff] %v13501_v16  ;;  %v3575_v16 = vmul.f32 %v13430_v44, %v12662_v43  ;;  %v3580_v44 = vmul.f32 %v13443_v32, %v12662_v43 }
 0x743   :  { %v13503_v9 = vpop.permute.xlu0 %3795 }
 0x745   :  { %v13505_v23 = vpop.permute.xlu1 %3797 }
 0x746   :  { %15975 = vst [vmem:[#allocation31_spill] sm:$0xff] %v13505_v23 }
 0x747   :  { %v13507_v63 = vpop.permute.xlu0 %3791 }
 0x749   :  { %v13509_v14 = vpop.permute.xlu1 %3793 }
 0x74b   :  { %v13511_v19 = vpop.permute.xlu0 %3803 }
 0x74c   :  { %15976 = vst [vmem:[#allocation6_spill] sm:$0xff] %v13511_v19  ;;  %v3576_v19 = vmul.f32 %v13433_v33, %v12662_v43  ;;  %v3583_v33 = vadd.f32 %v3575_v16, %v13393_v57  ;;  %v3671_v16 = vmul.f32 %v3648_v10, %v12677_v55  ;;  %v3675_v10 = vmul.f32 %v13467_v41, %v12677_v55 }
 0x74d   :  { %v13513_v56 = vpop.permute.xlu1 %3805 }
 0x74e   :  { %15977 = vst [vmem:[#allocation41_spill] sm:$0xff] %v13513_v56  ;;  %v3581_v56 = vmul.f32 %v13436_v4, %v12662_v43  ;;  %v3584_v23 = vadd.f32 %v3576_v19, %v13397_v45  ;;  %v3625_v4 = vmul.f32 %v13446_v60, %v12670_v1  ;;  %v3630_v19 = vmul.f32 %v3614_v6, %v12670_v1 }
 0x74f   :  { %v13515_v25 = vpop.permute.xlu0 %3799  ;;  %v3627_v45 = vmul.f32 %v3608_v24, %v12670_v1  ;;  %v3628_v60 = vmul.f32 %v3610_v59, %v12670_v1  ;;  %v3677_v59 = vmul.f32 %v13463_v3, %v12677_v55  ;;  %v3720_v3 = vmul.f32 %v13477_v22, %v12684_v8 }
 0x750   :  { %15978 = vst [vmem:[#allocation51_spill] sm:$0xff] %v13515_v25  ;;  %v3579_v25 = vmul.f32 %v13441_v30, %v12662_v43  ;;  %v3589_v52 = vadd.f32 %v13399_v31, %v3581_v56  ;;  %v3629_v30 = vmul.f32 %v3612_v38, %v12670_v1  ;;  %v3588_v56 = vadd.f32 %v3580_v44, %v13405_v26 }
 0x751   :  { %v13517_v51 = vpop.permute.xlu1 %3801  ;;  %v3673_v31 = vmul.f32 %v3652_v37, %v12677_v55  ;;  %v3633_v62 = vadd.f32 %v3625_v4, %v3585_v46  ;;  %v3632_v6 = vadd.f32 %v3624_v0, %v3584_v23  ;;  %v3719_v37 = vmul.f32 %v13475_v29, %v12684_v8 }
 0x752   :  { %15979 = vst [vmem:[#allocation7_spill] sm:$0xff] %v13517_v51  ;;  %v3582_v51 = vmul.f32 %v13439_v27, %v12662_v43  ;;  %v3626_v27 = vmul.f32 %v13449_v2, %v12670_v1  ;;  %v3587_v2 = vadd.f32 %v3579_v25, %v13401_v61  ;;  %v3637_v24 = vadd.f32 %v3629_v30, %v3589_v52 }
 0x753   :  { %v13523_v40 = vpop.permute.xlu0 %3843  ;;  %v3636_v26 = vadd.f32 %v3628_v60, %v3588_v56  ;;  %v3681_v5 = vadd.f32 %v3673_v31, %v3633_v62  ;;  %v3678_v46 = vmul.f32 %v13465_v36, %v12677_v55  ;;  %v3676_v29 = vmul.f32 %v13469_v18, %v12677_v55 }
 0x754   :  { %v3590_v57 = vadd.f32 %v13403_v17, %v3582_v51  ;;  %v3634_v38 = vadd.f32 %v3626_v27, %v3586_v47  ;;  %v3672_v51 = vmul.f32 %v3650_v54, %v12677_v55  ;;  %v3631_v17 = vadd.f32 %v3623_v39, %v3583_v33 }
 0x755   :  { %v13531_v35 = vpop.permute.xlu1 %3845  ;;  %v3635_v61 = vadd.f32 %v3627_v45, %v3587_v2  ;;  %v3767_v33 = vmul.f32 %v13491_v15, %v12690_v12  ;;  %v3685_v4 = vadd.f32 %v3677_v59, %v3637_v24  ;;  %v3721_v27 = vmul.f32 %v13471_v50, %v12684_v8  ;;  %v15980_v59 = vld [vmem:[#allocation31_spill] sm:$0xff] }
 0x756   :  { %v3638_v25 = vadd.f32 %v3630_v19, %v3590_v57  ;;  %v3682_v44 = vadd.f32 %v3674_v28, %v3634_v38  ;;  %v3679_v23 = vadd.f32 %v3671_v16, %v3631_v17  ;;  %v3680_v47 = vadd.f32 %v3672_v51, %v3632_v6  ;;  %v13610_v6 = vld [vmem:[%s15783_s2 + $0x8] ss:$0 sm:$0xff] }
 0x757   :  { %v3840_v32 = vpop.permute.xlu0 %3839  ;;  %v3722_v36 = vmul.f32 %v13473_v49, %v12684_v8  ;;  %v3725_v39 = vmul.f32 %v13479_v53, %v12684_v8  ;;  %v3768_v22 = vmul.f32 %v13493_v11, %v12690_v12  ;;  %v3815_v15 = vmul.f32 %v13507_v63, %v12700_v13 }
 0x758   :  { %v3727_v52 = vadd.f32 %v3719_v37, %v3679_v23  ;;  %v13589_v0 = vadd.f32 %v3678_v46, %v3638_v25  ;;  %v3683_v18 = vadd.f32 %v3675_v10, %v3635_v61  ;;  %v3723_v50 = vmul.f32 %v13483_v58, %v12684_v8  ;;  %v15981_v25 = vld [vmem:[#allocation51_spill] sm:$0xff]  ;;  %v15982_v10 = vld [vmem:[#allocation30_spill] sm:$0xff] }
 0x759   :  { %v3842_v21 = vpop.permute.xlu1 %3841  ;;  %v3769_v49 = vmul.f32 %v13487_v34, %v12690_v12  ;;  %v3728_v57 = vadd.f32 %v3720_v3, %v3680_v47  ;;  %v3816_v53 = vmul.f32 %v13509_v14, %v12700_v13  ;;  %v3863_v11 = vmul.f32 %v3840_v32, %v12711_v48  ;;  %v15983_v47 = vld [vmem:[#allocation75_spill] sm:$0xff] }
 0x75a   :  { %v3775_v19 = vadd.f32 %v3767_v33, %v3727_v52  ;;  %v3684_v45 = vadd.f32 %v3676_v29, %v3636_v26  ;;  %v3729_v60 = vadd.f32 %v3721_v27, %v3681_v5  ;;  %v3730_v63 = vadd.f32 %v3722_v36, %v3682_v44  ;;  %v15984_v52 = vld [vmem:[#allocation22_spill] sm:$0xff] }
 0x75b   :  { %v3817_v2 = vmul.f32 %v13503_v9, %v12700_v13  ;;  %v3733_v31 = vadd.f32 %v3725_v39, %v3685_v4  ;;  %v3776_v58 = vadd.f32 %v3768_v22, %v3728_v57  ;;  %v3864_v34 = vmul.f32 %v3842_v21, %v12711_v48 }
 0x75c   :  { %v3848_v54 = vpop.permute.xlu0 %3847  ;;  %v3823_v28 = vadd.f32 %v3815_v15, %v3775_v19  ;;  %v3731_v62 = vadd.f32 %v3723_v50, %v3683_v18  ;;  %v3777_v38 = vadd.f32 %v3769_v49, %v3729_v60  ;;  %v3770_v16 = vmul.f32 %v13489_v7, %v12690_v12  ;;  %v15985_v15 = vld [vmem:[#allocation6_spill] sm:$0xff]  ;;  %v15986_v50 = vld [vmem:[#allocation7_spill] sm:$0xff] }
 0x75d   :  { %v3771_v14 = vmul.f32 %v13499_v20, %v12690_v12  ;;  %v3824_v51 = vadd.f32 %v3816_v53, %v3776_v58  ;;  %v3865_v17 = vmul.f32 %v13523_v40, %v12711_v48  ;;  %v3724_v24 = vmul.f32 %v13485_v42, %v12684_v8 }
 0x75e   :  { %v13581_v41 = vpop.permute.xlu1 %3849  ;;  %v3871_v9 = vadd.f32 %v3863_v11, %v3823_v28  ;;  %v3825_v7 = vadd.f32 %v3817_v2, %v3777_v38  ;;  %v3818_v20 = vmul.f32 %v15980_v59, %v12700_v13  ;;  %v3819_v61 = vmul.f32 %v15981_v25, %v12700_v13  ;;  %v15987_v11 = vld [vmem:[#allocation40_spill] sm:$0xff] }
 0x75f   :  { %v3872_v40 = vadd.f32 %v3864_v34, %v3824_v51  ;;  %v3778_v46 = vadd.f32 %v3770_v16, %v3730_v63  ;;  %v3773_v23 = vmul.f32 %v15982_v10, %v12690_v12  ;;  %v3779_v42 = vadd.f32 %v3771_v14, %v3731_v62  ;;  %v15988_v14 = vld [vmem:[#allocation41_spill] sm:$0xff] }
 0x760   :  { %v3772_v3 = vmul.f32 %v15983_v47, %v12690_v12  ;;  %v3873_v4 = vadd.f32 %v3865_v17, %v3825_v7  ;;  %v3866_v29 = vmul.f32 %v13531_v35, %v12711_v48  ;;  %v3867_v27 = vmul.f32 %v3848_v54, %v12711_v48 }
 0x761   :  { %v3726_v39 = vmul.f32 %v15984_v52, %v12684_v8  ;;  %v3732_v22 = vadd.f32 %v3724_v24, %v3684_v45  ;;  %v3821_v18 = vmul.f32 %v15985_v15, %v12700_v13  ;;  %v3820_v49 = vmul.f32 %v15986_v50, %v12700_v13 }
 0x762   :  { %v3826_v57 = vadd.f32 %v3818_v20, %v3778_v46  ;;  %v3827_v19 = vadd.f32 %v3819_v61, %v3779_v42  ;;  %v3781_v54 = vadd.f32 %v3773_v23, %v3733_v31  ;;  %v3774_v60 = vmul.f32 %v15987_v11, %v12690_v12 }
 0x763   :  { %v3892_v30 = vpop.permute.xlu0 %3891  ;;  %v3780_v63 = vadd.f32 %v3772_v3, %v3732_v22  ;;  %v3868_v45 = vmul.f32 %v13581_v41, %v12711_v48  ;;  %v3734_v38 = vadd.f32 %v3726_v39, %v13589_v0  ;;  %v11701_v46 = vmov 3  }
 0x764   :  { %v3913_v37 = vmul.f32 %v13610_v6, %v3892_v30  ;;  %v3874_v58 = vadd.f32 %v3866_v29, %v3826_v57  ;;  %v3875_v28 = vadd.f32 %v3867_v27, %v3827_v19  ;;  %10812 = vset.pattern.permute.xlu1 %v11701_v46 }
 0x765   :  { %v3894_v56 = vpop.permute.xlu1 %3893  ;;  %v3828_v16 = vadd.f32 %v3820_v49, %v3780_v63 }
 0x766   :  { %v3921_v53 = vadd.f32 %v3913_v37, %v3873_v4  ;;  %v3914_v35 = vmul.f32 %v13610_v6, %v3894_v56  ;;  %v3829_v56 = vadd.f32 %v3821_v18, %v3781_v54 }
 0x767   :  { %v3888_v32 = vpop.permute.xlu0 %3887 }
 0x768   :  { %v3911_v21 = vmul.f32 %v13610_v6, %v3888_v32  ;;  %v3822_v32 = vmul.f32 %v15988_v14, %v12700_v13  ;;  %v3922_v51 = vadd.f32 %v3914_v35, %v3874_v58  ;;  %v11633_v14 = vld [vmem:[%s15792_s11 + $0x20] sm:$0xff] }
 0x769   :  { %v3890_v26 = vpop.permute.xlu1 %3889 }
 0x76a   :  { %v13620_v5 = vadd.f32 %v3911_v21, %v3871_v9  ;;  %v3912_v44 = vmul.f32 %v13610_v6, %v3890_v26  ;;  %v3782_v9 = vadd.f32 %v3774_v60, %v3734_v38  ;;  %v3876_v21 = vadd.f32 %v3868_v45, %v3828_v16  ;;  %v13694_v38 = vld [vmem:[%s15792_s11 + $0x8] sm:$0xff]  ;;  %v13700_v16 = vld [vmem:[%s15792_s11 + $0x10] sm:$0xff] }
 0x76b   :  { %v3852_v33 = vpop.permute.xlu0 %3851 }
 0x76c   :  { %v3920_v36 = vadd.f32 %v3912_v44, %v3872_v40  ;;  %3927 = vadd.xlane.f32.xlu0 %v13620_v5  ;;  %v3869_v34 = vmul.f32 %v3852_v33, %v12711_v48  ;;  %v3830_v25 = vadd.f32 %v3822_v32, %v3782_v9 }
 0x76d   :  { %v3854_v30 = vpop.permute.xlu1 %3853 }
 0x76e   :  { %3929 = vadd.xlane.f32.xlu1 %v3920_v36  ;;  %v3877_v7 = vadd.f32 %v3869_v34, %v3829_v56  ;;  %v3870_v59 = vmul.f32 %v3854_v30, %v12711_v48  ;;  %v11702_v56 = vmov 2  }
 0x76f   :  { %v3896_v2 = vpop.permute.xlu0 %3895  ;;  %10814 = vset.pattern.permute.xlu0 %v11702_v56 }
 0x770   :  { %v3915_v62 = vmul.f32 %v13610_v6, %v3896_v2  ;;  %3931 = vadd.xlane.f32.xlu0 %v3921_v53  ;;  %v3878_v37 = vadd.f32 %v3870_v59, %v3830_v25 }
 0x771   :  { %v3898_v31 = vpop.permute.xlu1 %3897 }
 0x772   :  { %v3923_v17 = vadd.f32 %v3915_v62, %v3875_v28  ;;  %v3916_v41 = vmul.f32 %v13610_v6, %v3898_v31  ;;  %v13688_v62 = vld [vmem:[%s15792_s11] sm:$0xff]  ;;  %v13706_v31 = vld [vmem:[%s15792_s11 + $0x18] sm:$0xff] }
 0x773   :  { %v3900_v24 = vpop.permute.xlu0 %3899 }
 0x774   :  { %v3917_v20 = vmul.f32 %v13610_v6, %v3900_v24  ;;  %3933 = vadd.xlane.f32.xlu0 %v3922_v51  ;;  %3935 = vadd.xlane.f32.xlu1 %v3923_v17  ;;  %v3924_v61 = vadd.f32 %v3916_v41, %v3876_v21 }
 0x775   :  { %v3902_v0 = vpop.permute.xlu1 %3901 }
 0x776   :  { %v3925_v26 = vadd.f32 %v3917_v20, %v3877_v7  ;;  %v3918_v40 = vmul.f32 %v13610_v6, %v3902_v0 }
 0x778   :  { %3939 = vadd.xlane.f32.xlu1 %v3925_v26  ;;  %3937 = vadd.xlane.f32.xlu0 %v3924_v61  ;;  %v3926_v44 = vadd.f32 %v3918_v40, %v3878_v37 }
 0x77c   :  { %3941 = vadd.xlane.f32.xlu0 %v3926_v44 }
 0x7f9   :  { %v3928_v10 = vpop.xlane.xlu0 %3927 }
 0x7fa   :  { %v3943_v23 = vmul.f32 0.0078125, %v3928_v10 }
 0x7fb   :  { %v3930_v42 = vpop.xlane.xlu1 %3929 }
 0x7fc   :  { %v13653_v47 = vsub.f32 %v13620_v5, %v3943_v23  ;;  %v3944_v3 = vmul.f32 0.0078125, %v3930_v42 }
 0x7fd   :  { %v3932_v33 = vpop.xlane.xlu0 %3931 }
 0x7fe   :  { %v13655_v4 = vsub.f32 %v3920_v36, %v3944_v3  ;;  %v3945_v29 = vmul.f32 0.0078125, %v3932_v33  ;;  %v3959_v27 = vmul.f32 %v13653_v47, %v13653_v47 }
 0x800   :  { %v13659_v52 = vsub.f32 %v3921_v53, %v3945_v29  ;;  %3967 = vadd.xlane.f32.xlu1 %v3959_v27  ;;  %v3960_v39 = vmul.f32 %v13655_v4, %v13655_v4 }
 0x801   :  { %v3934_v22 = vpop.xlane.xlu0 %3933  ;;  %v3936_v15 = vpop.xlane.xlu1 %3935 }
 0x802   :  { %v3946_v18 = vmul.f32 0.0078125, %v3934_v22  ;;  %v3947_v50 = vmul.f32 0.0078125, %v3936_v15  ;;  %3969 = vadd.xlane.f32.xlu0 %v3960_v39  ;;  %v3961_v5 = vmul.f32 %v13659_v52, %v13659_v52 }
 0x804   :  { %v13665_v36 = vsub.f32 %v3922_v51, %v3946_v18  ;;  %v13667_v49 = vsub.f32 %v3923_v17, %v3947_v50  ;;  %3971 = vadd.xlane.f32.xlu1 %v3961_v5 }
 0x805   :  { %v3938_v30 = vpop.xlane.xlu0 %3937  ;;  %v3940_v57 = vpop.xlane.xlu1 %3939 }
 0x806   :  { %v3948_v19 = vmul.f32 0.0078125, %v3938_v30  ;;  %v3949_v53 = vmul.f32 0.0078125, %v3940_v57  ;;  %v3962_v35 = vmul.f32 %v13665_v36, %v13665_v36  ;;  %v3963_v54 = vmul.f32 %v13667_v49, %v13667_v49  ;;  %v11634_v57 = vld [vmem:[%s15792_s11 + $0x28] sm:$0xff] }
 0x808   :  { %v13673_v11 = vsub.f32 %v3924_v61, %v3948_v19  ;;  %v13675_v60 = vsub.f32 %v3925_v26, %v3949_v53  ;;  %3973 = vadd.xlane.f32.xlu0 %v3962_v35  ;;  %3975 = vadd.xlane.f32.xlu1 %v3963_v54 }
 0x809   :  { %v3942_v63 = vpop.xlane.xlu0 %3941 }
 0x80a   :  { %v3950_v45 = vmul.f32 0.0078125, %v3942_v63  ;;  %v3964_v2 = vmul.f32 %v13673_v11, %v13673_v11  ;;  %v3965_v58 = vmul.f32 %v13675_v60, %v13675_v60  ;;  %v11635_v63 = vld [vmem:[%s15792_s11 + $0x30] sm:$0xff] }
 0x80c   :  { %v13681_v28 = vsub.f32 %v3926_v44, %v3950_v45  ;;  %3977 = vadd.xlane.f32.xlu0 %v3964_v2  ;;  %3979 = vadd.xlane.f32.xlu1 %v3965_v58 }
 0x80e   :  { %v3966_v34 = vmul.f32 %v13681_v28, %v13681_v28 }
 0x810   :  { %3981 = vadd.xlane.f32.xlu0 %v3966_v34 }
 0x81d   :  { %4064 = vperm.xlu1 %10812, %v13688_v62  }
 0x821   :  { %4068 = vperm.xlu1 %10812, %v13694_v38  }
 0x825   :  { %4072 = vperm.xlu1 %10812, %v13700_v16  }
 0x829   :  { %4076 = vperm.xlu1 %10812, %v13706_v31  }
 0x82d   :  { %4080 = vperm.xlu1 %10812, %v11633_v14  }
 0x831   :  { %10813 = vset.pattern.permute.xlu1 %v11702_v56 }
 0x88d   :  { %v3968_v32 = vpop.xlane.xlu1 %3967 }
 0x88e   :  { %v3983_v17 = vmul.f32 0.0078125, %v3968_v32  ;;  %v11636_v32 = vld [vmem:[%s15792_s11 + $0x38] sm:$0xff] }
 0x88f   :  { %v3970_v51 = vpop.xlane.xlu0 %3969 }
 0x890   :  { %v3984_v41 = vmul.f32 0.0078125, %v3970_v51  ;;  %v3991_v7 = vadd.f32 1e-05, %v3983_v17  ;;  %v11118_v51 = vld [vmem:[%s15786_s5] sm:$0xff]  }
 0x891   :  { %v3972_v9 = vpop.xlane.xlu1 %3971  ;;  %10643 = vmatprep.mubr.msk.bf16.mxu1 %vm4257_vm0, %v11118_v51 }
 0x892   :  { %v3992_v21 = vadd.f32 1e-05, %v3984_v41  ;;  %v3985_v24 = vmul.f32 0.0078125, %v3972_v9 }
 0x894   :  { %11536 = vrsqrt.f32 %v3992_v21  ;;  %v3993_v59 = vadd.f32 1e-05, %v3985_v24 }
 0x895   :  { %v3974_v20 = vpop.xlane.xlu0 %3973  ;;  %v3976_v0 = vpop.xlane.xlu1 %3975 }
 0x896   :  { %11538 = vrsqrt.f32 %v3993_v59  ;;  %v3986_v25 = vmul.f32 0.0078125, %v3974_v20  ;;  %v3987_v10 = vmul.f32 0.0078125, %v3976_v0 }
 0x897   :  { %11540 = vrsqrt.f32 %v3991_v7 }
 0x898   :  { %v3994_v61 = vadd.f32 1e-05, %v3986_v25  ;;  %v3995_v39 = vadd.f32 1e-05, %v3987_v10 }
 0x899   :  { %v3978_v26 = vpop.xlane.xlu0 %3977  ;;  %v3980_v40 = vpop.xlane.xlu1 %3979 }
 0x89a   :  { %v3988_v37 = vmul.f32 0.0078125, %v3978_v26  ;;  %v3989_v44 = vmul.f32 0.0078125, %v3980_v40  ;;  %11542 = vrsqrt.f32 %v3994_v61 }
 0x89c   :  { %v3996_v23 = vadd.f32 1e-05, %v3988_v37  ;;  %v3997_v42 = vadd.f32 1e-05, %v3989_v44 }
 0x89d   :  { %v3982_v3 = vpop.xlane.xlu0 %3981  ;;  %v4065_v17 = vpop.permute.xlu1 %4064 }
 0x89e   :  { %v11537_v33 = vpop.eup %11536  ;;  %11544 = vrsqrt.f32 %v3996_v23  ;;  %v3990_v22 = vmul.f32 0.0078125, %v3982_v3 }
 0x89f   :  { %v4008_v29 = vmul.f32 %v13694_v38, %v11537_v33  ;;  %11546 = vrsqrt.f32 %v3997_v42 }
 0x8a0   :  { %v11539_v27 = vpop.eup %11538  ;;  %11548 = vrsqrt.f32 %v3995_v39  ;;  %v3998_v50 = vadd.f32 1e-05, %v3990_v22 }
 0x8a1   :  { %4022 = vperm.xlu0 %10814, %v4008_v29   ;;  %v4009_v15 = vmul.f32 %v13700_v16, %v11539_v27  ;;  %v11541_v18 = vpop.eup %11540 }
 0x8a2   :  { %v4007_v5 = vmul.f32 %v13688_v62, %v11541_v18  ;;  %11550 = vrsqrt.f32 %v3998_v50 }
 0x8a3   :  { %4027 = vperm.xlu1 %10813, %v4009_v15  }
 0x8a4   :  { %v11543_v30 = vpop.eup %11542 }
 0x8a5   :  { %10815 = vset.pattern.permute.xlu0 %v11701_v46  ;;  %v4010_v35 = vmul.f32 %v13706_v31, %v11543_v30 }
 0x8a6   :  { %4084 = vperm.xlu0 %10815, %v11634_v57  }
 0x8a7   :  { %4017 = vperm.xlu1 %10813, %v4007_v5  }
 0x8a8   :  { %v11545_v19 = vpop.eup %11544 }
 0x8a9   :  { %v4012_v53 = vmul.f32 %v11634_v57, %v11545_v19  ;;  %v11547_v54 = vpop.eup %11546 }
 0x8aa   :  { %10816 = vset.pattern.permute.xlu0 %v11702_v56  ;;  %v4013_v45 = vmul.f32 %v11635_v63, %v11547_v54  ;;  %v11549_v2 = vpop.eup %11548 }
 0x8ab   :  { %4042 = vperm.xlu0 %10816, %v4012_v53   ;;  %4032 = vperm.xlu1 %10813, %v4010_v35   ;;  %v4011_v58 = vmul.f32 %v11633_v14, %v11549_v2  ;;  %v4069_v14 = vpop.permute.xlu1 %4068 }
 0x8ac   :  { %v11551_v34 = vpop.eup %11550 }
 0x8ad   :  { %v4014_v56 = vmul.f32 %v11636_v32, %v11551_v34 }
 0x8af   :  { %4047 = vperm.xlu1 %10813, %v4013_v45   ;;  %10817 = vset.pattern.permute.xlu0 %v11701_v46  ;;  %v4073_v41 = vpop.permute.xlu1 %4072 }
 0x8b0   :  { %4088 = vperm.xlu0 %10817, %v11635_v63  }
 0x8b3   :  { %4037 = vperm.xlu1 %10813, %v4011_v58   ;;  %v4077_v9 = vpop.permute.xlu1 %4076 }
 0x8b7   :  { %4052 = vperm.xlu1 %10813, %v4014_v56   ;;  %v4081_v21 = vpop.permute.xlu1 %4080 }
 0x8bb   :  { %10818 = vset.pattern.permute.xlu1 %v11701_v46 }
 0x8bc   :  { %4092 = vperm.xlu1 %10818, %v11636_v32  }
 0x920   :  { %v4023_v24 = vpop.permute.xlu0 %4022 }
 0x921   :  { %v4056_v7 = vmul.f32 %v4023_v24, %v13655_v4  ;;  %v11124_v24 = vld [vmem:[%s15786_s5 + $0x30] sm:$0xff]  }
 0x922   :  { %v4028_v59 = vpop.permute.xlu1 %4027 }
 0x923   :  { %v4057_v20 = vmul.f32 %v4028_v59, %v13659_v52  ;;  %v4096_v46 = vadd.f32 %v4069_v14, %v4056_v7  ;;  %v11119_v14 = vld [vmem:[%s15786_s5 + $0x8] sm:$0xff]   ;;  %v11125_v7 = vld [vmem:[%s15786_s5 + $0x38] sm:$0xff]   ;;  %v11126_v59 = vld [vmem:[%s15786_s5 + $0x40] sm:$0xff]  }
 0x925   :  { %v4085_v0 = vpop.permute.xlu0 %4084  ;;  %v4097_v26 = vadd.f32 %v4073_v41, %v4057_v20  ;;  %v4112_v40 = vmul.f32 0.2, %v4096_v46  ;;  %vm4104_vm1 = vcmp.ge.f32.partialorder %v4096_v46, 0.0  ;;  %v11121_v41 = vld [vmem:[%s15786_s5 + $0x18] sm:$0xff]   ;;  %v11127_v20 = vld [vmem:[%s15786_s5 + $0x48] sm:$0xff]  }
 0x926   :  { %v4018_v25 = vpop.permute.xlu1 %4017 }
 0x927   :  { %v4055_v61 = vmul.f32 %v4018_v25, %v13653_v47  ;;  %v4113_v3 = vmul.f32 0.2, %v4097_v26  ;;  %v4120_v29 = vsel %vm4104_vm1, %v4096_v46, %v4112_v40  ;;  %vm4105_vm3 = vcmp.ge.f32.partialorder %v4097_v26, 0.0  ;;  %v11128_v46 = vld [vmem:[%s15786_s5 + $0x50] sm:$0xff]   ;;  %v11130_v25 = vld [vmem:[%s15786_s5 + $0x60] sm:$0xff]   ;;  %v11133_v40 = vld [vmem:[%s15786_s5 + $0x78] sm:$0xff]  }
 0x929   :  { %v4095_v37 = vadd.f32 %v4065_v17, %v4055_v61  ;;  %v4121_v15 = vsel %vm4105_vm3, %v4097_v26, %v4113_v3  ;;  %v11131_v61 = vld [vmem:[%s15786_s5 + $0x68] sm:$0xff]   ;;  %v11132_v26 = vld [vmem:[%s15786_s5 + $0x70] sm:$0xff]  }
 0x92a   :  { %v4043_v44 = vpop.permute.xlu0 %4042  ;;  %v4033_v10 = vpop.permute.xlu1 %4032 }
 0x92b   :  { %v4111_v23 = vmul.f32 0.2, %v4095_v37  ;;  %v4058_v42 = vmul.f32 %v4033_v10, %v13665_v36  ;;  %vm4103_vm2 = vcmp.ge.f32.partialorder %v4095_v37, 0.0  ;;  %v4060_v4 = vmul.f32 %v4043_v44, %v13673_v11  ;;  %v11135_v44 = vld [vmem:[%s15786_s5 + $0x88] sm:$0xff]  }
 0x92d   :  { %v4098_v33 = vadd.f32 %v4077_v9, %v4058_v42  ;;  %v4119_v52 = vsel %vm4103_vm2, %v4095_v37, %v4111_v23  ;;  %v4100_v22 = vadd.f32 %v4085_v0, %v4060_v4  ;;  %v11122_v9 = vld [vmem:[%s15786_s5 + $0x20] sm:$0xff]   ;;  %v11129_v0 = vld [vmem:[%s15786_s5 + $0x58] sm:$0xff]  }
 0x92e   :  { %v4048_v27 = vpop.permute.xlu1 %4047  ;;  %v4163_v39 = vpack.c.bf16 %v4120_v29, %v4119_v52  ;;  %v11134_v37 = vld [vmem:[%s15786_s5 + $0x80] sm:$0xff]  }
 0x92f   :  { %v4114_v47 = vmul.f32 0.2, %v4098_v33  ;;  %vm4106_vm4 = vcmp.ge.f32.partialorder %v4098_v33, 0.0  ;;  %v4061_v30 = vmul.f32 %v4048_v27, %v13675_v60  ;;  %v4116_v11 = vmul.f32 0.2, %v4100_v22  ;;  %v4089_v57 = vpop.permute.xlu0 %4088 }
 0x930   :  { %10635 = vmatprep.subr.bf16.mxu1 %v4163_v39  ;;  %vm4108_vm5 = vcmp.ge.f32.partialorder %v4100_v22, 0.0 }
 0x931   :  { %10636 = vmatpush3.bf16.msra.mxu1 %v4163_v39  ;;  %v4122_v18 = vsel %vm4106_vm4, %v4098_v33, %v4114_v47  ;;  %v4101_v54 = vadd.f32 %v4089_v57, %v4061_v30  ;;  %v4124_v45 = vsel %vm4108_vm5, %v4100_v22, %v4116_v11 }
 0x932   :  { %v4038_v50 = vpop.permute.xlu1 %4037  ;;  %v4164_v5 = vpack.c.bf16 %v4122_v18, %v4121_v15 }
 0x933   :  { %v4059_v36 = vmul.f32 %v4038_v50, %v13667_v49  ;;  %v4117_v32 = vmul.f32 0.2, %v4101_v54  ;;  %vm4109_vm7 = vcmp.ge.f32.partialorder %v4101_v54, 0.0 }
 0x934   :  { %10637 = vmatprep.subr.bf16.mxu1 %v4164_v5 }
 0x935   :  { %v4099_v19 = vadd.f32 %v4081_v21, %v4059_v36  ;;  %10638 = vmatpush3.bf16.msra.mxu1 %v4164_v5  ;;  %v4125_v56 = vsel %vm4109_vm7, %v4101_v54, %v4117_v32  ;;  %v11123_v21 = vld [vmem:[%s15786_s5 + $0x28] sm:$0xff]  }
 0x936   :  { %v4053_v53 = vpop.permute.xlu1 %4052 }
 0x937   :  { %v4115_v35 = vmul.f32 0.2, %v4099_v19  ;;  %vm4107_vm6 = vcmp.ge.f32.partialorder %v4099_v19, 0.0  ;;  %v4062_v2 = vmul.f32 %v4053_v53, %v13681_v28  ;;  %v11120_v28 = vld [vmem:[%s15786_s5 + $0x10] sm:$0xff]  }
 0x939   :  { %v4123_v63 = vsel %vm4107_vm6, %v4099_v19, %v4115_v35 }
 0x93a   :  { %v4165_v58 = vpack.c.bf16 %v4124_v45, %v4123_v63 }
 0x93b   :  { %v4093_v34 = vpop.permute.xlu1 %4092 }
 0x93c   :  { %v4102_v49 = vadd.f32 %v4093_v34, %v4062_v2  ;;  %10639 = vmatprep.subr.bf16.mxu1 %v4165_v58 }
 0x93d   :  { %10640 = vmatpush3.bf16.msra.mxu1 %v4165_v58 }
 0x93e   :  { %vm4110_vm8 = vcmp.ge.f32.partialorder %v4102_v49, 0.0  ;;  %v4118_v60 = vmul.f32 0.2, %v4102_v49 }
 0x940   :  { %v4126_v51 = vsel %vm4110_vm8, %v4102_v49, %v4118_v60 }
 0x941   :  { %v4166_v17 = vpack.c.bf16 %v4126_v51, %v4125_v56 }
 0x943   :  { %10641 = vmatprep.subr.bf16.mxu1 %v4166_v17 }
 0x944   :  { %10642 = vmatpush3.bf16.msra.mxu1 %v4166_v17 }
 0x947   :  { %10644 = vmatmul.mubr.msk.bf16.vlgmr.msra.gmra.mrb[72].mxu1 %vm4257_vm0, %v11119_v14 }
 0x948   :  { %10647 = vmatprep.mubr.msk.bf16.mxu1 %vm4257_vm0, %v11120_v28 }
 0x94f   :  { %10648 = vmatmul.mubr.msk.bf16.gmra.mrb[76].mxu1 %vm4257_vm0, %v11121_v41 }
 0x950   :  { %10651 = vmatprep.mubr.msk.bf16.mxu1 %vm4257_vm0, %v11122_v9 }
 0x957   :  { %10652 = vmatmul.mubr.msk.bf16.gmra.mrb[80].mxu1 %vm4257_vm0, %v11123_v21 }
 0x958   :  { %10655 = vmatprep.mubr.msk.bf16.mxu1 %vm4257_vm0, %v11124_v24 }
 0x95f   :  { %10656 = vmatmul.mubr.msk.bf16.gmra.mrb[84].mxu1 %vm4257_vm0, %v11125_v7 }
 0x960   :  { %10659 = vmatprep.mubr.msk.bf16.mxu1 %vm4257_vm0, %v11126_v59 }
 0x967   :  { %10660 = vmatmul.mubr.msk.bf16.gmra.mrb[88].mxu1 %vm4257_vm0, %v11127_v20 }
 0x968   :  { %10663 = vmatprep.mubr.msk.bf16.mxu1 %vm4257_vm0, %v11128_v46 }
 0x96f   :  { %10664 = vmatmul.mubr.msk.bf16.gmra.mrb[92].mxu1 %vm4257_vm0, %v11129_v0 }
 0x970   :  { %10667 = vmatprep.mubr.msk.bf16.mxu1 %vm4257_vm0, %v11130_v25 }
 0x977   :  { %10668 = vmatmul.mubr.msk.bf16.gmra.mrb[96].mxu1 %vm4257_vm0, %v11131_v61 }
 0x978   :  { %10671 = vmatprep.mubr.msk.bf16.mxu1 %vm4257_vm0, %v11132_v26 }
 0x97f   :  { %10672 = vmatmul.mubr.msk.bf16.gmra.mrb[100].mxu1 %vm4257_vm0, %v11133_v40 }
 0x980   :  { %10675 = vmatprep.mubr.msk.bf16.mxu1 %vm4257_vm0, %v11134_v37 }
 0x987   :  { %10676 = vmatmul.mubr.msk.bf16.gmra.mrb[104].mxu1 %vm4257_vm0, %v11135_v44 }
 0xa1a   :  { %v10645_v10 = vpop.f32.mrb[72].mxu1 }
 0xa1b   :  { %4497 = vrot.lane.b32.xlu0 %v10645_v10, %s11693_s22  ;;  %v4346_v23 = vpop.f32.mrb[73].mxu1 }
 0xa1c   :  { %v10646_v42 = vpop.f32.mrb[74].mxu1 }
 0xa1d   :  { %4499 = vrot.lane.b32.xlu1 %v10646_v42, %s11693_s22  ;;  %v4349_v3 = vpop.f32.mrb[75].mxu1 }
 0xa1f   :  { %4493 = vrot.lane.b32.xlu0 %v4346_v23, %s11693_s22 }
 0xa21   :  { %4495 = vrot.lane.b32.xlu1 %v4349_v3, %s11693_s22 }
 0xa22   :  { %v10649_v4 = vpop.f32.mrb[76].mxu1 }
 0xa23   :  { %4521 = vrot.lane.b32.xlu0 %v10649_v4, %s11691_s19  ;;  %v4362_v33 = vpop.f32.mrb[77].mxu1 }
 0xa24   :  { %v10650_v52 = vpop.f32.mrb[78].mxu1 }
 0xa25   :  { %4523 = vrot.lane.b32.xlu1 %v10650_v52, %s11691_s19  ;;  %v4365_v29 = vpop.f32.mrb[79].mxu1 }
 0xa27   :  { %4517 = vrot.lane.b32.xlu0 %v4362_v33, %s11691_s19 }
 0xa29   :  { %4519 = vrot.lane.b32.xlu1 %v4365_v29, %s11691_s19 }
 0xa2a   :  { %v10653_v27 = vpop.f32.mrb[80].mxu1 }
 0xa2b   :  { %4545 = vrot.lane.b32.xlu0 %v10653_v27, %s11694_s17  ;;  %v4378_v39 = vpop.f32.mrb[81].mxu1 }
 0xa2c   :  { %v10654_v47 = vpop.f32.mrb[82].mxu1 }
 0xa2d   :  { %4547 = vrot.lane.b32.xlu1 %v10654_v47, %s11694_s17  ;;  %v4381_v22 = vpop.f32.mrb[83].mxu1 }
 0xa2f   :  { %4541 = vrot.lane.b32.xlu0 %v4378_v39, %s11694_s17 }
 0xa31   :  { %4543 = vrot.lane.b32.xlu1 %v4381_v22, %s11694_s17 }
 0xa32   :  { %v10657_v15 = vpop.f32.mrb[84].mxu1 }
 0xa33   :  { %4569 = vrot.lane.b32.xlu0 %v10657_v15, %s11695_s18  ;;  %v4394_v18 = vpop.f32.mrb[85].mxu1 }
 0xa34   :  { %v10658_v50 = vpop.f32.mrb[86].mxu1 }
 0xa35   :  { %4571 = vrot.lane.b32.xlu1 %v10658_v50, %s11695_s18  ;;  %v4397_v5 = vpop.f32.mrb[87].mxu1 }
 0xa37   :  { %4565 = vrot.lane.b32.xlu0 %v4394_v18, %s11695_s18 }
 0xa39   :  { %4567 = vrot.lane.b32.xlu1 %v4397_v5, %s11695_s18 }
 0xa3a   :  { %v13824_v36 = vpop.f32.mrb[88].mxu1 }
 0xa3b   :  { %v4410_v30 = vpop.f32.mrb[89].mxu1 }
 0xa3c   :  { %v13826_v11 = vpop.f32.mrb[90].mxu1 }
 0xa3d   :  { %v13828_v57 = vpop.f32.mrb[91].mxu1 }
 0xa42   :  { %v10665_v19 = vpop.f32.mrb[92].mxu1 }
 0xa43   :  { %4593 = vrot.lane.b32.xlu0 %v10665_v19, %s11696_s25  ;;  %v4426_v53 = vpop.f32.mrb[93].mxu1 }
 0xa44   :  { %v10666_v35 = vpop.f32.mrb[94].mxu1 }
 0xa45   :  { %4595 = vrot.lane.b32.xlu1 %v10666_v35, %s11696_s25  ;;  %v4429_v54 = vpop.f32.mrb[95].mxu1 }
 0xa47   :  { %4589 = vrot.lane.b32.xlu0 %v4426_v53, %s11696_s25 }
 0xa49   :  { %4591 = vrot.lane.b32.xlu1 %v4429_v54, %s11696_s25 }
 0xa4a   :  { %v10669_v63 = vpop.f32.mrb[96].mxu1 }
 0xa4b   :  { %4617 = vrot.lane.b32.xlu0 %v10669_v63, %s11697_s3  ;;  %v4442_v45 = vpop.f32.mrb[97].mxu1 }
 0xa4c   :  { %v10670_v2 = vpop.f32.mrb[98].mxu1 }
 0xa4d   :  { %4619 = vrot.lane.b32.xlu1 %v10670_v2, %s11697_s3  ;;  %v4445_v58 = vpop.f32.mrb[99].mxu1 }
 0xa4f   :  { %4613 = vrot.lane.b32.xlu0 %v4442_v45, %s11697_s3 }
 0xa51   :  { %4615 = vrot.lane.b32.xlu1 %v4445_v58, %s11697_s3 }
 0xa52   :  { %v10673_v34 = vpop.f32.mrb[100].mxu1 }
 0xa53   :  { %4641 = vrot.lane.b32.xlu0 %v10673_v34, %s11698_s26  ;;  %v4458_v32 = vpop.f32.mrb[101].mxu1 }
 0xa54   :  { %v10674_v49 = vpop.f32.mrb[102].mxu1 }
 0xa55   :  { %4643 = vrot.lane.b32.xlu1 %v10674_v49, %s11698_s26  ;;  %v4461_v60 = vpop.f32.mrb[103].mxu1 }
 0xa57   :  { %4637 = vrot.lane.b32.xlu0 %v4458_v32, %s11698_s26 }
 0xa59   :  { %4639 = vrot.lane.b32.xlu1 %v4461_v60, %s11698_s26 }
 0xa5a   :  { %v10677_v56 = vpop.f32.mrb[104].mxu1 }
 0xa5b   :  { %v4474_v51 = vpop.f32.mrb[105].mxu1 }
 0xa5c   :  { %4661 = vrot.lane.b32.xlu0 %v4474_v51, %s11699_s29  ;;  %v10678_v17 = vpop.f32.mrb[106].mxu1 }
 0xa5d   :  { %v4477_v14 = vpop.f32.mrb[107].mxu1 }
 0xa5e   :  { %4663 = vrot.lane.b32.xlu1 %v4477_v14, %s11699_s29 }
 0xa60   :  { %4665 = vrot.lane.b32.xlu0 %v10677_v56, %s11699_s29 }
 0xa62   :  { %4667 = vrot.lane.b32.xlu1 %v10678_v17, %s11699_s29 }
 0xa8d   :  { %v4498_v28 = vpop.permute.xlu0 %4497 }
 0xa8e   :  { %v4507_v47 = vmul.f32 %v4498_v28, %v12662_v43 }
 0xa8f   :  { %v4500_v41 = vpop.permute.xlu1 %4499 }
 0xa90   :  { %v4511_v45 = vadd.f32 %v13824_v36, %v4507_v47  ;;  %v4508_v2 = vmul.f32 %v4500_v41, %v12662_v43 }
 0xa91   :  { %v4494_v9 = vpop.permute.xlu0 %4493 }
 0xa92   :  { %v4505_v33 = vmul.f32 %v4494_v9, %v12662_v43  ;;  %v4512_v9 = vadd.f32 %v13826_v11, %v4508_v2 }
 0xa93   :  { %v4496_v21 = vpop.permute.xlu1 %4495 }
 0xa94   :  { %v4506_v29 = vmul.f32 %v4496_v21, %v12662_v43  ;;  %v4509_v22 = vadd.f32 %v4505_v33, %v4410_v30 }
 0xa95   :  { %v4522_v24 = vpop.permute.xlu0 %4521 }
 0xa96   :  { %v4531_v5 = vmul.f32 %v4522_v24, %v12670_v1  ;;  %v4510_v19 = vadd.f32 %v4506_v29, %v13828_v57 }
 0xa97   :  { %v4524_v7 = vpop.permute.xlu1 %4523 }
 0xa98   :  { %v4535_v57 = vadd.f32 %v4531_v5, %v4511_v45  ;;  %v4532_v56 = vmul.f32 %v4524_v7, %v12670_v1 }
 0xa99   :  { %v4518_v59 = vpop.permute.xlu0 %4517 }
 0xa9a   :  { %v4529_v27 = vmul.f32 %v4518_v59, %v12670_v1 }
 0xa9b   :  { %v4520_v20 = vpop.permute.xlu1 %4519 }
 0xa9c   :  { %v4530_v15 = vmul.f32 %v4520_v20, %v12670_v1  ;;  %v4533_v53 = vadd.f32 %v4529_v27, %v4509_v22 }
 0xa9d   :  { %v4546_v46 = vpop.permute.xlu0 %4545 }
 0xa9e   :  { %v4555_v30 = vmul.f32 %v4546_v46, %v12677_v55  ;;  %v4534_v58 = vadd.f32 %v4530_v15, %v4510_v19 }
 0xa9f   :  { %v4548_v0 = vpop.permute.xlu1 %4547 }
 0xaa0   :  { %v4559_v21 = vadd.f32 %v4555_v30, %v4535_v57  ;;  %v4556_v24 = vmul.f32 %v4548_v0, %v12677_v55 }
 0xaa1   :  { %v4542_v25 = vpop.permute.xlu0 %4541 }
 0xaa2   :  { %v4553_v18 = vmul.f32 %v4542_v25, %v12677_v55 }
 0xaa3   :  { %v4544_v61 = vpop.permute.xlu1 %4543 }
 0xaa4   :  { %v4554_v35 = vmul.f32 %v4544_v61, %v12677_v55  ;;  %v4557_v34 = vadd.f32 %v4553_v18, %v4533_v53 }
 0xaa5   :  { %v4570_v26 = vpop.permute.xlu0 %4569 }
 0xaa6   :  { %v4579_v51 = vmul.f32 %v4570_v26, %v12684_v8  ;;  %v4558_v17 = vadd.f32 %v4554_v35, %v4534_v58  ;;  %v4536_v26 = vadd.f32 %v4532_v56, %v4512_v9 }
 0xaa7   :  { %v4572_v40 = vpop.permute.xlu1 %4571 }
 0xaa8   :  { %v4560_v0 = vadd.f32 %v4556_v24, %v4536_v26 }
 0xaa9   :  { %v4566_v37 = vpop.permute.xlu0 %4565 }
 0xaaa   :  { %v4577_v54 = vmul.f32 %v4566_v37, %v12684_v8  ;;  %v4583_v37 = vadd.f32 %v4579_v51, %v4559_v21 }
 0xaab   :  { %v4568_v44 = vpop.permute.xlu1 %4567 }
 0xaac   :  { %v4578_v32 = vmul.f32 %v4568_v44, %v12684_v8  ;;  %v4581_v14 = vadd.f32 %v4577_v54, %v4557_v34  ;;  %v4580_v44 = vmul.f32 %v4572_v40, %v12684_v8 }
 0xaae   :  { %v4582_v20 = vadd.f32 %v4578_v32, %v4558_v17  ;;  %v4584_v18 = vadd.f32 %v4580_v44, %v4560_v0 }
 0xab5   :  { %v4594_v10 = vpop.permute.xlu0 %4593 }
 0xab6   :  { %v4603_v59 = vmul.f32 %v4594_v10, %v12690_v12 }
 0xab7   :  { %v4596_v23 = vpop.permute.xlu1 %4595 }
 0xab8   :  { %v4607_v29 = vadd.f32 %v4603_v59, %v4583_v37  ;;  %v4604_v10 = vmul.f32 %v4596_v23, %v12690_v12 }
 0xab9   :  { %v4590_v42 = vpop.permute.xlu0 %4589 }
 0xaba   :  { %v4601_v49 = vmul.f32 %v4590_v42, %v12690_v12  ;;  %v4608_v35 = vadd.f32 %v4604_v10, %v4584_v18 }
 0xabb   :  { %v4592_v3 = vpop.permute.xlu1 %4591 }
 0xabc   :  { %v4602_v36 = vmul.f32 %v4592_v3, %v12690_v12  ;;  %v4605_v46 = vadd.f32 %v4601_v49, %v4581_v14 }
 0xabd   :  { %v4618_v4 = vpop.permute.xlu0 %4617 }
 0xabe   :  { %v4627_v42 = vmul.f32 %v4618_v4, %v12700_v13  ;;  %v4606_v3 = vadd.f32 %v4602_v36, %v4582_v20 }
 0xabf   :  { %v4620_v52 = vpop.permute.xlu1 %4619 }
 0xac0   :  { %v4628_v4 = vmul.f32 %v4620_v52, %v12700_v13 }
 0xac1   :  { %v4614_v39 = vpop.permute.xlu0 %4613 }
 0xac2   :  { %v4625_v28 = vmul.f32 %v4614_v39, %v12700_v13  ;;  %v4632_v58 = vadd.f32 %v4628_v4, %v4608_v35  ;;  %v15806_v4 = vmov 0.0  }
 0xac3   :  { %v4616_v50 = vpop.permute.xlu1 %4615  ;;  %10679 = vmatprep.subr.bf16.mxu1 %v15806_v4  ;;  %10683 = vmatprep.mubr.msk.bf16.mxu1 %vm11706_vm9, %v15806_v4 }
 0xac4   :  { %v4626_v7 = vmul.f32 %v4616_v50, %v12700_v13  ;;  %v4629_v11 = vadd.f32 %v4625_v28, %v4605_v46  ;;  %v4631_v50 = vadd.f32 %v4627_v42, %v4607_v29 }
 0xac5   :  { %v4642_v63 = vpop.permute.xlu0 %4641 }
 0xac6   :  { %v4630_v39 = vadd.f32 %v4626_v7, %v4606_v3  ;;  %v4651_v47 = vmul.f32 %v4642_v63, %v12711_v48  ;;  %v11703_v7 = vmov 4  }
 0xac7   :  { %v4644_v60 = vpop.permute.xlu1 %4643  ;;  %10819 = vset.pattern.permute.xlu1 %v11703_v7  ;;  %10820 = vset.pattern.permute.xlu0 %v11703_v7 }
 0xac8   :  { %v4655_v45 = vadd.f32 %v4651_v47, %v4631_v50  ;;  %v4652_v23 = vmul.f32 %v4644_v60, %v12711_v48 }
 0xac9   :  { %v4638_v41 = vpop.permute.xlu0 %4637 }
 0xaca   :  { %v4649_v25 = vmul.f32 %v4638_v41, %v12711_v48  ;;  %v4656_v52 = vadd.f32 %v4652_v23, %v4632_v58 }
 0xacb   :  { %v4640_v61 = vpop.permute.xlu1 %4639 }
 0xacc   :  { %v4650_v33 = vmul.f32 %v4640_v61, %v12711_v48  ;;  %v4653_v22 = vadd.f32 %v4649_v25, %v4629_v11 }
 0xace   :  { %v4662_v27 = vpop.permute.xlu0 %4661  ;;  %v4654_v5 = vadd.f32 %v4650_v33, %v4630_v39 }
 0xacf   :  { %v4673_v15 = vmul.f32 %v13610_v6, %v4662_v27 }
 0xad0   :  { %v4664_v40 = vpop.permute.xlu1 %4663 }
 0xad1   :  { %v4677_v19 = vadd.f32 %v4673_v15, %v4653_v22  ;;  %v4674_v53 = vmul.f32 %v13610_v6, %v4664_v40  ;;  %v11704_v15 = vmov 5  }
 0xad2   :  { %v4666_v54 = vpop.permute.xlu0 %4665 }
 0xad3   :  { %v4678_v2 = vadd.f32 %v4674_v53, %v4654_v5  ;;  %v4675_v63 = vmul.f32 %v13610_v6, %v4666_v54  ;;  %4681 = vadd.xlane.f32.xlu0 %v4677_v19 }
 0xad4   :  { %v4668_v30 = vpop.permute.xlu1 %4667 }
 0xad5   :  { %v4679_v34 = vadd.f32 %v4675_v63, %v4655_v45  ;;  %v4676_v32 = vmul.f32 %v13610_v6, %v4668_v30  ;;  %4683 = vadd.xlane.f32.xlu1 %v4678_v2 }
 0xad7   :  { %4685 = vadd.xlane.f32.xlu0 %v4679_v34  ;;  %v4680_v49 = vadd.f32 %v4676_v32, %v4656_v52 }
 0xadb   :  { %4687 = vadd.xlane.f32.xlu0 %v4680_v49 }
 0xb60   :  { %v4682_v57 = vpop.xlane.xlu0 %4681 }
 0xb61   :  { %v4689_v56 = vmul.f32 0.0078125, %v4682_v57 }
 0xb62   :  { %v4684_v51 = vpop.xlane.xlu1 %4683 }
 0xb63   :  { %v4693_v17 = vsub.f32 %v4677_v19, %v4689_v56  ;;  %v4690_v14 = vmul.f32 0.0078125, %v4684_v51 }
 0xb64   :  { %v4686_v60 = vpop.xlane.xlu0 %4685 }
 0xb65   :  { %v4694_v36 = vsub.f32 %v4678_v2, %v4690_v14  ;;  %v4691_v28 = vmul.f32 0.0078125, %v4686_v60  ;;  %v4697_v41 = vmul.f32 %v4693_v17, %v4693_v17 }
 0xb67   :  { %v13881_v9 = vsub.f32 %v4679_v34, %v4691_v28  ;;  %4701 = vadd.xlane.f32.xlu1 %v4697_v41  ;;  %v4698_v21 = vmul.f32 %v4694_v36, %v4694_v36  ;;  %v11136_v41 = vld [vmem:[%s15787_s6] sm:$0xff]  }
 0xb68   :  { %v4688_v24 = vpop.xlane.xlu0 %4687 }
 0xb69   :  { %v4692_v6 = vmul.f32 0.0078125, %v4688_v24  ;;  %4703 = vadd.xlane.f32.xlu0 %v4698_v21  ;;  %v4699_v59 = vmul.f32 %v13881_v9, %v13881_v9  ;;  %v15991_v21 = vmov 0   ;;  %v11138_v24 = vld [vmem:[%s15782_s1 + $0x8] sm:$0xff]  }
 0xb6b   :  { %v13885_v20 = vsub.f32 %v4680_v49, %v4692_v6  ;;  %4705 = vadd.xlane.f32.xlu1 %v4699_v59  ;;  %v11144_v6 = vld [vmem:[%s15787_s6 + $0x8] sm:$0xff]   ;;  %v11139_v59 = vld [vmem:[%s15782_s1 + $0x10] sm:$0xff]  }
 0xb6d   :  { %v4700_v46 = vmul.f32 %v13885_v20, %v13885_v20 }
 0xb6f   :  { %4707 = vadd.xlane.f32.xlu0 %v4700_v46  ;;  %v11147_v46 = vld [vmem:[%s15787_s6 + $0x10] sm:$0xff]  }
 0xbf4   :  { %v4702_v25 = vpop.xlane.xlu1 %4701 }
 0xbf5   :  { %v4709_v61 = vmul.f32 0.0078125, %v4702_v25  ;;  %v11142_v25 = vld [vmem:[%s15782_s1 + $0x28] sm:$0xff]  }
 0xbf6   :  { %v4704_v26 = vpop.xlane.xlu0 %4703 }
 0xbf7   :  { %v4713_v37 = vadd.f32 1e-05, %v4709_v61  ;;  %v4710_v44 = vmul.f32 0.0078125, %v4704_v26  ;;  %v11150_v61 = vld [vmem:[%s15787_s6 + $0x18] sm:$0xff]   ;;  %v11143_v26 = vld [vmem:[%s15782_s1 + $0x30] sm:$0xff]  }
 0xbf8   :  { %v4706_v3 = vpop.xlane.xlu1 %4705 }
 0xbf9   :  { %11552 = vrsqrt.f32 %v4713_v37  ;;  %v4714_v42 = vadd.f32 1e-05, %v4710_v44  ;;  %v4711_v11 = vmul.f32 0.0078125, %v4706_v3  ;;  %v11145_v37 = vld [vmem:[%s15782_s1 + $0x38] sm:$0xff]   ;;  %v11153_v44 = vld [vmem:[%s15787_s6 + $0x20] ss:$0 sps:$4 sm:$0xff]  }
 0xbfa   :  { %v11159_v3 = vld [vmem:[#allocation2 + $0x4] ss:$8 sps:$4 sm:$0xff]  }
 0xbfb   :  { %11554 = vrsqrt.f32 %v4714_v42  ;;  %v4715_v0 = vadd.f32 1e-05, %v4711_v11  ;;  %v11146_v42 = vld [vmem:[%s15782_s1 + $0x40] sm:$0xff]   ;;  %v11148_v11 = vld [vmem:[%s15782_s1 + $0x48] sm:$0xff]  }
 0xbfc   :  { %v4708_v33 = vpop.xlane.xlu0 %4707 }
 0xbfd   :  { %v4712_v29 = vmul.f32 0.0078125, %v4708_v33  ;;  %11556 = vrsqrt.f32 %v4715_v0  ;;  %v11149_v33 = vld [vmem:[%s15782_s1 + $0x50] sm:$0xff]   ;;  %v11151_v0 = vld [vmem:[%s15782_s1 + $0x58] sm:$0xff]  }
 0xbff   :  { %v4716_v47 = vadd.f32 1e-05, %v4712_v29  ;;  %v11152_v29 = vld [vmem:[%s15782_s1 + $0x60] sm:$0xff]  }
 0xc01   :  { %11558 = vrsqrt.f32 %v4716_v47  ;;  %v11157_v47 = vld [vmem:[#allocation2] ss:$8 sps:$4 sm:$0xff]  }
 0xc03   :  { %v11553_v10 = vpop.eup %11552 }
 0xc04   :  { %v4721_v27 = vmul.f32 %v13688_v62, %v11553_v10  ;;  %v11154_v10 = vld [vmem:[%s15782_s1 + $0x68] sm:$0xff]  }
 0xc05   :  { %v11555_v39 = vpop.eup %11554 }
 0xc06   :  { %4727 = vperm.xlu1 %10819, %v4721_v27   ;;  %v4722_v22 = vmul.f32 %v13694_v38, %v11555_v39  ;;  %v11155_v27 = vld [vmem:[%s15782_s1 + $0x70] sm:$0xff]   ;;  %v11156_v39 = vld [vmem:[%s15782_s1 + $0x78] sm:$0xff]  }
 0xc07   :  { %v11557_v18 = vpop.eup %11556 }
 0xc08   :  { %4732 = vperm.xlu0 %10820, %v4722_v22   ;;  %v4723_v50 = vmul.f32 %v13700_v16, %v11557_v18  ;;  %v11160_v22 = vld [vmem:[#allocation2 + $0x14] ss:$8 sps:$4 sm:$0xff]   ;;  %v11163_v18 = vld [vmem:[#allocation2 + $0x24] ss:$8 sps:$4 sm:$0xff]  }
 0xc0a   :  { %10821 = vset.pattern.permute.xlu1 %v11704_v15 }
 0xc0b   :  { %4750 = vperm.xlu1 %10821, %v13688_v62   ;;  %v11559_v40 = vpop.eup %11558 }
 0xc0c   :  { %v4724_v5 = vmul.f32 %v13706_v31, %v11559_v40  ;;  %v11166_v40 = vld [vmem:[#allocation2 + $0x34] ss:$8 sps:$4 sm:$0xff]  }
 0xc0f   :  { %4754 = vperm.xlu1 %10821, %v13694_v38  }
 0xc13   :  { %10822 = vset.pattern.permute.xlu1 %v11703_v7  ;;  %v11141_v7 = vld [vmem:[%s15782_s1 + $0x20] sm:$0xff]  }
 0xc14   :  { %4737 = vperm.xlu1 %10822, %v4723_v50   ;;  %v11165_v50 = vld [vmem:[#allocation2 + $0x20] ss:$8 sps:$4 sm:$0xff]  }
 0xc18   :  { %4742 = vperm.xlu1 %10822, %v4724_v5   ;;  %v11168_v5 = vld [vmem:[#allocation2 + $0x30] ss:$8 sps:$4 sm:$0xff]  }
 0xc1c   :  { %10823 = vset.pattern.permute.xlu1 %v11704_v15  ;;  %v11162_v15 = vld [vmem:[#allocation2 + $0x10] ss:$8 sps:$4 sm:$0xff]  }
 0xc1d   :  { %4758 = vperm.xlu1 %10823, %v13700_v16  }
 0xc21   :  { %4762 = vperm.xlu1 %10823, %v13706_v31  }
 0xc85   :  { %v4728_v62 = vpop.permute.xlu1 %4727 }
 0xc86   :  { %v4745_v38 = vmul.f32 %v4728_v62, %v4693_v17  ;;  %v11169_v62 = vld [vmem:[#allocation2 + $0x44] ss:$8 sps:$4 sm:$0xff]  }
 0xc87   :  { %v4733_v19 = vpop.permute.xlu0 %4732 }
 0xc88   :  { %v4746_v54 = vmul.f32 %v4733_v19, %v4694_v36  ;;  %v11172_v19 = vld [vmem:[#allocation2 + $0x54] ss:$8 sps:$4 sm:$0xff]  }
 0xc8a   :  { %v4751_v53 = vpop.permute.xlu1 %4750 }
 0xc8b   :  { %v4765_v35 = vadd.f32 %v4751_v53, %v4745_v38  ;;  %v11171_v38 = vld [vmem:[#allocation2 + $0x40] ss:$8 sps:$4 sm:$0xff]   ;;  %v11174_v53 = vld [vmem:[#allocation2 + $0x50] ss:$8 sps:$4 sm:$0xff]  }
 0xc8d   :  { %v4773_v23 = vmul.f32 0.2, %v4765_v35  ;;  %vm4769_vm10 = vcmp.ge.f32.partialorder %v4765_v35, 0.0 }
 0xc8e   :  { %v4755_v45 = vpop.permute.xlu1 %4754 }
 0xc8f   :  { %v4766_v2 = vadd.f32 %v4755_v45, %v4746_v54  ;;  %v4777_v30 = vsel %vm4769_vm10, %v4765_v35, %v4773_v23  ;;  %v11175_v35 = vld [vmem:[#allocation2 + $0x64] ss:$8 sps:$4 sm:$0xff]   ;;  %v11177_v54 = vld [vmem:[#allocation2 + $0x60] ss:$8 sps:$4 sm:$0xff]   ;;  %v11178_v45 = vld [vmem:[#allocation2 + $0x74] ss:$8 sps:$4 sm:$0xff]  }
 0xc90   :  { %v11180_v23 = vld [vmem:[#allocation2 + $0x70] ss:$8 sps:$4 sm:$0xff]  }
 0xc91   :  { %vm4770_vm11 = vcmp.ge.f32.partialorder %v4766_v2, 0.0  ;;  %v4774_v63 = vmul.f32 0.2, %v4766_v2 }
 0xc93   :  { %v4778_v16 = vsel %vm4770_vm11, %v4766_v2, %v4774_v63  ;;  %v4738_v58 = vpop.permute.xlu1 %4737  ;;  %v11181_v2 = vld [vmem:[#allocation2 + $0x84] ss:$8 sps:$4 sm:$0xff]   ;;  %v11183_v63 = vld [vmem:[#allocation2 + $0x80] ss:$8 sps:$4 sm:$0xff]  }
 0xc94   :  { %v13900_v31 = vpack.c.bf16 %v4778_v16, %v4777_v30  ;;  %v4747_v32 = vmul.f32 %v4738_v58, %v13881_v9  ;;  %v11137_v9 = vld [vmem:[%s15782_s1] sm:$0xff]   ;;  %v11184_v30 = vld [vmem:[#allocation2 + $0x94] ss:$8 sps:$4 sm:$0xff]   ;;  %v11186_v16 = vld [vmem:[#allocation2 + $0x90] ss:$8 sps:$4 sm:$0xff]  }
 0xc95   :  { %v11187_v58 = vld [vmem:[#allocation2 + $0xa4] ss:$8 sps:$4 sm:$0xff]  }
 0xc96   :  { %15989 = vst [vmem:[#allocation52_spill] sm:$0xff] %v13900_v31  ;;  %10680 = vmatpush3.bf16.msra.mxu1 %v13900_v31 }
 0xc97   :  { %v4743_v34 = vpop.permute.xlu1 %4742  ;;  %10681 = vmatprep.subr.bf16.mxu1 %v15806_v4 }
 0xc98   :  { %v4748_v57 = vmul.f32 %v4743_v34, %v13885_v20  ;;  %v11140_v20 = vld [vmem:[%s15782_s1 + $0x18] sm:$0xff]   ;;  %v11189_v34 = vld [vmem:[#allocation2 + $0xa0] ss:$8 sps:$4 sm:$0xff]  }
 0xc9c   :  { %v4759_v52 = vpop.permute.xlu1 %4758 }
 0xc9d   :  { %v4767_v49 = vadd.f32 %v4759_v52, %v4747_v32  ;;  %v11190_v32 = vld [vmem:[#allocation2 + $0xb4] ss:$8 sps:$4 sm:$0xff]   ;;  %v11192_v52 = vld [vmem:[#allocation2 + $0xb0] ss:$8 sps:$4 sm:$0xff]  }
 0xc9f   :  { %v4775_v51 = vmul.f32 0.2, %v4767_v49  ;;  %vm4771_vm12 = vcmp.ge.f32.partialorder %v4767_v49, 0.0 }
 0xca0   :  { %v4763_v56 = vpop.permute.xlu1 %4762 }
 0xca1   :  { %v4768_v17 = vadd.f32 %v4763_v56, %v4748_v57  ;;  %v4779_v60 = vsel %vm4771_vm12, %v4767_v49, %v4775_v51  ;;  %v11193_v49 = vld [vmem:[#allocation2 + $0xc4] ss:$8 sps:$4 sm:$0xff]   ;;  %v11195_v57 = vld [vmem:[#allocation2 + $0xc0] ss:$8 sps:$4 sm:$0xff]   ;;  %v11196_v56 = vld [vmem:[#allocation2 + $0xd4] ss:$8 sps:$4 sm:$0xff]  }
 0xca2   :  { %v11198_v51 = vld [vmem:[#allocation2 + $0xd0] ss:$8 sps:$4 sm:$0xff]  }
 0xca3   :  { %vm4772_vm13 = vcmp.ge.f32.partialorder %v4768_v17, 0.0  ;;  %v4776_v14 = vmul.f32 0.2, %v4768_v17 }
 0xca5   :  { %v4780_v36 = vsel %vm4772_vm13, %v4768_v17, %v4776_v14  ;;  %v11199_v17 = vld [vmem:[#allocation2 + $0xe4] ss:$8 sps:$4 sm:$0xff]   ;;  %v11201_v14 = vld [vmem:[#allocation2 + $0xe0] ss:$8 sps:$4 sm:$0xff]  }
 0xca6   :  { %v13906_v28 = vpack.c.bf16 %v4780_v36, %v4779_v60  ;;  %v11202_v60 = vld [vmem:[#allocation2 + $0xf4] ss:$8 sps:$4 sm:$0xff]   ;;  %v11204_v36 = vld [vmem:[#allocation2 + $0xf0] ss:$8 sps:$4 sm:$0xff]  }
 0xca8   :  { %15990 = vst [vmem:[#allocation63_spill] sm:$0xff] %v13906_v28  ;;  %10682 = vmatpush3.bf16.msra.mxu1 %v13906_v28 }
 0xca9   :  { %5940 = vmatprep.subr.bf16.mxu1 %v15991_v21 }
 0xcab   :  { %10684 = vmatmul.mubr.msk.bf16.vlgmr.msra.gmra.mrb[108].mxu1 %vm4815_vm14, %v11136_v41  ;;  %v11205_v41 = vld [vmem:[#allocation2 + $0x104] ss:$8 sps:$4 sm:$0xff]  }
 0xcac   :  { %5941 = vmatpush1.bf16.msra.mxu1 %v11137_v9  ;;  %10687 = vmatprep.mubr.msk.bf16.mxu1 %vm11706_vm9, %v15806_v4  ;;  %v11207_v9 = vld [vmem:[#allocation2 + $0x100] ss:$8 sps:$4 sm:$0xff]  }
 0xcad   :  { %5942 = vmatprep.subr.bf16.mxu1 %v15991_v21 }
 0xcb0   :  { %5943 = vmatpush1.bf16.msra.mxu1 %v11138_v24  ;;  %v11208_v24 = vld [vmem:[#allocation2 + $0x114] ss:$8 sps:$4 sm:$0xff]  }
 0xcb1   :  { %5944 = vmatprep.subr.bf16.mxu1 %v15991_v21 }
 0xcb3   :  { %10688 = vmatmul.mubr.msk.bf16.gmra.mrb[112].mxu1 %vm4815_vm14, %v11144_v6  ;;  %v11210_v6 = vld [vmem:[#allocation2 + $0x110] ss:$8 sps:$4 sm:$0xff]  }
 0xcb4   :  { %5945 = vmatpush1.bf16.msra.mxu1 %v11139_v59  ;;  %10691 = vmatprep.mubr.msk.bf16.mxu1 %vm11706_vm9, %v15806_v4  ;;  %v11211_v59 = vld [vmem:[#allocation2 + $0x124] ss:$8 sps:$4 sm:$0xff]  }
 0xcb5   :  { %5946 = vmatprep.subr.bf16.mxu1 %v15991_v21 }
 0xcb8   :  { %5947 = vmatpush1.bf16.msra.mxu1 %v11140_v20  ;;  %v11213_v20 = vld [vmem:[#allocation2 + $0x120] ss:$8 sps:$4 sm:$0xff]  }
 0xcb9   :  { %5948 = vmatprep.subr.bf16.mxu1 %v15991_v21 }
 0xcbb   :  { %10692 = vmatmul.mubr.msk.bf16.gmra.mrb[116].mxu1 %vm4815_vm14, %v11147_v46  ;;  %v11214_v46 = vld [vmem:[#allocation2 + $0x134] ss:$8 sps:$4 sm:$0xff]  }
 0xcbc   :  { %5949 = vmatpush1.bf16.msra.mxu1 %v11141_v7  ;;  %10695 = vmatprep.mubr.msk.bf16.mxu1 %vm11706_vm9, %v15806_v4 }
 0xcbd   :  { %5950 = vmatprep.subr.bf16.mxu1 %v15991_v21 }
 0xcc0   :  { %5951 = vmatpush1.bf16.msra.mxu1 %v11142_v25 }
 0xcc1   :  { %5952 = vmatprep.subr.bf16.mxu1 %v15991_v21 }
 0xcc3   :  { %10696 = vmatmul.mubr.msk.bf16.gmra.mrb[120].mxu1 %vm4815_vm14, %v11150_v61  ;;  %v11216_v61 = vld [vmem:[#allocation2 + $0x130] ss:$8 sps:$4 sm:$0xff]  }
 0xcc4   :  { %5953 = vmatpush1.bf16.msra.mxu1 %v11143_v26  ;;  %10699 = vmatprep.mubr.msk.bf16.mxu1 %vm11706_vm9, %v15806_v4 }
 0xcc5   :  { %5954 = vmatprep.subr.bf16.mxu1 %v15991_v21 }
 0xcc8   :  { %5955 = vmatpush1.bf16.msra.mxu1 %v11145_v37  ;;  %v11217_v37 = vld [vmem:[#allocation2 + $0x144] ss:$8 sps:$4 sm:$0xff]  }
 0xcc9   :  { %5956 = vmatprep.subr.bf16.mxu1 %v15991_v21 }
 0xccb   :  { %10700 = vmatmul.mubr.msk.bf16.gmra.mrb[124].mxu1 %vm4815_vm14, %v11153_v44 }
 0xccc   :  { %5957 = vmatpush1.bf16.msra.mxu1 %v11146_v42  ;;  %5972 = vmatprep.mubr.bf16.mxu1 %v11159_v3  ;;  %v11219_v3 = vld [vmem:[#allocation2 + $0x140] ss:$8 sps:$4 sm:$0xff]  }
 0xccd   :  { %5958 = vmatprep.subr.bf16.mxu1 %v15991_v21 }
 0xcd0   :  { %5959 = vmatpush1.bf16.msra.mxu1 %v11148_v11 }
 0xcd1   :  { %5960 = vmatprep.subr.bf16.mxu1 %v15991_v21 }
 0xcd4   :  { %5961 = vmatpush1.bf16.msra.mxu1 %v11149_v33  ;;  %v11220_v33 = vld [vmem:[#allocation2 + $0x154] ss:$8 sps:$4 sm:$0xff]  }
 0xcd5   :  { %5962 = vmatprep.subr.bf16.mxu1 %v15991_v21 }
 0xcd8   :  { %5963 = vmatpush1.bf16.msra.mxu1 %v11151_v0 }
 0xcd9   :  { %5964 = vmatprep.subr.bf16.mxu1 %v15991_v21 }
 0xcdc   :  { %5965 = vmatpush1.bf16.msra.mxu1 %v11152_v29 }
 0xcdd   :  { %5966 = vmatprep.subr.bf16.mxu1 %v15991_v21 }
 0xce0   :  { %5967 = vmatpush1.bf16.msra.mxu1 %v11154_v10 }
 0xce1   :  { %5968 = vmatprep.subr.bf16.mxu1 %v15991_v21 }
 0xce4   :  { %5969 = vmatpush1.bf16.msra.mxu1 %v11155_v27  ;;  %v11222_v27 = vld [vmem:[#allocation2 + $0x150] ss:$8 sps:$4 sm:$0xff]  }
 0xce5   :  { %5970 = vmatprep.subr.bf16.mxu1 %v15991_v21 }
 0xce8   :  { %5971 = vmatpush1.bf16.msra.mxu1 %v11156_v39 }
 0xceb   :  { %5973 = vmatmul.mubr.bf16.vlgmr.msra.gmra.mrb[128].mxu1 %v11157_v47  ;;  %v11223_v47 = vld [vmem:[#allocation2 + $0x164] ss:$8 sps:$4 sm:$0xff]  }
 0xcec   :  { %5980 = vmatprep.mubr.bf16.mxu1 %v11160_v22 }
 0xcf3   :  { %5981 = vmatmul.mubr.bf16.gmra.mrb[132].mxu1 %v11162_v15 }
 0xcf4   :  { %5988 = vmatprep.mubr.bf16.mxu1 %v11163_v18 }
 0xcfb   :  { %5989 = vmatmul.mubr.bf16.gmra.mrb[136].mxu1 %v11165_v50  ;;  %v11225_v50 = vld [vmem:[#allocation2 + $0x160] ss:$8 sps:$4 sm:$0xff]  }
 0xcfc   :  { %5996 = vmatprep.mubr.bf16.mxu1 %v11166_v40 }
 0xd03   :  { %5997 = vmatmul.mubr.bf16.gmra.mrb[140].mxu1 %v11168_v5  ;;  %v11226_v5 = vld [vmem:[#allocation2 + $0x174] ss:$8 sps:$4 sm:$0xff]  }
 0xd04   :  { %6004 = vmatprep.mubr.bf16.mxu1 %v11169_v62 }
 0xd0b   :  { %6005 = vmatmul.mubr.bf16.gmra.mrb[144].mxu1 %v11171_v38 }
 0xd0c   :  { %6012 = vmatprep.mubr.bf16.mxu1 %v11172_v19 }
 0xd13   :  { %6013 = vmatmul.mubr.bf16.gmra.mrb[148].mxu1 %v11174_v53  ;;  %v11228_v53 = vld [vmem:[#allocation2 + $0x170] ss:$8 sps:$4 sm:$0xff]  }
 0xd14   :  { %6020 = vmatprep.mubr.bf16.mxu1 %v11175_v35 }
 0xd1b   :  { %6021 = vmatmul.mubr.bf16.gmra.mrb[152].mxu1 %v11177_v54  ;;  %v11229_v54 = vld [vmem:[#allocation2 + $0x184] ss:$8 sps:$4 sm:$0xff]  }
 0xd1c   :  { %6028 = vmatprep.mubr.bf16.mxu1 %v11178_v45 }
 0xd23   :  { %6029 = vmatmul.mubr.bf16.gmra.mrb[156].mxu1 %v11180_v23 }
 0xd24   :  { %6036 = vmatprep.mubr.bf16.mxu1 %v11181_v2  ;;  %v11231_v2 = vld [vmem:[#allocation2 + $0x180] ss:$8 sps:$4 sm:$0xff]  }
 0xd2b   :  { %6037 = vmatmul.mubr.bf16.gmra.mrb[160].mxu1 %v11183_v63  ;;  %v11232_v63 = vld [vmem:[#allocation2 + $0x194] ss:$8 sps:$4 sm:$0xff]  }
 0xd2c   :  { %6044 = vmatprep.mubr.bf16.mxu1 %v11184_v30  ;;  %v11234_v30 = vld [vmem:[#allocation2 + $0x190] ss:$8 sps:$4 sm:$0xff]  }
 0xd33   :  { %6045 = vmatmul.mubr.bf16.gmra.mrb[164].mxu1 %v11186_v16  ;;  %v11235_v16 = vld [vmem:[#allocation2 + $0x1a4] ss:$8 sps:$4 sm:$0xff]  }
 0xd34   :  { %6052 = vmatprep.mubr.bf16.mxu1 %v11187_v58  ;;  %v11237_v58 = vld [vmem:[#allocation2 + $0x1a0] ss:$8 sps:$4 sm:$0xff]  }
 0xd3b   :  { %6053 = vmatmul.mubr.bf16.gmra.mrb[168].mxu1 %v11189_v34  ;;  %v11238_v34 = vld [vmem:[#allocation2 + $0x1b4] ss:$8 sps:$4 sm:$0xff]  }
 0xd3c   :  { %6060 = vmatprep.mubr.bf16.mxu1 %v11190_v32 }
 0xd43   :  { %6061 = vmatmul.mubr.bf16.gmra.mrb[172].mxu1 %v11192_v52 }
 0xd44   :  { %6068 = vmatprep.mubr.bf16.mxu1 %v11193_v49  ;;  %v11240_v49 = vld [vmem:[#allocation2 + $0x1b0] ss:$8 sps:$4 sm:$0xff]  }
 0xd4b   :  { %6069 = vmatmul.mubr.bf16.gmra.mrb[176].mxu1 %v11195_v57 }
 0xd4c   :  { %6076 = vmatprep.mubr.bf16.mxu1 %v11196_v56  ;;  %v11241_v56 = vld [vmem:[#allocation2 + $0x1c4] ss:$8 sps:$4 sm:$0xff]  }
 0xd53   :  { %6077 = vmatmul.mubr.bf16.gmra.mrb[180].mxu1 %v11198_v51 }
 0xd54   :  { %6084 = vmatprep.mubr.bf16.mxu1 %v11199_v17 }
 0xd5b   :  { %6085 = vmatmul.mubr.bf16.gmra.mrb[184].mxu1 %v11201_v14 }
 0xd5c   :  { %6092 = vmatprep.mubr.bf16.mxu1 %v11202_v60  ;;  %v11243_v60 = vld [vmem:[#allocation2 + $0x1c0] ss:$8 sps:$4 sm:$0xff]  }
 0xd63   :  { %6093 = vmatmul.mubr.bf16.gmra.mrb[188].mxu1 %v11204_v36 }
 0xd64   :  { %6100 = vmatprep.mubr.bf16.mxu1 %v11205_v41  ;;  %v11244_v41 = vld [vmem:[#allocation2 + $0x1d4] ss:$8 sps:$4 sm:$0xff]  }
 0xd6b   :  { %6101 = vmatmul.mubr.bf16.gmra.mrb[192].mxu1 %v11207_v9 }
 0xd6c   :  { %6108 = vmatprep.mubr.bf16.mxu1 %v11208_v24 }
 0xd73   :  { %6109 = vmatmul.mubr.bf16.gmra.mrb[196].mxu1 %v11210_v6 }
 0xd74   :  { %6116 = vmatprep.mubr.bf16.mxu1 %v11211_v59  ;;  %v11246_v59 = vld [vmem:[#allocation2 + $0x1d0] ss:$8 sps:$4 sm:$0xff]  }
 0xd7b   :  { %6117 = vmatmul.mubr.bf16.gmra.mrb[200].mxu1 %v11213_v20 }
 0xd7c   :  { %6124 = vmatprep.mubr.bf16.mxu1 %v11214_v46  ;;  %v11247_v46 = vld [vmem:[#allocation2 + $0x1e4] ss:$8 sps:$4 sm:$0xff]  }
 0xd7e   :  { %v14001_v7 = vpop.f32.mrb[108].mxu1 }
 0xd7f   :  { %15992 = vst [vmem:[#allocation17_spill] sm:$0xff] %v14001_v7  ;;  %v10685_v25 = vpop.f32.mrb[109].mxu1 }
 0xd80   :  { %v14003_v26 = vpop.f32.mrb[110].mxu1 }
 0xd81   :  { %15993 = vst [vmem:[#allocation23_spill] sm:$0xff] %v14003_v26  ;;  %v10686_v44 = vpop.f32.mrb[111].mxu1 }
 0xd82   :  { %v11249_v44 = vld [vmem:[#allocation2 + $0x1e0] ss:$8 sps:$4 sm:$0xff]  }
 0xd83   :  { %6125 = vmatmul.mubr.bf16.gmra.mrb[204].mxu1 %v11216_v61 }
 0xd84   :  { %6132 = vmatprep.mubr.bf16.mxu1 %v11217_v37 }
 0xd86   :  { %v14005_v42 = vpop.f32.mrb[112].mxu1 }
 0xd87   :  { %15994 = vst [vmem:[#allocation64_spill] sm:$0xff] %v14005_v42  ;;  %v10689_v11 = vpop.f32.mrb[113].mxu1 }
 0xd88   :  { %v14007_v0 = vpop.f32.mrb[114].mxu1  ;;  %v11250_v11 = vld [vmem:[#allocation2 + $0x1f4] ss:$8 sps:$4 sm:$0xff]  }
 0xd89   :  { %15995 = vst [vmem:[#allocation76_spill] sm:$0xff] %v14007_v0  ;;  %v10690_v29 = vpop.f32.mrb[115].mxu1 }
 0xd8b   :  { %6133 = vmatmul.mubr.bf16.gmra.mrb[208].mxu1 %v11219_v3 }
 0xd8c   :  { %6140 = vmatprep.mubr.bf16.mxu1 %v11220_v33 }
 0xd8e   :  { %v14009_v10 = vpop.f32.mrb[116].mxu1 }
 0xd8f   :  { %15996 = vst [vmem:[#allocation15_spill] sm:$0xff] %v14009_v10  ;;  %v10693_v39 = vpop.f32.mrb[117].mxu1 }
 0xd90   :  { %v14011_v22 = vpop.f32.mrb[118].mxu1  ;;  %v11252_v39 = vld [vmem:[#allocation2 + $0x1f0] ss:$8 sps:$4 sm:$0xff]  }
 0xd91   :  { %15997 = vst [vmem:[#allocation32_spill] sm:$0xff] %v14011_v22  ;;  %v10694_v15 = vpop.f32.mrb[119].mxu1 }
 0xd92   :  { %v11255_v15 = vld [vmem:[#allocation2 + $0x204] ss:$8 sps:$4 sm:$0xff]  }
 0xd93   :  { %6141 = vmatmul.mubr.bf16.gmra.mrb[212].mxu1 %v11222_v27 }
 0xd94   :  { %6148 = vmatprep.mubr.bf16.mxu1 %v11223_v47 }
 0xd96   :  { %v14013_v18 = vpop.f32.mrb[120].mxu1 }
 0xd97   :  { %15998 = vst [vmem:[#allocation42_spill] sm:$0xff] %v14013_v18  ;;  %v10697_v40 = vpop.f32.mrb[121].mxu1 }
 0xd98   :  { %v14015_v62 = vpop.f32.mrb[122].mxu1 }
 0xd99   :  { %15999 = vst [vmem:[#allocation24_spill] sm:$0xff] %v14015_v62  ;;  %v10698_v38 = vpop.f32.mrb[123].mxu1 }
 0xd9a   :  { %v11253_v38 = vld [vmem:[#allocation2 + $0x200] ss:$8 sps:$4 sm:$0xff]  }
 0xd9b   :  { %6149 = vmatmul.mubr.bf16.gmra.mrb[216].mxu1 %v11225_v50 }
 0xd9c   :  { %6156 = vmatprep.mubr.bf16.mxu1 %v11226_v5 }
 0xd9e   :  { %v14017_v19 = vpop.f32.mrb[124].mxu1 }
 0xd9f   :  { %16000 = vst [vmem:[#allocation77_spill] sm:$0xff] %v14017_v19  ;;  %v10701_v35 = vpop.f32.mrb[125].mxu1 }
 0xda0   :  { %v4900_v45 = vpop.f32.mrb[126].mxu1  ;;  %v11258_v35 = vld [vmem:[#allocation2 + $0x214] ss:$8 sps:$4 sm:$0xff]  }
 0xda1   :  { %v10702_v23 = vpop.f32.mrb[127].mxu1 }
 0xda3   :  { %6157 = vmatmul.mubr.bf16.gmra.mrb[220].mxu1 %v11228_v53 }
 0xda4   :  { %6164 = vmatprep.mubr.bf16.mxu1 %v11229_v54 }
 0xdab   :  { %6165 = vmatmul.mubr.bf16.gmra.mrb[224].mxu1 %v11231_v2  ;;  %v11256_v2 = vld [vmem:[#allocation2 + $0x210] ss:$8 sps:$4 sm:$0xff]  }
 0xdac   :  { %6172 = vmatprep.mubr.bf16.mxu1 %v11232_v63 }
 0xdb3   :  { %6173 = vmatmul.mubr.bf16.gmra.mrb[228].mxu1 %v11234_v30  ;;  %v11261_v30 = vld [vmem:[#allocation2 + $0x224] ss:$8 sps:$4 sm:$0xff]  }
 0xdb4   :  { %6180 = vmatprep.mubr.bf16.mxu1 %v11235_v16 }
 0xdbb   :  { %6181 = vmatmul.mubr.bf16.gmra.mrb[232].mxu1 %v11237_v58 }
 0xdbc   :  { %6188 = vmatprep.mubr.bf16.mxu1 %v11238_v34 }
 0xdbe   :  { %v5974_v32 = vpop.f32.mrb[128].mxu1 }
 0xdbf   :  { %6565 = vrot.lane.b32.xlu1 %v5974_v32, %s11693_s22  ;;  %v5976_v52 = vpop.f32.mrb[129].mxu1  ;;  %v11259_v32 = vld [vmem:[#allocation2 + $0x220] ss:$8 sps:$4 sm:$0xff]  }
 0xdc0   :  { %v5977_v57 = vpop.f32.mrb[130].mxu1 }
 0xdc1   :  { %v5979_v51 = vpop.f32.mrb[131].mxu1 }
 0xdc3   :  { %6189 = vmatmul.mubr.bf16.gmra.mrb[236].mxu1 %v11240_v49  ;;  %6567 = vrot.lane.b32.xlu1 %v5977_v57, %s11693_s22  ;;  %v11264_v49 = vld [vmem:[#allocation2 + $0x234] ss:$8 sps:$4 sm:$0xff]  }
 0xdc4   :  { %6196 = vmatprep.mubr.bf16.mxu1 %v11241_v56 }
 0xdc6   :  { %v5982_v17 = vpop.f32.mrb[132].mxu1 }
 0xdc7   :  { %6569 = vrot.lane.b32.xlu0 %v5982_v17, %s11693_s22  ;;  %v5984_v14 = vpop.f32.mrb[133].mxu1  ;;  %v11262_v17 = vld [vmem:[#allocation2 + $0x230] ss:$8 sps:$4 sm:$0xff]  }
 0xdc8   :  { %v5985_v36 = vpop.f32.mrb[134].mxu1 }
 0xdc9   :  { %6571 = vrot.lane.b32.xlu1 %v5985_v36, %s11693_s22  ;;  %v5987_v9 = vpop.f32.mrb[135].mxu1 }
 0xdcb   :  { %6197 = vmatmul.mubr.bf16.gmra.mrb[240].mxu1 %v11243_v60  ;;  %v11267_v60 = vld [vmem:[#allocation2 + $0x244] ss:$8 sps:$4 sm:$0xff]  }
 0xdcc   :  { %6204 = vmatprep.mubr.bf16.mxu1 %v11244_v41 }
 0xdce   :  { %v5990_v24 = vpop.f32.mrb[136].mxu1 }
 0xdcf   :  { %6573 = vrot.lane.b32.xlu0 %v5990_v24, %s11693_s22  ;;  %v5992_v6 = vpop.f32.mrb[137].mxu1  ;;  %v11265_v24 = vld [vmem:[#allocation2 + $0x240] ss:$8 sps:$4 sm:$0xff]  }
 0xdd0   :  { %v5993_v20 = vpop.f32.mrb[138].mxu1 }
 0xdd1   :  { %6575 = vrot.lane.b32.xlu1 %v5993_v20, %s11693_s22  ;;  %v5995_v25 = vpop.f32.mrb[139].mxu1 }
 0xdd3   :  { %6205 = vmatmul.mubr.bf16.gmra.mrb[244].mxu1 %v11246_v59  ;;  %v11270_v59 = vld [vmem:[#allocation2 + $0x254] ss:$8 sps:$4 sm:$0xff]  }
 0xdd4   :  { %6212 = vmatprep.mubr.bf16.mxu1 %v11247_v46 }
 0xdd6   :  { %v5998_v61 = vpop.f32.mrb[140].mxu1 }
 0xdd7   :  { %6577 = vrot.lane.b32.xlu0 %v5998_v61, %s11693_s22  ;;  %v6000_v37 = vpop.f32.mrb[141].mxu1  ;;  %v11268_v61 = vld [vmem:[#allocation2 + $0x250] ss:$8 sps:$4 sm:$0xff]  }
 0xdd8   :  { %v6001_v3 = vpop.f32.mrb[142].mxu1 }
 0xdd9   :  { %6579 = vrot.lane.b32.xlu1 %v6001_v3, %s11693_s22  ;;  %v6003_v33 = vpop.f32.mrb[143].mxu1 }
 0xddb   :  { %6213 = vmatmul.mubr.bf16.gmra.mrb[248].mxu1 %v11249_v44  ;;  %v11273_v44 = vld [vmem:[#allocation2 + $0x264] ss:$8 sps:$4 sm:$0xff]  }
 0xddc   :  { %6220 = vmatprep.mubr.bf16.mxu1 %v11250_v11 }
 0xdde   :  { %v6006_v29 = vpop.f32.mrb[144].mxu1 }
 0xddf   :  { %6581 = vrot.lane.b32.xlu0 %v6006_v29, %s11693_s22  ;;  %v6008_v27 = vpop.f32.mrb[145].mxu1  ;;  %v11271_v29 = vld [vmem:[#allocation2 + $0x260] ss:$8 sps:$4 sm:$0xff]  }
 0xde0   :  { %v6009_v47 = vpop.f32.mrb[146].mxu1 }
 0xde1   :  { %6583 = vrot.lane.b32.xlu1 %v6009_v47, %s11693_s22  ;;  %v6011_v50 = vpop.f32.mrb[147].mxu1 }
 0xde3   :  { %6221 = vmatmul.mubr.bf16.gmra.mrb[252].mxu1 %v11252_v39  ;;  %v11276_v39 = vld [vmem:[#allocation2 + $0x274] ss:$8 sps:$4 sm:$0xff]  }
 0xde4   :  { %6228 = vmatprep.mubr.bf16.mxu1 %v11255_v15 }
 0xde6   :  { %v6014_v40 = vpop.f32.mrb[148].mxu1 }
 0xde7   :  { %6585 = vrot.lane.b32.xlu0 %v6014_v40, %s11693_s22  ;;  %v6016_v5 = vpop.f32.mrb[149].mxu1  ;;  %v11274_v40 = vld [vmem:[#allocation2 + $0x270] ss:$8 sps:$4 sm:$0xff]  }
 0xde8   :  { %v6017_v53 = vpop.f32.mrb[150].mxu1 }
 0xde9   :  { %6587 = vrot.lane.b32.xlu1 %v6017_v53, %s11693_s22  ;;  %v6019_v54 = vpop.f32.mrb[151].mxu1 }
 0xdeb   :  { %6229 = vmatmul.mubr.bf16.gmra.mrb[0].mxu1 %v11253_v38  ;;  %v11279_v38 = vld [vmem:[#allocation2 + $0x284] ss:$8 sps:$4 sm:$0xff]  }
 0xdec   :  { %6236 = vmatprep.mubr.bf16.mxu1 %v11258_v35 }
 0xdee   :  { %v6022_v45 = vpop.f32.mrb[152].mxu1 }
 0xdef   :  { %6589 = vrot.lane.b32.xlu0 %v6022_v45, %s11693_s22  ;;  %v6024_v23 = vpop.f32.mrb[153].mxu1  ;;  %v11277_v45 = vld [vmem:[#allocation2 + $0x280] ss:$8 sps:$4 sm:$0xff]  }
 0xdf0   :  { %v6025_v63 = vpop.f32.mrb[154].mxu1 }
 0xdf1   :  { %6591 = vrot.lane.b32.xlu1 %v6025_v63, %s11693_s22  ;;  %v6027_v16 = vpop.f32.mrb[155].mxu1 }
 0xdf3   :  { %6237 = vmatmul.mubr.bf16.gmra.mrb[4].mxu1 %v11256_v2  ;;  %v11282_v2 = vld [vmem:[#allocation2 + $0x294] ss:$8 sps:$4 sm:$0xff]  }
 0xdf4   :  { %6244 = vmatprep.mubr.bf16.mxu1 %v11261_v30 }
 0xdf6   :  { %v6030_v58 = vpop.f32.mrb[156].mxu1 }
 0xdf7   :  { %6593 = vrot.lane.b32.xlu0 %v6030_v58, %s11693_s22  ;;  %v6032_v34 = vpop.f32.mrb[157].mxu1  ;;  %v11280_v58 = vld [vmem:[#allocation2 + $0x290] ss:$8 sps:$4 sm:$0xff]  }
 0xdf8   :  { %v6033_v52 = vpop.f32.mrb[158].mxu1 }
 0xdf9   :  { %6595 = vrot.lane.b32.xlu1 %v6033_v52, %s11693_s22  ;;  %v6035_v57 = vpop.f32.mrb[159].mxu1 }
 0xdfb   :  { %6245 = vmatmul.mubr.bf16.gmra.mrb[8].mxu1 %v11259_v32  ;;  %v11285_v32 = vld [vmem:[#allocation2 + $0x2a4] ss:$8 sps:$4 sm:$0xff]  }
 0xdfc   :  { %6252 = vmatprep.mubr.bf16.mxu1 %v11264_v49 }
 0xdfe   :  { %v6038_v56 = vpop.f32.mrb[160].mxu1 }
 0xdff   :  { %6661 = vrot.lane.b32.xlu0 %v6038_v56, %s11691_s19  ;;  %v6040_v51 = vpop.f32.mrb[161].mxu1  ;;  %v11283_v56 = vld [vmem:[#allocation2 + $0x2a0] ss:$8 sps:$4 sm:$0xff]  }
 0xe00   :  { %v6041_v14 = vpop.f32.mrb[162].mxu1 }
 0xe01   :  { %6663 = vrot.lane.b32.xlu1 %v6041_v14, %s11691_s19  ;;  %v6043_v36 = vpop.f32.mrb[163].mxu1 }
 0xe03   :  { %6253 = vmatmul.mubr.bf16.gmra.mrb[12].mxu1 %v11262_v17  ;;  %v11288_v17 = vld [vmem:[#allocation2 + $0x2b4] ss:$8 sps:$4 sm:$0xff]  }
 0xe04   :  { %6260 = vmatprep.mubr.bf16.mxu1 %v11267_v60 }
 0xe06   :  { %v6046_v41 = vpop.f32.mrb[164].mxu1 }
 0xe07   :  { %6665 = vrot.lane.b32.xlu0 %v6046_v41, %s11691_s19  ;;  %v6048_v9 = vpop.f32.mrb[165].mxu1  ;;  %v11286_v41 = vld [vmem:[#allocation2 + $0x2b0] ss:$8 sps:$4 sm:$0xff]  }
 0xe08   :  { %v6049_v6 = vpop.f32.mrb[166].mxu1 }
 0xe09   :  { %6667 = vrot.lane.b32.xlu1 %v6049_v6, %s11691_s19  ;;  %v6051_v20 = vpop.f32.mrb[167].mxu1 }
 0xe0b   :  { %6261 = vmatmul.mubr.bf16.gmra.mrb[16].mxu1 %v11265_v24  ;;  %v11291_v24 = vld [vmem:[#allocation2 + $0x2c4] ss:$8 sps:$4 sm:$0xff]  }
 0xe0c   :  { %6268 = vmatprep.mubr.bf16.mxu1 %v11270_v59 }
 0xe0e   :  { %v6054_v46 = vpop.f32.mrb[168].mxu1 }
 0xe0f   :  { %6669 = vrot.lane.b32.xlu0 %v6054_v46, %s11691_s19  ;;  %v6056_v25 = vpop.f32.mrb[169].mxu1  ;;  %v11289_v46 = vld [vmem:[#allocation2 + $0x2c0] ss:$8 sps:$4 sm:$0xff]  }
 0xe10   :  { %v6057_v37 = vpop.f32.mrb[170].mxu1 }
 0xe11   :  { %6671 = vrot.lane.b32.xlu1 %v6057_v37, %s11691_s19  ;;  %v6059_v3 = vpop.f32.mrb[171].mxu1 }
 0xe13   :  { %6269 = vmatmul.mubr.bf16.gmra.mrb[20].mxu1 %v11268_v61  ;;  %v11294_v61 = vld [vmem:[#allocation2 + $0x2d4] ss:$8 sps:$4 sm:$0xff]  }
 0xe14   :  { %6276 = vmatprep.mubr.bf16.mxu1 %v11273_v44 }
 0xe16   :  { %v6062_v11 = vpop.f32.mrb[172].mxu1 }
 0xe17   :  { %6673 = vrot.lane.b32.xlu0 %v6062_v11, %s11691_s19  ;;  %v6064_v33 = vpop.f32.mrb[173].mxu1  ;;  %v11292_v11 = vld [vmem:[#allocation2 + $0x2d0] ss:$8 sps:$4 sm:$0xff]  }
 0xe18   :  { %v6065_v27 = vpop.f32.mrb[174].mxu1 }
 0xe19   :  { %6675 = vrot.lane.b32.xlu1 %v6065_v27, %s11691_s19  ;;  %v6067_v47 = vpop.f32.mrb[175].mxu1 }
 0xe1b   :  { %6277 = vmatmul.mubr.bf16.gmra.mrb[24].mxu1 %v11271_v29  ;;  %v11297_v29 = vld [vmem:[#allocation2 + $0x2e4] ss:$8 sps:$4 sm:$0xff]  }
 0xe1c   :  { %6284 = vmatprep.mubr.bf16.mxu1 %v11276_v39 }
 0xe1e   :  { %v6070_v15 = vpop.f32.mrb[176].mxu1 }
 0xe1f   :  { %6677 = vrot.lane.b32.xlu0 %v6070_v15, %s11691_s19  ;;  %v6072_v50 = vpop.f32.mrb[177].mxu1  ;;  %v11295_v15 = vld [vmem:[#allocation2 + $0x2e0] ss:$8 sps:$4 sm:$0xff]  }
 0xe20   :  { %v6073_v5 = vpop.f32.mrb[178].mxu1 }
 0xe21   :  { %6679 = vrot.lane.b32.xlu1 %v6073_v5, %s11691_s19  ;;  %v6075_v53 = vpop.f32.mrb[179].mxu1 }
 0xe23   :  { %6285 = vmatmul.mubr.bf16.gmra.mrb[28].mxu1 %v11274_v40  ;;  %v11300_v40 = vld [vmem:[#allocation2 + $0x2f4] ss:$8 sps:$4 sm:$0xff]  }
 0xe24   :  { %6292 = vmatprep.mubr.bf16.mxu1 %v11279_v38 }
 0xe26   :  { %v6078_v35 = vpop.f32.mrb[180].mxu1 }
 0xe27   :  { %6681 = vrot.lane.b32.xlu0 %v6078_v35, %s11691_s19  ;;  %v6080_v54 = vpop.f32.mrb[181].mxu1  ;;  %v11298_v35 = vld [vmem:[#allocation2 + $0x2f0] ss:$8 sps:$4 sm:$0xff]  }
 0xe28   :  { %v6081_v23 = vpop.f32.mrb[182].mxu1 }
 0xe29   :  { %6683 = vrot.lane.b32.xlu1 %v6081_v23, %s11691_s19  ;;  %v6083_v63 = vpop.f32.mrb[183].mxu1 }
 0xe2b   :  { %6293 = vmatmul.mubr.bf16.gmra.mrb[32].mxu1 %v11277_v45  ;;  %v11303_v45 = vld [vmem:[#allocation2 + $0x304] ss:$8 sps:$4 sm:$0xff]  }
 0xe2c   :  { %6300 = vmatprep.mubr.bf16.mxu1 %v11282_v2 }
 0xe2e   :  { %v6086_v30 = vpop.f32.mrb[184].mxu1 }
 0xe2f   :  { %6685 = vrot.lane.b32.xlu0 %v6086_v30, %s11691_s19  ;;  %v6088_v16 = vpop.f32.mrb[185].mxu1  ;;  %v11301_v30 = vld [vmem:[#allocation2 + $0x300] ss:$8 sps:$4 sm:$0xff]  }
 0xe30   :  { %v6089_v34 = vpop.f32.mrb[186].mxu1 }
 0xe31   :  { %6687 = vrot.lane.b32.xlu1 %v6089_v34, %s11691_s19  ;;  %v6091_v52 = vpop.f32.mrb[187].mxu1 }
 0xe33   :  { %6301 = vmatmul.mubr.bf16.gmra.mrb[36].mxu1 %v11280_v58  ;;  %v11306_v58 = vld [vmem:[#allocation2 + $0x314] ss:$8 sps:$4 sm:$0xff]  }
 0xe34   :  { %6308 = vmatprep.mubr.bf16.mxu1 %v11285_v32 }
 0xe36   :  { %v6094_v49 = vpop.f32.mrb[188].mxu1 }
 0xe37   :  { %6689 = vrot.lane.b32.xlu0 %v6094_v49, %s11691_s19  ;;  %v6096_v57 = vpop.f32.mrb[189].mxu1  ;;  %v11304_v49 = vld [vmem:[#allocation2 + $0x310] ss:$8 sps:$4 sm:$0xff]  }
 0xe38   :  { %v6097_v51 = vpop.f32.mrb[190].mxu1 }
 0xe39   :  { %6691 = vrot.lane.b32.xlu1 %v6097_v51, %s11691_s19  ;;  %v6099_v14 = vpop.f32.mrb[191].mxu1 }
 0xe3b   :  { %6309 = vmatmul.mubr.bf16.gmra.mrb[40].mxu1 %v11283_v56  ;;  %v11309_v56 = vld [vmem:[#allocation2 + $0x324] ss:$8 sps:$4 sm:$0xff]  }
 0xe3c   :  { %6316 = vmatprep.mubr.bf16.mxu1 %v11288_v17 }
 0xe3e   :  { %v6102_v60 = vpop.f32.mrb[192].mxu1 }
 0xe3f   :  { %6757 = vrot.lane.b32.xlu0 %v6102_v60, %s11694_s17  ;;  %v6104_v36 = vpop.f32.mrb[193].mxu1  ;;  %v11307_v60 = vld [vmem:[#allocation2 + $0x320] ss:$8 sps:$4 sm:$0xff]  }
 0xe40   :  { %v6105_v9 = vpop.f32.mrb[194].mxu1 }
 0xe41   :  { %6759 = vrot.lane.b32.xlu1 %v6105_v9, %s11694_s17  ;;  %v6107_v6 = vpop.f32.mrb[195].mxu1 }
 0xe43   :  { %6317 = vmatmul.mubr.bf16.gmra.mrb[44].mxu1 %v11286_v41  ;;  %v11312_v41 = vld [vmem:[#allocation2 + $0x334] ss:$8 sps:$4 sm:$0xff]  }
 0xe44   :  { %6324 = vmatprep.mubr.bf16.mxu1 %v11291_v24 }
 0xe46   :  { %v6110_v59 = vpop.f32.mrb[196].mxu1 }
 0xe47   :  { %6761 = vrot.lane.b32.xlu0 %v6110_v59, %s11694_s17  ;;  %v6112_v20 = vpop.f32.mrb[197].mxu1  ;;  %v11310_v59 = vld [vmem:[#allocation2 + $0x330] ss:$8 sps:$4 sm:$0xff]  }
 0xe48   :  { %v6113_v25 = vpop.f32.mrb[198].mxu1 }
 0xe49   :  { %6763 = vrot.lane.b32.xlu1 %v6113_v25, %s11694_s17  ;;  %v6115_v37 = vpop.f32.mrb[199].mxu1 }
 0xe4b   :  { %6325 = vmatmul.mubr.bf16.gmra.mrb[48].mxu1 %v11289_v46  ;;  %v11315_v46 = vld [vmem:[#allocation2 + $0x344] ss:$8 sps:$4 sm:$0xff]  }
 0xe4c   :  { %6332 = vmatprep.mubr.bf16.mxu1 %v11294_v61 }
 0xe4e   :  { %v6118_v44 = vpop.f32.mrb[200].mxu1 }
 0xe4f   :  { %6765 = vrot.lane.b32.xlu0 %v6118_v44, %s11694_s17  ;;  %v6120_v3 = vpop.f32.mrb[201].mxu1  ;;  %v11313_v44 = vld [vmem:[#allocation2 + $0x340] ss:$8 sps:$4 sm:$0xff]  }
 0xe50   :  { %v6121_v33 = vpop.f32.mrb[202].mxu1 }
 0xe51   :  { %6767 = vrot.lane.b32.xlu1 %v6121_v33, %s11694_s17  ;;  %v6123_v27 = vpop.f32.mrb[203].mxu1 }
 0xe53   :  { %6333 = vmatmul.mubr.bf16.gmra.mrb[52].mxu1 %v11292_v11  ;;  %v11318_v11 = vld [vmem:[#allocation2 + $0x354] ss:$8 sps:$4 sm:$0xff]  }
 0xe54   :  { %6340 = vmatprep.mubr.bf16.mxu1 %v11297_v29 }
 0xe56   :  { %v6126_v39 = vpop.f32.mrb[204].mxu1 }
 0xe57   :  { %6769 = vrot.lane.b32.xlu0 %v6126_v39, %s11694_s17  ;;  %v6128_v47 = vpop.f32.mrb[205].mxu1  ;;  %v11316_v39 = vld [vmem:[#allocation2 + $0x350] ss:$8 sps:$4 sm:$0xff]  }
 0xe58   :  { %v6129_v50 = vpop.f32.mrb[206].mxu1 }
 0xe59   :  { %6771 = vrot.lane.b32.xlu1 %v6129_v50, %s11694_s17  ;;  %v6131_v5 = vpop.f32.mrb[207].mxu1 }
 0xe5b   :  { %6341 = vmatmul.mubr.bf16.gmra.mrb[56].mxu1 %v11295_v15  ;;  %v11321_v15 = vld [vmem:[#allocation2 + $0x364] ss:$8 sps:$4 sm:$0xff]  }
 0xe5c   :  { %6348 = vmatprep.mubr.bf16.mxu1 %v11300_v40 }
 0xe5e   :  { %v6134_v38 = vpop.f32.mrb[208].mxu1 }
 0xe5f   :  { %6773 = vrot.lane.b32.xlu0 %v6134_v38, %s11694_s17  ;;  %v6136_v53 = vpop.f32.mrb[209].mxu1  ;;  %v11319_v38 = vld [vmem:[#allocation2 + $0x360] ss:$8 sps:$4 sm:$0xff]  }
 0xe60   :  { %v6137_v54 = vpop.f32.mrb[210].mxu1 }
 0xe61   :  { %6775 = vrot.lane.b32.xlu1 %v6137_v54, %s11694_s17  ;;  %v6139_v23 = vpop.f32.mrb[211].mxu1 }
 0xe63   :  { %6349 = vmatmul.mubr.bf16.gmra.mrb[60].mxu1 %v11298_v35  ;;  %v11324_v35 = vld [vmem:[#allocation2 + $0x374] ss:$8 sps:$4 sm:$0xff]  }
 0xe64   :  { %6356 = vmatprep.mubr.bf16.mxu1 %v11303_v45 }
 0xe66   :  { %v6142_v2 = vpop.f32.mrb[212].mxu1 }
 0xe67   :  { %6777 = vrot.lane.b32.xlu0 %v6142_v2, %s11694_s17  ;;  %v6144_v63 = vpop.f32.mrb[213].mxu1  ;;  %v11322_v2 = vld [vmem:[#allocation2 + $0x370] ss:$8 sps:$4 sm:$0xff]  }
 0xe68   :  { %v6145_v16 = vpop.f32.mrb[214].mxu1 }
 0xe69   :  { %6779 = vrot.lane.b32.xlu1 %v6145_v16, %s11694_s17  ;;  %v6147_v34 = vpop.f32.mrb[215].mxu1 }
 0xe6b   :  { %6357 = vmatmul.mubr.bf16.gmra.mrb[64].mxu1 %v11301_v30  ;;  %v11327_v30 = vld [vmem:[#allocation2 + $0x384] ss:$8 sps:$4 sm:$0xff]  }
 0xe6c   :  { %6364 = vmatprep.mubr.bf16.mxu1 %v11306_v58 }
 0xe6e   :  { %v6150_v32 = vpop.f32.mrb[216].mxu1 }
 0xe6f   :  { %6781 = vrot.lane.b32.xlu0 %v6150_v32, %s11694_s17  ;;  %v6152_v52 = vpop.f32.mrb[217].mxu1  ;;  %v11325_v32 = vld [vmem:[#allocation2 + $0x380] ss:$8 sps:$4 sm:$0xff]  }
 0xe70   :  { %v6153_v57 = vpop.f32.mrb[218].mxu1 }
 0xe71   :  { %6783 = vrot.lane.b32.xlu1 %v6153_v57, %s11694_s17  ;;  %v6155_v51 = vpop.f32.mrb[219].mxu1 }
 0xe73   :  { %6365 = vmatmul.mubr.bf16.gmra.mrb[68].mxu1 %v11304_v49  ;;  %v11330_v49 = vld [vmem:[#allocation2 + $0x394] ss:$8 sps:$4 sm:$0xff]  }
 0xe74   :  { %6372 = vmatprep.mubr.bf16.mxu1 %v11309_v56 }
 0xe76   :  { %v6158_v17 = vpop.f32.mrb[220].mxu1 }
 0xe77   :  { %6785 = vrot.lane.b32.xlu0 %v6158_v17, %s11694_s17  ;;  %v6160_v14 = vpop.f32.mrb[221].mxu1  ;;  %v11328_v17 = vld [vmem:[#allocation2 + $0x390] ss:$8 sps:$4 sm:$0xff]  }
 0xe78   :  { %v6161_v36 = vpop.f32.mrb[222].mxu1 }
 0xe79   :  { %6787 = vrot.lane.b32.xlu1 %v6161_v36, %s11694_s17  ;;  %v6163_v9 = vpop.f32.mrb[223].mxu1 }
 0xe7b   :  { %6373 = vmatmul.mubr.bf16.gmra.mrb[72].mxu1 %v11307_v60  ;;  %v11333_v60 = vld [vmem:[#allocation2 + $0x3a4] ss:$8 sps:$4 sm:$0xff]  }
 0xe7c   :  { %6380 = vmatprep.mubr.bf16.mxu1 %v11312_v41 }
 0xe7e   :  { %v6166_v24 = vpop.f32.mrb[224].mxu1 }
 0xe7f   :  { %6853 = vrot.lane.b32.xlu0 %v6166_v24, %s11695_s18  ;;  %v6168_v6 = vpop.f32.mrb[225].mxu1  ;;  %v11331_v24 = vld [vmem:[#allocation2 + $0x3a0] ss:$8 sps:$4 sm:$0xff]  }
 0xe80   :  { %v6169_v20 = vpop.f32.mrb[226].mxu1 }
 0xe81   :  { %6855 = vrot.lane.b32.xlu1 %v6169_v20, %s11695_s18  ;;  %v6171_v25 = vpop.f32.mrb[227].mxu1 }
 0xe83   :  { %6381 = vmatmul.mubr.bf16.gmra.mrb[76].mxu1 %v11310_v59  ;;  %v11336_v59 = vld [vmem:[#allocation2 + $0x3b4] ss:$8 sps:$4 sm:$0xff]  }
 0xe84   :  { %6388 = vmatprep.mubr.bf16.mxu1 %v11315_v46 }
 0xe86   :  { %v6174_v61 = vpop.f32.mrb[228].mxu1 }
 0xe87   :  { %6857 = vrot.lane.b32.xlu0 %v6174_v61, %s11695_s18  ;;  %v6176_v37 = vpop.f32.mrb[229].mxu1  ;;  %v11334_v61 = vld [vmem:[#allocation2 + $0x3b0] ss:$8 sps:$4 sm:$0xff]  }
 0xe88   :  { %v6177_v3 = vpop.f32.mrb[230].mxu1 }
 0xe89   :  { %6859 = vrot.lane.b32.xlu1 %v6177_v3, %s11695_s18  ;;  %v6179_v33 = vpop.f32.mrb[231].mxu1 }
 0xe8b   :  { %6389 = vmatmul.mubr.bf16.gmra.mrb[80].mxu1 %v11313_v44  ;;  %v11339_v44 = vld [vmem:[#allocation2 + $0x3c4] ss:$8 sps:$4 sm:$0xff]  }
 0xe8c   :  { %6396 = vmatprep.mubr.bf16.mxu1 %v11318_v11 }
 0xe8e   :  { %v6182_v29 = vpop.f32.mrb[232].mxu1 }
 0xe8f   :  { %6861 = vrot.lane.b32.xlu0 %v6182_v29, %s11695_s18  ;;  %v6184_v27 = vpop.f32.mrb[233].mxu1  ;;  %v11337_v29 = vld [vmem:[#allocation2 + $0x3c0] ss:$8 sps:$4 sm:$0xff]  }
 0xe90   :  { %v6185_v47 = vpop.f32.mrb[234].mxu1 }
 0xe91   :  { %6863 = vrot.lane.b32.xlu1 %v6185_v47, %s11695_s18  ;;  %v6187_v50 = vpop.f32.mrb[235].mxu1 }
 0xe93   :  { %6397 = vmatmul.mubr.bf16.gmra.mrb[84].mxu1 %v11316_v39  ;;  %v11342_v39 = vld [vmem:[#allocation2 + $0x3d4] ss:$8 sps:$4 sm:$0xff]  }
 0xe94   :  { %6404 = vmatprep.mubr.bf16.mxu1 %v11321_v15 }
 0xe96   :  { %v6190_v40 = vpop.f32.mrb[236].mxu1 }
 0xe97   :  { %6865 = vrot.lane.b32.xlu0 %v6190_v40, %s11695_s18  ;;  %v6192_v5 = vpop.f32.mrb[237].mxu1  ;;  %v11340_v40 = vld [vmem:[#allocation2 + $0x3d0] ss:$8 sps:$4 sm:$0xff]  }
 0xe98   :  { %v6193_v53 = vpop.f32.mrb[238].mxu1 }
 0xe99   :  { %6867 = vrot.lane.b32.xlu1 %v6193_v53, %s11695_s18  ;;  %v6195_v54 = vpop.f32.mrb[239].mxu1 }
 0xe9b   :  { %6405 = vmatmul.mubr.bf16.gmra.mrb[88].mxu1 %v11319_v38  ;;  %v11345_v38 = vld [vmem:[#allocation2 + $0x3e4] ss:$8 sps:$4 sm:$0xff]  }
 0xe9c   :  { %6412 = vmatprep.mubr.bf16.mxu1 %v11324_v35 }
 0xe9e   :  { %v6198_v45 = vpop.f32.mrb[240].mxu1 }
 0xe9f   :  { %6869 = vrot.lane.b32.xlu0 %v6198_v45, %s11695_s18  ;;  %v6200_v23 = vpop.f32.mrb[241].mxu1  ;;  %v11343_v45 = vld [vmem:[#allocation2 + $0x3e0] ss:$8 sps:$4 sm:$0xff]  }
 0xea0   :  { %v6201_v63 = vpop.f32.mrb[242].mxu1 }
 0xea1   :  { %6871 = vrot.lane.b32.xlu1 %v6201_v63, %s11695_s18  ;;  %v6203_v16 = vpop.f32.mrb[243].mxu1 }
 0xea3   :  { %6413 = vmatmul.mubr.bf16.gmra.mrb[92].mxu1 %v11322_v2  ;;  %v11348_v2 = vld [vmem:[#allocation2 + $0x3f4] ss:$8 sps:$4 sm:$0xff]  }
 0xea4   :  { %6420 = vmatprep.mubr.bf16.mxu1 %v11327_v30 }
 0xea6   :  { %v6206_v58 = vpop.f32.mrb[244].mxu1 }
 0xea7   :  { %6873 = vrot.lane.b32.xlu0 %v6206_v58, %s11695_s18  ;;  %v6208_v34 = vpop.f32.mrb[245].mxu1  ;;  %v11346_v58 = vld [vmem:[#allocation2 + $0x3f0] ss:$8 sps:$4 sm:$0xff]  }
 0xea8   :  { %v6209_v52 = vpop.f32.mrb[246].mxu1 }
 0xea9   :  { %6875 = vrot.lane.b32.xlu1 %v6209_v52, %s11695_s18  ;;  %v6211_v57 = vpop.f32.mrb[247].mxu1 }
 0xeab   :  { %6421 = vmatmul.mubr.bf16.gmra.mrb[96].mxu1 %v11325_v32  ;;  %v11351_v32 = vld [vmem:[#allocation2 + $0x404] ss:$8 sps:$4 sm:$0xff]  }
 0xeac   :  { %6428 = vmatprep.mubr.bf16.mxu1 %v11330_v49 }
 0xeae   :  { %v6214_v56 = vpop.f32.mrb[248].mxu1 }
 0xeaf   :  { %6877 = vrot.lane.b32.xlu0 %v6214_v56, %s11695_s18  ;;  %v6216_v51 = vpop.f32.mrb[249].mxu1  ;;  %v11349_v56 = vld [vmem:[#allocation2 + $0x400] ss:$8 sps:$4 sm:$0xff]  }
 0xeb0   :  { %v6217_v14 = vpop.f32.mrb[250].mxu1 }
 0xeb1   :  { %6879 = vrot.lane.b32.xlu1 %v6217_v14, %s11695_s18  ;;  %v6219_v36 = vpop.f32.mrb[251].mxu1 }
 0xeb3   :  { %6429 = vmatmul.mubr.bf16.gmra.mrb[100].mxu1 %v11328_v17  ;;  %v11354_v17 = vld [vmem:[#allocation2 + $0x414] ss:$8 sps:$4 sm:$0xff]  }
 0xeb4   :  { %6436 = vmatprep.mubr.bf16.mxu1 %v11333_v60 }
 0xeb6   :  { %v6222_v41 = vpop.f32.mrb[252].mxu1 }
 0xeb7   :  { %6881 = vrot.lane.b32.xlu0 %v6222_v41, %s11695_s18  ;;  %v6224_v9 = vpop.f32.mrb[253].mxu1  ;;  %v11352_v41 = vld [vmem:[#allocation2 + $0x410] ss:$8 sps:$4 sm:$0xff]  }
 0xeb8   :  { %v6225_v6 = vpop.f32.mrb[254].mxu1 }
 0xeb9   :  { %6883 = vrot.lane.b32.xlu1 %v6225_v6, %s11695_s18  ;;  %v6227_v20 = vpop.f32.mrb[255].mxu1 }
 0xebb   :  { %6437 = vmatmul.mubr.bf16.gmra.mrb[104].mxu1 %v11331_v24  ;;  %v11357_v24 = vld [vmem:[#allocation2 + $0x424] ss:$8 sps:$4 sm:$0xff]  }
 0xebc   :  { %6444 = vmatprep.mubr.bf16.mxu1 %v11336_v59 }
 0xebe   :  { %v14083_v46 = vpop.f32.mrb[0].mxu1 }
 0xebf   :  { %v6232_v25 = vpop.f32.mrb[1].mxu1 }
 0xec0   :  { %v14085_v37 = vpop.f32.mrb[2].mxu1  ;;  %v11355_v25 = vld [vmem:[#allocation2 + $0x420] ss:$8 sps:$4 sm:$0xff]  }
 0xec1   :  { %v6235_v3 = vpop.f32.mrb[3].mxu1 }
 0xec3   :  { %6445 = vmatmul.mubr.bf16.gmra.mrb[108].mxu1 %v11334_v61 }
 0xec4   :  { %6452 = vmatprep.mubr.bf16.mxu1 %v11339_v44  ;;  %v11360_v44 = vld [vmem:[#allocation2 + $0x434] ss:$8 sps:$4 sm:$0xff]  }
 0xec6   :  { %v14087_v11 = vpop.f32.mrb[4].mxu1 }
 0xec7   :  { %v6240_v33 = vpop.f32.mrb[5].mxu1 }
 0xec8   :  { %v14089_v27 = vpop.f32.mrb[6].mxu1 }
 0xec9   :  { %v6243_v47 = vpop.f32.mrb[7].mxu1 }
 0xecb   :  { %6453 = vmatmul.mubr.bf16.gmra.mrb[112].mxu1 %v11337_v29 }
 0xecc   :  { %6460 = vmatprep.mubr.bf16.mxu1 %v11342_v39  ;;  %v11358_v39 = vld [vmem:[#allocation2 + $0x430] ss:$8 sps:$4 sm:$0xff]  }
 0xece   :  { %v14091_v15 = vpop.f32.mrb[8].mxu1 }
 0xecf   :  { %v6248_v50 = vpop.f32.mrb[9].mxu1 }
 0xed0   :  { %v14093_v5 = vpop.f32.mrb[10].mxu1  ;;  %v11363_v50 = vld [vmem:[#allocation2 + $0x444] ss:$8 sps:$4 sm:$0xff]  }
 0xed1   :  { %v6251_v53 = vpop.f32.mrb[11].mxu1 }
 0xed3   :  { %6461 = vmatmul.mubr.bf16.gmra.mrb[116].mxu1 %v11340_v40 }
 0xed4   :  { %6468 = vmatprep.mubr.bf16.mxu1 %v11345_v38 }
 0xed6   :  { %v14095_v35 = vpop.f32.mrb[12].mxu1 }
 0xed7   :  { %v6256_v54 = vpop.f32.mrb[13].mxu1 }
 0xed8   :  { %v14097_v23 = vpop.f32.mrb[14].mxu1  ;;  %v11361_v54 = vld [vmem:[#allocation2 + $0x440] ss:$8 sps:$4 sm:$0xff]  }
 0xed9   :  { %16001 = vst [vmem:[#allocation33_spill] sm:$0xff] %v14097_v23  ;;  %v6259_v63 = vpop.f32.mrb[15].mxu1 }
 0xedb   :  { %6469 = vmatmul.mubr.bf16.gmra.mrb[120].mxu1 %v11343_v45 }
 0xedc   :  { %6476 = vmatprep.mubr.bf16.mxu1 %v11348_v2  ;;  %v11366_v2 = vld [vmem:[#allocation2 + $0x454] ss:$8 sps:$4 sm:$0xff]  }
 0xede   :  { %v14099_v30 = vpop.f32.mrb[16].mxu1 }
 0xedf   :  { %16002 = vst [vmem:[#allocation8_spill] sm:$0xff] %v14099_v30  ;;  %v6264_v16 = vpop.f32.mrb[17].mxu1 }
 0xee0   :  { %v14101_v34 = vpop.f32.mrb[18].mxu1 }
 0xee1   :  { %16003 = vst [vmem:[#allocation43_spill] sm:$0xff] %v14101_v34  ;;  %v6267_v52 = vpop.f32.mrb[19].mxu1 }
 0xee3   :  { %6477 = vmatmul.mubr.bf16.gmra.mrb[124].mxu1 %v11346_v58 }
 0xee4   :  { %6484 = vmatprep.mubr.bf16.mxu1 %v11351_v32  ;;  %v11364_v32 = vld [vmem:[#allocation2 + $0x450] ss:$8 sps:$4 sm:$0xff]  }
 0xee6   :  { %v14103_v49 = vpop.f32.mrb[20].mxu1 }
 0xee7   :  { %16004 = vst [vmem:[#allocation53_spill] sm:$0xff] %v14103_v49  ;;  %v6272_v57 = vpop.f32.mrb[21].mxu1 }
 0xee8   :  { %v14105_v51 = vpop.f32.mrb[22].mxu1  ;;  %v11369_v57 = vld [vmem:[#allocation2 + $0x464] ss:$8 sps:$4 sm:$0xff]  }
 0xee9   :  { %16005 = vst [vmem:[#allocation9_spill] sm:$0xff] %v14105_v51  ;;  %v6275_v14 = vpop.f32.mrb[23].mxu1 }
 0xeeb   :  { %6485 = vmatmul.mubr.bf16.gmra.mrb[128].mxu1 %v11349_v56 }
 0xeec   :  { %6492 = vmatprep.mubr.bf16.mxu1 %v11354_v17 }
 0xeee   :  { %v14107_v60 = vpop.f32.mrb[24].mxu1 }
 0xeef   :  { %16006 = vst [vmem:[#allocation54_spill] sm:$0xff] %v14107_v60  ;;  %v6280_v36 = vpop.f32.mrb[25].mxu1 }
 0xef0   :  { %v14109_v9 = vpop.f32.mrb[26].mxu1  ;;  %v11367_v36 = vld [vmem:[#allocation2 + $0x460] ss:$8 sps:$4 sm:$0xff]  }
 0xef1   :  { %16007 = vst [vmem:[#allocation65_spill] sm:$0xff] %v14109_v9  ;;  %v6283_v6 = vpop.f32.mrb[27].mxu1 }
 0xef3   :  { %6493 = vmatmul.mubr.bf16.gmra.mrb[132].mxu1 %v11352_v41 }
 0xef4   :  { %6500 = vmatprep.mubr.bf16.mxu1 %v11357_v24  ;;  %v11372_v24 = vld [vmem:[#allocation2 + $0x474] ss:$8 sps:$4 sm:$0xff]  }
 0xef6   :  { %v14111_v59 = vpop.f32.mrb[28].mxu1 }
 0xef7   :  { %16008 = vst [vmem:[#allocation19_spill] sm:$0xff] %v14111_v59  ;;  %v6288_v20 = vpop.f32.mrb[29].mxu1 }
 0xef8   :  { %v14113_v61 = vpop.f32.mrb[30].mxu1 }
 0xef9   :  { %16009 = vst [vmem:[#allocation25_spill] sm:$0xff] %v14113_v61  ;;  %v6291_v3 = vpop.f32.mrb[31].mxu1 }
 0xefb   :  { %6501 = vmatmul.mubr.bf16.gmra.mrb[136].mxu1 %v11355_v25 }
 0xefc   :  { %6508 = vmatprep.mubr.bf16.mxu1 %v11360_v44  ;;  %v11370_v44 = vld [vmem:[#allocation2 + $0x470] ss:$8 sps:$4 sm:$0xff]  }
 0xefe   :  { %v6294_v33 = vpop.f32.mrb[32].mxu1 }
 0xeff   :  { %6949 = vrot.lane.b32.xlu0 %v6294_v33, %s11696_s25  ;;  %v6296_v29 = vpop.f32.mrb[33].mxu1 }
 0xf00   :  { %v6297_v47 = vpop.f32.mrb[34].mxu1 }
 0xf01   :  { %6951 = vrot.lane.b32.xlu1 %v6297_v47, %s11696_s25  ;;  %v6299_v40 = vpop.f32.mrb[35].mxu1 }
 0xf03   :  { %6509 = vmatmul.mubr.bf16.gmra.mrb[140].mxu1 %v11358_v39 }
 0xf04   :  { %6516 = vmatprep.mubr.bf16.mxu1 %v11363_v50 }
 0xf06   :  { %v6302_v38 = vpop.f32.mrb[36].mxu1 }
 0xf07   :  { %6953 = vrot.lane.b32.xlu0 %v6302_v38, %s11696_s25  ;;  %v6304_v53 = vpop.f32.mrb[37].mxu1 }
 0xf08   :  { %v6305_v45 = vpop.f32.mrb[38].mxu1 }
 0xf09   :  { %6955 = vrot.lane.b32.xlu1 %v6305_v45, %s11696_s25  ;;  %v6307_v63 = vpop.f32.mrb[39].mxu1 }
 0xf0b   :  { %6517 = vmatmul.mubr.bf16.gmra.mrb[144].mxu1 %v11361_v54 }
 0xf0c   :  { %6524 = vmatprep.mubr.bf16.mxu1 %v11366_v2 }
 0xf0e   :  { %v6310_v16 = vpop.f32.mrb[40].mxu1 }
 0xf0f   :  { %6957 = vrot.lane.b32.xlu0 %v6310_v16, %s11696_s25  ;;  %v6312_v58 = vpop.f32.mrb[41].mxu1 }
 0xf10   :  { %v6313_v52 = vpop.f32.mrb[42].mxu1 }
 0xf11   :  { %6959 = vrot.lane.b32.xlu1 %v6313_v52, %s11696_s25  ;;  %v6315_v56 = vpop.f32.mrb[43].mxu1 }
 0xf13   :  { %6525 = vmatmul.mubr.bf16.gmra.mrb[148].mxu1 %v11364_v32 }
 0xf14   :  { %6532 = vmatprep.mubr.bf16.mxu1 %v11369_v57 }
 0xf16   :  { %v6318_v17 = vpop.f32.mrb[44].mxu1 }
 0xf17   :  { %6961 = vrot.lane.b32.xlu0 %v6318_v17, %s11696_s25  ;;  %v6320_v14 = vpop.f32.mrb[45].mxu1 }
 0xf18   :  { %v6321_v41 = vpop.f32.mrb[46].mxu1 }
 0xf19   :  { %6963 = vrot.lane.b32.xlu1 %v6321_v41, %s11696_s25  ;;  %v6323_v6 = vpop.f32.mrb[47].mxu1  ;;  %v14135_v41 = vpop.permute.xlu1 %6565 }
 0xf1b   :  { %6533 = vmatmul.mubr.bf16.gmra.mrb[152].mxu1 %v11367_v36 }
 0xf1c   :  { %6540 = vmatprep.mubr.bf16.mxu1 %v11372_v24 }
 0xf1e   :  { %v6326_v20 = vpop.f32.mrb[48].mxu1 }
 0xf1f   :  { %6965 = vrot.lane.b32.xlu0 %v6326_v20, %s11696_s25  ;;  %v6328_v25 = vpop.f32.mrb[49].mxu1 }
 0xf20   :  { %v6329_v3 = vpop.f32.mrb[50].mxu1 }
 0xf21   :  { %6967 = vrot.lane.b32.xlu1 %v6329_v3, %s11696_s25  ;;  %v6331_v33 = vpop.f32.mrb[51].mxu1  ;;  %v14141_v3 = vpop.permute.xlu0 %6569 }
 0xf23   :  { %6541 = vmatmul.mubr.bf16.gmra.mrb[156].mxu1 %v11370_v44  ;;  %v14139_v44 = vpop.permute.xlu1 %6567 }
 0xf26   :  { %v6334_v29 = vpop.f32.mrb[52].mxu1 }
 0xf27   :  { %6969 = vrot.lane.b32.xlu0 %v6334_v29, %s11696_s25  ;;  %v6336_v39 = vpop.f32.mrb[53].mxu1  ;;  %v14143_v29 = vpop.permute.xlu1 %6571 }
 0xf28   :  { %v6337_v47 = vpop.f32.mrb[54].mxu1 }
 0xf29   :  { %6971 = vrot.lane.b32.xlu1 %v6337_v47, %s11696_s25  ;;  %v6339_v50 = vpop.f32.mrb[55].mxu1 }
 0xf2a   :  { %v14146_v50 = vpop.permute.xlu0 %6573 }
 0xf2e   :  { %v6342_v40 = vpop.f32.mrb[56].mxu1 }
 0xf2f   :  { %6973 = vrot.lane.b32.xlu0 %v6342_v40, %s11696_s25  ;;  %v6344_v38 = vpop.f32.mrb[57].mxu1 }
 0xf30   :  { %v6345_v53 = vpop.f32.mrb[58].mxu1  ;;  %v14149_v38 = vpop.permute.xlu1 %6575 }
 0xf31   :  { %6975 = vrot.lane.b32.xlu1 %v6345_v53, %s11696_s25  ;;  %v6347_v54 = vpop.f32.mrb[59].mxu1  ;;  %v14151_v53 = vpop.permute.xlu0 %6577 }
 0xf36   :  { %v6350_v45 = vpop.f32.mrb[60].mxu1 }
 0xf37   :  { %6977 = vrot.lane.b32.xlu0 %v6350_v45, %s11696_s25  ;;  %v6352_v2 = vpop.f32.mrb[61].mxu1  ;;  %v14153_v45 = vpop.permute.xlu1 %6579 }
 0xf38   :  { %v6353_v63 = vpop.f32.mrb[62].mxu1 }
 0xf39   :  { %6979 = vrot.lane.b32.xlu1 %v6353_v63, %s11696_s25  ;;  %v6355_v16 = vpop.f32.mrb[63].mxu1 }
 0xf3a   :  { %v14156_v16 = vpop.permute.xlu0 %6581 }
 0xf3e   :  { %v6358_v58 = vpop.f32.mrb[64].mxu1 }
 0xf3f   :  { %7045 = vrot.lane.b32.xlu0 %v6358_v58, %s11697_s3  ;;  %v6360_v32 = vpop.f32.mrb[65].mxu1 }
 0xf40   :  { %v6361_v52 = vpop.f32.mrb[66].mxu1  ;;  %v14159_v32 = vpop.permute.xlu1 %6583 }
 0xf41   :  { %7047 = vrot.lane.b32.xlu1 %v6361_v52, %s11697_s3  ;;  %v6363_v57 = vpop.f32.mrb[67].mxu1  ;;  %16010 = vst [vmem:[#allocation66_spill] sm:$0xff] %v14159_v32  ;;  %v14161_v52 = vpop.permute.xlu0 %6585 }
 0xf42   :  { %16011 = vst [vmem:[#allocation78_spill] sm:$0xff] %v14161_v52 }
 0xf46   :  { %v6366_v56 = vpop.f32.mrb[68].mxu1 }
 0xf47   :  { %7049 = vrot.lane.b32.xlu0 %v6366_v56, %s11697_s3  ;;  %v6368_v17 = vpop.f32.mrb[69].mxu1  ;;  %v14163_v56 = vpop.permute.xlu1 %6587 }
 0xf48   :  { %v6369_v14 = vpop.f32.mrb[70].mxu1  ;;  %16012 = vst [vmem:[#allocation16_spill] sm:$0xff] %v14163_v56 }
 0xf49   :  { %7051 = vrot.lane.b32.xlu1 %v6369_v14, %s11697_s3  ;;  %v6371_v36 = vpop.f32.mrb[71].mxu1 }
 0xf4a   :  { %v14166_v36 = vpop.permute.xlu0 %6589 }
 0xf4b   :  { %16013 = vst [vmem:[#allocation34_spill] sm:$0xff] %v14166_v36 }
 0xf4e   :  { %v6374_v24 = vpop.f32.mrb[72].mxu1 }
 0xf4f   :  { %7053 = vrot.lane.b32.xlu0 %v6374_v24, %s11697_s3  ;;  %v6376_v6 = vpop.f32.mrb[73].mxu1 }
 0xf50   :  { %v6377_v20 = vpop.f32.mrb[74].mxu1  ;;  %v14169_v6 = vpop.permute.xlu1 %6591 }
 0xf51   :  { %7055 = vrot.lane.b32.xlu1 %v6377_v20, %s11697_s3  ;;  %v6379_v25 = vpop.f32.mrb[75].mxu1  ;;  %16014 = vst [vmem:[#allocation44_spill] sm:$0xff] %v14169_v6  ;;  %v14171_v20 = vpop.permute.xlu0 %6593 }
 0xf52   :  { %16015 = vst [vmem:[#allocation26_spill] sm:$0xff] %v14171_v20 }
 0xf56   :  { %v6382_v33 = vpop.f32.mrb[76].mxu1 }
 0xf57   :  { %7057 = vrot.lane.b32.xlu0 %v6382_v33, %s11697_s3  ;;  %v6384_v39 = vpop.f32.mrb[77].mxu1  ;;  %v14173_v33 = vpop.permute.xlu1 %6595 }
 0xf58   :  { %v6385_v47 = vpop.f32.mrb[78].mxu1  ;;  %16016 = vst [vmem:[#allocation79_spill] sm:$0xff] %v14173_v33 }
 0xf59   :  { %7059 = vrot.lane.b32.xlu1 %v6385_v47, %s11697_s3  ;;  %v6387_v40 = vpop.f32.mrb[79].mxu1 }
 0xf5a   :  { %v14176_v40 = vpop.permute.xlu0 %6661 }
 0xf5e   :  { %v6390_v54 = vpop.f32.mrb[80].mxu1 }
 0xf5f   :  { %7061 = vrot.lane.b32.xlu0 %v6390_v54, %s11697_s3  ;;  %v6392_v2 = vpop.f32.mrb[81].mxu1 }
 0xf60   :  { %v6393_v63 = vpop.f32.mrb[82].mxu1  ;;  %v14179_v2 = vpop.permute.xlu1 %6663 }
 0xf61   :  { %7063 = vrot.lane.b32.xlu1 %v6393_v63, %s11697_s3  ;;  %v6395_v58 = vpop.f32.mrb[83].mxu1  ;;  %v14181_v63 = vpop.permute.xlu0 %6665 }
 0xf66   :  { %v6398_v57 = vpop.f32.mrb[84].mxu1 }
 0xf67   :  { %7065 = vrot.lane.b32.xlu0 %v6398_v57, %s11697_s3  ;;  %v6400_v17 = vpop.f32.mrb[85].mxu1  ;;  %v14183_v57 = vpop.permute.xlu1 %6667 }
 0xf68   :  { %v6401_v14 = vpop.f32.mrb[86].mxu1 }
 0xf69   :  { %7067 = vrot.lane.b32.xlu1 %v6401_v14, %s11697_s3  ;;  %v6403_v24 = vpop.f32.mrb[87].mxu1 }
 0xf6a   :  { %v14186_v24 = vpop.permute.xlu0 %6669 }
 0xf6e   :  { %v6406_v25 = vpop.f32.mrb[88].mxu1 }
 0xf6f   :  { %7069 = vrot.lane.b32.xlu0 %v6406_v25, %s11697_s3  ;;  %v6408_v39 = vpop.f32.mrb[89].mxu1 }
 0xf70   :  { %v6409_v47 = vpop.f32.mrb[90].mxu1  ;;  %v14189_v39 = vpop.permute.xlu1 %6671 }
 0xf71   :  { %7071 = vrot.lane.b32.xlu1 %v6409_v47, %s11697_s3  ;;  %v6411_v54 = vpop.f32.mrb[91].mxu1  ;;  %v14191_v47 = vpop.permute.xlu0 %6673 }
 0xf74   :  { %v14193_v4 = vpop.permute.xlu1 %6675 }
 0xf75   :  { %16017 = vst [vmem:[#allocation35_spill] sm:$0xff] %v14193_v4  ;;  %v14196_v31 = vpop.permute.xlu0 %6677 }
 0xf76   :  { %v6414_v58 = vpop.f32.mrb[92].mxu1  ;;  %16018 = vst [vmem:[#allocation10_spill] sm:$0xff] %v14196_v31 }
 0xf77   :  { %7073 = vrot.lane.b32.xlu0 %v6414_v58, %s11697_s3  ;;  %v6416_v17 = vpop.f32.mrb[93].mxu1 }
 0xf78   :  { %v6417_v14 = vpop.f32.mrb[94].mxu1  ;;  %v14199_v17 = vpop.permute.xlu1 %6679 }
 0xf79   :  { %7075 = vrot.lane.b32.xlu1 %v6417_v14, %s11697_s3  ;;  %v6419_v25 = vpop.f32.mrb[95].mxu1  ;;  %16019 = vst [vmem:[#allocation45_spill] sm:$0xff] %v14199_v17  ;;  %v14201_v14 = vpop.permute.xlu0 %6681 }
 0xf7a   :  { %16020 = vst [vmem:[#allocation55_spill] sm:$0xff] %v14201_v14 }
 0xf7c   :  { %v14203_v19 = vpop.permute.xlu1 %6683 }
 0xf7d   :  { %16021 = vst [vmem:[#allocation11_spill] sm:$0xff] %v14203_v19  ;;  %v14206_v22 = vpop.permute.xlu0 %6685 }
 0xf7e   :  { %v6422_v54 = vpop.f32.mrb[96].mxu1  ;;  %16022 = vst [vmem:[#allocation56_spill] sm:$0xff] %v14206_v22 }
 0xf7f   :  { %7141 = vrot.lane.b32.xlu0 %v6422_v54, %s11698_s26  ;;  %v6424_v10 = vpop.f32.mrb[97].mxu1 }
 0xf80   :  { %v6425_v28 = vpop.f32.mrb[98].mxu1  ;;  %v14209_v54 = vpop.permute.xlu1 %6687 }
 0xf81   :  { %7143 = vrot.lane.b32.xlu1 %v6425_v28, %s11698_s26  ;;  %v6427_v58 = vpop.f32.mrb[99].mxu1  ;;  %16023 = vst [vmem:[#allocation67_spill] sm:$0xff] %v14209_v54  ;;  %v14211_v28 = vpop.permute.xlu0 %6689 }
 0xf82   :  { %16024 = vst [vmem:[#allocation20_spill] sm:$0xff] %v14211_v28 }
 0xf84   :  { %v14213_v0 = vpop.permute.xlu1 %6691 }
 0xf85   :  { %16025 = vst [vmem:[#allocation27_spill] sm:$0xff] %v14213_v0  ;;  %v14216_v7 = vpop.permute.xlu0 %6757 }
 0xf86   :  { %v6430_v25 = vpop.f32.mrb[100].mxu1 }
 0xf87   :  { %7145 = vrot.lane.b32.xlu0 %v6430_v25, %s11698_s26  ;;  %v6432_v62 = vpop.f32.mrb[101].mxu1 }
 0xf88   :  { %v6433_v18 = vpop.f32.mrb[102].mxu1  ;;  %v14219_v25 = vpop.permute.xlu1 %6759 }
 0xf89   :  { %7147 = vrot.lane.b32.xlu1 %v6433_v18, %s11698_s26  ;;  %v6435_v10 = vpop.f32.mrb[103].mxu1  ;;  %v14221_v18 = vpop.permute.xlu0 %6761 }
 0xf8c   :  { %v14223_v21 = vpop.permute.xlu1 %6763 }
 0xf8d   :  { %v14226_v59 = vpop.permute.xlu0 %6765 }
 0xf8e   :  { %v6438_v58 = vpop.f32.mrb[104].mxu1 }
 0xf8f   :  { %7149 = vrot.lane.b32.xlu0 %v6438_v58, %s11698_s26  ;;  %v6440_v42 = vpop.f32.mrb[105].mxu1 }
 0xf90   :  { %v6441_v26 = vpop.f32.mrb[106].mxu1  ;;  %v14229_v58 = vpop.permute.xlu1 %6767 }
 0xf91   :  { %7151 = vrot.lane.b32.xlu1 %v6441_v26, %s11698_s26  ;;  %v6443_v62 = vpop.f32.mrb[107].mxu1  ;;  %v14231_v26 = vpop.permute.xlu0 %6769 }
 0xf92   :  { %16026 = vst [vmem:[#allocation68_spill] sm:$0xff] %v14231_v26 }
 0xf94   :  { %v14233_v28 = vpop.permute.xlu1 %6771 }
 0xf95   :  { %16027 = vst [vmem:[#allocation18_spill] sm:$0xff] %v14233_v28  ;;  %v14236_v20 = vpop.permute.xlu0 %6773 }
 0xf96   :  { %v6446_v10 = vpop.f32.mrb[108].mxu1  ;;  %16028 = vst [vmem:[#allocation36_spill] sm:$0xff] %v14236_v20 }
 0xf97   :  { %7153 = vrot.lane.b32.xlu0 %v6446_v10, %s11698_s26  ;;  %v6448_v61 = vpop.f32.mrb[109].mxu1 }
 0xf98   :  { %v6449_v0 = vpop.f32.mrb[110].mxu1  ;;  %v14239_v10 = vpop.permute.xlu1 %6775 }
 0xf99   :  { %7155 = vrot.lane.b32.xlu1 %v6449_v0, %s11698_s26  ;;  %v6451_v42 = vpop.f32.mrb[111].mxu1  ;;  %16029 = vst [vmem:[#allocation46_spill] sm:$0xff] %v14239_v10  ;;  %v14241_v0 = vpop.permute.xlu0 %6777 }
 0xf9a   :  { %16030 = vst [vmem:[#allocation28_spill] sm:$0xff] %v14241_v0 }
 0xf9c   :  { %v14243_v9 = vpop.permute.xlu1 %6779 }
 0xf9d   :  { %16031 = vst [vmem:[#allocation37_spill] sm:$0xff] %v14243_v9  ;;  %v14246_v6 = vpop.permute.xlu0 %6781 }
 0xf9e   :  { %v6454_v62 = vpop.f32.mrb[112].mxu1  ;;  %16032 = vst [vmem:[#allocation12_spill] sm:$0xff] %v14246_v6 }
 0xf9f   :  { %7157 = vrot.lane.b32.xlu0 %v6454_v62, %s11698_s26  ;;  %v6456_v33 = vpop.f32.mrb[113].mxu1 }
 0xfa0   :  { %v6457_v54 = vpop.f32.mrb[114].mxu1  ;;  %v14249_v62 = vpop.permute.xlu1 %6783 }
 0xfa1   :  { %7159 = vrot.lane.b32.xlu1 %v6457_v54, %s11698_s26  ;;  %v6459_v61 = vpop.f32.mrb[115].mxu1  ;;  %16033 = vst [vmem:[#allocation47_spill] sm:$0xff] %v14249_v62  ;;  %v14251_v54 = vpop.permute.xlu0 %6785 }
 0xfa2   :  { %16034 = vst [vmem:[#allocation57_spill] sm:$0xff] %v14251_v54 }
 0xfa4   :  { %v14253_v19 = vpop.permute.xlu1 %6787 }
 0xfa5   :  { %16035 = vst [vmem:[#allocation13_spill] sm:$0xff] %v14253_v19  ;;  %v14256_v36 = vpop.permute.xlu0 %6853 }
 0xfa6   :  { %v6462_v42 = vpop.f32.mrb[116].mxu1 }
 0xfa7   :  { %7161 = vrot.lane.b32.xlu0 %v6462_v42, %s11698_s26  ;;  %v6464_v60 = vpop.f32.mrb[117].mxu1 }
 0xfa8   :  { %v6465_v22 = vpop.f32.mrb[118].mxu1  ;;  %v14259_v42 = vpop.permute.xlu1 %6855 }
 0xfa9   :  { %7163 = vrot.lane.b32.xlu1 %v6465_v22, %s11698_s26  ;;  %v6467_v33 = vpop.f32.mrb[119].mxu1  ;;  %v14261_v22 = vpop.permute.xlu0 %6857 }
 0xfac   :  { %v14263_v62 = vpop.permute.xlu1 %6859 }
 0xfad   :  { %v14266_v6 = vpop.permute.xlu0 %6861 }
 0xfae   :  { %v6470_v61 = vpop.f32.mrb[120].mxu1 }
 0xfaf   :  { %7165 = vrot.lane.b32.xlu0 %v6470_v61, %s11698_s26  ;;  %v6472_v0 = vpop.f32.mrb[121].mxu1 }
 0xfb0   :  { %v6473_v9 = vpop.f32.mrb[122].mxu1  ;;  %v14269_v61 = vpop.permute.xlu1 %6863 }
 0xfb1   :  { %7167 = vrot.lane.b32.xlu1 %v6473_v9, %s11698_s26  ;;  %v6475_v60 = vpop.f32.mrb[123].mxu1  ;;  %v14271_v9 = vpop.permute.xlu0 %6865 }
 0xfb2   :  { %16036 = vst [vmem:[#allocation58_spill] sm:$0xff] %v14271_v9 }
 0xfb4   :  { %v14273_v51 = vpop.permute.xlu1 %6867 }
 0xfb5   :  { %16037 = vst [vmem:[#allocation69_spill] sm:$0xff] %v14273_v51  ;;  %v14276_v14 = vpop.permute.xlu0 %6869 }
 0xfb6   :  { %v6478_v33 = vpop.f32.mrb[124].mxu1  ;;  %16038 = vst [vmem:[#allocation29_spill] sm:$0xff] %v14276_v14 }
 0xfb7   :  { %7169 = vrot.lane.b32.xlu0 %v6478_v33, %s11698_s26  ;;  %v6480_v54 = vpop.f32.mrb[125].mxu1 }
 0xfb8   :  { %v6481_v19 = vpop.f32.mrb[126].mxu1  ;;  %v14279_v33 = vpop.permute.xlu1 %6871 }
 0xfb9   :  { %7171 = vrot.lane.b32.xlu1 %v6481_v19, %s11698_s26  ;;  %v6483_v0 = vpop.f32.mrb[127].mxu1  ;;  %16039 = vst [vmem:[#allocation70_spill] sm:$0xff] %v14279_v33  ;;  %v14281_v19 = vpop.permute.xlu0 %6873 }
 0xfba   :  { %16040 = vst [vmem:[#allocation38_spill] sm:$0xff] %v14281_v19 }
 0xfbc   :  { %v14283_v20 = vpop.permute.xlu1 %6875 }
 0xfbd   :  { %16041 = vst [vmem:[#allocation48_spill] sm:$0xff] %v14283_v20  ;;  %v14286_v52 = vpop.permute.xlu0 %6877 }
 0xfbe   :  { %v6486_v60 = vpop.f32.mrb[128].mxu1  ;;  %16042 = vst [vmem:[#allocation39_spill] sm:$0xff] %v14286_v52 }
 0xfbf   :  { %7237 = vrot.lane.b32.xlu0 %v6486_v60, %s11699_s29  ;;  %v6488_v49 = vpop.f32.mrb[129].mxu1 }
 0xfc0   :  { %v6489_v10 = vpop.f32.mrb[130].mxu1  ;;  %v14289_v60 = vpop.permute.xlu1 %6879 }
 0xfc1   :  { %7239 = vrot.lane.b32.xlu1 %v6489_v10, %s11699_s29  ;;  %v6491_v54 = vpop.f32.mrb[131].mxu1  ;;  %16043 = vst [vmem:[#allocation49_spill] sm:$0xff] %v14289_v60  ;;  %v14291_v10 = vpop.permute.xlu0 %6881 }
 0xfc2   :  { %16044 = vst [vmem:[#allocation59_spill] sm:$0xff] %v14291_v10 }
 0xfc4   :  { %v14293_v33 = vpop.permute.xlu1 %6883 }
 0xfc5   :  { %16045 = vst [vmem:[#allocation60_spill] sm:$0xff] %v14293_v33  ;;  %v14296_v14 = vpop.permute.xlu0 %6949 }
 0xfc6   :  { %v6494_v0 = vpop.f32.mrb[132].mxu1 }
 0xfc7   :  { %7241 = vrot.lane.b32.xlu0 %v6494_v0, %s11699_s29  ;;  %v6496_v56 = vpop.f32.mrb[133].mxu1 }
 0xfc8   :  { %v6497_v17 = vpop.f32.mrb[134].mxu1  ;;  %v14299_v0 = vpop.permute.xlu1 %6951 }
 0xfc9   :  { %7243 = vrot.lane.b32.xlu1 %v6497_v17, %s11699_s29  ;;  %v6499_v49 = vpop.f32.mrb[135].mxu1  ;;  %v14301_v17 = vpop.permute.xlu0 %6953 }
 0xfcc   :  { %v14303_v60 = vpop.permute.xlu1 %6955 }
 0xfcd   :  { %v14306_v52 = vpop.permute.xlu0 %6957 }
 0xfce   :  { %v6502_v54 = vpop.f32.mrb[136].mxu1 }
 0xfcf   :  { %7245 = vrot.lane.b32.xlu0 %v6502_v54, %s11699_s29  ;;  %v6504_v19 = vpop.f32.mrb[137].mxu1 }
 0xfd0   :  { %v6505_v20 = vpop.f32.mrb[138].mxu1  ;;  %v14309_v54 = vpop.permute.xlu1 %6959 }
 0xfd1   :  { %7247 = vrot.lane.b32.xlu1 %v6505_v20, %s11699_s29  ;;  %v6507_v56 = vpop.f32.mrb[139].mxu1  ;;  %16046 = vst [vmem:[#allocation71_spill] sm:$0xff] %v14309_v54  ;;  %v14311_v20 = vpop.permute.xlu0 %6961 }
 0xfd2   :  { %16047 = vst [vmem:[#allocation72_spill] sm:$0xff] %v14311_v20 }
 0xfd4   :  { %v14313_v34 = vpop.permute.xlu1 %6963 }
 0xfd5   :  { %16048 = vst [vmem:[#allocation31_spill] sm:$0xff] %v14313_v34  ;;  %v14316_v28 = vpop.permute.xlu0 %6965 }
 0xfd6   :  { %v6510_v49 = vpop.f32.mrb[140].mxu1  ;;  %16049 = vst [vmem:[#allocation51_spill] sm:$0xff] %v14316_v28 }
 0xfd7   :  { %7249 = vrot.lane.b32.xlu0 %v6510_v49, %s11699_s29  ;;  %v6512_v10 = vpop.f32.mrb[141].mxu1 }
 0xfd8   :  { %v6513_v33 = vpop.f32.mrb[142].mxu1  ;;  %v14319_v49 = vpop.permute.xlu1 %6967 }
 0xfd9   :  { %7251 = vrot.lane.b32.xlu1 %v6513_v33, %s11699_s29  ;;  %v6515_v19 = vpop.f32.mrb[143].mxu1  ;;  %16050 = vst [vmem:[#allocation30_spill] sm:$0xff] %v14319_v49  ;;  %v14321_v33 = vpop.permute.xlu0 %6969 }
 0xfda   :  { %16051 = vst [vmem:[#allocation75_spill] sm:$0xff] %v14321_v33 }
 0xfdc   :  { %v14323_v9 = vpop.permute.xlu1 %6971 }
 0xfdd   :  { %16052 = vst [vmem:[#allocation22_spill] sm:$0xff] %v14323_v9  ;;  %v14326_v26 = vpop.permute.xlu0 %6973 }
 0xfde   :  { %v6518_v56 = vpop.f32.mrb[144].mxu1  ;;  %16053 = vst [vmem:[#allocation6_spill] sm:$0xff] %v14326_v26 }
 0xfdf   :  { %7253 = vrot.lane.b32.xlu0 %v6518_v56, %s11699_s29  ;;  %v6520_v51 = vpop.f32.mrb[145].mxu1 }
 0xfe0   :  { %v6521_v30 = vpop.f32.mrb[146].mxu1  ;;  %v14329_v56 = vpop.permute.xlu1 %6975 }
 0xfe1   :  { %7255 = vrot.lane.b32.xlu1 %v6521_v30, %s11699_s29  ;;  %v6523_v10 = vpop.f32.mrb[147].mxu1  ;;  %16054 = vst [vmem:[#allocation7_spill] sm:$0xff] %v14329_v56  ;;  %v14331_v30 = vpop.permute.xlu0 %6977 }
 0xfe2   :  { %16055 = vst [vmem:[#allocation40_spill] sm:$0xff] %v14331_v30 }
 0xfe4   :  { %v14333_v49 = vpop.permute.xlu1 %6979 }
 0xfe5   :  { %16056 = vst [vmem:[#allocation41_spill] sm:$0xff] %v14333_v49  ;;  %v7046_v28 = vpop.permute.xlu0 %7045 }
 0xfe6   :  { %v6526_v19 = vpop.f32.mrb[148].mxu1 }
 0xfe7   :  { %7257 = vrot.lane.b32.xlu0 %v6526_v19, %s11699_s29  ;;  %v6528_v20 = vpop.f32.mrb[149].mxu1 }
 0xfe8   :  { %v6529_v34 = vpop.f32.mrb[150].mxu1  ;;  %v14337_v19 = vpop.permute.xlu1 %7047 }
 0xfe9   :  { %7259 = vrot.lane.b32.xlu1 %v6529_v34, %s11699_s29  ;;  %v6531_v51 = vpop.f32.mrb[151].mxu1  ;;  %v14339_v26 = vpop.permute.xlu0 %7049 }
 0xfec   :  { %v14341_v51 = vpop.permute.xlu1 %7051 }
 0xfed   :  { %v14344_v49 = vpop.permute.xlu0 %7053 }
 0xfee   :  { %v6534_v10 = vpop.f32.mrb[152].mxu1  ;;  %16057 = vst [vmem:[#allocation80_spill] sm:$0xff] %v14344_v49 }
 0xfef   :  { %7261 = vrot.lane.b32.xlu0 %v6534_v10, %s11699_s29  ;;  %v6536_v33 = vpop.f32.mrb[153].mxu1 }
 0xff0   :  { %v6537_v9 = vpop.f32.mrb[154].mxu1  ;;  %v14347_v10 = vpop.permute.xlu1 %7055 }
 0xff1   :  { %7263 = vrot.lane.b32.xlu1 %v6537_v9, %s11699_s29  ;;  %v6539_v20 = vpop.f32.mrb[155].mxu1  ;;  %16058 = vst [vmem:[#allocation81_spill] sm:$0xff] %v14347_v10  ;;  %v14349_v9 = vpop.permute.xlu0 %7057 }
 0xff2   :  { %16059 = vst [vmem:[#allocation82_spill] sm:$0xff] %v14349_v9 }
 0xff4   :  { %v14351_v20 = vpop.permute.xlu1 %7059 }
 0xff5   :  { %16060 = vst [vmem:[#allocation83_spill] sm:$0xff] %v14351_v20  ;;  %v14353_v31 = vpop.permute.xlu0 %7061 }
 0xff6   :  { %v6542_v34 = vpop.f32.mrb[156].mxu1  ;;  %16061 = vst [vmem:[#allocation84_spill] sm:$0xff] %v14353_v31 }
 0xff7   :  { %7265 = vrot.lane.b32.xlu0 %v6542_v34, %s11699_s29  ;;  %v6544_v30 = vpop.f32.mrb[157].mxu1 }
 0xff8   :  { %v6545_v56 = vpop.f32.mrb[158].mxu1  ;;  %v14355_v4 = vpop.permute.xlu1 %7063 }
 0xff9   :  { %7267 = vrot.lane.b32.xlu1 %v6545_v56, %s11699_s29  ;;  %v6547_v33 = vpop.f32.mrb[159].mxu1  ;;  %16062 = vst [vmem:[#allocation85_spill] sm:$0xff] %v14355_v4  ;;  %v14357_v32 = vpop.permute.xlu0 %7065 }
 0xffa   :  { %16063 = vst [vmem:[#allocation86_spill] sm:$0xff] %v14357_v32 }
 0xffc   :  { %v14359_v34 = vpop.permute.xlu1 %7067 }
 0xffd   :  { %16064 = vst [vmem:[#allocation87_spill] sm:$0xff] %v14359_v34  ;;  %v14361_v30 = vpop.permute.xlu0 %7069 }
 0xffe   :  { %16065 = vst [vmem:[#allocation88_spill] sm:$0xff] %v14361_v30 }
0x1000   :  { %v14363_v49 = vpop.permute.xlu1 %7071 }
0x1001   :  { %16066 = vst [vmem:[#allocation89_spill] sm:$0xff] %v14363_v49  ;;  %v14365_v56 = vpop.permute.xlu0 %7073  ;;  %v6613_v49 = vmul.f32 %v14135_v41, %v12662_v43 }
0x1002   :  { %16067 = vst [vmem:[#allocation90_spill] sm:$0xff] %v14365_v56 }
0x1003   :  { %v6629_v30 = vadd.f32 %v6613_v49, %v14083_v46  ;;  %v6805_v46 = vmul.f32 %v14216_v7, %v12677_v55  ;;  %v6711_v7 = vmul.f32 %v14181_v63, %v12670_v1 }
0x1004   :  { %v14367_v33 = vpop.permute.xlu1 %7075 }
0x1005   :  { %16068 = vst [vmem:[#allocation91_spill] sm:$0xff] %v14367_v33  ;;  %v7142_v10 = vpop.permute.xlu0 %7141  ;;  %v6614_v33 = vmul.f32 %v14139_v44, %v12662_v43 }
0x1008   :  { %v7144_v9 = vpop.permute.xlu1 %7143 }
0x1009   :  { %v14369_v54 = vpop.permute.xlu0 %7145 }
0x100c   :  { %v14371_v20 = vpop.permute.xlu1 %7147 }
0x100d   :  { %16069 = vst [vmem:[#allocation92_spill] sm:$0xff] %v14371_v20  ;;  %v14373_v31 = vpop.permute.xlu0 %7149 }
0x100e   :  { %16070 = vst [vmem:[#allocation93_spill] sm:$0xff] %v14373_v31  ;;  %v6709_v31 = vmul.f32 %v14176_v40, %v12670_v1  ;;  %v6901_v40 = vmul.f32 %v14256_v36, %v12684_v8 }
0x1010   :  { %v14375_v4 = vpop.permute.xlu1 %7151  ;;  %v6725_v41 = vadd.f32 %v6709_v31, %v6629_v30  ;;  %v6997_v30 = vmul.f32 %v14296_v14, %v12690_v12  ;;  %v6618_v14 = vmul.f32 %v14149_v38, %v12662_v43  ;;  %v6807_v38 = vmul.f32 %v14221_v18, %v12677_v55 }
0x1011   :  { %16071 = vst [vmem:[#allocation94_spill] sm:$0xff] %v14375_v4  ;;  %v14377_v32 = vpop.permute.xlu0 %7153  ;;  %v6630_v4 = vadd.f32 %v6614_v33, %v14085_v37 }
0x1012   :  { %16072 = vst [vmem:[#allocation95_spill] sm:$0xff] %v14377_v32  ;;  %v6821_v31 = vadd.f32 %v6805_v46, %v6725_v41 }
0x1014   :  { %v14379_v34 = vpop.permute.xlu1 %7155 }
0x1015   :  { %16073 = vst [vmem:[#allocation96_spill] sm:$0xff] %v14379_v34  ;;  %v14383_v56 = vpop.permute.xlu0 %7157  ;;  %v6710_v34 = vmul.f32 %v14179_v2, %v12670_v1  ;;  %v6806_v2 = vmul.f32 %v14219_v25, %v12677_v55  ;;  %v6998_v25 = vmul.f32 %v14299_v0, %v12690_v12  ;;  %v7189_v0 = vmul.f32 %v7142_v10, %v12711_v48 }
0x1016   :  { %16074 = vst [vmem:[#allocation97_spill] sm:$0xff] %v14383_v56  ;;  %v6615_v56 = vmul.f32 %v14141_v3, %v12662_v43  ;;  %v6902_v3 = vmul.f32 %v14259_v42, %v12684_v8  ;;  %v6617_v42 = vmul.f32 %v14146_v50, %v12662_v43  ;;  %v6712_v50 = vmul.f32 %v14183_v57, %v12670_v1 }
0x1017   :  { %v6726_v44 = vadd.f32 %v6710_v34, %v6630_v4  ;;  %v6616_v4 = vmul.f32 %v14143_v29, %v12662_v43  ;;  %v6917_v34 = vadd.f32 %v6901_v40, %v6821_v31  ;;  %v7190_v10 = vmul.f32 %v7144_v9, %v12711_v48 }
0x1018   :  { %v14388_v23 = vpop.permute.xlu1 %7159  ;;  %v6631_v37 = vadd.f32 %v6615_v56, %v14087_v11  ;;  %v7093_v56 = vmul.f32 %v7046_v28, %v12700_v13  ;;  %v6619_v28 = vmul.f32 %v14151_v53, %v12662_v43  ;;  %v6713_v53 = vmul.f32 %v14186_v24, %v12670_v1 }
0x1019   :  { %v14393_v32 = vpop.permute.xlu0 %7161  ;;  %v6822_v11 = vadd.f32 %v6806_v2, %v6726_v44  ;;  %v6632_v29 = vadd.f32 %v6616_v4, %v14089_v27  ;;  %v7013_v46 = vadd.f32 %v6997_v30, %v6917_v34  ;;  %v7094_v44 = vmul.f32 %v14337_v19, %v12700_v13 }
0x101a   :  { %v6727_v33 = vadd.f32 %v6711_v7, %v6631_v37  ;;  %v6903_v27 = vmul.f32 %v14261_v22, %v12684_v8  ;;  %v6620_v37 = vmul.f32 %v14153_v45, %v12662_v43  ;;  %v6999_v22 = vmul.f32 %v14301_v17, %v12690_v12  ;;  %v14454_v45 = vld [vmem:[%s15783_s2 + $0x8] ss:$0 sm:$0xff] }
0x101b   :  { %v6918_v63 = vadd.f32 %v6902_v3, %v6822_v11  ;;  %v7109_v2 = vadd.f32 %v7093_v56, %v7013_v46  ;;  %v6728_v57 = vadd.f32 %v6712_v50, %v6632_v29  ;;  %v6633_v3 = vadd.f32 %v6617_v42, %v14091_v15 }
0x101c   :  { %v14399_v20 = vpop.permute.xlu1 %7163  ;;  %v6823_v31 = vadd.f32 %v6807_v38, %v6727_v33  ;;  %v6808_v24 = vmul.f32 %v14223_v21, %v12677_v55  ;;  %v6634_v7 = vadd.f32 %v6618_v14, %v14093_v5  ;;  %v6904_v15 = vmul.f32 %v14263_v62, %v12684_v8 }
0x101d   :  { %v7014_v19 = vadd.f32 %v6998_v25, %v6918_v63  ;;  %v7205_v4 = vadd.f32 %v7189_v0, %v7109_v2  ;;  %v7095_v17 = vmul.f32 %v14339_v26, %v12700_v13  ;;  %v6714_v33 = vmul.f32 %v14189_v39, %v12670_v1 }
0x101e   :  { %v6919_v11 = vadd.f32 %v6903_v27, %v6823_v31  ;;  %v6824_v29 = vadd.f32 %v6808_v24, %v6728_v57  ;;  %v6729_v21 = vadd.f32 %v6713_v53, %v6633_v3  ;;  %v7000_v5 = vmul.f32 %v14303_v60, %v12690_v12  ;;  %v16076_v31 = vld [vmem:[#allocation33_spill] sm:$0xff] }
0x101f   :  { %v7110_v30 = vadd.f32 %v7094_v44, %v7014_v19  ;;  %v6621_v62 = vmul.f32 %v14156_v16, %v12662_v43  ;;  %v7191_v26 = vmul.f32 %v14369_v54, %v12711_v48  ;;  %v6809_v46 = vmul.f32 %v14226_v59, %v12677_v55 }
0x1020   :  { %v7015_v14 = vadd.f32 %v6999_v22, %v6919_v11  ;;  %v6730_v39 = vadd.f32 %v6714_v33, %v6634_v7  ;;  %v6920_v44 = vadd.f32 %v6904_v15, %v6824_v29  ;;  %v6905_v0 = vmul.f32 %v14266_v6, %v12684_v8  ;;  %v16078_v22 = vld [vmem:[#allocation80_spill] sm:$0xff]  ;;  %v16080_v7 = vld [vmem:[#allocation35_spill] sm:$0xff]  ;;  %v16082_v33 = vld [vmem:[#allocation93_spill] sm:$0xff] }
0x1021   :  { %v14406_v49 = vpop.permute.xlu0 %7165  ;;  %v7206_v25 = vadd.f32 %v7190_v10, %v7110_v30  ;;  %v6715_v60 = vmul.f32 %v14191_v47, %v12670_v1  ;;  %v6810_v16 = vmul.f32 %v14229_v58, %v12677_v55  ;;  %v7096_v54 = vmul.f32 %v14341_v51, %v12700_v13  ;;  %v16075_v58 = vld [vmem:[#allocation92_spill] sm:$0xff] }
0x1022   :  { %v7111_v50 = vadd.f32 %v7095_v17, %v7015_v14  ;;  %v6825_v38 = vadd.f32 %v6809_v46, %v6729_v21  ;;  %v6635_v59 = vadd.f32 %v6619_v28, %v14095_v35  ;;  %v6906_v27 = vmul.f32 %v14269_v61, %v12684_v8  ;;  %v16077_v35 = vld [vmem:[#allocation71_spill] sm:$0xff]  ;;  %v16081_v17 = vld [vmem:[#allocation81_spill] sm:$0xff]  ;;  %v16083_v21 = vld [vmem:[#allocation10_spill] sm:$0xff] }
0x1023   :  { %v14418_v36 = vpop.permute.xlu1 %7167  ;;  %v7016_v19 = vadd.f32 %v7000_v5, %v6920_v44  ;;  %v7001_v47 = vmul.f32 %v14306_v52, %v12690_v12  ;;  %v7192_v10 = vmul.f32 %v16075_v58, %v12711_v48  ;;  %v6826_v51 = vadd.f32 %v6810_v16, %v6730_v39  ;;  %v16084_v14 = vld [vmem:[#allocation68_spill] sm:$0xff]  ;;  %v16085_v39 = vld [vmem:[#allocation58_spill] sm:$0xff] }
0x1024   :  { %v7207_v2 = vadd.f32 %v7191_v26, %v7111_v50  ;;  %v6636_v57 = vadd.f32 %v6620_v37, %v16076_v31  ;;  %v6921_v3 = vadd.f32 %v6905_v0, %v6825_v38  ;;  %v7002_v28 = vmul.f32 %v16077_v35, %v12690_v12  ;;  %v16086_v16 = vld [vmem:[#allocation94_spill] sm:$0xff]  ;;  %v16091_v35 = vld [vmem:[#allocation43_spill] sm:$0xff] }
0x1025   :  { %v7112_v61 = vadd.f32 %v7096_v54, %v7016_v19  ;;  %v7097_v30 = vmul.f32 %v16078_v22, %v12700_v13  ;;  %v6716_v11 = vmul.f32 %v16080_v7, %v12670_v1  ;;  %v6731_v37 = vadd.f32 %v6715_v60, %v6635_v59  ;;  %v16087_v38 = vld [vmem:[#allocation18_spill] sm:$0xff]  ;;  %v16088_v19 = vld [vmem:[#allocation8_spill] sm:$0xff] }
0x1026   :  { %v6922_v15 = vadd.f32 %v6906_v27, %v6826_v51  ;;  %v7193_v29 = vmul.f32 %v16082_v33, %v12711_v48  ;;  %v6717_v5 = vmul.f32 %v16083_v21, %v12670_v1  ;;  %v6811_v26 = vmul.f32 %v16084_v14, %v12677_v55  ;;  %v16096_v33 = vld [vmem:[#allocation83_spill] sm:$0xff] }
0x1027   :  { %v6732_v46 = vadd.f32 %v6716_v11, %v6636_v57  ;;  %v6907_v44 = vmul.f32 %v16085_v39, %v12684_v8  ;;  %v7194_v50 = vmul.f32 %v16086_v16, %v12711_v48  ;;  %v6812_v59 = vmul.f32 %v16087_v38, %v12677_v55  ;;  %v16097_v21 = vld [vmem:[#allocation95_spill] sm:$0xff] }
0x1028   :  { %v7018_v0 = vadd.f32 %v7002_v28, %v6922_v15  ;;  %v6827_v27 = vadd.f32 %v6811_v26, %v6731_v37  ;;  %v16094_v37 = vld [vmem:[#allocation78_spill] sm:$0xff]  ;;  %v7195_v14 = vmul.f32 %v16097_v21, %v12711_v48 }
0x1029   :  { %v14428_v41 = vpop.permute.xlu0 %7169  ;;  %v6623_v15 = vmul.f32 %v16094_v37, %v12662_v43 }
0x102b   :  { %v14441_v40 = vpop.permute.xlu1 %7171 }
0x1031   :  { %v7238_v18 = vpop.permute.xlu0 %7237 }
0x1032   :  { %v7285_v9 = vmul.f32 %v14454_v45, %v7238_v18 }
0x1033   :  { %v7240_v34 = vpop.permute.xlu1 %7239 }
0x1034   :  { %v14464_v56 = vadd.f32 %v7285_v9, %v7205_v4  ;;  %v7286_v42 = vmul.f32 %v14454_v45, %v7240_v34  ;;  %v16079_v9 = vld [vmem:[#allocation66_spill] sm:$0xff]  ;;  %v7017_v34 = vadd.f32 %v7001_v47, %v6921_v3  ;;  %v16089_v47 = vld [vmem:[#allocation69_spill] sm:$0xff]  ;;  %v6828_v3 = vadd.f32 %v6812_v59, %v6732_v46  ;;  %v16098_v46 = vld [vmem:[#allocation16_spill] sm:$0xff] }
0x1035   :  { %v6622_v24 = vmul.f32 %v16079_v9, %v12662_v43  ;;  %v6624_v39 = vmul.f32 %v16098_v46, %v12662_v43 }
0x1036   :  { %v14475_v63 = vadd.f32 %v7286_v42, %v7206_v25  ;;  %7317 = vadd.xlane.f32.xlu0 %v14464_v56  ;;  %v7098_v25 = vmul.f32 %v16081_v17, %v12700_v13  ;;  %v7208_v42 = vadd.f32 %v7192_v10, %v7112_v61  ;;  %v7113_v60 = vadd.f32 %v7097_v30, %v7017_v34  ;;  %v16090_v10 = vld [vmem:[#allocation72_spill] sm:$0xff]  ;;  %v16092_v61 = vld [vmem:[#allocation31_spill] sm:$0xff]  ;;  %v16093_v30 = vld [vmem:[#allocation82_spill] sm:$0xff] }
0x1037   :  { %v6638_v28 = vadd.f32 %v6622_v24, %v16091_v35  ;;  %v16095_v34 = vld [vmem:[#allocation45_spill] sm:$0xff] }
0x1038   :  { %7319 = vadd.xlane.f32.xlu1 %v14475_v63  ;;  %v7114_v51 = vadd.f32 %v7098_v25, %v7018_v0  ;;  %v7209_v31 = vadd.f32 %v7193_v29, %v7113_v60  ;;  %v6718_v17 = vmul.f32 %v16095_v34, %v12670_v1  ;;  %v7100_v29 = vmul.f32 %v16096_v33, %v12700_v13 }
0x1039   :  { %v7242_v6 = vpop.permute.xlu0 %7241 }
0x103a   :  { %v7287_v53 = vmul.f32 %v14454_v45, %v7242_v6  ;;  %v6637_v6 = vadd.f32 %v6621_v62, %v16088_v19  ;;  %v7004_v62 = vmul.f32 %v16092_v61, %v12690_v12  ;;  %v7210_v9 = vadd.f32 %v7194_v50, %v7114_v51  ;;  %v16101_v50 = vld [vmem:[#allocation55_spill] sm:$0xff]  ;;  %v16102_v19 = vld [vmem:[#allocation96_spill] sm:$0xff]  ;;  %v16105_v51 = vld [vmem:[#allocation70_spill] sm:$0xff] }
0x103b   :  { %v7244_v18 = vpop.permute.xlu1 %7243  ;;  %v6734_v60 = vadd.f32 %v6718_v17, %v6638_v28  ;;  %v6719_v38 = vmul.f32 %v16101_v50, %v12670_v1  ;;  %v16114_v50 = vld [vmem:[#allocation44_spill] sm:$0xff] }
0x103c   :  { %v14502_v4 = vadd.f32 %v7287_v53, %v7207_v2  ;;  %v7288_v52 = vmul.f32 %v14454_v45, %v7244_v18  ;;  %v6908_v2 = vmul.f32 %v16089_v47, %v12684_v8  ;;  %v7003_v53 = vmul.f32 %v16090_v10, %v12690_v12  ;;  %v16103_v47 = vld [vmem:[#allocation46_spill] sm:$0xff]  ;;  %v16104_v10 = vld [vmem:[#allocation53_spill] sm:$0xff] }
0x103d   :  { %v6923_v18 = vadd.f32 %v6907_v44, %v6827_v27  ;;  %v6733_v24 = vadd.f32 %v6717_v5, %v6637_v6  ;;  %v16099_v44 = vld [vmem:[#allocation36_spill] sm:$0xff]  ;;  %v16100_v5 = vld [vmem:[#allocation29_spill] sm:$0xff]  ;;  %v7196_v6 = vmul.f32 %v16102_v19, %v12711_v48 }
0x103e   :  { %7321 = vadd.xlane.f32.xlu0 %v14502_v4  ;;  %v14522_v54 = vadd.f32 %v7288_v52, %v7208_v42  ;;  %v7099_v52 = vmul.f32 %v16093_v30, %v12700_v13  ;;  %v6924_v25 = vadd.f32 %v6908_v2, %v6828_v3  ;;  %v6813_v0 = vmul.f32 %v16099_v44, %v12677_v55  ;;  %v16106_v3 = vld [vmem:[#allocation51_spill] sm:$0xff]  ;;  %v16112_v44 = vld [vmem:[#allocation85_spill] sm:$0xff] }
0x103f   :  { %v7019_v42 = vadd.f32 %v7003_v53, %v6923_v18  ;;  %v6909_v16 = vmul.f32 %v16100_v5, %v12684_v8  ;;  %v6814_v2 = vmul.f32 %v16103_v47, %v12677_v55  ;;  %v6639_v53 = vadd.f32 %v6623_v15, %v16104_v10  ;;  %v16109_v15 = vld [vmem:[#allocation84_spill] sm:$0xff] }
0x1040   :  { %v7020_v59 = vadd.f32 %v7004_v62, %v6924_v25  ;;  %v7005_v35 = vmul.f32 %v16106_v3, %v12690_v12  ;;  %v7101_v34 = vmul.f32 %v16109_v15, %v12700_v13 }
0x1041   :  { %v7246_v58 = vpop.permute.xlu0 %7245  ;;  %v7115_v27 = vadd.f32 %v7099_v52, %v7019_v42  ;;  %v6830_v62 = vadd.f32 %v6814_v2, %v6734_v60  ;;  %v16110_v42 = vld [vmem:[#allocation34_spill] sm:$0xff]  ;;  %v16113_v60 = vld [vmem:[#allocation97_spill] sm:$0xff]  ;;  %v16117_v2 = vld [vmem:[#allocation56_spill] sm:$0xff] }
0x1042   :  { %v7289_v57 = vmul.f32 %v14454_v45, %v7246_v58  ;;  %7323 = vadd.xlane.f32.xlu0 %v14522_v54  ;;  %v6829_v58 = vadd.f32 %v6813_v0, %v6733_v24  ;;  %v7116_v28 = vadd.f32 %v7100_v29, %v7020_v59  ;;  %v6625_v33 = vmul.f32 %v16110_v42, %v12662_v43  ;;  %v16111_v29 = vld [vmem:[#allocation11_spill] sm:$0xff] }
0x1043   :  { %v7248_v22 = vpop.permute.xlu1 %7247  ;;  %v7211_v18 = vadd.f32 %v7195_v14, %v7115_v27  ;;  %v6720_v21 = vmul.f32 %v16111_v29, %v12670_v1  ;;  %v6735_v14 = vadd.f32 %v6719_v38, %v6639_v53  ;;  %v7102_v0 = vmul.f32 %v16112_v44, %v12700_v13  ;;  %v16115_v27 = vld [vmem:[#allocation28_spill] sm:$0xff]  ;;  %v16116_v38 = vld [vmem:[#allocation38_spill] sm:$0xff] }
0x1044   :  { %v14538_v7 = vadd.f32 %v7289_v57, %v7209_v31  ;;  %v7290_v11 = vmul.f32 %v14454_v45, %v7248_v22  ;;  %v6910_v31 = vmul.f32 %v16105_v51, %v12684_v8  ;;  %v16107_v22 = vld [vmem:[#allocation9_spill] sm:$0xff]  ;;  %v6925_v52 = vadd.f32 %v6909_v16, %v6829_v58 }
0x1045   :  { %v6640_v30 = vadd.f32 %v6624_v39, %v16107_v22  ;;  %v7212_v17 = vadd.f32 %v7196_v6, %v7116_v28  ;;  %v7197_v5 = vmul.f32 %v16113_v60, %v12711_v48  ;;  %v6626_v59 = vmul.f32 %v16114_v50, %v12662_v43  ;;  %v16121_v22 = vld [vmem:[#allocation75_spill] sm:$0xff] }
0x1046   :  { %v14549_v26 = vadd.f32 %v7290_v11, %v7210_v9  ;;  %7325 = vadd.xlane.f32.xlu1 %v14538_v7  ;;  %v16108_v9 = vld [vmem:[#allocation30_spill] sm:$0xff]  ;;  %v6926_v46 = vadd.f32 %v6910_v31, %v6830_v62  ;;  %v7021_v39 = vadd.f32 %v7005_v35, %v6925_v52  ;;  %v6815_v19 = vmul.f32 %v16115_v27, %v12677_v55  ;;  %v16118_v31 = vld [vmem:[#allocation37_spill] sm:$0xff]  ;;  %v16127_v27 = vld [vmem:[#allocation87_spill] sm:$0xff] }
0x1047   :  { %v7006_v11 = vmul.f32 %v16108_v9, %v12690_v12  ;;  %v6736_v6 = vadd.f32 %v6720_v21, %v6640_v30  ;;  %v6911_v47 = vmul.f32 %v16116_v38, %v12684_v8  ;;  %v6721_v58 = vmul.f32 %v16117_v2, %v12670_v1  ;;  %v16119_v35 = vld [vmem:[#allocation54_spill] sm:$0xff] }
0x1048   :  { %7327 = vadd.xlane.f32.xlu0 %v14549_v26  ;;  %v7117_v53 = vadd.f32 %v7101_v34, %v7021_v39  ;;  %v7198_v51 = vmul.f32 %v14388_v23, %v12711_v48  ;;  %v6831_v3 = vadd.f32 %v6815_v19, %v6735_v14  ;;  %v6641_v28 = vadd.f32 %v6625_v33, %v16119_v35  ;;  %v16124_v33 = vld [vmem:[#allocation86_spill] sm:$0xff] }
0x1049   :  { %v7250_v57 = vpop.permute.xlu0 %7249  ;;  %v7022_v10 = vadd.f32 %v7006_v11, %v6926_v46  ;;  %v7007_v30 = vmul.f32 %v16121_v22, %v12690_v12  ;;  %v7103_v29 = vmul.f32 %v16124_v33, %v12700_v13  ;;  %v16125_v39 = vld [vmem:[#allocation26_spill] sm:$0xff]  ;;  %v7104_v19 = vmul.f32 %v16127_v27, %v12700_v13  ;;  %v16133_v22 = vld [vmem:[#allocation19_spill] sm:$0xff] }
0x104a   :  { %v7291_v61 = vmul.f32 %v14454_v45, %v7250_v57  ;;  %v6816_v57 = vmul.f32 %v16118_v31, %v12677_v55  ;;  %v7213_v9 = vadd.f32 %v7197_v5, %v7117_v53  ;;  %v6927_v34 = vadd.f32 %v6911_v47, %v6831_v3  ;;  %v16128_v47 = vld [vmem:[#allocation79_spill] sm:$0xff] }
0x104b   :  { %v7252_v37 = vpop.permute.xlu1 %7251  ;;  %v7118_v52 = vadd.f32 %v7102_v0, %v7022_v10  ;;  %v6627_v44 = vmul.f32 %v16125_v39, %v12662_v43  ;;  %v16126_v0 = vld [vmem:[#allocation67_spill] sm:$0xff]  ;;  %v6737_v5 = vadd.f32 %v6721_v58, %v6641_v28  ;;  %v6628_v2 = vmul.f32 %v16128_v47, %v12662_v43  ;;  %v16129_v10 = vld [vmem:[#allocation12_spill] sm:$0xff]  ;;  %v16140_v47 = vld [vmem:[#allocation89_spill] sm:$0xff] }
0x104c   :  { %v14576_v24 = vadd.f32 %v7291_v61, %v7211_v18  ;;  %v7292_v25 = vmul.f32 %v14454_v45, %v7252_v37  ;;  %v16120_v18 = vld [vmem:[#allocation48_spill] sm:$0xff]  ;;  %v6832_v23 = vadd.f32 %v6816_v57, %v6736_v6  ;;  %v16122_v37 = vld [vmem:[#allocation65_spill] sm:$0xff]  ;;  %v6722_v60 = vmul.f32 %v16126_v0, %v12670_v1  ;;  %v16130_v58 = vld [vmem:[#allocation39_spill] sm:$0xff] }
0x104d   :  { %v6912_v61 = vmul.f32 %v16120_v18, %v12684_v8  ;;  %v6642_v15 = vadd.f32 %v6626_v59, %v16122_v37  ;;  %v7214_v21 = vadd.f32 %v7198_v51, %v7118_v52  ;;  %v7023_v59 = vadd.f32 %v7007_v30, %v6927_v34  ;;  %v16131_v57 = vld [vmem:[#allocation20_spill] sm:$0xff]  ;;  %v16132_v18 = vld [vmem:[#allocation47_spill] sm:$0xff]  ;;  %v16134_v52 = vld [vmem:[#allocation49_spill] sm:$0xff] }
0x104e   :  { %v14587_v16 = vadd.f32 %v7292_v25, %v7212_v17  ;;  %7329 = vadd.xlane.f32.xlu1 %v14576_v24  ;;  %v16123_v17 = vld [vmem:[#allocation22_spill] sm:$0xff]  ;;  %v7199_v6 = vmul.f32 %v14393_v32, %v12711_v48  ;;  %v6817_v53 = vmul.f32 %v16129_v10, %v12677_v55  ;;  %v6913_v31 = vmul.f32 %v16130_v58, %v12684_v8  ;;  %v16138_v39 = vld [vmem:[#allocation88_spill] sm:$0xff] }
0x104f   :  { %v7008_v25 = vmul.f32 %v16123_v17, %v12690_v12  ;;  %v6928_v50 = vadd.f32 %v6912_v61, %v6832_v23  ;;  %v6738_v51 = vadd.f32 %v6722_v60, %v6642_v15  ;;  %v6723_v3 = vmul.f32 %v16131_v57, %v12670_v1  ;;  %v16135_v23 = vld [vmem:[#allocation6_spill] sm:$0xff]  ;;  %v16142_v57 = vld [vmem:[#allocation59_spill] sm:$0xff] }
0x1050   :  { %7331 = vadd.xlane.f32.xlu0 %v14587_v16  ;;  %v7119_v28 = vadd.f32 %v7103_v29, %v7023_v59  ;;  %v7200_v32 = vmul.f32 %v14399_v20, %v12711_v48  ;;  %v6818_v61 = vmul.f32 %v16132_v18, %v12677_v55  ;;  %v6643_v30 = vadd.f32 %v6627_v44, %v16133_v22  ;;  %v16137_v29 = vld [vmem:[#allocation7_spill] sm:$0xff] }
0x1051   :  { %v7254_v62 = vpop.permute.xlu0 %7253  ;;  %v7024_v35 = vadd.f32 %v7008_v25, %v6928_v50  ;;  %v7009_v37 = vmul.f32 %v16135_v23, %v12690_v12  ;;  %v16136_v25 = vld [vmem:[#allocation25_spill] sm:$0xff]  ;;  %v7105_v44 = vmul.f32 %v16138_v39, %v12700_v13  ;;  %v16139_v50 = vld [vmem:[#allocation27_spill] sm:$0xff]  ;;  %v7201_v10 = vmul.f32 %v14406_v49, %v12711_v48 }
0x1052   :  { %v7293_v11 = vmul.f32 %v14454_v45, %v7254_v62  ;;  %v6833_v62 = vadd.f32 %v6817_v53, %v6737_v5  ;;  %v7215_v34 = vadd.f32 %v7199_v6, %v7119_v28  ;;  %v6834_v20 = vadd.f32 %v6818_v61, %v6738_v51  ;;  %v16141_v51 = vld [vmem:[#allocation57_spill] sm:$0xff] }
0x1053   :  { %v7256_v42 = vpop.permute.xlu1 %7255  ;;  %v7120_v15 = vadd.f32 %v7104_v19, %v7024_v35  ;;  %v6724_v59 = vmul.f32 %v16139_v50, %v12670_v1  ;;  %v6739_v27 = vadd.f32 %v6723_v3, %v6643_v30  ;;  %v6819_v58 = vmul.f32 %v16141_v51, %v12677_v55  ;;  %v16143_v49 = vld [vmem:[#allocation13_spill] sm:$0xff] }
0x1054   :  { %v14614_v14 = vadd.f32 %v7293_v11, %v7213_v9  ;;  %v7294_v46 = vmul.f32 %v14454_v45, %v7256_v42  ;;  %v6914_v9 = vmul.f32 %v16134_v52, %v12684_v8  ;;  %v6644_v42 = vadd.f32 %v6628_v2, %v16136_v25  ;;  %v16145_v52 = vld [vmem:[#allocation40_spill] sm:$0xff]  ;;  %v16147_v25 = vld [vmem:[#allocation90_spill] sm:$0xff] }
0x1055   :  { %v6929_v33 = vadd.f32 %v6913_v31, %v6833_v62  ;;  %v7216_v0 = vadd.f32 %v7200_v32, %v7120_v15  ;;  %v7106_v2 = vmul.f32 %v16140_v47, %v12700_v13  ;;  %v6915_v35 = vmul.f32 %v16142_v57, %v12684_v8  ;;  %v16144_v62 = vld [vmem:[#allocation60_spill] sm:$0xff] }
0x1056   :  { %v14625_v38 = vadd.f32 %v7294_v46, %v7214_v21  ;;  %7333 = vadd.xlane.f32.xlu1 %v14614_v14  ;;  %v7010_v21 = vmul.f32 %v16137_v29, %v12690_v12  ;;  %v6930_v19 = vadd.f32 %v6914_v9, %v6834_v20  ;;  %v6740_v31 = vadd.f32 %v6724_v59, %v6644_v42 }
0x1057   :  { %v7025_v6 = vadd.f32 %v7009_v37, %v6929_v33  ;;  %v7202_v32 = vmul.f32 %v14418_v36, %v12711_v48  ;;  %v6820_v18 = vmul.f32 %v16143_v49, %v12677_v55  ;;  %v6835_v61 = vadd.f32 %v6819_v58, %v6739_v27  ;;  %v16146_v36 = vld [vmem:[#allocation41_spill] sm:$0xff] }
0x1058   :  { %7335 = vadd.xlane.f32.xlu0 %v14625_v38  ;;  %v7026_v3 = vadd.f32 %v7010_v21, %v6930_v19  ;;  %v6916_v22 = vmul.f32 %v16144_v62, %v12684_v8  ;;  %v7011_v9 = vmul.f32 %v16145_v52, %v12690_v12  ;;  %v7107_v42 = vmul.f32 %v16147_v25, %v12700_v13 }
0x1059   :  { %v7258_v11 = vpop.permute.xlu0 %7257  ;;  %v7121_v28 = vadd.f32 %v7105_v44, %v7025_v6  ;;  %v6836_v15 = vadd.f32 %v6820_v18, %v6740_v31  ;;  %v16148_v44 = vld [vmem:[#allocation91_spill] sm:$0xff]  ;;  %v7204_v19 = vmul.f32 %v14441_v40, %v12711_v48  ;;  %v11707_v40 = vmov 9  }
0x105a   :  { %v7295_v17 = vmul.f32 %v14454_v45, %v7258_v11  ;;  %v7122_v11 = vadd.f32 %v7106_v2, %v7026_v3  ;;  %10824 = vset.pattern.permute.xlu1 %v11707_v40  ;;  %10825 = vset.pattern.permute.xlu0 %v11707_v40 }
0x105b   :  { %v7260_v46 = vpop.permute.xlu1 %7259  ;;  %v7217_v23 = vadd.f32 %v7201_v10, %v7121_v28 }
0x105c   :  { %v14652_v60 = vadd.f32 %v7295_v17, %v7215_v34  ;;  %v7296_v5 = vmul.f32 %v14454_v45, %v7260_v46  ;;  %v6931_v34 = vadd.f32 %v6915_v35, %v6835_v61  ;;  %v7012_v17 = vmul.f32 %v16146_v36, %v12690_v12 }
0x105d   :  { %v7218_v33 = vadd.f32 %v7202_v32, %v7122_v11  ;;  %v6932_v46 = vadd.f32 %v6916_v22, %v6836_v15 }
0x105e   :  { %v14661_v53 = vadd.f32 %v7296_v5, %v7216_v0  ;;  %7337 = vadd.xlane.f32.xlu1 %v14652_v60  ;;  %v7027_v39 = vadd.f32 %v7011_v9, %v6931_v34  ;;  %v7108_v0 = vmul.f32 %v16148_v44, %v12700_v13  ;;  %v7203_v5 = vmul.f32 %v14428_v41, %v12711_v48 }
0x105f   :  { %v7028_v59 = vadd.f32 %v7012_v17, %v6932_v46 }
0x1060   :  { %7339 = vadd.xlane.f32.xlu0 %v14661_v53  ;;  %v7123_v27 = vadd.f32 %v7107_v42, %v7027_v39 }
0x1061   :  { %v7262_v30 = vpop.permute.xlu0 %7261  ;;  %v7124_v47 = vadd.f32 %v7108_v0, %v7028_v59 }
0x1062   :  { %v7297_v37 = vmul.f32 %v14454_v45, %v7262_v30  ;;  %v7219_v2 = vadd.f32 %v7203_v5, %v7123_v27 }
0x1063   :  { %v7264_v20 = vpop.permute.xlu1 %7263  ;;  %v7220_v58 = vadd.f32 %v7204_v19, %v7124_v47 }
0x1064   :  { %v14682_v29 = vadd.f32 %v7297_v37, %v7217_v23  ;;  %v7298_v21 = vmul.f32 %v14454_v45, %v7264_v20 }
0x1066   :  { %v14689_v50 = vadd.f32 %v7298_v21, %v7218_v33  ;;  %7341 = vadd.xlane.f32.xlu1 %v14682_v29 }
0x1068   :  { %7343 = vadd.xlane.f32.xlu0 %v14689_v50 }
0x1069   :  { %v7266_v6 = vpop.permute.xlu0 %7265 }
0x106a   :  { %v7299_v10 = vmul.f32 %v14454_v45, %v7266_v6 }
0x106b   :  { %v7268_v51 = vpop.permute.xlu1 %7267 }
0x106c   :  { %v14696_v31 = vadd.f32 %v7299_v10, %v7219_v2  ;;  %v7300_v41 = vmul.f32 %v14454_v45, %v7268_v51 }
0x106e   :  { %v14699_v57 = vadd.f32 %v7300_v41, %v7220_v58  ;;  %7345 = vadd.xlane.f32.xlu1 %v14696_v31 }
0x1070   :  { %7347 = vadd.xlane.f32.xlu0 %v14699_v57 }
0x10c3   :  { %v7318_v35 = vpop.xlane.xlu0 %7317 }
0x10c4   :  { %v7349_v3 = vmul.f32 0.0078125, %v7318_v35 }
0x10c5   :  { %v7320_v28 = vpop.xlane.xlu1 %7319 }
0x10c6   :  { %v14706_v32 = vsub.f32 %v14464_v56, %v7349_v3  ;;  %v7350_v49 = vmul.f32 0.0078125, %v7320_v28 }
0x10c8   :  { %v14709_v45 = vsub.f32 %v14475_v63, %v7350_v49  ;;  %v7381_v18 = vmul.f32 %v14706_v32, %v14706_v32 }
0x10ca   :  { %7397 = vadd.xlane.f32.xlu1 %v7381_v18  ;;  %v7382_v61 = vmul.f32 %v14709_v45, %v14709_v45 }
0x10cb   :  { %v7322_v62 = vpop.xlane.xlu0 %7321 }
0x10cc   :  { %v7351_v22 = vmul.f32 0.0078125, %v7322_v62  ;;  %7399 = vadd.xlane.f32.xlu0 %v7382_v61 }
0x10ce   :  { %v14716_v30 = vsub.f32 %v14502_v4, %v7351_v22 }
0x10cf   :  { %v7324_v52 = vpop.xlane.xlu0 %7323 }
0x10d0   :  { %v7352_v56 = vmul.f32 0.0078125, %v7324_v52  ;;  %v7383_v9 = vmul.f32 %v14716_v30, %v14716_v30 }
0x10d2   :  { %v14721_v63 = vsub.f32 %v14522_v54, %v7352_v56  ;;  %7401 = vadd.xlane.f32.xlu1 %v7383_v9  ;;  %v11638_v9 = vld [vmem:[%s15792_s11] sm:$0xff] }
0x10d3   :  { %v7326_v11 = vpop.xlane.xlu1 %7325 }
0x10d4   :  { %v7353_v23 = vmul.f32 0.0078125, %v7326_v11  ;;  %v7384_v37 = vmul.f32 %v14721_v63, %v14721_v63  ;;  %v11641_v11 = vld [vmem:[%s15792_s11 + $0x10] sm:$0xff] }
0x10d5   :  { %v7328_v15 = vpop.xlane.xlu0 %7327 }
0x10d6   :  { %v14726_v34 = vsub.f32 %v14538_v7, %v7353_v23  ;;  %v7354_v4 = vmul.f32 0.0078125, %v7328_v15  ;;  %7403 = vadd.xlane.f32.xlu0 %v7384_v37  ;;  %v14803_v23 = vld [vmem:[%s15792_s11 + $0x30] sm:$0xff]  ;;  %v11643_v37 = vld [vmem:[%s15792_s11 + $0x18] sm:$0xff]  ;;  %v14812_v15 = vld [vmem:[%s15792_s11 + $0x48] sm:$0xff] }
0x10d8   :  { %v14729_v36 = vsub.f32 %v14549_v26, %v7354_v4  ;;  %v7385_v17 = vmul.f32 %v14726_v34, %v14726_v34  ;;  %v11645_v4 = vld [vmem:[%s15792_s11 + $0x20] sm:$0xff] }
0x10da   :  { %7405 = vadd.xlane.f32.xlu1 %v7385_v17  ;;  %v7386_v54 = vmul.f32 %v14729_v36, %v14729_v36  ;;  %v14821_v17 = vld [vmem:[%s15792_s11 + $0x50] sm:$0xff] }
0x10db   :  { %v7330_v20 = vpop.xlane.xlu1 %7329 }
0x10dc   :  { %v7355_v25 = vmul.f32 0.0078125, %v7330_v20  ;;  %7407 = vadd.xlane.f32.xlu0 %v7386_v54  ;;  %v14827_v54 = vld [vmem:[%s15792_s11 + $0x38] sm:$0xff]  ;;  %v11708_v20 = vmov 8  }
0x10dd   :  { %v7332_v42 = vpop.xlane.xlu0 %7331 }
0x10de   :  { %v14736_v33 = vsub.f32 %v14576_v24, %v7355_v25  ;;  %v7356_v7 = vmul.f32 0.0078125, %v7332_v42  ;;  %v14834_v25 = vld [vmem:[%s15792_s11 + $0x40] sm:$0xff]  ;;  %v14840_v42 = vld [vmem:[%s15792_s11 + $0x58] sm:$0xff] }
0x10e0   :  { %v14739_v21 = vsub.f32 %v14587_v16, %v7356_v7  ;;  %v7387_v26 = vmul.f32 %v14736_v33, %v14736_v33  ;;  %v14846_v7 = vld [vmem:[%s15792_s11 + $0x60] sm:$0xff] }
0x10e2   :  { %7409 = vadd.xlane.f32.xlu1 %v7387_v26  ;;  %v7388_v46 = vmul.f32 %v14739_v21, %v14739_v21 }
0x10e3   :  { %v7334_v39 = vpop.xlane.xlu1 %7333 }
0x10e4   :  { %v7357_v44 = vmul.f32 0.0078125, %v7334_v39  ;;  %7411 = vadd.xlane.f32.xlu0 %v7388_v46 }
0x10e5   :  { %v7336_v0 = vpop.xlane.xlu0 %7335 }
0x10e6   :  { %v14746_v5 = vsub.f32 %v14614_v14, %v7357_v44  ;;  %v7358_v24 = vmul.f32 0.0078125, %v7336_v0 }
0x10e8   :  { %v14749_v59 = vsub.f32 %v14625_v38, %v7358_v24  ;;  %v7389_v16 = vmul.f32 %v14746_v5, %v14746_v5 }
0x10ea   :  { %7413 = vadd.xlane.f32.xlu1 %v7389_v16  ;;  %v7390_v27 = vmul.f32 %v14749_v59, %v14749_v59 }
0x10eb   :  { %v7338_v19 = vpop.xlane.xlu1 %7337 }
0x10ec   :  { %v7359_v6 = vmul.f32 0.0078125, %v7338_v19  ;;  %7415 = vadd.xlane.f32.xlu0 %v7390_v27 }
0x10ed   :  { %v7340_v47 = vpop.xlane.xlu0 %7339 }
0x10ee   :  { %v14756_v2 = vsub.f32 %v14652_v60, %v7359_v6  ;;  %v7360_v14 = vmul.f32 0.0078125, %v7340_v47 }
0x10f0   :  { %v14759_v10 = vsub.f32 %v14661_v53, %v7360_v14  ;;  %v7391_v38 = vmul.f32 %v14756_v2, %v14756_v2 }
0x10f2   :  { %7417 = vadd.xlane.f32.xlu1 %v7391_v38  ;;  %v7392_v51 = vmul.f32 %v14759_v10, %v14759_v10 }
0x10f3   :  { %v7342_v58 = vpop.xlane.xlu1 %7341 }
0x10f4   :  { %v7361_v41 = vmul.f32 0.0078125, %v7342_v58  ;;  %7419 = vadd.xlane.f32.xlu0 %v7392_v51 }
0x10f5   :  { %v7344_v35 = vpop.xlane.xlu0 %7343 }
0x10f6   :  { %v14766_v3 = vsub.f32 %v14682_v29, %v7361_v41  ;;  %v7362_v60 = vmul.f32 0.0078125, %v7344_v35 }
0x10f8   :  { %v14769_v28 = vsub.f32 %v14689_v50, %v7362_v60  ;;  %v7393_v53 = vmul.f32 %v14766_v3, %v14766_v3 }
0x10fa   :  { %7421 = vadd.xlane.f32.xlu1 %v7393_v53  ;;  %v7394_v49 = vmul.f32 %v14769_v28, %v14769_v28 }
0x10fb   :  { %v7346_v18 = vpop.xlane.xlu1 %7345 }
0x10fc   :  { %v7363_v61 = vmul.f32 0.0078125, %v7346_v18  ;;  %7423 = vadd.xlane.f32.xlu0 %v7394_v49 }
0x10fd   :  { %v7348_v62 = vpop.xlane.xlu0 %7347 }
0x10fe   :  { %v14776_v22 = vsub.f32 %v14696_v31, %v7363_v61  ;;  %v7364_v29 = vmul.f32 0.0078125, %v7348_v62  ;;  %v11639_v31 = vld [vmem:[%s15792_s11 + $0x8] sm:$0xff] }
0x1100   :  { %v14779_v52 = vsub.f32 %v14699_v57, %v7364_v29  ;;  %v7395_v50 = vmul.f32 %v14776_v22, %v14776_v22  ;;  %v14794_v57 = vld [vmem:[%s15792_s11 + $0x28] sm:$0xff] }
0x1102   :  { %7425 = vadd.xlane.f32.xlu1 %v7395_v50  ;;  %v7396_v56 = vmul.f32 %v14779_v52, %v14779_v52 }
0x1104   :  { %7427 = vadd.xlane.f32.xlu0 %v7396_v56 }
0x1113   :  { %7590 = vperm.xlu1 %10824, %v11638_v9  }
0x1117   :  { %7594 = vperm.xlu1 %10824, %v11639_v31  }
0x111a   :  { %7610 = vperm.xlu0 %10825, %v14794_v57  }
0x111b   :  { %7598 = vperm.xlu1 %10824, %v11641_v11  }
0x111e   :  { %7614 = vperm.xlu0 %10825, %v14803_v23  }
0x111f   :  { %7602 = vperm.xlu1 %10824, %v11643_v37  }
0x1122   :  { %7626 = vperm.xlu0 %10825, %v14812_v15  }
0x1123   :  { %7606 = vperm.xlu1 %10824, %v11645_v4  }
0x1126   :  { %7630 = vperm.xlu0 %10825, %v14821_v17  }
0x1127   :  { %7618 = vperm.xlu1 %10824, %v14827_v54  }
0x112a   :  { %10827 = vset.pattern.permute.xlu0 %v11708_v20 }
0x112b   :  { %7622 = vperm.xlu1 %10824, %v14834_v25  }
0x112f   :  { %7634 = vperm.xlu1 %10824, %v14840_v42  }
0x1133   :  { %7638 = vperm.xlu1 %10824, %v14846_v7  }
0x1137   :  { %10826 = vset.pattern.permute.xlu1 %v11708_v20 }
0x1157   :  { %v7398_v26 = vpop.xlane.xlu1 %7397 }
0x1158   :  { %v7429_v46 = vmul.f32 0.0078125, %v7398_v26 }
0x1159   :  { %v7400_v39 = vpop.xlane.xlu0 %7399 }
0x115a   :  { %v7445_v44 = vadd.f32 1e-05, %v7429_v46  ;;  %v7430_v0 = vmul.f32 0.0078125, %v7400_v39 }
0x115c   :  { %11560 = vrsqrt.f32 %v7445_v44  ;;  %v7446_v24 = vadd.f32 1e-05, %v7430_v0 }
0x115e   :  { %11562 = vrsqrt.f32 %v7446_v24 }
0x115f   :  { %v7402_v16 = vpop.xlane.xlu1 %7401 }
0x1160   :  { %v7431_v27 = vmul.f32 0.0078125, %v7402_v16 }
0x1162   :  { %v7447_v19 = vadd.f32 1e-05, %v7431_v27 }
0x1163   :  { %v7404_v6 = vpop.xlane.xlu0 %7403 }
0x1164   :  { %11564 = vrsqrt.f32 %v7447_v19  ;;  %v7432_v47 = vmul.f32 0.0078125, %v7404_v6 }
0x1166   :  { %v11561_v14 = vpop.eup %11560  ;;  %v7448_v38 = vadd.f32 1e-05, %v7432_v47 }
0x1167   :  { %v7406_v51 = vpop.xlane.xlu1 %7405  ;;  %v7477_v58 = vmul.f32 %v11638_v9, %v11561_v14 }
0x1168   :  { %v11563_v41 = vpop.eup %11562  ;;  %11566 = vrsqrt.f32 %v7448_v38  ;;  %v7433_v35 = vmul.f32 0.0078125, %v7406_v51 }
0x1169   :  { %v7408_v60 = vpop.xlane.xlu0 %7407  ;;  %7495 = vperm.xlu1 %10826, %v7477_v58   ;;  %v7478_v53 = vmul.f32 %v11639_v31, %v11563_v41 }
0x116a   :  { %v7449_v49 = vadd.f32 1e-05, %v7433_v35  ;;  %v7434_v18 = vmul.f32 0.0078125, %v7408_v60 }
0x116b   :  { %7500 = vperm.xlu0 %10827, %v7478_v53  }
0x116c   :  { %11568 = vrsqrt.f32 %v7449_v49  ;;  %v7450_v61 = vadd.f32 1e-05, %v7434_v18 }
0x116e   :  { %v11565_v62 = vpop.eup %11564  ;;  %11570 = vrsqrt.f32 %v7450_v61 }
0x116f   :  { %v7410_v29 = vpop.xlane.xlu1 %7409  ;;  %v7479_v50 = vmul.f32 %v11641_v11, %v11565_v62 }
0x1170   :  { %v7435_v56 = vmul.f32 0.0078125, %v7410_v29 }
0x1171   :  { %v7412_v26 = vpop.xlane.xlu0 %7411  ;;  %7505 = vperm.xlu1 %10826, %v7479_v50  }
0x1172   :  { %v11567_v46 = vpop.eup %11566  ;;  %v7451_v9 = vadd.f32 1e-05, %v7435_v56  ;;  %v7436_v39 = vmul.f32 0.0078125, %v7412_v26 }
0x1173   :  { %v7480_v44 = vmul.f32 %v11643_v37, %v11567_v46 }
0x1174   :  { %11572 = vrsqrt.f32 %v7451_v9  ;;  %v7452_v0 = vadd.f32 1e-05, %v7436_v39  ;;  %v11651_v39 = vld [vmem:[%s15792_s11 + $0x68] sm:$0xff] }
0x1175   :  { %7510 = vperm.xlu1 %10826, %v7480_v44  }
0x1176   :  { %v11569_v31 = vpop.eup %11568  ;;  %11574 = vrsqrt.f32 %v7452_v0 }
0x1177   :  { %v7414_v24 = vpop.xlane.xlu1 %7413  ;;  %v7481_v16 = vmul.f32 %v11645_v4, %v11569_v31 }
0x1178   :  { %v11571_v27 = vpop.eup %11570  ;;  %v7437_v19 = vmul.f32 0.0078125, %v7414_v24 }
0x1179   :  { %v7416_v6 = vpop.xlane.xlu0 %7415  ;;  %7515 = vperm.xlu1 %10826, %v7481_v16   ;;  %v7482_v11 = vmul.f32 %v14794_v57, %v11571_v27 }
0x117a   :  { %v7453_v47 = vadd.f32 1e-05, %v7437_v19  ;;  %v7438_v14 = vmul.f32 0.0078125, %v7416_v6 }
0x117b   :  { %7520 = vperm.xlu0 %10827, %v7482_v11  }
0x117c   :  { %11576 = vrsqrt.f32 %v7453_v47  ;;  %v7454_v38 = vadd.f32 1e-05, %v7438_v14 }
0x117e   :  { %v11573_v51 = vpop.eup %11572  ;;  %11578 = vrsqrt.f32 %v7454_v38 }
0x117f   :  { %v7418_v37 = vpop.xlane.xlu1 %7417  ;;  %v7483_v58 = vmul.f32 %v14803_v23, %v11573_v51  ;;  %v11653_v51 = vld [vmem:[%s15792_s11 + $0x78] sm:$0xff] }
0x1180   :  { %v11575_v41 = vpop.eup %11574  ;;  %v7439_v35 = vmul.f32 0.0078125, %v7418_v37 }
0x1181   :  { %v7420_v60 = vpop.xlane.xlu0 %7419  ;;  %7525 = vperm.xlu1 %10826, %v7483_v58   ;;  %v7484_v49 = vmul.f32 %v14827_v54, %v11575_v41 }
0x1182   :  { %v7455_v4 = vadd.f32 1e-05, %v7439_v35  ;;  %v7440_v53 = vmul.f32 0.0078125, %v7420_v60 }
0x1184   :  { %11580 = vrsqrt.f32 %v7455_v4  ;;  %v7456_v57 = vadd.f32 1e-05, %v7440_v53  ;;  %v11375_v4 = vld [vmem:[%s15789_s8 + $0x4] ss:$8 sps:$4 sm:$0xff]  }
0x1185   :  { %7530 = vperm.xlu1 %10826, %v7484_v49   ;;  %8189 = vmatprep.mubr.bf16.mxu0 %v11375_v4 }
0x1186   :  { %v11577_v18 = vpop.eup %11576  ;;  %11582 = vrsqrt.f32 %v7456_v57 }
0x1187   :  { %v7422_v61 = vpop.xlane.xlu1 %7421  ;;  %v7485_v62 = vmul.f32 %v14834_v25, %v11577_v18 }
0x1188   :  { %v11579_v29 = vpop.eup %11578  ;;  %v7441_v50 = vmul.f32 0.0078125, %v7422_v61 }
0x1189   :  { %v7424_v56 = vpop.xlane.xlu0 %7423  ;;  %7535 = vperm.xlu0 %10827, %v7485_v62   ;;  %v7486_v23 = vmul.f32 %v14812_v15, %v11579_v29 }
0x118a   :  { %v7457_v26 = vadd.f32 1e-05, %v7441_v50  ;;  %v7442_v46 = vmul.f32 0.0078125, %v7424_v56 }
0x118b   :  { %7540 = vperm.xlu1 %10826, %v7486_v23  }
0x118c   :  { %11584 = vrsqrt.f32 %v7457_v26  ;;  %v7458_v9 = vadd.f32 1e-05, %v7442_v46 }
0x118d   :  { %10828 = vset.pattern.permute.xlu0 %v11707_v40 }
0x118e   :  { %v11581_v54 = vpop.eup %11580  ;;  %11586 = vrsqrt.f32 %v7458_v9  ;;  %7642 = vperm.xlu0 %10828, %v11651_v39  }
0x118f   :  { %v7426_v25 = vpop.xlane.xlu1 %7425  ;;  %v7487_v44 = vmul.f32 %v14821_v17, %v11581_v54 }
0x1190   :  { %v11583_v0 = vpop.eup %11582  ;;  %v7443_v31 = vmul.f32 0.0078125, %v7426_v25 }
0x1191   :  { %v7428_v15 = vpop.xlane.xlu0 %7427  ;;  %7545 = vperm.xlu1 %10826, %v7487_v44   ;;  %v7488_v27 = vmul.f32 %v14840_v42, %v11583_v0 }
0x1192   :  { %v7459_v24 = vadd.f32 1e-05, %v7443_v31  ;;  %v7444_v16 = vmul.f32 0.0078125, %v7428_v15  ;;  %10829 = vset.pattern.permute.xlu0 %v11708_v20  ;;  %v11652_v20 = vld [vmem:[%s15792_s11 + $0x70] sm:$0xff] }
0x1193   :  { %v7591_v37 = vpop.permute.xlu1 %7590 }
0x1194   :  { %11588 = vrsqrt.f32 %v7459_v24  ;;  %v7460_v19 = vadd.f32 1e-05, %v7444_v16 }
0x1195   :  { %7550 = vperm.xlu1 %10826, %v7488_v27   ;;  %v16149_v27 = vmov 0  }
0x1196   :  { %v11585_v6 = vpop.eup %11584  ;;  %11590 = vrsqrt.f32 %v7460_v19 }
0x1197   :  { %v7489_v11 = vmul.f32 %v14846_v7, %v11585_v6  ;;  %v7595_v58 = vpop.permute.xlu1 %7594 }
0x1198   :  { %v11587_v47 = vpop.eup %11586 }
0x1199   :  { %7555 = vperm.xlu0 %10829, %v7489_v11   ;;  %v7490_v17 = vmul.f32 %v11651_v39, %v11587_v47  ;;  %v7611_v49 = vpop.permute.xlu0 %7610 }
0x119b   :  { %7560 = vperm.xlu1 %10826, %v7490_v17   ;;  %v7599_v41 = vpop.permute.xlu1 %7598 }
0x119d   :  { %10830 = vset.pattern.permute.xlu0 %v11707_v40  ;;  %v7615_v18 = vpop.permute.xlu0 %7614 }
0x119e   :  { %v11589_v14 = vpop.eup %11588  ;;  %7646 = vperm.xlu0 %10830, %v11652_v20  }
0x119f   :  { %v7491_v42 = vmul.f32 %v11652_v20, %v11589_v14  ;;  %v7603_v35 = vpop.permute.xlu1 %7602 }
0x11a0   :  { %v11591_v38 = vpop.eup %11590 }
0x11a1   :  { %7565 = vperm.xlu1 %10826, %v7491_v42   ;;  %v7492_v7 = vmul.f32 %v11653_v51, %v11591_v38  ;;  %v14878_v62 = vpop.permute.xlu0 %7626 }
0x11a3   :  { %v7607_v60 = vpop.permute.xlu1 %7606 }
0x11a5   :  { %7570 = vperm.xlu1 %10826, %v7492_v7   ;;  %v14882_v29 = vpop.permute.xlu0 %7630 }
0x11a7   :  { %v7619_v53 = vpop.permute.xlu1 %7618 }
0x11a9   :  { %10831 = vset.pattern.permute.xlu1 %v11707_v40 }
0x11aa   :  { %7650 = vperm.xlu1 %10831, %v11653_v51  }
0x11ab   :  { %v14874_v57 = vpop.permute.xlu1 %7622 }
0x11af   :  { %v14876_v61 = vpop.permute.xlu1 %7634 }
0x11b3   :  { %v14880_v40 = vpop.permute.xlu1 %7638 }
0x11e8   :  { %v7496_v50 = vpop.permute.xlu1 %7495 }
0x11e9   :  { %v7573_v56 = vmul.f32 %v7496_v50, %v14706_v32 }
0x11ea   :  { %v7501_v23 = vpop.permute.xlu0 %7500 }
0x11eb   :  { %v7653_v26 = vadd.f32 %v7591_v37, %v7573_v56  ;;  %v7574_v46 = vmul.f32 %v7501_v23, %v14709_v45 }
0x11ed   :  { %v7685_v9 = vmul.f32 0.2, %v7653_v26  ;;  %v7654_v54 = vadd.f32 %v7595_v58, %v7574_v46  ;;  %vm7669_vm15 = vcmp.ge.f32.partialorder %v7653_v26, 0.0 }
0x11ef   :  { %vm7670_vm1 = vcmp.ge.f32.partialorder %v7654_v54, 0.0  ;;  %v7686_v39 = vmul.f32 0.2, %v7654_v54  ;;  %v7701_v44 = vsel %vm7669_vm15, %v7653_v26, %v7685_v9 }
0x11f0   :  { %v7506_v25 = vpop.permute.xlu1 %7505 }
0x11f1   :  { %v7702_v0 = vsel %vm7670_vm1, %v7654_v54, %v7686_v39  ;;  %v7575_v31 = vmul.f32 %v7506_v25, %v14716_v30 }
0x11f2   :  { %v7789_v15 = vpack.c.bf16 %v7702_v0, %v7701_v44 }
0x11f3   :  { %v7655_v24 = vadd.f32 %v7599_v41, %v7575_v31 }
0x11f4   :  { %8158 = vmatpush1.bf16.msra.mxu0 %v7789_v15  ;;  %v7511_v16 = vpop.permute.xlu1 %7510 }
0x11f5   :  { %v7576_v32 = vmul.f32 %v7511_v16, %v14721_v63  ;;  %8159 = vmatprep.subr.bf16.mxu0 %v16149_v27  ;;  %v7687_v19 = vmul.f32 0.2, %v7655_v24  ;;  %vm7671_vm2 = vcmp.ge.f32.partialorder %v7655_v24, 0.0 }
0x11f7   :  { %v7656_v45 = vadd.f32 %v7603_v35, %v7576_v32  ;;  %v7703_v14 = vsel %vm7671_vm2, %v7655_v24, %v7687_v19 }
0x11f8   :  { %v7516_v6 = vpop.permute.xlu1 %7515 }
0x11f9   :  { %vm7672_vm3 = vcmp.ge.f32.partialorder %v7656_v45, 0.0  ;;  %v7688_v11 = vmul.f32 0.2, %v7656_v45  ;;  %v7577_v47 = vmul.f32 %v7516_v6, %v14726_v34 }
0x11fa   :  { %v7521_v17 = vpop.permute.xlu0 %7520 }
0x11fb   :  { %v7704_v20 = vsel %vm7672_vm3, %v7656_v45, %v7688_v11  ;;  %v7657_v30 = vadd.f32 %v7607_v60, %v7577_v47  ;;  %v7578_v42 = vmul.f32 %v7521_v17, %v14729_v36 }
0x11fc   :  { %v7790_v38 = vpack.c.bf16 %v7704_v20, %v7703_v14 }
0x11fd   :  { %v7689_v51 = vmul.f32 0.2, %v7657_v30  ;;  %v7658_v7 = vadd.f32 %v7611_v49, %v7578_v42  ;;  %vm7673_vm4 = vcmp.ge.f32.partialorder %v7657_v30, 0.0 }
0x11fe   :  { %8160 = vmatpush1.bf16.msra.mxu0 %v7790_v38 }
0x11ff   :  { %vm7674_vm5 = vcmp.ge.f32.partialorder %v7658_v7, 0.0  ;;  %v7690_v63 = vmul.f32 0.2, %v7658_v7  ;;  %8161 = vmatprep.subr.bf16.mxu0 %v16149_v27  ;;  %v7705_v58 = vsel %vm7673_vm4, %v7657_v30, %v7689_v51 }
0x1200   :  { %v7526_v37 = vpop.permute.xlu1 %7525 }
0x1201   :  { %v7706_v41 = vsel %vm7674_vm5, %v7658_v7, %v7690_v63  ;;  %v7579_v34 = vmul.f32 %v7526_v37, %v14736_v33 }
0x1202   :  { %v7791_v35 = vpack.c.bf16 %v7706_v41, %v7705_v58 }
0x1203   :  { %v7659_v4 = vadd.f32 %v7615_v18, %v7579_v34 }
0x1204   :  { %8162 = vmatpush1.bf16.msra.mxu0 %v7791_v35  ;;  %v7531_v60 = vpop.permute.xlu1 %7530 }
0x1205   :  { %v7580_v36 = vmul.f32 %v7531_v60, %v14739_v21  ;;  %8163 = vmatprep.subr.bf16.mxu0 %v16149_v27  ;;  %v7691_v49 = vmul.f32 0.2, %v7659_v4  ;;  %vm7675_vm6 = vcmp.ge.f32.partialorder %v7659_v4, 0.0 }
0x1207   :  { %v7660_v50 = vadd.f32 %v7619_v53, %v7580_v36  ;;  %v7707_v9 = vsel %vm7675_vm6, %v7659_v4, %v7691_v49  ;;  %v16151_v36 = vld [vmem:[#allocation5_spill] sm:$0xff] }
0x1208   :  { %v7536_v56 = vpop.permute.xlu0 %7535  ;;  %v16153_v49 = vld [vmem:[#allocation61_spill] sm:$0xff] }
0x1209   :  { %vm7676_vm7 = vcmp.ge.f32.partialorder %v7660_v50, 0.0  ;;  %v7692_v23 = vmul.f32 0.2, %v7660_v50  ;;  %v7581_v26 = vmul.f32 %v7536_v56, %v14746_v5  ;;  %v16155_v56 = vld [vmem:[#allocation21_spill] sm:$0xff] }
0x120a   :  { %v7541_v46 = vpop.permute.xlu1 %7540 }
0x120b   :  { %v7708_v54 = vsel %vm7676_vm7, %v7660_v50, %v7692_v23  ;;  %v7661_v33 = vadd.f32 %v14874_v57, %v7581_v26  ;;  %v7582_v18 = vmul.f32 %v7541_v46, %v14749_v59  ;;  %v16154_v50 = vld [vmem:[#allocation14_spill] sm:$0xff] }
0x120c   :  { %v7792_v39 = vpack.c.bf16 %v7708_v54, %v7707_v9  ;;  %v16156_v23 = vld [vmem:[#allocation62_spill] sm:$0xff]  ;;  %v11378_v9 = vld [vmem:[%s15789_s8 + $0x14] ss:$8 sps:$4 sm:$0xff]   ;;  %v16158_v54 = vmov 0.0  }
0x120d   :  { %v7693_v25 = vmul.f32 0.2, %v7661_v33  ;;  %v7662_v21 = vadd.f32 %v14878_v62, %v7582_v18  ;;  %vm7677_vm8 = vcmp.ge.f32.partialorder %v7661_v33, 0.0  ;;  %v7643_v15 = vpop.permute.xlu0 %7642  ;;  %v11373_v26 = vld [vmem:[%s15789_s8] ss:$8 sps:$4 sm:$0xff]  }
0x120e   :  { %8164 = vmatpush1.bf16.msra.mxu0 %v7792_v39  ;;  %v16157_v46 = vld [vmem:[#allocation74_spill] sm:$0xff]  ;;  %v11384_v39 = vld [vmem:[%s15789_s8 + $0x34] ss:$8 sps:$4 sm:$0xff]  }
0x120f   :  { %vm7678_vm10 = vcmp.ge.f32.partialorder %v7662_v21, 0.0  ;;  %v7694_v53 = vmul.f32 0.2, %v7662_v21  ;;  %8165 = vmatprep.subr.bf16.mxu0 %v16149_v27  ;;  %v7709_v0 = vsel %vm7677_vm8, %v7661_v33, %v7693_v25  ;;  %v11376_v33 = vld [vmem:[%s15789_s8 + $0x10] ss:$8 sps:$4 sm:$0xff]  }
0x1210   :  { %v7546_v44 = vpop.permute.xlu1 %7545  ;;  %v11379_v18 = vld [vmem:[%s15789_s8 + $0x20] ss:$8 sps:$4 sm:$0xff]   ;;  %v11382_v25 = vld [vmem:[%s15789_s8 + $0x30] ss:$8 sps:$4 sm:$0xff]  }
0x1211   :  { %v7710_v5 = vsel %vm7678_vm10, %v7662_v21, %v7694_v53  ;;  %v7583_v31 = vmul.f32 %v7546_v44, %v14756_v2  ;;  %v11387_v21 = vld [vmem:[%s15789_s8 + $0x44] ss:$8 sps:$4 sm:$0xff]   ;;  %v11385_v53 = vld [vmem:[%s15789_s8 + $0x40] ss:$8 sps:$4 sm:$0xff]   ;;  %v11390_v44 = vld [vmem:[%s15789_s8 + $0x54] ss:$8 sps:$4 sm:$0xff]  }
0x1212   :  { %v7793_v24 = vpack.c.bf16 %v7710_v5, %v7709_v0  ;;  %v11388_v0 = vld [vmem:[%s15789_s8 + $0x50] ss:$8 sps:$4 sm:$0xff]   ;;  %v11393_v5 = vld [vmem:[%s15789_s8 + $0x64] ss:$8 sps:$4 sm:$0xff]  }
0x1213   :  { %v7663_v57 = vadd.f32 %v14882_v29, %v7583_v31  ;;  %v11391_v31 = vld [vmem:[%s15789_s8 + $0x60] ss:$8 sps:$4 sm:$0xff]  }
0x1214   :  { %8166 = vmatpush1.bf16.msra.mxu0 %v7793_v24  ;;  %v7551_v59 = vpop.permute.xlu1 %7550  ;;  %v11394_v24 = vld [vmem:[%s15789_s8 + $0x70] ss:$8 sps:$4 sm:$0xff]  }
0x1215   :  { %v7584_v16 = vmul.f32 %v7551_v59, %v14759_v10  ;;  %8167 = vmatprep.subr.bf16.mxu0 %v16149_v27  ;;  %v7695_v62 = vmul.f32 0.2, %v7663_v57  ;;  %vm7679_vm11 = vcmp.ge.f32.partialorder %v7663_v57, 0.0  ;;  %v11397_v59 = vld [vmem:[%s15789_s8 + $0x80] ss:$8 sps:$4 sm:$0xff]  }
0x1217   :  { %v7664_v32 = vadd.f32 %v14876_v61, %v7584_v16  ;;  %v7711_v11 = vsel %vm7679_vm11, %v7663_v57, %v7695_v62  ;;  %v11399_v57 = vld [vmem:[%s15789_s8 + $0x84] ss:$8 sps:$4 sm:$0xff]   ;;  %v11402_v16 = vld [vmem:[%s15789_s8 + $0x94] ss:$8 sps:$4 sm:$0xff]   ;;  %v11400_v62 = vld [vmem:[%s15789_s8 + $0x90] ss:$8 sps:$4 sm:$0xff]  }
0x1218   :  { %v7556_v19 = vpop.permute.xlu0 %7555 }
0x1219   :  { %vm7680_vm12 = vcmp.ge.f32.partialorder %v7664_v32, 0.0  ;;  %v7696_v45 = vmul.f32 0.2, %v7664_v32  ;;  %v7585_v6 = vmul.f32 %v7556_v19, %v14766_v3  ;;  %v11403_v19 = vld [vmem:[%s15789_s8 + $0xa0] ss:$8 sps:$4 sm:$0xff]  }
0x121a   :  { %v7561_v2 = vpop.permute.xlu1 %7560 }
0x121b   :  { %v7712_v47 = vsel %vm7680_vm12, %v7664_v32, %v7696_v45  ;;  %v7665_v29 = vadd.f32 %v14880_v40, %v7585_v6  ;;  %v7586_v17 = vmul.f32 %v7561_v2, %v14769_v28  ;;  %v11405_v32 = vld [vmem:[%s15789_s8 + $0xa4] ss:$8 sps:$4 sm:$0xff]   ;;  %v11408_v45 = vld [vmem:[%s15789_s8 + $0xb4] ss:$8 sps:$4 sm:$0xff]   ;;  %v11406_v6 = vld [vmem:[%s15789_s8 + $0xb0] ss:$8 sps:$4 sm:$0xff]  }
0x121c   :  { %v7794_v14 = vpack.c.bf16 %v7712_v47, %v7711_v11  ;;  %v11411_v2 = vld [vmem:[%s15789_s8 + $0xc4] ss:$8 sps:$4 sm:$0xff]   ;;  %v11409_v11 = vld [vmem:[%s15789_s8 + $0xc0] ss:$8 sps:$4 sm:$0xff]   ;;  %v11414_v47 = vld [vmem:[%s15789_s8 + $0xd4] ss:$8 sps:$4 sm:$0xff]  }
0x121d   :  { %v7697_v10 = vmul.f32 0.2, %v7665_v29  ;;  %v7666_v20 = vadd.f32 %v7643_v15, %v7586_v17  ;;  %vm7681_vm13 = vcmp.ge.f32.partialorder %v7665_v29, 0.0  ;;  %v7647_v7 = vpop.permute.xlu0 %7646  ;;  %v11396_v15 = vld [vmem:[%s15789_s8 + $0x74] ss:$8 sps:$4 sm:$0xff]  }
0x121e   :  { %8168 = vmatpush1.bf16.msra.mxu0 %v7794_v14  ;;  %v11417_v17 = vld [vmem:[%s15789_s8 + $0xe4] ss:$8 sps:$4 sm:$0xff]   ;;  %v11415_v14 = vld [vmem:[%s15789_s8 + $0xe0] ss:$8 sps:$4 sm:$0xff]  }
0x121f   :  { %vm7682_vm14 = vcmp.ge.f32.partialorder %v7666_v20, 0.0  ;;  %v7698_v61 = vmul.f32 0.2, %v7666_v20  ;;  %8169 = vmatprep.subr.bf16.mxu0 %v16149_v27  ;;  %v7713_v42 = vsel %vm7681_vm13, %v7665_v29, %v7697_v10  ;;  %v11412_v29 = vld [vmem:[%s15789_s8 + $0xd0] ss:$8 sps:$4 sm:$0xff]  }
0x1220   :  { %v7566_v30 = vpop.permute.xlu1 %7565  ;;  %v11420_v10 = vld [vmem:[%s15789_s8 + $0xf4] ss:$8 sps:$4 sm:$0xff]  }
0x1221   :  { %v7714_v38 = vsel %vm7682_vm14, %v7666_v20, %v7698_v61  ;;  %v7587_v3 = vmul.f32 %v7566_v30, %v14776_v22  ;;  %v16150_v22 = vld [vmem:[#allocation73_spill] sm:$0xff]  ;;  %v11418_v20 = vld [vmem:[%s15789_s8 + $0xf0] ss:$8 sps:$4 sm:$0xff]  }
0x1222   :  { %v7795_v51 = vpack.c.bf16 %v7714_v38, %v7713_v42  ;;  %v11423_v61 = vld [vmem:[%s15789_s8 + $0x104] ss:$8 sps:$4 sm:$0xff]   ;;  %v11421_v30 = vld [vmem:[%s15789_s8 + $0x100] ss:$8 sps:$4 sm:$0xff]   ;;  %v11426_v42 = vld [vmem:[%s15789_s8 + $0x114] ss:$8 sps:$4 sm:$0xff]  }
0x1223   :  { %v7667_v28 = vadd.f32 %v7647_v7, %v7587_v3  ;;  %v11424_v38 = vld [vmem:[%s15789_s8 + $0x110] ss:$8 sps:$4 sm:$0xff]   ;;  %v11429_v3 = vld [vmem:[%s15789_s8 + $0x124] ss:$8 sps:$4 sm:$0xff]   ;;  %v11432_v7 = vld [vmem:[%s15789_s8 + $0x134] ss:$8 sps:$4 sm:$0xff]  }
0x1224   :  { %8170 = vmatpush1.bf16.msra.mxu0 %v7795_v51  ;;  %v7571_v40 = vpop.permute.xlu1 %7570  ;;  %v11427_v51 = vld [vmem:[%s15789_s8 + $0x120] ss:$8 sps:$4 sm:$0xff]  }
0x1225   :  { %8171 = vmatprep.subr.bf16.mxu0 %v16149_v27  ;;  %v7588_v63 = vmul.f32 %v7571_v40, %v14779_v52  ;;  %v7699_v58 = vmul.f32 0.2, %v7667_v28  ;;  %vm7683_vm15 = vcmp.ge.f32.partialorder %v7667_v28, 0.0  ;;  %v16152_v52 = vld [vmem:[#allocation50_spill] sm:$0xff]  ;;  %v11430_v40 = vld [vmem:[%s15789_s8 + $0x130] ss:$8 sps:$4 sm:$0xff]  }
0x1227   :  { %v7715_v35 = vsel %vm7683_vm15, %v7667_v28, %v7699_v58  ;;  %v11435_v28 = vld [vmem:[%s15789_s8 + $0x144] ss:$8 sps:$4 sm:$0xff]   ;;  %v11436_v58 = vld [vmem:[%s15789_s8 + $0x150] ss:$8 sps:$4 sm:$0xff]  }
0x1229   :  { %v7651_v37 = vpop.permute.xlu1 %7650 }
0x122a   :  { %v7668_v41 = vadd.f32 %v7651_v37, %v7588_v63  ;;  %v11433_v63 = vld [vmem:[%s15789_s8 + $0x140] ss:$8 sps:$4 sm:$0xff]   ;;  %v11438_v37 = vld [vmem:[%s15789_s8 + $0x154] ss:$8 sps:$4 sm:$0xff]  }
0x122c   :  { %vm7684_vm1 = vcmp.ge.f32.partialorder %v7668_v41, 0.0  ;;  %v7700_v34 = vmul.f32 0.2, %v7668_v41 }
0x122e   :  { %v7716_v4 = vsel %vm7684_vm1, %v7668_v41, %v7700_v34  ;;  %v11441_v41 = vld [vmem:[%s15789_s8 + $0x164] ss:$8 sps:$4 sm:$0xff]   ;;  %v11439_v34 = vld [vmem:[%s15789_s8 + $0x160] ss:$8 sps:$4 sm:$0xff]  }
0x122f   :  { %v7796_v60 = vpack.c.bf16 %v7716_v4, %v7715_v35  ;;  %v11444_v35 = vld [vmem:[%s15789_s8 + $0x174] ss:$8 sps:$4 sm:$0xff]   ;;  %v11442_v4 = vld [vmem:[%s15789_s8 + $0x170] ss:$8 sps:$4 sm:$0xff]  }
0x1231   :  { %8172 = vmatpush1.bf16.msra.mxu0 %v7796_v60  ;;  %v11447_v60 = vld [vmem:[%s15789_s8 + $0x184] ss:$8 sps:$4 sm:$0xff]  }
0x1232   :  { %8173 = vmatprep.subr.bf16.mxu0 %v16149_v27 }
0x1235   :  { %8174 = vmatpush1.bf16.msra.mxu0 %v16150_v22  ;;  %v11445_v22 = vld [vmem:[%s15789_s8 + $0x180] ss:$8 sps:$4 sm:$0xff]  }
0x1236   :  { %8175 = vmatprep.subr.bf16.mxu0 %v16149_v27 }
0x1239   :  { %8176 = vmatpush1.bf16.msra.mxu0 %v16151_v36  ;;  %v11450_v36 = vld [vmem:[%s15789_s8 + $0x194] ss:$8 sps:$4 sm:$0xff]  }
0x123a   :  { %8177 = vmatprep.subr.bf16.mxu0 %v16149_v27 }
0x123d   :  { %8178 = vmatpush1.bf16.msra.mxu0 %v16152_v52  ;;  %v11448_v52 = vld [vmem:[%s15789_s8 + $0x190] ss:$8 sps:$4 sm:$0xff]  }
0x123e   :  { %8179 = vmatprep.subr.bf16.mxu0 %v16149_v27 }
0x1241   :  { %8180 = vmatpush1.bf16.msra.mxu0 %v16153_v49  ;;  %v11453_v49 = vld [vmem:[%s15789_s8 + $0x1a4] ss:$8 sps:$4 sm:$0xff]  }
0x1242   :  { %8181 = vmatprep.subr.bf16.mxu0 %v16149_v27 }
0x1245   :  { %8182 = vmatpush1.bf16.msra.mxu0 %v16154_v50  ;;  %v11451_v50 = vld [vmem:[%s15789_s8 + $0x1a0] ss:$8 sps:$4 sm:$0xff]  }
0x1246   :  { %8183 = vmatprep.subr.bf16.mxu0 %v16149_v27 }
0x1249   :  { %8184 = vmatpush1.bf16.msra.mxu0 %v16155_v56  ;;  %v11456_v56 = vld [vmem:[%s15789_s8 + $0x1b4] ss:$8 sps:$4 sm:$0xff]  }
0x124a   :  { %8185 = vmatprep.subr.bf16.mxu0 %v16149_v27 }
0x124d   :  { %8186 = vmatpush1.bf16.msra.mxu0 %v16156_v23 }
0x124e   :  { %8187 = vmatprep.subr.bf16.mxu0 %v16149_v27  ;;  %v11381_v27 = vld [vmem:[%s15789_s8 + $0x24] ss:$8 sps:$4 sm:$0xff]  }
0x1251   :  { %8188 = vmatpush1.bf16.msra.mxu0 %v16157_v46  ;;  %v11454_v46 = vld [vmem:[%s15789_s8 + $0x1b0] ss:$8 sps:$4 sm:$0xff]  }
0x1252   :  { %10747 = vmatprep.subr.bf16.mxu0 %v16158_v54 }
0x1254   :  { %8190 = vmatmul.mubr.bf16.vlgmr.msra.gmra.mrb[32].mxu0 %v11373_v26 }
0x1255   :  { %8197 = vmatprep.mubr.bf16.mxu0 %v11378_v9 }
0x125c   :  { %8198 = vmatmul.mubr.bf16.gmra.mrb[36].mxu0 %v11376_v33  ;;  %v11459_v33 = vld [vmem:[%s15789_s8 + $0x1c4] ss:$8 sps:$4 sm:$0xff]  }
0x125d   :  { %8205 = vmatprep.mubr.bf16.mxu0 %v11381_v27 }
0x1264   :  { %8206 = vmatmul.mubr.bf16.gmra.mrb[40].mxu0 %v11379_v18 }
0x1265   :  { %8213 = vmatprep.mubr.bf16.mxu0 %v11384_v39 }
0x126c   :  { %8214 = vmatmul.mubr.bf16.gmra.mrb[44].mxu0 %v11382_v25  ;;  %v11457_v25 = vld [vmem:[%s15789_s8 + $0x1c0] ss:$8 sps:$4 sm:$0xff]  }
0x126d   :  { %8221 = vmatprep.mubr.bf16.mxu0 %v11387_v21 }
0x1274   :  { %8222 = vmatmul.mubr.bf16.gmra.mrb[48].mxu0 %v11385_v53  ;;  %v11462_v53 = vld [vmem:[%s15789_s8 + $0x1d4] ss:$8 sps:$4 sm:$0xff]  }
0x1275   :  { %8229 = vmatprep.mubr.bf16.mxu0 %v11390_v44 }
0x127c   :  { %8230 = vmatmul.mubr.bf16.gmra.mrb[52].mxu0 %v11388_v0 }
0x127d   :  { %8237 = vmatprep.mubr.bf16.mxu0 %v11393_v5 }
0x1284   :  { %8238 = vmatmul.mubr.bf16.gmra.mrb[56].mxu0 %v11391_v31  ;;  %v11460_v31 = vld [vmem:[%s15789_s8 + $0x1d0] ss:$8 sps:$4 sm:$0xff]  }
0x1285   :  { %8245 = vmatprep.mubr.bf16.mxu0 %v11396_v15 }
0x128c   :  { %8246 = vmatmul.mubr.bf16.gmra.mrb[60].mxu0 %v11394_v24  ;;  %v11465_v24 = vld [vmem:[%s15789_s8 + $0x1e4] ss:$8 sps:$4 sm:$0xff]  }
0x128d   :  { %8253 = vmatprep.mubr.bf16.mxu0 %v11399_v57 }
0x1294   :  { %8254 = vmatmul.mubr.bf16.gmra.mrb[64].mxu0 %v11397_v59 }
0x1295   :  { %8261 = vmatprep.mubr.bf16.mxu0 %v11402_v16 }
0x129c   :  { %8262 = vmatmul.mubr.bf16.gmra.mrb[68].mxu0 %v11400_v62  ;;  %v11463_v62 = vld [vmem:[%s15789_s8 + $0x1e0] ss:$8 sps:$4 sm:$0xff]  }
0x129d   :  { %8269 = vmatprep.mubr.bf16.mxu0 %v11405_v32 }
0x12a4   :  { %8270 = vmatmul.mubr.bf16.gmra.mrb[72].mxu0 %v11403_v19  ;;  %v11468_v19 = vld [vmem:[%s15789_s8 + $0x1f4] ss:$8 sps:$4 sm:$0xff]  }
0x12a5   :  { %8277 = vmatprep.mubr.bf16.mxu0 %v11408_v45 }
0x12ac   :  { %8278 = vmatmul.mubr.bf16.gmra.mrb[76].mxu0 %v11406_v6 }
0x12ad   :  { %8285 = vmatprep.mubr.bf16.mxu0 %v11411_v2 }
0x12b4   :  { %8286 = vmatmul.mubr.bf16.gmra.mrb[80].mxu0 %v11409_v11  ;;  %v11466_v11 = vld [vmem:[%s15789_s8 + $0x1f0] ss:$8 sps:$4 sm:$0xff]  }
0x12b5   :  { %8293 = vmatprep.mubr.bf16.mxu0 %v11414_v47 }
0x12bc   :  { %8294 = vmatmul.mubr.bf16.gmra.mrb[84].mxu0 %v11412_v29  ;;  %v11471_v29 = vld [vmem:[%s15789_s8 + $0x204] ss:$8 sps:$4 sm:$0xff]  }
0x12bd   :  { %8301 = vmatprep.mubr.bf16.mxu0 %v11417_v17 }
0x12c4   :  { %8302 = vmatmul.mubr.bf16.gmra.mrb[88].mxu0 %v11415_v14 }
0x12c5   :  { %8309 = vmatprep.mubr.bf16.mxu0 %v11420_v10 }
0x12cc   :  { %8310 = vmatmul.mubr.bf16.gmra.mrb[92].mxu0 %v11418_v20  ;;  %v11469_v20 = vld [vmem:[%s15789_s8 + $0x200] ss:$8 sps:$4 sm:$0xff]  }
0x12cd   :  { %8317 = vmatprep.mubr.bf16.mxu0 %v11423_v61 }
0x12d4   :  { %8318 = vmatmul.mubr.bf16.gmra.mrb[96].mxu0 %v11421_v30  ;;  %v11474_v30 = vld [vmem:[%s15789_s8 + $0x214] ss:$8 sps:$4 sm:$0xff]  }
0x12d5   :  { %8325 = vmatprep.mubr.bf16.mxu0 %v11426_v42 }
0x12dc   :  { %8326 = vmatmul.mubr.bf16.gmra.mrb[100].mxu0 %v11424_v38 }
0x12dd   :  { %8333 = vmatprep.mubr.bf16.mxu0 %v11429_v3 }
0x12e4   :  { %8334 = vmatmul.mubr.bf16.gmra.mrb[104].mxu0 %v11427_v51  ;;  %v11472_v51 = vld [vmem:[%s15789_s8 + $0x210] ss:$8 sps:$4 sm:$0xff]  }
0x12e5   :  { %8341 = vmatprep.mubr.bf16.mxu0 %v11432_v7 }
0x12ec   :  { %8342 = vmatmul.mubr.bf16.gmra.mrb[108].mxu0 %v11430_v40  ;;  %v11477_v40 = vld [vmem:[%s15789_s8 + $0x224] ss:$8 sps:$4 sm:$0xff]  }
0x12ed   :  { %8349 = vmatprep.mubr.bf16.mxu0 %v11435_v28 }
0x12f4   :  { %8350 = vmatmul.mubr.bf16.gmra.mrb[112].mxu0 %v11433_v63 }
0x12f5   :  { %8357 = vmatprep.mubr.bf16.mxu0 %v11438_v37 }
0x12fc   :  { %8358 = vmatmul.mubr.bf16.gmra.mrb[116].mxu0 %v11436_v58  ;;  %v11475_v58 = vld [vmem:[%s15789_s8 + $0x220] ss:$8 sps:$4 sm:$0xff]  }
0x12fd   :  { %8365 = vmatprep.mubr.bf16.mxu0 %v11441_v41 }
0x1304   :  { %8366 = vmatmul.mubr.bf16.gmra.mrb[120].mxu0 %v11439_v34  ;;  %v11480_v34 = vld [vmem:[%s15789_s8 + $0x234] ss:$8 sps:$4 sm:$0xff]  }
0x1305   :  { %8373 = vmatprep.mubr.bf16.mxu0 %v11444_v35 }
0x130c   :  { %8374 = vmatmul.mubr.bf16.gmra.mrb[124].mxu0 %v11442_v4 }
0x130d   :  { %8381 = vmatprep.mubr.bf16.mxu0 %v11447_v60 }
0x1314   :  { %8382 = vmatmul.mubr.bf16.gmra.mrb[128].mxu0 %v11445_v22  ;;  %v11478_v22 = vld [vmem:[%s15789_s8 + $0x230] ss:$8 sps:$4 sm:$0xff]  }
0x1315   :  { %8389 = vmatprep.mubr.bf16.mxu0 %v11450_v36 }
0x131c   :  { %8390 = vmatmul.mubr.bf16.gmra.mrb[132].mxu0 %v11448_v52 }
0x131d   :  { %8397 = vmatprep.mubr.bf16.mxu0 %v11453_v49 }
0x1324   :  { %8398 = vmatmul.mubr.bf16.gmra.mrb[136].mxu0 %v11451_v50 }
0x1325   :  { %8405 = vmatprep.mubr.bf16.mxu0 %v11456_v56 }
0x1327   :  { %v8191_v23 = vpop.f32.mrb[32].mxu0 }
0x1328   :  { %8486 = vrot.lane.b32.xlu0 %v8191_v23, %s11693_s22  ;;  %v8193_v26 = vpop.f32.mrb[33].mxu0 }
0x1329   :  { %v8194_v9 = vpop.f32.mrb[34].mxu0 }
0x132a   :  { %8488 = vrot.lane.b32.xlu1 %v8194_v9, %s11693_s22  ;;  %v8196_v27 = vpop.f32.mrb[35].mxu0 }
0x132c   :  { %8406 = vmatmul.mubr.bf16.gmra.mrb[140].mxu0 %v11454_v46 }
0x132d   :  { %8413 = vmatprep.mubr.bf16.mxu0 %v11459_v33 }
0x132f   :  { %v8199_v18 = vpop.f32.mrb[36].mxu0 }
0x1330   :  { %8490 = vrot.lane.b32.xlu0 %v8199_v18, %s11693_s22  ;;  %v8201_v39 = vpop.f32.mrb[37].mxu0 }
0x1331   :  { %v8202_v21 = vpop.f32.mrb[38].mxu0 }
0x1332   :  { %8492 = vrot.lane.b32.xlu1 %v8202_v21, %s11693_s22  ;;  %v8204_v44 = vpop.f32.mrb[39].mxu0 }
0x1334   :  { %8414 = vmatmul.mubr.bf16.gmra.mrb[144].mxu0 %v11457_v25 }
0x1335   :  { %8421 = vmatprep.mubr.bf16.mxu0 %v11462_v53 }
0x1337   :  { %v8207_v0 = vpop.f32.mrb[40].mxu0 }
0x1338   :  { %8494 = vrot.lane.b32.xlu0 %v8207_v0, %s11693_s22  ;;  %v8209_v5 = vpop.f32.mrb[41].mxu0 }
0x1339   :  { %v8210_v15 = vpop.f32.mrb[42].mxu0 }
0x133a   :  { %8496 = vrot.lane.b32.xlu1 %v8210_v15, %s11693_s22  ;;  %v8212_v57 = vpop.f32.mrb[43].mxu0 }
0x133c   :  { %8422 = vmatmul.mubr.bf16.gmra.mrb[148].mxu0 %v11460_v31 }
0x133d   :  { %8429 = vmatprep.mubr.bf16.mxu0 %v11465_v24 }
0x133f   :  { %v8215_v59 = vpop.f32.mrb[44].mxu0 }
0x1340   :  { %8498 = vrot.lane.b32.xlu0 %v8215_v59, %s11693_s22  ;;  %v8217_v16 = vpop.f32.mrb[45].mxu0 }
0x1341   :  { %v8218_v32 = vpop.f32.mrb[46].mxu0 }
0x1342   :  { %8500 = vrot.lane.b32.xlu1 %v8218_v32, %s11693_s22  ;;  %v8220_v45 = vpop.f32.mrb[47].mxu0 }
0x1344   :  { %8430 = vmatmul.mubr.bf16.gmra.mrb[152].mxu0 %v11463_v62 }
0x1345   :  { %8437 = vmatprep.mubr.bf16.mxu0 %v11468_v19 }
0x1347   :  { %v8223_v6 = vpop.f32.mrb[48].mxu0 }
0x1348   :  { %8534 = vrot.lane.b32.xlu0 %v8223_v6, %s11691_s19  ;;  %v8225_v2 = vpop.f32.mrb[49].mxu0 }
0x1349   :  { %v8226_v47 = vpop.f32.mrb[50].mxu0 }
0x134a   :  { %8536 = vrot.lane.b32.xlu1 %v8226_v47, %s11691_s19  ;;  %v8228_v17 = vpop.f32.mrb[51].mxu0 }
0x134c   :  { %8438 = vmatmul.mubr.bf16.gmra.mrb[156].mxu0 %v11466_v11 }
0x134d   :  { %8445 = vmatprep.mubr.bf16.mxu0 %v11471_v29 }
0x134f   :  { %v8231_v14 = vpop.f32.mrb[52].mxu0 }
0x1350   :  { %8538 = vrot.lane.b32.xlu0 %v8231_v14, %s11691_s19  ;;  %v8233_v10 = vpop.f32.mrb[53].mxu0 }
0x1351   :  { %v8234_v61 = vpop.f32.mrb[54].mxu0 }
0x1352   :  { %8540 = vrot.lane.b32.xlu1 %v8234_v61, %s11691_s19  ;;  %v8236_v42 = vpop.f32.mrb[55].mxu0 }
0x1354   :  { %8446 = vmatmul.mubr.bf16.gmra.mrb[160].mxu0 %v11469_v20 }
0x1355   :  { %8453 = vmatprep.mubr.bf16.mxu0 %v11474_v30 }
0x1357   :  { %v8239_v38 = vpop.f32.mrb[56].mxu0 }
0x1358   :  { %8542 = vrot.lane.b32.xlu0 %v8239_v38, %s11691_s19  ;;  %v8241_v3 = vpop.f32.mrb[57].mxu0 }
0x1359   :  { %v8242_v7 = vpop.f32.mrb[58].mxu0 }
0x135a   :  { %8544 = vrot.lane.b32.xlu1 %v8242_v7, %s11691_s19  ;;  %v8244_v28 = vpop.f32.mrb[59].mxu0 }
0x135c   :  { %8454 = vmatmul.mubr.bf16.gmra.mrb[164].mxu0 %v11472_v51 }
0x135d   :  { %8461 = vmatprep.mubr.bf16.mxu0 %v11477_v40 }
0x135f   :  { %v8247_v63 = vpop.f32.mrb[60].mxu0 }
0x1360   :  { %8546 = vrot.lane.b32.xlu0 %v8247_v63, %s11691_s19  ;;  %v8249_v37 = vpop.f32.mrb[61].mxu0 }
0x1361   :  { %v8250_v41 = vpop.f32.mrb[62].mxu0 }
0x1362   :  { %8548 = vrot.lane.b32.xlu1 %v8250_v41, %s11691_s19  ;;  %v8252_v35 = vpop.f32.mrb[63].mxu0 }
0x1364   :  { %8462 = vmatmul.mubr.bf16.gmra.mrb[168].mxu0 %v11475_v58 }
0x1365   :  { %8469 = vmatprep.mubr.bf16.mxu0 %v11480_v34 }
0x1367   :  { %v8255_v4 = vpop.f32.mrb[64].mxu0 }
0x1368   :  { %8582 = vrot.lane.b32.xlu0 %v8255_v4, %s11694_s17  ;;  %v8257_v60 = vpop.f32.mrb[65].mxu0 }
0x1369   :  { %v8258_v36 = vpop.f32.mrb[66].mxu0 }
0x136a   :  { %8584 = vrot.lane.b32.xlu1 %v8258_v36, %s11694_s17  ;;  %v8260_v52 = vpop.f32.mrb[67].mxu0 }
0x136c   :  { %8470 = vmatmul.mubr.bf16.gmra.mrb[172].mxu0 %v11478_v22 }
0x136d   :  { %10755 = vmatprep.mubr.msk.bf16.mxu0 %vm11706_vm9, %v16158_v54 }
0x136f   :  { %v8263_v49 = vpop.f32.mrb[68].mxu0 }
0x1370   :  { %8586 = vrot.lane.b32.xlu0 %v8263_v49, %s11694_s17  ;;  %v8265_v50 = vpop.f32.mrb[69].mxu0 }
0x1371   :  { %v8266_v56 = vpop.f32.mrb[70].mxu0 }
0x1372   :  { %8588 = vrot.lane.b32.xlu1 %v8266_v56, %s11694_s17  ;;  %v8268_v23 = vpop.f32.mrb[71].mxu0 }
0x1377   :  { %v8271_v26 = vpop.f32.mrb[72].mxu0 }
0x1378   :  { %8590 = vrot.lane.b32.xlu0 %v8271_v26, %s11694_s17  ;;  %v8273_v46 = vpop.f32.mrb[73].mxu0 }
0x1379   :  { %v8274_v9 = vpop.f32.mrb[74].mxu0 }
0x137a   :  { %8592 = vrot.lane.b32.xlu1 %v8274_v9, %s11694_s17  ;;  %v8276_v33 = vpop.f32.mrb[75].mxu0 }
0x137f   :  { %v8279_v27 = vpop.f32.mrb[76].mxu0 }
0x1380   :  { %8594 = vrot.lane.b32.xlu0 %v8279_v27, %s11694_s17  ;;  %v8281_v18 = vpop.f32.mrb[77].mxu0 }
0x1381   :  { %v8282_v39 = vpop.f32.mrb[78].mxu0 }
0x1382   :  { %8596 = vrot.lane.b32.xlu1 %v8282_v39, %s11694_s17  ;;  %v8284_v25 = vpop.f32.mrb[79].mxu0 }
0x1387   :  { %v8287_v21 = vpop.f32.mrb[80].mxu0 }
0x1388   :  { %8630 = vrot.lane.b32.xlu0 %v8287_v21, %s11695_s18  ;;  %v8289_v53 = vpop.f32.mrb[81].mxu0 }
0x1389   :  { %v8290_v44 = vpop.f32.mrb[82].mxu0 }
0x138a   :  { %8632 = vrot.lane.b32.xlu1 %v8290_v44, %s11695_s18  ;;  %v8292_v0 = vpop.f32.mrb[83].mxu0 }
0x138f   :  { %v8295_v5 = vpop.f32.mrb[84].mxu0 }
0x1390   :  { %8634 = vrot.lane.b32.xlu0 %v8295_v5, %s11695_s18  ;;  %v8297_v31 = vpop.f32.mrb[85].mxu0 }
0x1391   :  { %v8298_v15 = vpop.f32.mrb[86].mxu0 }
0x1392   :  { %8636 = vrot.lane.b32.xlu1 %v8298_v15, %s11695_s18  ;;  %v8300_v24 = vpop.f32.mrb[87].mxu0 }
0x1397   :  { %v8303_v57 = vpop.f32.mrb[88].mxu0 }
0x1398   :  { %8638 = vrot.lane.b32.xlu0 %v8303_v57, %s11695_s18  ;;  %v8305_v59 = vpop.f32.mrb[89].mxu0 }
0x1399   :  { %v8306_v16 = vpop.f32.mrb[90].mxu0 }
0x139a   :  { %8640 = vrot.lane.b32.xlu1 %v8306_v16, %s11695_s18  ;;  %v8308_v62 = vpop.f32.mrb[91].mxu0 }
0x139f   :  { %v8311_v32 = vpop.f32.mrb[92].mxu0 }
0x13a0   :  { %8642 = vrot.lane.b32.xlu0 %v8311_v32, %s11695_s18  ;;  %v8313_v19 = vpop.f32.mrb[93].mxu0 }
0x13a1   :  { %v8314_v45 = vpop.f32.mrb[94].mxu0 }
0x13a2   :  { %8644 = vrot.lane.b32.xlu1 %v8314_v45, %s11695_s18  ;;  %v8316_v6 = vpop.f32.mrb[95].mxu0 }
0x13a7   :  { %v15176_v2 = vpop.f32.mrb[96].mxu0 }
0x13a8   :  { %v8321_v11 = vpop.f32.mrb[97].mxu0 }
0x13a9   :  { %v15178_v47 = vpop.f32.mrb[98].mxu0 }
0x13aa   :  { %v8324_v29 = vpop.f32.mrb[99].mxu0 }
0x13af   :  { %v15180_v17 = vpop.f32.mrb[100].mxu0 }
0x13b0   :  { %v8329_v14 = vpop.f32.mrb[101].mxu0 }
0x13b1   :  { %v15182_v10 = vpop.f32.mrb[102].mxu0 }
0x13b2   :  { %v8332_v20 = vpop.f32.mrb[103].mxu0 }
0x13b7   :  { %v15184_v61 = vpop.f32.mrb[104].mxu0 }
0x13b8   :  { %v8337_v30 = vpop.f32.mrb[105].mxu0 }
0x13b9   :  { %v15186_v42 = vpop.f32.mrb[106].mxu0 }
0x13ba   :  { %v8340_v38 = vpop.f32.mrb[107].mxu0 }
0x13bf   :  { %v15188_v3 = vpop.f32.mrb[108].mxu0 }
0x13c0   :  { %16159 = vst [vmem:[#allocation92_spill] sm:$0xff] %v15188_v3  ;;  %v8345_v51 = vpop.f32.mrb[109].mxu0 }
0x13c1   :  { %v15190_v7 = vpop.f32.mrb[110].mxu0 }
0x13c2   :  { %16160 = vst [vmem:[#allocation33_spill] sm:$0xff] %v15190_v7  ;;  %v8348_v40 = vpop.f32.mrb[111].mxu0 }
0x13c7   :  { %v8351_v28 = vpop.f32.mrb[112].mxu0 }
0x13c8   :  { %8678 = vrot.lane.b32.xlu0 %v8351_v28, %s11696_s25  ;;  %v8353_v63 = vpop.f32.mrb[113].mxu0 }
0x13c9   :  { %v8354_v37 = vpop.f32.mrb[114].mxu0 }
0x13ca   :  { %8680 = vrot.lane.b32.xlu1 %v8354_v37, %s11696_s25  ;;  %v8356_v58 = vpop.f32.mrb[115].mxu0 }
0x13cb   :  { %v15217_v58 = vpop.permute.xlu0 %8486 }
0x13cf   :  { %v8359_v41 = vpop.f32.mrb[116].mxu0 }
0x13d0   :  { %8682 = vrot.lane.b32.xlu0 %v8359_v41, %s11696_s25  ;;  %v8361_v34 = vpop.f32.mrb[117].mxu0 }
0x13d1   :  { %v8362_v35 = vpop.f32.mrb[118].mxu0  ;;  %v15220_v34 = vpop.permute.xlu1 %8488 }
0x13d2   :  { %8684 = vrot.lane.b32.xlu1 %v8362_v35, %s11696_s25  ;;  %v8364_v4 = vpop.f32.mrb[119].mxu0  ;;  %v15222_v35 = vpop.permute.xlu0 %8490 }
0x13d7   :  { %v8367_v60 = vpop.f32.mrb[120].mxu0 }
0x13d8   :  { %8686 = vrot.lane.b32.xlu0 %v8367_v60, %s11696_s25  ;;  %v8369_v22 = vpop.f32.mrb[121].mxu0  ;;  %v15224_v60 = vpop.permute.xlu1 %8492 }
0x13d9   :  { %v8370_v36 = vpop.f32.mrb[122].mxu0 }
0x13da   :  { %8688 = vrot.lane.b32.xlu1 %v8370_v36, %s11696_s25  ;;  %v8372_v52 = vpop.f32.mrb[123].mxu0 }
0x13db   :  { %v15227_v52 = vpop.permute.xlu0 %8494 }
0x13df   :  { %v8375_v49 = vpop.f32.mrb[124].mxu0 }
0x13e0   :  { %8690 = vrot.lane.b32.xlu0 %v8375_v49, %s11696_s25  ;;  %v8377_v50 = vpop.f32.mrb[125].mxu0 }
0x13e1   :  { %v8378_v56 = vpop.f32.mrb[126].mxu0  ;;  %v15230_v50 = vpop.permute.xlu1 %8496 }
0x13e2   :  { %8692 = vrot.lane.b32.xlu1 %v8378_v56, %s11696_s25  ;;  %v8380_v23 = vpop.f32.mrb[127].mxu0  ;;  %v15232_v56 = vpop.permute.xlu0 %8498 }
0x13e7   :  { %v8383_v26 = vpop.f32.mrb[128].mxu0 }
0x13e8   :  { %8726 = vrot.lane.b32.xlu0 %v8383_v26, %s11697_s3  ;;  %v8385_v46 = vpop.f32.mrb[129].mxu0  ;;  %v15234_v26 = vpop.permute.xlu1 %8500 }
0x13e9   :  { %v8386_v9 = vpop.f32.mrb[130].mxu0 }
0x13ea   :  { %8728 = vrot.lane.b32.xlu1 %v8386_v9, %s11697_s3  ;;  %v8388_v33 = vpop.f32.mrb[131].mxu0 }
0x13eb   :  { %v8535_v33 = vpop.permute.xlu0 %8534 }
0x13ef   :  { %v8391_v27 = vpop.f32.mrb[132].mxu0 }
0x13f0   :  { %8730 = vrot.lane.b32.xlu0 %v8391_v27, %s11697_s3  ;;  %v8393_v18 = vpop.f32.mrb[133].mxu0 }
0x13f1   :  { %v8394_v39 = vpop.f32.mrb[134].mxu0  ;;  %v8537_v18 = vpop.permute.xlu1 %8536 }
0x13f2   :  { %8732 = vrot.lane.b32.xlu1 %v8394_v39, %s11697_s3  ;;  %v8396_v25 = vpop.f32.mrb[135].mxu0  ;;  %v15238_v39 = vpop.permute.xlu0 %8538 }
0x13f7   :  { %v8399_v21 = vpop.f32.mrb[136].mxu0 }
0x13f8   :  { %8734 = vrot.lane.b32.xlu0 %v8399_v21, %s11697_s3  ;;  %v8401_v53 = vpop.f32.mrb[137].mxu0  ;;  %v15240_v21 = vpop.permute.xlu1 %8540 }
0x13f9   :  { %v8402_v44 = vpop.f32.mrb[138].mxu0 }
0x13fa   :  { %8736 = vrot.lane.b32.xlu1 %v8402_v44, %s11697_s3  ;;  %v8404_v0 = vpop.f32.mrb[139].mxu0 }
0x13fb   :  { %v15243_v0 = vpop.permute.xlu0 %8542 }
0x13ff   :  { %v8407_v5 = vpop.f32.mrb[140].mxu0 }
0x1400   :  { %8738 = vrot.lane.b32.xlu0 %v8407_v5, %s11697_s3  ;;  %v8409_v31 = vpop.f32.mrb[141].mxu0 }
0x1401   :  { %v8410_v15 = vpop.f32.mrb[142].mxu0  ;;  %v15246_v31 = vpop.permute.xlu1 %8544 }
0x1402   :  { %8740 = vrot.lane.b32.xlu1 %v8410_v15, %s11697_s3  ;;  %v8412_v24 = vpop.f32.mrb[143].mxu0  ;;  %v15248_v15 = vpop.permute.xlu0 %8546 }
0x1405   :  { %v15250_v24 = vpop.permute.xlu1 %8548 }
0x1406   :  { %16161 = vst [vmem:[#allocation71_spill] sm:$0xff] %v15250_v24 }
0x1407   :  { %v8415_v57 = vpop.f32.mrb[144].mxu0 }
0x1408   :  { %8774 = vrot.lane.b32.xlu0 %v8415_v57, %s11698_s26  ;;  %v8417_v59 = vpop.f32.mrb[145].mxu0  ;;  %v8583_v57 = vpop.permute.xlu0 %8582 }
0x1409   :  { %v8418_v16 = vpop.f32.mrb[146].mxu0  ;;  %v8585_v59 = vpop.permute.xlu1 %8584 }
0x140a   :  { %8776 = vrot.lane.b32.xlu1 %v8418_v16, %s11698_s26  ;;  %v8420_v62 = vpop.f32.mrb[147].mxu0 }
0x140c   :  { %v8587_v16 = vpop.permute.xlu0 %8586 }
0x140d   :  { %v15252_v62 = vpop.permute.xlu1 %8588 }
0x140f   :  { %v8423_v32 = vpop.f32.mrb[148].mxu0 }
0x1410   :  { %8778 = vrot.lane.b32.xlu0 %v8423_v32, %s11698_s26  ;;  %v8425_v19 = vpop.f32.mrb[149].mxu0  ;;  %v15254_v32 = vpop.permute.xlu0 %8590 }
0x1411   :  { %v8426_v45 = vpop.f32.mrb[150].mxu0  ;;  %v15256_v19 = vpop.permute.xlu1 %8592 }
0x1412   :  { %8780 = vrot.lane.b32.xlu1 %v8426_v45, %s11698_s26  ;;  %v8428_v6 = vpop.f32.mrb[151].mxu0 }
0x1414   :  { %v15258_v45 = vpop.permute.xlu0 %8594 }
0x1415   :  { %16162 = vst [vmem:[#allocation80_spill] sm:$0xff] %v15258_v45  ;;  %v15260_v6 = vpop.permute.xlu1 %8596 }
0x1416   :  { %16163 = vst [vmem:[#allocation66_spill] sm:$0xff] %v15260_v6  ;;  %v8511_v6 = vmul.f32 %v15220_v34, %v12662_v43 }
0x1417   :  { %v8431_v11 = vpop.f32.mrb[152].mxu0 }
0x1418   :  { %8782 = vrot.lane.b32.xlu0 %v8431_v11, %s11698_s26  ;;  %v8433_v29 = vpop.f32.mrb[153].mxu0  ;;  %v8631_v11 = vpop.permute.xlu0 %8630 }
0x1419   :  { %v8434_v14 = vpop.f32.mrb[154].mxu0  ;;  %v8633_v29 = vpop.permute.xlu1 %8632 }
0x141a   :  { %8784 = vrot.lane.b32.xlu1 %v8434_v14, %s11698_s26  ;;  %v8436_v20 = vpop.f32.mrb[155].mxu0  ;;  %v8655_v34 = vmul.f32 %v8633_v29, %v12684_v8 }
0x141c   :  { %v8635_v14 = vpop.permute.xlu0 %8634 }
0x141d   :  { %v15262_v20 = vpop.permute.xlu1 %8636 }
0x141f   :  { %v8439_v30 = vpop.f32.mrb[156].mxu0 }
0x1420   :  { %8786 = vrot.lane.b32.xlu0 %v8439_v30, %s11698_s26  ;;  %v8441_v38 = vpop.f32.mrb[157].mxu0  ;;  %v15264_v30 = vpop.permute.xlu0 %8638 }
0x1421   :  { %v8442_v51 = vpop.f32.mrb[158].mxu0  ;;  %v15266_v38 = vpop.permute.xlu1 %8640 }
0x1422   :  { %8788 = vrot.lane.b32.xlu1 %v8442_v51, %s11698_s26  ;;  %v8444_v40 = vpop.f32.mrb[159].mxu0 }
0x1424   :  { %v15268_v51 = vpop.permute.xlu0 %8642 }
0x1425   :  { %16164 = vst [vmem:[#allocation35_spill] sm:$0xff] %v15268_v51  ;;  %v15270_v40 = vpop.permute.xlu1 %8644 }
0x1426   :  { %16165 = vst [vmem:[#allocation81_spill] sm:$0xff] %v15270_v40 }
0x1427   :  { %v8447_v28 = vpop.f32.mrb[160].mxu0 }
0x1428   :  { %8822 = vrot.lane.b32.xlu0 %v8447_v28, %s11699_s29  ;;  %v8449_v63 = vpop.f32.mrb[161].mxu0 }
0x1429   :  { %v8450_v37 = vpop.f32.mrb[162].mxu0 }
0x142a   :  { %8824 = vrot.lane.b32.xlu1 %v8450_v37, %s11699_s29  ;;  %v8452_v41 = vpop.f32.mrb[163].mxu0 }
0x142f   :  { %v8455_v4 = vpop.f32.mrb[164].mxu0 }
0x1430   :  { %8826 = vrot.lane.b32.xlu0 %v8455_v4, %s11699_s29  ;;  %v8457_v22 = vpop.f32.mrb[165].mxu0 }
0x1431   :  { %v8458_v36 = vpop.f32.mrb[166].mxu0 }
0x1432   :  { %8828 = vrot.lane.b32.xlu1 %v8458_v36, %s11699_s29  ;;  %v8460_v49 = vpop.f32.mrb[167].mxu0 }
0x1437   :  { %v8463_v23 = vpop.f32.mrb[168].mxu0 }
0x1438   :  { %8830 = vrot.lane.b32.xlu0 %v8463_v23, %s11699_s29  ;;  %v8465_v46 = vpop.f32.mrb[169].mxu0 }
0x1439   :  { %v8466_v9 = vpop.f32.mrb[170].mxu0 }
0x143a   :  { %8832 = vrot.lane.b32.xlu1 %v8466_v9, %s11699_s29  ;;  %v8468_v27 = vpop.f32.mrb[171].mxu0  ;;  %v8679_v28 = vpop.permute.xlu0 %8678 }
0x143c   :  { %v8681_v63 = vpop.permute.xlu1 %8680 }
0x143f   :  { %v8471_v25 = vpop.f32.mrb[172].mxu0 }
0x1440   :  { %8834 = vrot.lane.b32.xlu0 %v8471_v25, %s11699_s29  ;;  %v8473_v53 = vpop.f32.mrb[173].mxu0 }
0x1441   :  { %v8474_v44 = vpop.f32.mrb[174].mxu0 }
0x1442   :  { %8836 = vrot.lane.b32.xlu1 %v8474_v44, %s11699_s29  ;;  %v8476_v5 = vpop.f32.mrb[175].mxu0  ;;  %v8683_v37 = vpop.permute.xlu0 %8682 }
0x1444   :  { %v15272_v41 = vpop.permute.xlu1 %8684 }
0x144a   :  { %v15274_v4 = vpop.permute.xlu0 %8686 }
0x144c   :  { %v15276_v22 = vpop.permute.xlu1 %8688 }
0x144d   :  { %16166 = vst [vmem:[#allocation93_spill] sm:$0xff] %v15276_v22 }
0x1452   :  { %v15278_v36 = vpop.permute.xlu0 %8690 }
0x1453   :  { %16167 = vst [vmem:[#allocation10_spill] sm:$0xff] %v15278_v36  ;;  %v8510_v36 = vmul.f32 %v15217_v58, %v12662_v43  ;;  %v8607_v58 = vmul.f32 %v8585_v59, %v12677_v55 }
0x1454   :  { %v15280_v49 = vpop.permute.xlu1 %8692 }
0x1455   :  { %16168 = vst [vmem:[#allocation68_spill] sm:$0xff] %v15280_v49  ;;  %v8558_v49 = vmul.f32 %v8535_v33, %v12670_v1  ;;  %v8518_v7 = vadd.f32 %v8510_v36, %v15176_v2  ;;  %v8654_v33 = vmul.f32 %v8631_v11, %v12684_v8  ;;  %v8702_v2 = vmul.f32 %v8679_v28, %v12690_v12 }
0x1456   :  { %v8608_v28 = vmul.f32 %v8587_v16, %v12677_v55  ;;  %v8515_v16 = vmul.f32 %v15230_v50, %v12662_v43  ;;  %v15347_v50 = vld [vmem:[%s15783_s2 + $0x8] ss:$0 sm:$0xff] }
0x1457   :  { %v8566_v24 = vadd.f32 %v8558_v49, %v8518_v7 }
0x145a   :  { %v8727_v23 = vpop.permute.xlu0 %8726 }
0x145b   :  { %v8750_v11 = vmul.f32 %v8727_v23, %v12700_v13  ;;  %v8561_v23 = vmul.f32 %v15240_v21, %v12670_v1 }
0x145c   :  { %v8729_v46 = vpop.permute.xlu1 %8728 }
0x1462   :  { %v15282_v9 = vpop.permute.xlu0 %8730 }
0x1464   :  { %v15284_v27 = vpop.permute.xlu1 %8732 }
0x146a   :  { %v15286_v25 = vpop.permute.xlu0 %8734 }
0x146b   :  { %16169 = vst [vmem:[#allocation58_spill] sm:$0xff] %v15286_v25 }
0x146c   :  { %v15288_v53 = vpop.permute.xlu1 %8736 }
0x146d   :  { %16170 = vst [vmem:[#allocation94_spill] sm:$0xff] %v15288_v53  ;;  %v8559_v53 = vmul.f32 %v8537_v18, %v12670_v1  ;;  %v8512_v18 = vmul.f32 %v15222_v35, %v12662_v43 }
0x146f   :  { %v8520_v29 = vadd.f32 %v8512_v18, %v15180_v17 }
0x1472   :  { %v15290_v44 = vpop.permute.xlu0 %8738 }
0x1473   :  { %16171 = vst [vmem:[#allocation18_spill] sm:$0xff] %v15290_v44  ;;  %v8606_v44 = vmul.f32 %v8583_v57, %v12677_v55  ;;  %v8560_v57 = vmul.f32 %v15238_v39, %v12670_v1  ;;  %v8751_v39 = vmul.f32 %v8729_v46, %v12700_v13 }
0x1474   :  { %v15292_v5 = vpop.permute.xlu1 %8740 }
0x1475   :  { %16172 = vst [vmem:[#allocation8_spill] sm:$0xff] %v15292_v5  ;;  %v8519_v5 = vadd.f32 %v8511_v6, %v15178_v47  ;;  %v8614_v22 = vadd.f32 %v8606_v44, %v8566_v24  ;;  %v8703_v6 = vmul.f32 %v8681_v63, %v12690_v12  ;;  %v8513_v24 = vmul.f32 %v15224_v60, %v12662_v43 }
0x1476   :  { %v8514_v63 = vmul.f32 %v15227_v52, %v12662_v43  ;;  %v8656_v60 = vmul.f32 %v8635_v14, %v12684_v8  ;;  %v8704_v14 = vmul.f32 %v8683_v37, %v12690_v12  ;;  %v8752_v37 = vmul.f32 %v15282_v9, %v12700_v13 }
0x1477   :  { %v8567_v25 = vadd.f32 %v8559_v53, %v8519_v5  ;;  %v8662_v59 = vadd.f32 %v8654_v33, %v8614_v22  ;;  %v8568_v22 = vadd.f32 %v8560_v57, %v8520_v29 }
0x1478   :  { %v8522_v5 = vadd.f32 %v8514_v63, %v15184_v61 }
0x1479   :  { %v8615_v7 = vadd.f32 %v8607_v58, %v8567_v25  ;;  %v8710_v49 = vadd.f32 %v8702_v2, %v8662_v59  ;;  %v8616_v52 = vadd.f32 %v8608_v28, %v8568_v22  ;;  %v8609_v58 = vmul.f32 %v15252_v62, %v12677_v55 }
0x147a   :  { %v8775_v54 = vpop.permute.xlu0 %8774  ;;  %v8657_v62 = vmul.f32 %v15262_v20, %v12684_v8  ;;  %v8523_v20 = vadd.f32 %v8515_v16, %v15186_v42  ;;  %v8517_v42 = vmul.f32 %v15234_v26, %v12662_v43 }
0x147b   :  { %v8663_v35 = vadd.f32 %v8655_v34, %v8615_v7  ;;  %v8798_v25 = vmul.f32 %v8775_v54, %v12711_v48  ;;  %v8758_v44 = vadd.f32 %v8750_v11, %v8710_v49  ;;  %v8521_v54 = vadd.f32 %v8513_v24, %v15182_v10 }
0x147c   :  { %v8777_v40 = vpop.permute.xlu1 %8776  ;;  %v8562_v10 = vmul.f32 %v15243_v0, %v12670_v1  ;;  %v8664_v61 = vadd.f32 %v8656_v60, %v8616_v52  ;;  %v8610_v0 = vmul.f32 %v15254_v32, %v12677_v55  ;;  %v8705_v24 = vmul.f32 %v15272_v41, %v12690_v12 }
0x147d   :  { %v8711_v53 = vadd.f32 %v8703_v6, %v8663_v35  ;;  %v8799_v46 = vmul.f32 %v8777_v40, %v12711_v48  ;;  %v8806_v34 = vadd.f32 %v8798_v25, %v8758_v44  ;;  %v8569_v2 = vadd.f32 %v8561_v23, %v8521_v54  ;;  %v16173_v44 = vld [vmem:[#allocation93_spill] sm:$0xff] }
0x147e   :  { %v8563_v6 = vmul.f32 %v15246_v31, %v12670_v1  ;;  %v8712_v29 = vadd.f32 %v8704_v14, %v8664_v61  ;;  %v8570_v35 = vadd.f32 %v8562_v10, %v8522_v5  ;;  %v8611_v31 = vmul.f32 %v15256_v19, %v12677_v55  ;;  %v16174_v5 = vld [vmem:[#allocation58_spill] sm:$0xff]  ;;  %v16176_v14 = vld [vmem:[#allocation71_spill] sm:$0xff] }
0x147f   :  { %v8759_v33 = vadd.f32 %v8751_v39, %v8711_v53  ;;  %v8617_v11 = vadd.f32 %v8609_v58, %v8569_v2  ;;  %v8658_v32 = vmul.f32 %v15264_v30, %v12684_v8  ;;  %v8516_v41 = vmul.f32 %v15232_v56, %v12662_v43  ;;  %v16178_v10 = vld [vmem:[#allocation94_spill] sm:$0xff] }
0x1480   :  { %v8760_v39 = vadd.f32 %v8752_v37, %v8712_v29  ;;  %v8571_v25 = vadd.f32 %v8563_v6, %v8523_v20  ;;  %v8618_v63 = vadd.f32 %v8610_v0, %v8570_v35  ;;  %v8659_v19 = vmul.f32 %v15266_v38, %v12684_v8  ;;  %v16179_v37 = vld [vmem:[#allocation33_spill] sm:$0xff]  ;;  %v16180_v6 = vld [vmem:[#allocation66_spill] sm:$0xff]  ;;  %v16181_v0 = vld [vmem:[#allocation35_spill] sm:$0xff] }
0x1481   :  { %v8807_v57 = vadd.f32 %v8799_v46, %v8759_v33  ;;  %v8665_v49 = vadd.f32 %v8657_v62, %v8617_v11  ;;  %v8706_v30 = vmul.f32 %v15274_v4, %v12690_v12  ;;  %v8707_v46 = vmul.f32 %v16173_v44, %v12690_v12 }
0x1482   :  { %v15297_v51 = vpop.permute.xlu0 %8778  ;;  %v8619_v16 = vadd.f32 %v8611_v31, %v8571_v25  ;;  %v8666_v53 = vadd.f32 %v8658_v32, %v8618_v63  ;;  %v8754_v52 = vmul.f32 %v16174_v5, %v12700_v13  ;;  %v8565_v33 = vmul.f32 %v16176_v14, %v12670_v1 }
0x1483   :  { %v8800_v9 = vmul.f32 %v15297_v51, %v12711_v48  ;;  %v8753_v51 = vmul.f32 %v15284_v27, %v12700_v13  ;;  %v8713_v22 = vadd.f32 %v8705_v24, %v8665_v49  ;;  %v8564_v27 = vmul.f32 %v15248_v15, %v12670_v1  ;;  %v16177_v15 = vld [vmem:[#allocation80_spill] sm:$0xff] }
0x1484   :  { %v15304_v45 = vpop.permute.xlu1 %8780  ;;  %v8714_v2 = vadd.f32 %v8706_v30, %v8666_v53  ;;  %v8755_v61 = vmul.f32 %v16178_v10, %v12700_v13  ;;  %v8613_v11 = vmul.f32 %v16180_v6, %v12677_v55  ;;  %v8660_v24 = vmul.f32 %v16181_v0, %v12684_v8 }
0x1485   :  { %v8808_v56 = vadd.f32 %v8800_v9, %v8760_v39  ;;  %v8801_v26 = vmul.f32 %v15304_v45, %v12711_v48  ;;  %v8761_v54 = vadd.f32 %v8753_v51, %v8713_v22  ;;  %v16175_v45 = vld [vmem:[#allocation92_spill] sm:$0xff] }
0x1486   :  { %v8762_v29 = vadd.f32 %v8754_v52, %v8714_v2 }
0x1487   :  { %v8809_v62 = vadd.f32 %v8801_v26, %v8761_v54 }
0x148a   :  { %v15309_v3 = vpop.permute.xlu0 %8782 }
0x148c   :  { %v15317_v47 = vpop.permute.xlu1 %8784 }
0x148d   :  { %v8803_v9 = vmul.f32 %v15317_v47, %v12711_v48 }
0x1492   :  { %v15325_v36 = vpop.permute.xlu0 %8786 }
0x1493   :  { %v8804_v54 = vmul.f32 %v15325_v36, %v12711_v48  ;;  %v11709_v36 = vmov 11  }
0x1494   :  { %v15334_v17 = vpop.permute.xlu1 %8788  ;;  %10832 = vset.pattern.permute.xlu1 %v11709_v36 }
0x149a   :  { %v8823_v21 = vpop.permute.xlu0 %8822 }
0x149b   :  { %v8846_v40 = vmul.f32 %v15347_v50, %v8823_v21  ;;  %v8524_v21 = vadd.f32 %v8516_v41, %v16175_v45  ;;  %v8805_v45 = vmul.f32 %v15334_v17, %v12711_v48 }
0x149c   :  { %v8825_v18 = vpop.permute.xlu1 %8824 }
0x149d   :  { %v15356_v7 = vadd.f32 %v8846_v40, %v8806_v34  ;;  %v8847_v59 = vmul.f32 %v15347_v50, %v8825_v18  ;;  %v8612_v34 = vmul.f32 %v16177_v15, %v12677_v55  ;;  %v8667_v40 = vadd.f32 %v8659_v19, %v8619_v16 }
0x149e   :  { %v8802_v18 = vmul.f32 %v15309_v3, %v12711_v48  ;;  %v16182_v3 = vld [vmem:[#allocation81_spill] sm:$0xff] }
0x149f   :  { %v15368_v28 = vadd.f32 %v8847_v59, %v8807_v57  ;;  %8862 = vadd.xlane.f32.xlu0 %v15356_v7  ;;  %v8525_v57 = vadd.f32 %v8517_v42, %v16179_v37  ;;  %v8572_v59 = vadd.f32 %v8564_v27, %v8524_v21  ;;  %v8715_v20 = vadd.f32 %v8707_v46, %v8667_v40  ;;  %v16183_v42 = vld [vmem:[#allocation10_spill] sm:$0xff]  ;;  %v16186_v46 = vld [vmem:[#allocation8_spill] sm:$0xff] }
0x14a0   :  { %v8661_v32 = vmul.f32 %v16182_v3, %v12684_v8  ;;  %v8708_v39 = vmul.f32 %v16183_v42, %v12690_v12  ;;  %v8810_v25 = vadd.f32 %v8802_v18, %v8762_v29 }
0x14a1   :  { %8864 = vadd.xlane.f32.xlu1 %v15368_v28  ;;  %v8573_v31 = vadd.f32 %v8565_v33, %v8525_v57  ;;  %v8620_v49 = vadd.f32 %v8612_v34, %v8572_v59  ;;  %v8763_v51 = vadd.f32 %v8755_v61, %v8715_v20 }
0x14a2   :  { %v8827_v23 = vpop.permute.xlu0 %8826 }
0x14a3   :  { %v8848_v60 = vmul.f32 %v15347_v50, %v8827_v23  ;;  %v8621_v19 = vadd.f32 %v8613_v11, %v8573_v31  ;;  %v8668_v22 = vadd.f32 %v8660_v24, %v8620_v49  ;;  %v16184_v23 = vld [vmem:[#allocation68_spill] sm:$0xff] }
0x14a4   :  { %v8829_v38 = vpop.permute.xlu1 %8828  ;;  %v8709_v47 = vmul.f32 %v16184_v23, %v12690_v12 }
0x14a5   :  { %v15395_v4 = vadd.f32 %v8848_v60, %v8808_v56  ;;  %v8849_v58 = vmul.f32 %v15347_v50, %v8829_v38  ;;  %v16185_v56 = vld [vmem:[#allocation18_spill] sm:$0xff]  ;;  %v8811_v60 = vadd.f32 %v8803_v9, %v8763_v51  ;;  %v8669_v53 = vadd.f32 %v8661_v32, %v8621_v19 }
0x14a6   :  { %v8756_v26 = vmul.f32 %v16185_v56, %v12700_v13  ;;  %v8716_v44 = vadd.f32 %v8708_v39, %v8668_v22  ;;  %v8757_v38 = vmul.f32 %v16186_v46, %v12700_v13  ;;  %v11710_v56 = vmov 10  }
0x14a7   :  { %8866 = vadd.xlane.f32.xlu0 %v15395_v4  ;;  %v8857_v35 = vadd.f32 %v8849_v58, %v8809_v62  ;;  %v8717_v52 = vadd.f32 %v8709_v47, %v8669_v53 }
0x14a8   :  { %v8764_v58 = vadd.f32 %v8756_v26, %v8716_v44  ;;  %10834 = vset.pattern.permute.xlu0 %v11710_v56  ;;  %v15472_v26 = vld [vmem:[%s15792_s11] sm:$0xff] }
0x14a9   :  { %v8765_v14 = vadd.f32 %v8757_v38, %v8717_v52 }
0x14aa   :  { %v8831_v41 = vpop.permute.xlu0 %8830  ;;  %v8812_v33 = vadd.f32 %v8804_v54, %v8764_v58 }
0x14ab   :  { %v8850_v63 = vmul.f32 %v15347_v50, %v8831_v41  ;;  %8868 = vadd.xlane.f32.xlu0 %v8857_v35  ;;  %v8813_v40 = vadd.f32 %v8805_v45, %v8765_v14 }
0x14ac   :  { %v8833_v30 = vpop.permute.xlu1 %8832 }
0x14ad   :  { %v8858_v27 = vadd.f32 %v8850_v63, %v8810_v25  ;;  %v8851_v16 = vmul.f32 %v15347_v50, %v8833_v30 }
0x14af   :  { %v8859_v5 = vadd.f32 %v8851_v16, %v8811_v60  ;;  %8870 = vadd.xlane.f32.xlu1 %v8858_v27  ;;  %v15478_v60 = vld [vmem:[%s15792_s11 + $0x8] sm:$0xff]  ;;  %v15490_v16 = vld [vmem:[%s15792_s11 + $0x18] sm:$0xff] }
0x14b1   :  { %8872 = vadd.xlane.f32.xlu0 %v8859_v5 }
0x14b2   :  { %v8835_v21 = vpop.permute.xlu0 %8834 }
0x14b3   :  { %v8852_v15 = vmul.f32 %v15347_v50, %v8835_v21 }
0x14b4   :  { %v8837_v34 = vpop.permute.xlu1 %8836 }
0x14b5   :  { %v8860_v2 = vadd.f32 %v8852_v15, %v8812_v33  ;;  %v8853_v10 = vmul.f32 %v15347_v50, %v8837_v34 }
0x14b7   :  { %v8861_v61 = vadd.f32 %v8853_v10, %v8813_v40  ;;  %8874 = vadd.xlane.f32.xlu1 %v8860_v2 }
0x14b9   :  { %8876 = vadd.xlane.f32.xlu0 %v8861_v61 }
0x152c   :  { %v8863_v62 = vpop.xlane.xlu0 %8862 }
0x152d   :  { %v8878_v18 = vmul.f32 0.0078125, %v8863_v62 }
0x152e   :  { %v8865_v17 = vpop.xlane.xlu1 %8864 }
0x152f   :  { %v15435_v37 = vsub.f32 %v15356_v7, %v8878_v18  ;;  %v8879_v57 = vmul.f32 0.0078125, %v8865_v17 }
0x1531   :  { %v15438_v59 = vsub.f32 %v15368_v28, %v8879_v57  ;;  %v8894_v6 = vmul.f32 %v15435_v37, %v15435_v37 }
0x1533   :  { %8902 = vadd.xlane.f32.xlu1 %v8894_v6  ;;  %v8895_v11 = vmul.f32 %v15438_v59, %v15438_v59 }
0x1534   :  { %v8867_v0 = vpop.xlane.xlu0 %8866 }
0x1535   :  { %v8880_v24 = vmul.f32 0.0078125, %v8867_v0  ;;  %8904 = vadd.xlane.f32.xlu0 %v8895_v11  ;;  %v11659_v11 = vld [vmem:[%s15792_s11 + $0x28] sm:$0xff] }
0x1537   :  { %v15445_v20 = vsub.f32 %v15395_v4, %v8880_v24 }
0x1538   :  { %v8869_v29 = vpop.xlane.xlu0 %8868 }
0x1539   :  { %v8881_v7 = vmul.f32 0.0078125, %v8869_v29  ;;  %v8896_v9 = vmul.f32 %v15445_v20, %v15445_v20  ;;  %v11660_v29 = vld [vmem:[%s15792_s11 + $0x20] sm:$0xff] }
0x153b   :  { %v15449_v28 = vsub.f32 %v8857_v35, %v8881_v7  ;;  %8906 = vadd.xlane.f32.xlu1 %v8896_v9 }
0x153c   :  { %v8871_v31 = vpop.xlane.xlu1 %8870 }
0x153d   :  { %v8882_v49 = vmul.f32 0.0078125, %v8871_v31  ;;  %v8897_v3 = vmul.f32 %v15449_v28, %v15449_v28 }
0x153e   :  { %v8873_v32 = vpop.xlane.xlu0 %8872 }
0x153f   :  { %v15453_v41 = vsub.f32 %v8858_v27, %v8882_v49  ;;  %v8883_v42 = vmul.f32 0.0078125, %v8873_v32  ;;  %8908 = vadd.xlane.f32.xlu0 %v8897_v3  ;;  %v15484_v27 = vld [vmem:[%s15792_s11 + $0x10] sm:$0xff] }
0x1541   :  { %v15455_v4 = vsub.f32 %v8859_v5, %v8883_v42  ;;  %v8898_v39 = vmul.f32 %v15453_v41, %v15453_v41 }
0x1543   :  { %8910 = vadd.xlane.f32.xlu1 %v8898_v39  ;;  %v8899_v35 = vmul.f32 %v15455_v4, %v15455_v4 }
0x1544   :  { %v8875_v51 = vpop.xlane.xlu1 %8874 }
0x1545   :  { %v8884_v25 = vmul.f32 0.0078125, %v8875_v51  ;;  %8912 = vadd.xlane.f32.xlu0 %v8899_v35 }
0x1546   :  { %v8877_v63 = vpop.xlane.xlu0 %8876 }
0x1547   :  { %v15461_v19 = vsub.f32 %v8860_v2, %v8884_v25  ;;  %v8885_v22 = vmul.f32 0.0078125, %v8877_v63 }
0x1549   :  { %v15463_v23 = vsub.f32 %v8861_v61, %v8885_v22  ;;  %v8900_v47 = vmul.f32 %v15461_v19, %v15461_v19 }
0x154b   :  { %8914 = vadd.xlane.f32.xlu1 %v8900_v47  ;;  %v8901_v30 = vmul.f32 %v15463_v23, %v15463_v23  ;;  %v11661_v47 = vld [vmem:[%s15792_s11 + $0x38] sm:$0xff] }
0x154d   :  { %8916 = vadd.xlane.f32.xlu0 %v8901_v30 }
0x155c   :  { %8999 = vperm.xlu1 %10832, %v15472_v26  }
0x1560   :  { %9003 = vperm.xlu1 %10832, %v15478_v60  }
0x1564   :  { %9007 = vperm.xlu1 %10832, %v15484_v27  }
0x1568   :  { %9011 = vperm.xlu1 %10832, %v15490_v16  }
0x156c   :  { %10833 = vset.pattern.permute.xlu1 %v11710_v56 }
0x15c0   :  { %v8903_v53 = vpop.xlane.xlu1 %8902 }
0x15c1   :  { %v8918_v44 = vmul.f32 0.0078125, %v8903_v53 }
0x15c2   :  { %v8905_v46 = vpop.xlane.xlu0 %8904 }
0x15c3   :  { %v8926_v38 = vadd.f32 1e-05, %v8918_v44  ;;  %v8919_v54 = vmul.f32 0.0078125, %v8905_v46  ;;  %v11481_v44 = vld [vmem:[%s15790_s9] sm:$0xff]  }
0x15c4   :  { %10711 = vmatprep.mubr.msk.bf16.mxu1 %vm4257_vm0, %v11481_v44 }
0x15c5   :  { %11592 = vrsqrt.f32 %v8926_v38  ;;  %v8927_v5 = vadd.f32 1e-05, %v8919_v54 }
0x15c7   :  { %11594 = vrsqrt.f32 %v8927_v5 }
0x15c8   :  { %v8907_v52 = vpop.xlane.xlu1 %8906 }
0x15c9   :  { %v8920_v58 = vmul.f32 0.0078125, %v8907_v52 }
0x15cb   :  { %v8928_v45 = vadd.f32 1e-05, %v8920_v58 }
0x15cc   :  { %v8909_v21 = vpop.xlane.xlu0 %8908 }
0x15cd   :  { %11596 = vrsqrt.f32 %v8928_v45  ;;  %v8921_v14 = vmul.f32 0.0078125, %v8909_v21 }
0x15cf   :  { %v11593_v33 = vpop.eup %11592  ;;  %v8929_v15 = vadd.f32 1e-05, %v8921_v14 }
0x15d0   :  { %v8911_v34 = vpop.xlane.xlu1 %8910  ;;  %v8942_v40 = vmul.f32 %v15472_v26, %v11593_v33 }
0x15d1   :  { %v11595_v2 = vpop.eup %11594  ;;  %11598 = vrsqrt.f32 %v8929_v15  ;;  %v8922_v10 = vmul.f32 0.0078125, %v8911_v34 }
0x15d2   :  { %v8913_v61 = vpop.xlane.xlu0 %8912  ;;  %8952 = vperm.xlu1 %10833, %v8942_v40   ;;  %v8943_v62 = vmul.f32 %v15478_v60, %v11595_v2 }
0x15d3   :  { %v8930_v18 = vadd.f32 1e-05, %v8922_v10  ;;  %v8923_v17 = vmul.f32 0.0078125, %v8913_v61 }
0x15d4   :  { %8957 = vperm.xlu0 %10834, %v8943_v62  }
0x15d5   :  { %11600 = vrsqrt.f32 %v8930_v18  ;;  %v8931_v57 = vadd.f32 1e-05, %v8923_v17 }
0x15d6   :  { %10836 = vset.pattern.permute.xlu1 %v11709_v36 }
0x15d7   :  { %v11597_v6 = vpop.eup %11596  ;;  %9019 = vperm.xlu1 %10836, %v11659_v11   ;;  %11602 = vrsqrt.f32 %v8931_v57 }
0x15d8   :  { %v8915_v0 = vpop.xlane.xlu1 %8914  ;;  %10835 = vset.pattern.permute.xlu0 %v11709_v36  ;;  %v8944_v9 = vmul.f32 %v15484_v27, %v11597_v6 }
0x15d9   :  { %v8924_v24 = vmul.f32 0.0078125, %v8915_v0  ;;  %9015 = vperm.xlu0 %10835, %v11660_v29  }
0x15da   :  { %v8917_v7 = vpop.xlane.xlu0 %8916 }
0x15db   :  { %v11599_v31 = vpop.eup %11598  ;;  %v8932_v49 = vadd.f32 1e-05, %v8924_v24  ;;  %v8925_v3 = vmul.f32 0.0078125, %v8917_v7  ;;  %10837 = vset.pattern.permute.xlu1 %v11710_v56 }
0x15dc   :  { %8962 = vperm.xlu1 %10837, %v8944_v9   ;;  %v8945_v42 = vmul.f32 %v15490_v16, %v11599_v31  ;;  %v9000_v46 = vpop.permute.xlu1 %8999 }
0x15dd   :  { %11604 = vrsqrt.f32 %v8932_v49  ;;  %v8933_v32 = vadd.f32 1e-05, %v8925_v3  ;;  %10838 = vset.pattern.permute.xlu0 %v11710_v56  ;;  %v11662_v56 = vld [vmem:[%s15792_s11 + $0x30] sm:$0xff] }
0x15df   :  { %v11601_v39 = vpop.eup %11600  ;;  %11606 = vrsqrt.f32 %v8933_v32 }
0x15e0   :  { %8967 = vperm.xlu1 %10837, %v8945_v42   ;;  %v8946_v35 = vmul.f32 %v11660_v29, %v11601_v39  ;;  %v9004_v38 = vpop.permute.xlu1 %9003 }
0x15e1   :  { %v11603_v51 = vpop.eup %11602 }
0x15e2   :  { %v8947_v25 = vmul.f32 %v11659_v11, %v11603_v51 }
0x15e4   :  { %8972 = vperm.xlu1 %10837, %v8946_v35   ;;  %v9008_v54 = vpop.permute.xlu1 %9007 }
0x15e7   :  { %v11605_v63 = vpop.eup %11604 }
0x15e8   :  { %8977 = vperm.xlu1 %10837, %v8947_v25   ;;  %v8948_v53 = vmul.f32 %v11662_v56, %v11605_v63  ;;  %v9012_v5 = vpop.permute.xlu1 %9011 }
0x15e9   :  { %v11607_v22 = vpop.eup %11606 }
0x15ea   :  { %v8949_v30 = vmul.f32 %v11661_v47, %v11607_v22 }
0x15ec   :  { %8987 = vperm.xlu0 %10838, %v8949_v30   ;;  %8982 = vperm.xlu1 %10837, %v8948_v53  }
0x15f0   :  { %10839 = vset.pattern.permute.xlu1 %v11709_v36 }
0x15f1   :  { %9023 = vperm.xlu1 %10839, %v11662_v56  }
0x15f5   :  { %9027 = vperm.xlu1 %10839, %v11661_v47  }
0x1651   :  { %v8953_v52 = vpop.permute.xlu1 %8952 }
0x1652   :  { %v8990_v58 = vmul.f32 %v8953_v52, %v15435_v37  ;;  %v11486_v52 = vld [vmem:[%s15790_s9 + $0x28] sm:$0xff]  }
0x1653   :  { %v8958_v45 = vpop.permute.xlu0 %8957 }
0x1654   :  { %v9030_v21 = vadd.f32 %v9000_v46, %v8990_v58  ;;  %v8991_v14 = vmul.f32 %v8958_v45, %v15438_v59  ;;  %v11487_v58 = vld [vmem:[%s15790_s9 + $0x30] sm:$0xff]   ;;  %v11488_v45 = vld [vmem:[%s15790_s9 + $0x38] sm:$0xff]  }
0x1656   :  { %v9046_v36 = vmul.f32 0.2, %v9030_v21  ;;  %v9031_v33 = vadd.f32 %v9004_v38, %v8991_v14  ;;  %v9020_v15 = vpop.permute.xlu1 %9019  ;;  %vm9038_vm2 = vcmp.ge.f32.partialorder %v9030_v21, 0.0  ;;  %v11490_v14 = vld [vmem:[%s15790_s9 + $0x48] sm:$0xff]  }
0x1658   :  { %vm9039_vm3 = vcmp.ge.f32.partialorder %v9031_v33, 0.0  ;;  %v9047_v34 = vmul.f32 0.2, %v9031_v33  ;;  %v9054_v40 = vsel %vm9038_vm2, %v9030_v21, %v9046_v36  ;;  %v9016_v11 = vpop.permute.xlu0 %9015  ;;  %v11489_v21 = vld [vmem:[%s15790_s9 + $0x40] sm:$0xff]   ;;  %v11491_v36 = vld [vmem:[%s15790_s9 + $0x50] sm:$0xff]  }
0x165a   :  { %v9055_v2 = vsel %vm9039_vm3, %v9031_v33, %v9047_v34  ;;  %v11492_v33 = vld [vmem:[%s15790_s9 + $0x58] sm:$0xff]   ;;  %v11494_v34 = vld [vmem:[%s15790_s9 + $0x68] sm:$0xff]  }
0x165b   :  { %v8963_v10 = vpop.permute.xlu1 %8962  ;;  %v9098_v61 = vpack.c.bf16 %v9055_v2, %v9054_v40  ;;  %v11495_v40 = vld [vmem:[%s15790_s9 + $0x70] sm:$0xff]   ;;  %v11496_v2 = vld [vmem:[%s15790_s9 + $0x78] sm:$0xff]  }
0x165c   :  { %v8992_v62 = vmul.f32 %v8963_v10, %v15445_v20  ;;  %v11497_v10 = vld [vmem:[%s15790_s9 + $0x80] sm:$0xff]  }
0x165d   :  { %10703 = vmatprep.subr.bf16.mxu1 %v9098_v61 }
0x165e   :  { %v9032_v18 = vadd.f32 %v9008_v54, %v8992_v62  ;;  %10704 = vmatpush3.bf16.msra.mxu1 %v9098_v61  ;;  %v11483_v54 = vld [vmem:[%s15790_s9 + $0x10] sm:$0xff]   ;;  %v11498_v61 = vld [vmem:[%s15790_s9 + $0x88] sm:$0xff]  }
0x165f   :  { %v8968_v37 = vpop.permute.xlu1 %8967 }
0x1660   :  { %v8993_v17 = vmul.f32 %v8968_v37, %v15449_v28  ;;  %v9048_v57 = vmul.f32 0.2, %v9032_v18  ;;  %vm9040_vm4 = vcmp.ge.f32.partialorder %v9032_v18, 0.0 }
0x1662   :  { %v9033_v59 = vadd.f32 %v9012_v5, %v8993_v17  ;;  %v9056_v7 = vsel %vm9040_vm4, %v9032_v18, %v9048_v57  ;;  %v11485_v5 = vld [vmem:[%s15790_s9 + $0x20] sm:$0xff]  }
0x1663   :  { %v8973_v6 = vpop.permute.xlu1 %8972 }
0x1664   :  { %vm9041_vm5 = vcmp.ge.f32.partialorder %v9033_v59, 0.0  ;;  %v9049_v0 = vmul.f32 0.2, %v9033_v59  ;;  %v8994_v24 = vmul.f32 %v8973_v6, %v15453_v41 }
0x1666   :  { %v9034_v29 = vadd.f32 %v9016_v11, %v8994_v24  ;;  %v9057_v9 = vsel %vm9041_vm5, %v9033_v59, %v9049_v0 }
0x1667   :  { %v8978_v31 = vpop.permute.xlu1 %8977  ;;  %v9099_v20 = vpack.c.bf16 %v9057_v9, %v9056_v7 }
0x1668   :  { %v8995_v49 = vmul.f32 %v8978_v31, %v15455_v4  ;;  %v9050_v3 = vmul.f32 0.2, %v9034_v29  ;;  %vm9042_vm6 = vcmp.ge.f32.partialorder %v9034_v29, 0.0 }
0x1669   :  { %10705 = vmatprep.subr.bf16.mxu1 %v9099_v20 }
0x166a   :  { %v9035_v32 = vadd.f32 %v9020_v15, %v8995_v49  ;;  %10706 = vmatpush3.bf16.msra.mxu1 %v9099_v20  ;;  %v9058_v39 = vsel %vm9042_vm6, %v9034_v29, %v9050_v3  ;;  %v11493_v15 = vld [vmem:[%s15790_s9 + $0x60] sm:$0xff]  }
0x166b   :  { %v8983_v28 = vpop.permute.xlu1 %8982  ;;  %v8988_v25 = vpop.permute.xlu0 %8987 }
0x166c   :  { %vm9043_vm7 = vcmp.ge.f32.partialorder %v9035_v32, 0.0  ;;  %v9051_v42 = vmul.f32 0.2, %v9035_v32  ;;  %v8996_v51 = vmul.f32 %v8983_v28, %v15461_v19  ;;  %v8997_v4 = vmul.f32 %v8988_v25, %v15463_v23  ;;  %v11482_v19 = vld [vmem:[%s15790_s9 + $0x8] sm:$0xff]   ;;  %v11484_v23 = vld [vmem:[%s15790_s9 + $0x18] sm:$0xff]  }
0x166e   :  { %v9059_v35 = vsel %vm9043_vm7, %v9035_v32, %v9051_v42 }
0x166f   :  { %v9100_v41 = vpack.c.bf16 %v9059_v35, %v9058_v39 }
0x1670   :  { %v9024_v63 = vpop.permute.xlu1 %9023 }
0x1671   :  { %v9036_v22 = vadd.f32 %v9024_v63, %v8996_v51  ;;  %10707 = vmatprep.subr.bf16.mxu1 %v9100_v41 }
0x1672   :  { %10708 = vmatpush3.bf16.msra.mxu1 %v9100_v41 }
0x1673   :  { %v9052_v30 = vmul.f32 0.2, %v9036_v22  ;;  %vm9044_vm8 = vcmp.ge.f32.partialorder %v9036_v22, 0.0 }
0x1674   :  { %v9028_v47 = vpop.permute.xlu1 %9027 }
0x1675   :  { %v9037_v56 = vadd.f32 %v9028_v47, %v8997_v4  ;;  %v9060_v44 = vsel %vm9044_vm8, %v9036_v22, %v9052_v30 }
0x1677   :  { %vm9045_vm10 = vcmp.ge.f32.partialorder %v9037_v56, 0.0  ;;  %v9053_v53 = vmul.f32 0.2, %v9037_v56 }
0x1679   :  { %v9061_v46 = vsel %vm9045_vm10, %v9037_v56, %v9053_v53 }
0x167a   :  { %v9101_v38 = vpack.c.bf16 %v9061_v46, %v9060_v44 }
0x167c   :  { %10709 = vmatprep.subr.bf16.mxu1 %v9101_v38 }
0x167d   :  { %10710 = vmatpush3.bf16.msra.mxu1 %v9101_v38 }
0x1680   :  { %10712 = vmatmul.mubr.msk.bf16.vlgmr.msra.gmra.mrb[160].mxu1 %vm4257_vm0, %v11482_v19 }
0x1681   :  { %10715 = vmatprep.mubr.msk.bf16.mxu1 %vm4257_vm0, %v11483_v54 }
0x1688   :  { %10716 = vmatmul.mubr.msk.bf16.gmra.mrb[164].mxu1 %vm4257_vm0, %v11484_v23 }
0x1689   :  { %10719 = vmatprep.mubr.msk.bf16.mxu1 %vm4257_vm0, %v11485_v5 }
0x1690   :  { %10720 = vmatmul.mubr.msk.bf16.gmra.mrb[168].mxu1 %vm4257_vm0, %v11486_v52 }
0x1691   :  { %10723 = vmatprep.mubr.msk.bf16.mxu1 %vm4257_vm0, %v11487_v58 }
0x1698   :  { %10724 = vmatmul.mubr.msk.bf16.gmra.mrb[172].mxu1 %vm4257_vm0, %v11488_v45 }
0x1699   :  { %10727 = vmatprep.mubr.msk.bf16.mxu1 %vm4257_vm0, %v11489_v21 }
0x16a0   :  { %10728 = vmatmul.mubr.msk.bf16.gmra.mrb[176].mxu1 %vm4257_vm0, %v11490_v14 }
0x16a1   :  { %10731 = vmatprep.mubr.msk.bf16.mxu1 %vm4257_vm0, %v11491_v36 }
0x16a8   :  { %10732 = vmatmul.mubr.msk.bf16.gmra.mrb[180].mxu1 %vm4257_vm0, %v11492_v33 }
0x16a9   :  { %10735 = vmatprep.mubr.msk.bf16.mxu1 %vm4257_vm0, %v11493_v15 }
0x16b0   :  { %10736 = vmatmul.mubr.msk.bf16.gmra.mrb[184].mxu1 %vm4257_vm0, %v11494_v34 }
0x16b1   :  { %10739 = vmatprep.mubr.msk.bf16.mxu1 %vm4257_vm0, %v11495_v40 }
0x16b8   :  { %10740 = vmatmul.mubr.msk.bf16.gmra.mrb[188].mxu1 %vm4257_vm0, %v11496_v2 }
0x16b9   :  { %10743 = vmatprep.mubr.msk.bf16.mxu1 %vm4257_vm0, %v11497_v10 }
0x16c0   :  { %10744 = vmatmul.mubr.msk.bf16.gmra.mrb[192].mxu1 %vm4257_vm0, %v11498_v61 }
0x1753   :  { %v10713_v62 = vpop.f32.mrb[160].mxu1 }
0x1754   :  { %9431 = vrot.lane.b32.xlu0 %v10713_v62, %s11693_s22  ;;  %v9280_v18 = vpop.f32.mrb[161].mxu1 }
0x1755   :  { %v10714_v37 = vpop.f32.mrb[162].mxu1 }
0x1756   :  { %9433 = vrot.lane.b32.xlu1 %v10714_v37, %s11693_s22  ;;  %v9283_v17 = vpop.f32.mrb[163].mxu1 }
0x1758   :  { %9427 = vrot.lane.b32.xlu0 %v9280_v18, %s11693_s22 }
0x175a   :  { %9429 = vrot.lane.b32.xlu1 %v9283_v17, %s11693_s22 }
0x175b   :  { %v10717_v57 = vpop.f32.mrb[164].mxu1 }
0x175c   :  { %9455 = vrot.lane.b32.xlu0 %v10717_v57, %s11691_s19  ;;  %v9296_v59 = vpop.f32.mrb[165].mxu1 }
0x175d   :  { %v10718_v6 = vpop.f32.mrb[166].mxu1 }
0x175e   :  { %9457 = vrot.lane.b32.xlu1 %v10718_v6, %s11691_s19  ;;  %v9299_v11 = vpop.f32.mrb[167].mxu1 }
0x1760   :  { %9451 = vrot.lane.b32.xlu0 %v9296_v59, %s11691_s19 }
0x1762   :  { %9453 = vrot.lane.b32.xlu1 %v9299_v11, %s11691_s19 }
0x1763   :  { %v10721_v0 = vpop.f32.mrb[168].mxu1 }
0x1764   :  { %9479 = vrot.lane.b32.xlu0 %v10721_v0, %s11694_s17  ;;  %v9312_v24 = vpop.f32.mrb[169].mxu1 }
0x1765   :  { %v10722_v29 = vpop.f32.mrb[170].mxu1 }
0x1766   :  { %9481 = vrot.lane.b32.xlu1 %v10722_v29, %s11694_s17  ;;  %v9315_v7 = vpop.f32.mrb[171].mxu1 }
0x1768   :  { %9475 = vrot.lane.b32.xlu0 %v9312_v24, %s11694_s17 }
0x176a   :  { %9477 = vrot.lane.b32.xlu1 %v9315_v7, %s11694_s17 }
0x176b   :  { %v10725_v9 = vpop.f32.mrb[172].mxu1 }
0x176c   :  { %9503 = vrot.lane.b32.xlu0 %v10725_v9, %s11695_s18  ;;  %v9328_v31 = vpop.f32.mrb[173].mxu1 }
0x176d   :  { %v10726_v20 = vpop.f32.mrb[174].mxu1 }
0x176e   :  { %9505 = vrot.lane.b32.xlu1 %v10726_v20, %s11695_s18  ;;  %v9331_v49 = vpop.f32.mrb[175].mxu1 }
0x1770   :  { %9499 = vrot.lane.b32.xlu0 %v9328_v31, %s11695_s18 }
0x1772   :  { %9501 = vrot.lane.b32.xlu1 %v9331_v49, %s11695_s18 }
0x1773   :  { %v15608_v3 = vpop.f32.mrb[176].mxu1 }
0x1774   :  { %v9344_v32 = vpop.f32.mrb[177].mxu1 }
0x1775   :  { %v15610_v28 = vpop.f32.mrb[178].mxu1 }
0x1776   :  { %v15612_v42 = vpop.f32.mrb[179].mxu1 }
0x177b   :  { %v10733_v39 = vpop.f32.mrb[180].mxu1 }
0x177c   :  { %9527 = vrot.lane.b32.xlu0 %v10733_v39, %s11696_s25  ;;  %v9360_v35 = vpop.f32.mrb[181].mxu1 }
0x177d   :  { %v10734_v51 = vpop.f32.mrb[182].mxu1 }
0x177e   :  { %9529 = vrot.lane.b32.xlu1 %v10734_v51, %s11696_s25  ;;  %v9363_v41 = vpop.f32.mrb[183].mxu1 }
0x1780   :  { %9523 = vrot.lane.b32.xlu0 %v9360_v35, %s11696_s25 }
0x1782   :  { %9525 = vrot.lane.b32.xlu1 %v9363_v41, %s11696_s25 }
0x1783   :  { %v10737_v25 = vpop.f32.mrb[184].mxu1 }
0x1784   :  { %9551 = vrot.lane.b32.xlu0 %v10737_v25, %s11697_s3  ;;  %v9376_v63 = vpop.f32.mrb[185].mxu1 }
0x1785   :  { %v10738_v22 = vpop.f32.mrb[186].mxu1 }
0x1786   :  { %9553 = vrot.lane.b32.xlu1 %v10738_v22, %s11697_s3  ;;  %v9379_v4 = vpop.f32.mrb[187].mxu1 }
0x1788   :  { %9547 = vrot.lane.b32.xlu0 %v9376_v63, %s11697_s3 }
0x178a   :  { %9549 = vrot.lane.b32.xlu1 %v9379_v4, %s11697_s3 }
0x178b   :  { %v10741_v47 = vpop.f32.mrb[188].mxu1 }
0x178c   :  { %9575 = vrot.lane.b32.xlu0 %v10741_v47, %s11698_s26  ;;  %v9392_v30 = vpop.f32.mrb[189].mxu1 }
0x178d   :  { %v10742_v56 = vpop.f32.mrb[190].mxu1 }
0x178e   :  { %9577 = vrot.lane.b32.xlu1 %v10742_v56, %s11698_s26  ;;  %v9395_v53 = vpop.f32.mrb[191].mxu1 }
0x1790   :  { %9571 = vrot.lane.b32.xlu0 %v9392_v30, %s11698_s26 }
0x1792   :  { %9573 = vrot.lane.b32.xlu1 %v9395_v53, %s11698_s26 }
0x1793   :  { %v10745_v44 = vpop.f32.mrb[192].mxu1 }
0x1794   :  { %v9408_v46 = vpop.f32.mrb[193].mxu1 }
0x1795   :  { %9595 = vrot.lane.b32.xlu0 %v9408_v46, %s11699_s29  ;;  %v10746_v38 = vpop.f32.mrb[194].mxu1 }
0x1796   :  { %v9411_v19 = vpop.f32.mrb[195].mxu1 }
0x1797   :  { %9597 = vrot.lane.b32.xlu1 %v9411_v19, %s11699_s29 }
0x1799   :  { %9599 = vrot.lane.b32.xlu0 %v10745_v44, %s11699_s29 }
0x179b   :  { %9601 = vrot.lane.b32.xlu1 %v10746_v38, %s11699_s29 }
0x17c6   :  { %v9432_v54 = vpop.permute.xlu0 %9431 }
0x17c7   :  { %v9441_v29 = vmul.f32 %v9432_v54, %v12662_v43 }
0x17c8   :  { %v9434_v23 = vpop.permute.xlu1 %9433 }
0x17c9   :  { %v9445_v63 = vadd.f32 %v15608_v3, %v9441_v29  ;;  %v9442_v22 = vmul.f32 %v9434_v23, %v12662_v43 }
0x17ca   :  { %v9428_v5 = vpop.permute.xlu0 %9427 }
0x17cb   :  { %v9439_v59 = vmul.f32 %v9428_v5, %v12662_v43  ;;  %v9446_v5 = vadd.f32 %v15610_v28, %v9442_v22 }
0x17cc   :  { %v9430_v52 = vpop.permute.xlu1 %9429 }
0x17cd   :  { %v9440_v11 = vmul.f32 %v9430_v52, %v12662_v43  ;;  %v9443_v7 = vadd.f32 %v9439_v59, %v9344_v32 }
0x17ce   :  { %v9456_v58 = vpop.permute.xlu0 %9455 }
0x17cf   :  { %v9465_v49 = vmul.f32 %v9456_v58, %v12670_v1  ;;  %v9444_v39 = vadd.f32 %v9440_v11, %v15612_v42 }
0x17d0   :  { %v9458_v45 = vpop.permute.xlu1 %9457 }
0x17d1   :  { %v9469_v42 = vadd.f32 %v9465_v49, %v9445_v63  ;;  %v9466_v44 = vmul.f32 %v9458_v45, %v12670_v1 }
0x17d2   :  { %v9452_v21 = vpop.permute.xlu0 %9451 }
0x17d3   :  { %v9463_v0 = vmul.f32 %v9452_v21, %v12670_v1 }
0x17d4   :  { %v9454_v14 = vpop.permute.xlu1 %9453 }
0x17d5   :  { %v9464_v9 = vmul.f32 %v9454_v14, %v12670_v1  ;;  %v9467_v35 = vadd.f32 %v9463_v0, %v9443_v7 }
0x17d6   :  { %v9480_v36 = vpop.permute.xlu0 %9479 }
0x17d7   :  { %v9489_v32 = vmul.f32 %v9480_v36, %v12677_v55  ;;  %v9468_v4 = vadd.f32 %v9464_v9, %v9444_v39 }
0x17d8   :  { %v9482_v33 = vpop.permute.xlu1 %9481 }
0x17d9   :  { %v9493_v52 = vadd.f32 %v9489_v32, %v9469_v42  ;;  %v9490_v58 = vmul.f32 %v9482_v33, %v12677_v55 }
0x17da   :  { %v9476_v15 = vpop.permute.xlu0 %9475 }
0x17db   :  { %v9487_v31 = vmul.f32 %v9476_v15, %v12677_v55 }
0x17dc   :  { %v9478_v34 = vpop.permute.xlu1 %9477 }
0x17dd   :  { %v9488_v51 = vmul.f32 %v9478_v34, %v12677_v55  ;;  %v9491_v47 = vadd.f32 %v9487_v31, %v9467_v35 }
0x17de   :  { %v9504_v40 = vpop.permute.xlu0 %9503 }
0x17df   :  { %v9513_v46 = vmul.f32 %v9504_v40, %v12684_v8  ;;  %v9492_v38 = vadd.f32 %v9488_v51, %v9468_v4  ;;  %v9470_v40 = vadd.f32 %v9466_v44, %v9446_v5 }
0x17e0   :  { %v9506_v2 = vpop.permute.xlu1 %9505 }
0x17e1   :  { %v9494_v33 = vadd.f32 %v9490_v58, %v9470_v40 }
0x17e2   :  { %v9500_v10 = vpop.permute.xlu0 %9499 }
0x17e3   :  { %v9511_v41 = vmul.f32 %v9500_v10, %v12684_v8  ;;  %v9517_v10 = vadd.f32 %v9513_v46, %v9493_v52 }
0x17e4   :  { %v9502_v61 = vpop.permute.xlu1 %9501 }
0x17e5   :  { %v9512_v30 = vmul.f32 %v9502_v61, %v12684_v8  ;;  %v9515_v19 = vadd.f32 %v9511_v41, %v9491_v47  ;;  %v9514_v61 = vmul.f32 %v9506_v2, %v12684_v8 }
0x17e7   :  { %v9516_v14 = vadd.f32 %v9512_v30, %v9492_v38  ;;  %v9518_v31 = vadd.f32 %v9514_v61, %v9494_v33 }
0x17ee   :  { %v9528_v62 = vpop.permute.xlu0 %9527 }
0x17ef   :  { %v9537_v21 = vmul.f32 %v9528_v62, %v12690_v12 }
0x17f0   :  { %v9530_v18 = vpop.permute.xlu1 %9529 }
0x17f1   :  { %v9541_v11 = vadd.f32 %v9537_v21, %v9517_v10  ;;  %v9538_v62 = vmul.f32 %v9530_v18, %v12690_v12 }
0x17f2   :  { %v9524_v37 = vpop.permute.xlu0 %9523 }
0x17f3   :  { %v9535_v56 = vmul.f32 %v9524_v37, %v12690_v12  ;;  %v9542_v51 = vadd.f32 %v9538_v62, %v9518_v31 }
0x17f4   :  { %v9526_v17 = vpop.permute.xlu1 %9525 }
0x17f5   :  { %v9536_v3 = vmul.f32 %v9526_v17, %v12690_v12  ;;  %v9539_v36 = vadd.f32 %v9535_v56, %v9515_v19 }
0x17f6   :  { %v9552_v57 = vpop.permute.xlu0 %9551 }
0x17f7   :  { %v9561_v37 = vmul.f32 %v9552_v57, %v12700_v13  ;;  %v9540_v17 = vadd.f32 %v9536_v3, %v9516_v14 }
0x17f8   :  { %v9554_v6 = vpop.permute.xlu1 %9553 }
0x17f9   :  { %v9562_v57 = vmul.f32 %v9554_v6, %v12700_v13 }
0x17fa   :  { %v9548_v24 = vpop.permute.xlu0 %9547 }
0x17fb   :  { %v9559_v54 = vmul.f32 %v9548_v24, %v12700_v13  ;;  %v9566_v4 = vadd.f32 %v9562_v57, %v9542_v51  ;;  %v16192_v51 = vld [vmem:[#allocation42_spill] sm:$0xff] }
0x17fc   :  { %v9550_v20 = vpop.permute.xlu1 %9549 }
0x17fd   :  { %v9560_v45 = vmul.f32 %v9550_v20, %v12700_v13  ;;  %v9563_v28 = vadd.f32 %v9559_v54, %v9539_v36  ;;  %v9565_v20 = vadd.f32 %v9561_v37, %v9541_v11 }
0x17fe   :  { %v9576_v25 = vpop.permute.xlu0 %9575 }
0x17ff   :  { %v9564_v24 = vadd.f32 %v9560_v45, %v9540_v17  ;;  %v9585_v29 = vmul.f32 %v9576_v25, %v12711_v48  ;;  %v11711_v45 = vmov 12  }
0x1800   :  { %v9578_v53 = vpop.permute.xlu1 %9577  ;;  %10840 = vset.pattern.permute.xlu1 %v11711_v45  ;;  %10841 = vset.pattern.permute.xlu0 %v11711_v45 }
0x1801   :  { %v9589_v63 = vadd.f32 %v9585_v29, %v9565_v20  ;;  %v9586_v18 = vmul.f32 %v9578_v53, %v12711_v48 }
0x1802   :  { %v9572_v23 = vpop.permute.xlu0 %9571 }
0x1803   :  { %v9583_v15 = vmul.f32 %v9572_v23, %v12711_v48  ;;  %v9590_v6 = vadd.f32 %v9586_v18, %v9566_v4 }
0x1804   :  { %v9574_v34 = vpop.permute.xlu1 %9573 }
0x1805   :  { %v9584_v59 = vmul.f32 %v9574_v34, %v12711_v48  ;;  %v9587_v7 = vadd.f32 %v9583_v15, %v9563_v28 }
0x1807   :  { %v9596_v0 = vpop.permute.xlu0 %9595  ;;  %v9588_v49 = vadd.f32 %v9584_v59, %v9564_v24 }
0x1808   :  { %v9607_v9 = vmul.f32 %v15347_v50, %v9596_v0 }
0x1809   :  { %v9598_v2 = vpop.permute.xlu1 %9597 }
0x180a   :  { %v9611_v39 = vadd.f32 %v9607_v9, %v9587_v7  ;;  %v9608_v35 = vmul.f32 %v15347_v50, %v9598_v2  ;;  %v11712_v9 = vmov 13  }
0x180b   :  { %v9600_v41 = vpop.permute.xlu0 %9599 }
0x180c   :  { %v9612_v22 = vadd.f32 %v9608_v35, %v9588_v49  ;;  %v9609_v25 = vmul.f32 %v15347_v50, %v9600_v41  ;;  %9615 = vadd.xlane.f32.xlu0 %v9611_v39  ;;  %v16187_v49 = vld [vmem:[#allocation17_spill] sm:$0xff]  ;;  %v16191_v35 = vld [vmem:[#allocation32_spill] sm:$0xff] }
0x180d   :  { %v9602_v32 = vpop.permute.xlu1 %9601 }
0x180e   :  { %v9613_v47 = vadd.f32 %v9609_v25, %v9589_v63  ;;  %9617 = vadd.xlane.f32.xlu1 %v9612_v22  ;;  %v9610_v30 = vmul.f32 %v15347_v50, %v9602_v32 }
0x1810   :  { %9619 = vadd.xlane.f32.xlu0 %v9613_v47  ;;  %v9614_v56 = vadd.f32 %v9610_v30, %v9590_v6 }
0x1814   :  { %9621 = vadd.xlane.f32.xlu0 %v9614_v56 }
0x1899   :  { %v9616_v42 = vpop.xlane.xlu0 %9615 }
0x189a   :  { %v9623_v44 = vmul.f32 0.0078125, %v9616_v42 }
0x189b   :  { %v9618_v46 = vpop.xlane.xlu1 %9617 }
0x189c   :  { %v15665_v38 = vsub.f32 %v9611_v39, %v9623_v44  ;;  %v9624_v53 = vmul.f32 0.0078125, %v9618_v46  ;;  %v16190_v39 = vld [vmem:[#allocation76_spill] sm:$0xff] }
0x189d   :  { %v9620_v19 = vpop.xlane.xlu0 %9619 }
0x189e   :  { %v15667_v3 = vsub.f32 %v9612_v22, %v9624_v53  ;;  %v9625_v54 = vmul.f32 0.0078125, %v9620_v19  ;;  %v9631_v23 = vmul.f32 %v15665_v38, %v15665_v38  ;;  %v16195_v19 = vmov 0.0  }
0x18a0   :  { %v15671_v5 = vsub.f32 %v9613_v47, %v9625_v54  ;;  %9635 = vadd.xlane.f32.xlu1 %v9631_v23  ;;  %v9632_v50 = vmul.f32 %v15667_v3, %v15667_v3 }
0x18a1   :  { %v9622_v52 = vpop.xlane.xlu0 %9621 }
0x18a2   :  { %v9626_v58 = vmul.f32 0.0078125, %v9622_v52  ;;  %9637 = vadd.xlane.f32.xlu0 %v9632_v50  ;;  %v9633_v21 = vmul.f32 %v15671_v5, %v15671_v5 }
0x18a4   :  { %v15677_v14 = vsub.f32 %v9614_v56, %v9626_v58  ;;  %9639 = vadd.xlane.f32.xlu1 %v9633_v21 }
0x18a6   :  { %v9634_v36 = vmul.f32 %v15677_v14, %v15677_v14 }
0x18a8   :  { %9641 = vadd.xlane.f32.xlu0 %v9634_v36 }
0x192d   :  { %v9636_v15 = vpop.xlane.xlu1 %9635 }
0x192e   :  { %v9643_v34 = vmul.f32 0.0078125, %v9636_v15 }
0x192f   :  { %v9638_v40 = vpop.xlane.xlu0 %9637 }
0x1930   :  { %v9647_v10 = vadd.f32 1e-05, %v9643_v34  ;;  %v9644_v61 = vmul.f32 0.0078125, %v9638_v40 }
0x1931   :  { %v9640_v17 = vpop.xlane.xlu1 %9639 }
0x1932   :  { %11608 = vrsqrt.f32 %v9647_v10  ;;  %v9648_v37 = vadd.f32 1e-05, %v9644_v61  ;;  %v9645_v28 = vmul.f32 0.0078125, %v9640_v17  ;;  %v16196_v10 = vld [vmem:[#allocation52_spill] sm:$0xff]  ;;  %v16197_v61 = vld [vmem:[#allocation63_spill] sm:$0xff] }
0x1934   :  { %11610 = vrsqrt.f32 %v9648_v37  ;;  %v9649_v33 = vadd.f32 1e-05, %v9645_v28 }
0x1935   :  { %v9642_v59 = vpop.xlane.xlu0 %9641 }
0x1936   :  { %v9646_v11 = vmul.f32 0.0078125, %v9642_v59  ;;  %11612 = vrsqrt.f32 %v9649_v33  ;;  %v16198_v33 = vld [vmem:[#allocation15_spill] sm:$0xff] }
0x1938   :  { %v9650_v29 = vadd.f32 1e-05, %v9646_v11 }
0x193a   :  { %11614 = vrsqrt.f32 %v9650_v29  ;;  %v11500_v29 = vld [vmem:[%s15791_s10 + $0x8] sm:$0xff]  }
0x193c   :  { %v11609_v62 = vpop.eup %11608 }
0x193d   :  { %v9655_v0 = vmul.f32 %v15472_v26, %v11609_v62 }
0x193e   :  { %v11611_v24 = vpop.eup %11610 }
0x193f   :  { %9661 = vperm.xlu1 %10840, %v9655_v0   ;;  %v9656_v7 = vmul.f32 %v15478_v60, %v11611_v24 }
0x1940   :  { %v11613_v31 = vpop.eup %11612 }
0x1941   :  { %9666 = vperm.xlu0 %10841, %v9656_v7   ;;  %v9657_v20 = vmul.f32 %v15484_v27, %v11613_v31 }
0x1943   :  { %10842 = vset.pattern.permute.xlu1 %v11712_v9 }
0x1944   :  { %9684 = vperm.xlu1 %10842, %v15472_v26   ;;  %v11615_v2 = vpop.eup %11614  ;;  %v16188_v26 = vld [vmem:[#allocation23_spill] sm:$0xff] }
0x1945   :  { %v9658_v57 = vmul.f32 %v15490_v16, %v11615_v2 }
0x1948   :  { %9688 = vperm.xlu1 %10842, %v15478_v60   ;;  %v16189_v60 = vld [vmem:[#allocation64_spill] sm:$0xff] }
0x194c   :  { %10843 = vset.pattern.permute.xlu1 %v11711_v45 }
0x194d   :  { %9671 = vperm.xlu1 %10843, %v9657_v20  }
0x1951   :  { %9676 = vperm.xlu1 %10843, %v9658_v57  }
0x1955   :  { %10844 = vset.pattern.permute.xlu1 %v11712_v9 }
0x1956   :  { %9692 = vperm.xlu1 %10844, %v15484_v27   ;;  %v16193_v27 = vld [vmem:[#allocation24_spill] sm:$0xff] }
0x195a   :  { %9696 = vperm.xlu1 %10844, %v15490_v16   ;;  %v16194_v16 = vld [vmem:[#allocation77_spill] sm:$0xff] }
0x195e   :  { %4904 = vrot.lane.b32.xlu1 %v16187_v49, %s11693_s22 }
0x1962   :  { %4910 = vrot.lane.b32.xlu1 %v16188_v26, %s11691_s19 }
0x1966   :  { %4916 = vrot.lane.b32.xlu1 %v16189_v60, %s11694_s17 }
0x196a   :  { %4922 = vrot.lane.b32.xlu1 %v16190_v39, %s11695_s18  ;;  %v11501_v39 = vld [vmem:[%s15791_s10 + $0x10] sm:$0xff]  }
0x196e   :  { %4928 = vrot.lane.b32.xlu1 %v16191_v35, %s11696_s25 }
0x1972   :  { %4934 = vrot.lane.b32.xlu1 %v16192_v51, %s11697_s3 }
0x1976   :  { %4940 = vrot.lane.b32.xlu1 %v16193_v27, %s11698_s26  ;;  %v15740_v27 = vld [vmem:[%s15783_s2 + $0x8] ss:$0 sm:$0xff] }
0x197a   :  { %4946 = vrot.lane.b32.xlu1 %v16194_v16, %s11699_s29 }
0x19be   :  { %v9662_v41 = vpop.permute.xlu1 %9661 }
0x19bf   :  { %v9679_v63 = vmul.f32 %v9662_v41, %v15665_v38 }
0x19c0   :  { %v9667_v18 = vpop.permute.xlu0 %9666 }
0x19c1   :  { %v9680_v32 = vmul.f32 %v9667_v18, %v15667_v3  ;;  %v11503_v18 = vld [vmem:[%s15791_s10 + $0x20] ss:$0 sps:$4 sm:$0xff]  }
0x19c3   :  { %v9685_v22 = vpop.permute.xlu1 %9684 }
0x19c4   :  { %v9699_v25 = vadd.f32 %v9685_v22, %v9679_v63  ;;  %v11502_v63 = vld [vmem:[%s15791_s10 + $0x18] sm:$0xff]  }
0x19c6   :  { %v9707_v47 = vmul.f32 0.2, %v9699_v25  ;;  %vm9703_vm11 = vcmp.ge.f32.partialorder %v9699_v25, 0.0 }
0x19c7   :  { %v9689_v4 = vpop.permute.xlu1 %9688 }
0x19c8   :  { %v9700_v30 = vadd.f32 %v9689_v4, %v9680_v32  ;;  %v9711_v56 = vsel %vm9703_vm11, %v9699_v25, %v9707_v47 }
0x19ca   :  { %vm9704_vm12 = vcmp.ge.f32.partialorder %v9700_v30, 0.0  ;;  %v9708_v6 = vmul.f32 0.2, %v9700_v30 }
0x19cc   :  { %v9712_v42 = vsel %vm9704_vm12, %v9700_v30, %v9708_v6  ;;  %v9672_v44 = vpop.permute.xlu1 %9671 }
0x19cd   :  { %v9724_v46 = vpack.c.bf16 %v9712_v42, %v9711_v56  ;;  %v9681_v38 = vmul.f32 %v9672_v44, %v15671_v5 }
0x19cf   :  { %10748 = vmatpush3.bf16.msra.mxu0 %v9724_v46 }
0x19d0   :  { %v9677_v53 = vpop.permute.xlu1 %9676  ;;  %10749 = vmatprep.subr.bf16.mxu0 %v16195_v19 }
0x19d1   :  { %v9682_v3 = vmul.f32 %v9677_v53, %v15677_v14  ;;  %v11499_v14 = vld [vmem:[%s15791_s10] sm:$0xff]  }
0x19d5   :  { %v9693_v54 = vpop.permute.xlu1 %9692 }
0x19d6   :  { %v9701_v23 = vadd.f32 %v9693_v54, %v9681_v38 }
0x19d8   :  { %v9709_v52 = vmul.f32 0.2, %v9701_v23  ;;  %vm9705_vm13 = vcmp.ge.f32.partialorder %v9701_v23, 0.0 }
0x19d9   :  { %v9697_v50 = vpop.permute.xlu1 %9696 }
0x19da   :  { %v9702_v58 = vadd.f32 %v9697_v50, %v9682_v3  ;;  %v9713_v45 = vsel %vm9705_vm13, %v9701_v23, %v9709_v52 }
0x19dc   :  { %vm9706_vm14 = vcmp.ge.f32.partialorder %v9702_v58, 0.0  ;;  %v9710_v21 = vmul.f32 0.2, %v9702_v58 }
0x19dd   :  { %v4905_v36 = vpop.permute.xlu1 %4904 }
0x19de   :  { %v9714_v15 = vsel %vm9706_vm14, %v9702_v58, %v9710_v21  ;;  %v4907_v17 = vmul.f32 %v4905_v36, %v12662_v43 }
0x19df   :  { %v9725_v34 = vpack.c.bf16 %v9714_v15, %v9713_v45 }
0x19e0   :  { %v4908_v11 = vadd.f32 %v4907_v17, %v16198_v33 }
0x19e1   :  { %10750 = vmatpush3.bf16.msra.mxu0 %v9725_v34  ;;  %v4911_v40 = vpop.permute.xlu1 %4910 }
0x19e2   :  { %10751 = vmatprep.subr.bf16.mxu0 %v16195_v19  ;;  %v4913_v28 = vmul.f32 %v4911_v40, %v12670_v1 }
0x19e4   :  { %v4914_v0 = vadd.f32 %v4913_v28, %v4908_v11 }
0x19e5   :  { %10752 = vmatpush3.bf16.msra.mxu0 %v16196_v10  ;;  %v4917_v5 = vpop.permute.xlu1 %4916 }
0x19e6   :  { %10753 = vmatprep.subr.bf16.mxu0 %v16195_v19  ;;  %v4919_v62 = vmul.f32 %v4917_v5, %v12677_v55 }
0x19e8   :  { %v4920_v9 = vadd.f32 %v4919_v62, %v4914_v0 }
0x19e9   :  { %10754 = vmatpush3.bf16.msra.mxu0 %v16197_v61  ;;  %v4923_v37 = vpop.permute.xlu1 %4922 }
0x19ea   :  { %v4925_v24 = vmul.f32 %v4923_v37, %v12684_v8 }
0x19ec   :  { %10756 = vmatmul.mubr.msk.bf16.vlgmr.msra.gmra.mrb[176].mxu0 %vm4257_vm0, %v11499_v14  ;;  %v4926_v20 = vadd.f32 %v4925_v24, %v4920_v9 }
0x19ed   :  { %v4929_v59 = vpop.permute.xlu1 %4928  ;;  %10759 = vmatprep.mubr.msk.bf16.mxu0 %vm11706_vm9, %v16195_v19 }
0x19ee   :  { %v4931_v31 = vmul.f32 %v4929_v59, %v12690_v12 }
0x19f0   :  { %v4932_v49 = vadd.f32 %v4931_v31, %v4926_v20 }
0x19f1   :  { %v4935_v7 = vpop.permute.xlu1 %4934 }
0x19f2   :  { %v4937_v2 = vmul.f32 %v4935_v7, %v12700_v13 }
0x19f4   :  { %10760 = vmatmul.mubr.msk.bf16.gmra.mrb[180].mxu0 %vm4257_vm0, %v11500_v29  ;;  %v4938_v60 = vadd.f32 %v4937_v2, %v4932_v49  ;;  %v11714_v2 = vmov 7  }
0x19f5   :  { %v4941_v57 = vpop.permute.xlu1 %4940  ;;  %10763 = vmatprep.mubr.msk.bf16.mxu0 %vm11706_vm9, %v16195_v19  ;;  %10846 = vset.pattern.permute.xlu1 %v11714_v2 }
0x19f6   :  { %v4943_v26 = vmul.f32 %v4941_v57, %v12711_v48 }
0x19f8   :  { %v4944_v51 = vadd.f32 %v4943_v26, %v4938_v60 }
0x19f9   :  { %v4947_v35 = vpop.permute.xlu1 %4946 }
0x19fa   :  { %v4949_v16 = vmul.f32 %v15740_v27, %v4947_v35 }
0x19fc   :  { %v4950_v41 = vadd.f32 %v4949_v16, %v4944_v51  ;;  %10764 = vmatmul.mubr.msk.bf16.gmra.mrb[184].mxu0 %vm4257_vm0, %v11501_v39  ;;  %v11664_v51 = vld [vmem:[%s15792_s11] sm:$0xff]  ;;  %v11715_v16 = vmov 14  }
0x19fd   :  { %10767 = vmatprep.mubr.msk.bf16.mxu0 %vm11706_vm9, %v16195_v19 }
0x19fe   :  { %4951 = vadd.xlane.f32.xlu1 %v4950_v41 }
0x1a04   :  { %10768 = vmatmul.mubr.msk.bf16.gmra.mrb[188].mxu0 %vm4257_vm0, %v11502_v63 }
0x1a05   :  { %10771 = vmatprep.mubr.msk.bf16.mxu0 %vm11706_vm9, %v16195_v19 }
0x1a0c   :  { %10772 = vmatmul.mubr.msk.bf16.gmra.mrb[192].mxu0 %vm4257_vm0, %v11503_v18 }
0x1a8b   :  { %v4952_v62 = vpop.xlane.xlu1 %4951 }
0x1abf   :  { %v9798_v22 = vpop.f32.mrb[176].mxu0 }
0x1ac0   :  { %9837 = vrot.lane.b32.xlu0 %v9798_v22, %s11693_s22  ;;  %v10757_v25 = vpop.f32.mrb[177].mxu0 }
0x1ac1   :  { %v9801_v32 = vpop.f32.mrb[178].mxu0 }
0x1ac2   :  { %v10758_v4 = vpop.f32.mrb[179].mxu0 }
0x1ac4   :  { %9843 = vrot.lane.b32.xlu0 %v9801_v32, %s11691_s19 }
0x1ac7   :  { %v9806_v47 = vpop.f32.mrb[180].mxu0 }
0x1ac8   :  { %9849 = vrot.lane.b32.xlu0 %v9806_v47, %s11694_s17  ;;  %v10761_v30 = vpop.f32.mrb[181].mxu0 }
0x1ac9   :  { %v9809_v6 = vpop.f32.mrb[182].mxu0 }
0x1aca   :  { %v10762_v56 = vpop.f32.mrb[183].mxu0 }
0x1acc   :  { %9855 = vrot.lane.b32.xlu0 %v9809_v6, %s11695_s18 }
0x1acf   :  { %v9814_v42 = vpop.f32.mrb[184].mxu0 }
0x1ad0   :  { %v10765_v44 = vpop.f32.mrb[185].mxu0 }
0x1ad1   :  { %v9817_v46 = vpop.f32.mrb[186].mxu0 }
0x1ad2   :  { %9861 = vrot.lane.b32.xlu0 %v9817_v46, %s11696_s25  ;;  %v10766_v53 = vpop.f32.mrb[187].mxu0 }
0x1ad7   :  { %v9822_v19 = vpop.f32.mrb[188].mxu0 }
0x1ad8   :  { %9867 = vrot.lane.b32.xlu0 %v9822_v19, %s11697_s3  ;;  %v10769_v38 = vpop.f32.mrb[189].mxu0 }
0x1ad9   :  { %v9825_v54 = vpop.f32.mrb[190].mxu0 }
0x1ada   :  { %v10770_v23 = vpop.f32.mrb[191].mxu0 }
0x1adc   :  { %9873 = vrot.lane.b32.xlu0 %v9825_v54, %s11698_s26 }
0x1adf   :  { %v9830_v3 = vpop.f32.mrb[192].mxu0 }
0x1ae0   :  { %9879 = vrot.lane.b32.xlu0 %v9830_v3, %s11699_s29  ;;  %v10773_v50 = vpop.f32.mrb[193].mxu0 }
0x1ae1   :  { %v9833_v52 = vpop.f32.mrb[194].mxu0 }
0x1ae2   :  { %v10774_v58 = vpop.f32.mrb[195].mxu0 }
0x1b32   :  { %v9838_v21 = vpop.permute.xlu0 %9837 }
0x1b33   :  { %v9840_v34 = vmul.f32 %v9838_v21, %v12662_v43 }
0x1b35   :  { %v9841_v5 = vadd.f32 %v9840_v34, %v9814_v42 }
0x1b36   :  { %v9844_v36 = vpop.permute.xlu0 %9843 }
0x1b37   :  { %v9846_v40 = vmul.f32 %v9844_v36, %v12670_v1  ;;  %v4953_v1 = vmul.f32 0.0078125, %v4952_v62 }
0x1b39   :  { %v9847_v61 = vadd.f32 %v9846_v40, %v9841_v5  ;;  %v4954_v31 = vsub.f32 %v4950_v41, %v4953_v1  ;;  %v11716_v41 = vmov 15  }
0x1b3a   :  { %v9850_v45 = vpop.permute.xlu0 %9849 }
0x1b3b   :  { %v9852_v14 = vmul.f32 %v9850_v45, %v12677_v55  ;;  %v4955_v20 = vmul.f32 %v4954_v31, %v4954_v31 }
0x1b3d   :  { %v9853_v28 = vadd.f32 %v9852_v14, %v9847_v61 }
0x1b3e   :  { %v9856_v15 = vpop.permute.xlu0 %9855 }
0x1b3f   :  { %v9858_v37 = vmul.f32 %v9856_v15, %v12684_v8 }
0x1b41   :  { %v9859_v33 = vadd.f32 %v9858_v37, %v9853_v28 }
0x1b44   :  { %v9862_v10 = vpop.permute.xlu0 %9861 }
0x1b45   :  { %v9864_v59 = vmul.f32 %v9862_v10, %v12690_v12  ;;  %v11713_v12 = vmov 6  }
0x1b46   :  { %10845 = vset.pattern.permute.xlu0 %v11713_v12 }
0x1b47   :  { %v9865_v24 = vadd.f32 %v9864_v59, %v9859_v33 }
0x1b4a   :  { %v9868_v17 = vpop.permute.xlu0 %9867 }
0x1b4b   :  { %v9870_v11 = vmul.f32 %v9868_v17, %v12700_v13 }
0x1b4d   :  { %v9871_v29 = vadd.f32 %v9870_v11, %v9865_v24 }
0x1b4e   :  { %v9874_v0 = vpop.permute.xlu0 %9873 }
0x1b4f   :  { %v9876_v43 = vmul.f32 %v9874_v0, %v12711_v48 }
0x1b51   :  { %v9877_v9 = vadd.f32 %v9876_v43, %v9871_v29 }
0x1b52   :  { %v9880_v7 = vpop.permute.xlu0 %9879 }
0x1b53   :  { %v9882_v55 = vmul.f32 %v15740_v27, %v9880_v7 }
0x1b55   :  { %v9883_v8 = vadd.f32 %v9882_v55, %v9877_v9 }
0x1b57   :  { %9884 = vadd.xlane.f32.xlu0 %v9883_v8 }
0x1b5b   :  { %4956 = vadd.xlane.f32.xlu0 %v4955_v20 }
0x1be4   :  { %v9885_v13 = vpop.xlane.xlu0 %9884 }
0x1be5   :  { %v9886_v57 = vmul.f32 0.0078125, %v9885_v13 }
0x1be7   :  { %v9887_v49 = vsub.f32 %v9883_v8, %v9886_v57 }
0x1be8   :  { %v4957_v26 = vpop.xlane.xlu0 %4956 }
0x1be9   :  { %v4958_v48 = vmul.f32 0.0078125, %v4957_v26  ;;  %v9888_v60 = vmul.f32 %v9887_v49, %v9887_v49 }
0x1beb   :  { %v4959_v39 = vadd.f32 1e-05, %v4958_v48  ;;  %9889 = vadd.xlane.f32.xlu1 %v9888_v60 }
0x1bed   :  { %11616 = vrsqrt.f32 %v4959_v39 }
0x1bf7   :  { %v11617_v35 = vpop.eup %11616 }
0x1bf8   :  { %v4961_v27 = vmul.f32 %v11664_v51, %v11617_v35 }
0x1bfa   :  { %4964 = vperm.xlu0 %10845, %v4961_v27  }
0x1bfc   :  { %4969 = vperm.xlu1 %10846, %v11664_v51  }
0x1bfe   :  { %10849 = vset.pattern.permute.xlu0 %v11716_v41 }
0x1c00   :  { %10847 = vset.pattern.permute.xlu1 %v11715_v16 }
0x1c78   :  { %v9890_v63 = vpop.xlane.xlu1 %9889 }
0x1c79   :  { %v9891_v18 = vmul.f32 0.0078125, %v9890_v63  ;;  %v4965_v22 = vpop.permute.xlu0 %4964 }
0x1c7a   :  { %v4967_v25 = vmul.f32 %v4965_v22, %v4954_v31 }
0x1c7b   :  { %v9892_v32 = vadd.f32 1e-05, %v9891_v18 }
0x1c7c   :  { %v4970_v4 = vpop.permute.xlu1 %4969 }
0x1c7d   :  { %11618 = vrsqrt.f32 %v9892_v32  ;;  %v4972_v47 = vadd.f32 %v4970_v4, %v4967_v25 }
0x1c7f   :  { %v4973_v30 = vsub.f32 0.0, %v4972_v47 }
0x1c81   :  { %v4974_v6 = vmul.f32 1.442695, %v4973_v30 }
0x1c83   :  { %11620 = vpow2.f32 %v4974_v6 }
0x1c87   :  { %v11619_v56 = vpop.eup %11618 }
0x1c88   :  { %v9894_v42 = vmul.f32 %v11664_v51, %v11619_v56 }
0x1c8a   :  { %9897 = vperm.xlu1 %10847, %v9894_v42  }
0x1c8d   :  { %v11621_v44 = vpop.eup %11620 }
0x1c8e   :  { %v4976_v46 = vadd.f32 1.0, %v11621_v44  ;;  %10848 = vset.pattern.permute.xlu1 %v11716_v41 }
0x1c8f   :  { %9902 = vperm.xlu1 %10848, %v11664_v51  }
0x1c90   :  { %11622 = vrcp.f32 %v4976_v46 }
0x1c9a   :  { %v11623_v53 = vpop.eup %11622 }
0x1c9b   :  { %4979 = vst [vmem:[%s15793_s12] sm:$0xff] %v11623_v53 }
0x1d09   :  { %v9898_v19 = vpop.permute.xlu1 %9897 }
0x1d0a   :  { %v9900_v38 = vmul.f32 %v9898_v19, %v9887_v49 }
0x1d0e   :  { %v9903_v54 = vpop.permute.xlu1 %9902 }
0x1d0f   :  { %v9905_v23 = vadd.f32 %v9903_v54, %v9900_v38 }
0x1d11   :  { %v9906_v3 = vsub.f32 0.0, %v9905_v23 }
0x1d13   :  { %v9907_v50 = vmul.f32 1.442695, %v9906_v3 }
0x1d15   :  { %11624 = vpow2.f32 %v9907_v50 }
0x1d1f   :  { %v11625_v52 = vpop.eup %11624 }
0x1d20   :  { %v9909_v58 = vadd.f32 1.0, %v11625_v52 }
0x1d22   :  { %11626 = vrcp.f32 %v9909_v58 }
0x1d2c   :  { %v11627_v21 = vpop.eup %11626 }
0x1d2d   :  { %9912 = vst [vmem:[%s15794_s13] sm:$0xff] %v11627_v21 }
0x1d2e   :  { %9921 = vsyncpa [#allocation3], 1 }

</bundles_post_ra>
